<compile_context>
chip_gen: v7x
topology: tpu7x:2x2x1
jax: 0.10.0
libtpu: 0.0.40
codegen_flags: <defaults>
</compile_context>

<pallas_src>
import jax
import jax.numpy as jnp
from jax.experimental import pallas as pl
from jax.experimental.pallas import tpu as pltpu

KERNEL_SIZE = 5
CHANNELS1 = 20
CHANNELS2 = 50
MLP_UNITS = 500
NUM_CLASSES = 10
BT = 8  # samples per grid step (batch tile)


# ------------------------------ fused kernel --------------------------------
#
# In-kernel row indexing convention for activations:
#   conv1 input rows  : r*7*BT + a*BT + b        (input row  h  = 4a + r)
#   conv1 out / pool1 : row = a*BT + b           (per row-phase value)
#   conv2 out / pool2 : row = i*BT + b
# Lane packing:
#   conv1 out : dj*240 + j*20 + c   (output col = 2j+dj, channel c)
#   pool1     : j*20 + c
#   conv2 out : dj*200 + j*50 + d   (output col = 2j+dj, channel d)
#   pool2     : w*50 + d

def _forward_kernel(x_ref, w1t_ref, w2t_ref, w1fc_ref, w2fc_ref,
                    b1_ref, b2_ref, bfc1_ref, bfc2_ref, out_ref):
    f32 = jnp.float32
    x = x_ref[...]                                   # (4*7*BT, 28)

    # ---- conv1 as 5 row-Toeplitz matmuls (one per kernel row kh) ----------
    rc1 = [jnp.dot(x, w1t_ref[kh], preferred_element_type=f32)
           for kh in range(KERNEL_SIZE)]             # each (28*BT, 480)

    # combine kernel rows into the 4 row-phases of the conv1 output
    def conv1_phase(r1):                             # output rows 4*a1 + r1
        acc = None
        for kh in range(KERNEL_SIZE):
            r, off = (r1 + kh) % 4, (r1 + kh) // 4
            blk = rc1[kh][(r * 7 + off) * BT:(r * 7 + off + 6) * BT, :]
            acc = blk if acc is None else acc + blk
        return acc                                   # (6*BT, 480)

    c1 = [conv1_phase(r1) for r1 in range(4)]

    # ---- bias + ReLU + 2x2 maxpool (row phases x lane halves) -------------
    b1 = b1_ref[...]                                 # (1, 240)
    def pool1(p):                                    # pooled rows 2*a + p
        e, o = c1[2 * p], c1[2 * p + 1]
        m = jnp.maximum(jnp.maximum(e[:, :240], e[:, 240:]),
                        jnp.maximum(o[:, :240], o[:, 240:]))
        return jnp.maximum(m + b1, 0.0)              # (6*BT, 240)
    p1 = [pool1(0), pool1(1)]

    # ---- conv_last as row-Toeplitz matmuls over packed (col, chan) lanes --
    rc2 = [[jnp.dot(p1[p], w2t_ref[kh], preferred_element_type=f32)
            for kh in range(KERNEL_SIZE)] for p in range(2)]   # each (6*BT, 400)

    def conv2_phase(di):                             # output rows 2*i + di
        acc = None
        for kh in range(KERNEL_SIZE):
            p, off = (di + kh) % 2, (di + kh) // 2
            blk = rc2[p][kh][off * BT:(off + 4) * BT, :]
            acc = blk if acc is None else acc + blk
        return acc                                   # (4*BT, 400)
    c2 = [conv2_phase(0), conv2_phase(1)]

    b2 = b2_ref[...]                                 # (1, 200)
    m2 = jnp.maximum(jnp.maximum(c2[0][:, :200], c2[0][:, 200:]),
                     jnp.maximum(c2[1][:, :200], c2[1][:, 200:]))
    q = jnp.maximum(m2 + b2, 0.0)                    # (4*BT, 200)

    # ---- fc1: contract the 800 features as 4 chunks of 200 (per row h) ----
    acc = jnp.dot(q[0:BT, :], w1fc_ref[0], preferred_element_type=f32)
    for h in range(1, 4):
        acc = acc + jnp.dot(q[h * BT:(h + 1) * BT, :], w1fc_ref[h],
                            preferred_element_type=f32)
    a = jnp.maximum(acc + bfc1_ref[...], 0.0)        # (BT, 500)

    # ---- fc2 (padded to 128 lanes) + log_softmax --------------------------
    logits = jnp.dot(a, w2fc_ref[...], preferred_element_type=f32) + bfc2_ref[...]
    mx = jnp.max(logits, axis=-1, keepdims=True)
    s = logits - mx
    lse = jnp.log(jnp.sum(jnp.exp(s), axis=-1, keepdims=True))
    out_ref[...] = s - lse                           # (BT, 128); lanes 10.. are pad


# ------------------------------ wrapper glue --------------------------------

def _prep_x(x_nchw):
    """(N,1,28,28) NCHW -> rows grouped by (mod-4 row phase, phase row, sample)."""
    N = x_nchw.shape[0]
    assert x_nchw.shape[1:] == (1, 28, 28), x_nchw.shape
    T = -(-N // BT)
    x = x_nchw.astype(jnp.float32).reshape(N, 28, 28)
    if T * BT != N:
        x = jnp.concatenate(
            [x, jnp.zeros((T * BT - N, 28, 28), jnp.float32)], axis=0)
    x = x.reshape(T, BT, 7, 4, 28)           # (t, b, a, r, w) with h = 4a + r
    x = jnp.transpose(x, (0, 3, 2, 1, 4))    # (t, r, a, b, w)
    return x.reshape(T * 4 * 7 * BT, 28), N, T


def _prep_params(params):
    """Expand conv kernels to row-Toeplitz matrices; permute/pad FC weights."""
    f32 = jnp.float32
    K = KERNEL_SIZE

    # conv1 Toeplitz: (5, 28, 480); lane = dj*240 + j*20 + c  (out col = 2j+dj)
    w1k = jnp.transpose(params["w_conv1"].astype(f32)[:, 0], (1, 2, 0))   # (kh,kw,c)
    sel1 = (jnp.arange(28)[:, None, None] ==
            (jnp.arange(24)[None, :, None] + jnp.arange(K)[None, None, :])
            ).astype(f32)                                                 # (w, v, kw)
    t1 = jnp.einsum("wvk,Kkc->Kwvc", sel1, w1k)                           # (5,28,24,20)
    t1 = t1.reshape(K, 28, 12, 2, CHANNELS1)                              # v = 2j+dj
    w1t = jnp.transpose(t1, (0, 1, 3, 2, 4)).reshape(K, 28, 480)

    # conv_last Toeplitz: (5, 240, 400); row = j*20+c, lane = dj*200 + j2*50 + d
    w2k = jnp.transpose(params["w_conv_last"].astype(f32), (2, 3, 1, 0))  # (kh,kw,c,d)
    sel2 = (jnp.arange(12)[:, None, None] ==
            (jnp.arange(8)[None, :, None] + jnp.arange(K)[None, None, :])
            ).astype(f32)                                                 # (j, w2, kw)
    t2 = jnp.einsum("jwk,Kkcd->Kjcwd", sel2, w2k)                         # (5,12,20,8,50)
    t2 = t2.reshape(K, 12, CHANNELS1, 4, 2, CHANNELS2)                    # w2 = 2j2+dj2
    w2t = jnp.transpose(t2, (0, 1, 2, 4, 3, 5)).reshape(K, 240, 400)

    # fc1: torch NCHW-flat rows (c*16 + h*4 + w) -> per-h chunks with row w*50+c
    wfc1 = params["w_fc1"].astype(f32).reshape(CHANNELS2, 4, 4, MLP_UNITS)
    wfc1 = jnp.transpose(wfc1, (1, 2, 0, 3)).reshape(4, 200, MLP_UNITS)

    # fc2 padded to 128 output lanes (dense final store); pad bias very negative
    wfc2 = jnp.zeros((MLP_UNITS, 128), f32).at[:, :NUM_CLASSES].set(
        params["w_fc2"].astype(f32))
    bfc2 = jnp.full((1, 128), -1e30, f32).at[0, :NUM_CLASSES].set(
        params["b_fc2"].astype(f32))

    b1t = jnp.tile(params["b_conv1"].astype(f32), 12).reshape(1, 240)
    b2t = jnp.tile(params["b_conv_last"].astype(f32), 4).reshape(1, 200)
    bfc1 = params["b_fc1"].astype(f32).reshape(1, MLP_UNITS)
    return w1t, w2t, wfc1, wfc2, b1t, b2t, bfc1, bfc2


def simple_cnn_forward(params, x_nchw):
    xprep, N, T = _prep_x(x_nchw)
    w1t, w2t, wfc1, wfc2, b1t, b2t, bfc1, bfc2 = _prep_params(params)

    in_specs = [
        pl.BlockSpec((28 * BT, 28), lambda t: (t, 0)),      # input (row-phase order)
        pl.BlockSpec((5, 28, 480), lambda t: (0, 0, 0)),    # conv1 Toeplitz
        pl.BlockSpec((5, 240, 400), lambda t: (0, 0, 0)),   # conv_last Toeplitz
        pl.BlockSpec((4, 200, 500), lambda t: (0, 0, 0)),   # fc1 (per spatial row)
        pl.BlockSpec((500, 128), lambda t: (0, 0)),         # fc2 (lane-padded)
        pl.BlockSpec((1, 240), lambda t: (0, 0)),           # conv1 bias (tiled)
        pl.BlockSpec((1, 200), lambda t: (0, 0)),           # conv_last bias (tiled)
        pl.BlockSpec((1, 500), lambda t: (0, 0)),           # fc1 bias
        pl.BlockSpec((1, 128), lambda t: (0, 0)),           # fc2 bias (padded)
    ]
    out = pl.pallas_call(
        _forward_kernel,
        out_shape=jax.ShapeDtypeStruct((T * BT, 128), jnp.float32),
        grid=(T,),
        in_specs=in_specs,
        out_specs=pl.BlockSpec((BT, 128), lambda t: (t, 0)),
        compiler_params=pltpu.CompilerParams(
            dimension_semantics=("parallel",)),
    )(xprep, w1t, w2t, wfc1, wfc2, b1t, b2t, bfc1, bfc2)
    return out[:N, :NUM_CLASSES]


# -------------------------- params / reference ------------------------------

def init_params(key):
    ks = jax.random.split(key, 8)

    def u(k, shape, fan_in):
        bound = 1.0 / (fan_in ** 0.5)
        return jax.random.uniform(k, shape, jnp.float32, -bound, bound)

    k2 = KERNEL_SIZE * KERNEL_SIZE
    factor = 4 * 4 * CHANNELS2
    return {
        "w_conv1": u(ks[0], (CHANNELS1, 1, KERNEL_SIZE, KERNEL_SIZE), k2 * 1),
        "b_conv1": u(ks[1], (CHANNELS1,), k2 * 1),
        "w_conv_last": u(ks[2], (CHANNELS2, CHANNELS1, KERNEL_SIZE, KERNEL_SIZE), k2 * CHANNELS1),
        "b_conv_last": u(ks[3], (CHANNELS2,), k2 * CHANNELS1),
        "w_fc1": u(ks[4], (factor, MLP_UNITS), factor),          # == torch fc1.weight.T
        "b_fc1": u(ks[5], (MLP_UNITS,), factor),
        "w_fc2": u(ks[6], (MLP_UNITS, NUM_CLASSES), MLP_UNITS),  # == torch fc2.weight.T
        "b_fc2": u(ks[7], (NUM_CLASSES,), MLP_UNITS),
    }


def reference_forward(params, x_nchw):
    # Pure-JAX (XLA) reference mirroring the PyTorch module, for validation.
    dn = jax.lax.conv_dimension_numbers(
        x_nchw.shape, params["w_conv1"].shape, ("NCHW", "OIHW", "NCHW"))

    def conv(x, w, b):
        y = jax.lax.conv_general_dilated(x, w, (1, 1), "VALID", dimension_numbers=dn)
        return jax.nn.relu(y + b[None, :, None, None])

    def pool(x):
        return jax.lax.reduce_window(x, -jnp.inf, jax.lax.max,
                                     (1, 1, 2, 2), (1, 1, 2, 2), "VALID")

    x = conv(x_nchw, params["w_conv1"], params["b_conv1"])
    x = pool(x)
    x = conv(x, params["w_conv_last"], params["b_conv_last"])
    x = pool(x)
    x = x.reshape(x.shape[0], -1)
    x = jax.nn.relu(x @ params["w_fc1"] + params["b_fc1"])
    logits = x @ params["w_fc2"] + params["b_fc2"]
    return jax.nn.log_softmax(logits, axis=1)


# ---------------------------------- main -------------------------------------

if __name__ == "__main__":
    key = jax.random.PRNGKey(0)
    pkey, xkey = jax.random.split(key)
    params = init_params(pkey)

    # Small batch of MNIST-shaped inputs (NCHW, like the PyTorch module).
    x = jax.random.normal(xkey, (2, 1, 28, 28), jnp.float32)

    out = jax.jit(simple_cnn_forward)(params, x)
    out = jax.block_until_ready(out)

    assert out.shape == (2, NUM_CLASSES), out.shape
    # log_softmax rows exponentiate to probability distributions.
    assert bool(jnp.allclose(jnp.exp(out).sum(axis=1), 1.0, atol=1e-4))
    # Match the pure-JAX reference (loose tol: TPU matmul precision).
    ref = reference_forward(params, x)
    assert bool(jnp.allclose(out, ref, atol=5e-2, rtol=5e-2))

    print("KERNEL_OK")
</pallas_src>

<mosaic_0001>
module attributes {stable_mosaic.version = 11 : i64} {
  func.func @_forward_kernel(%arg0: i32, %arg1: memref<224x28xf32, #tpu.memory_space<vmem>>, %arg2: memref<5x28x480xf32, #tpu.memory_space<vmem>>, %arg3: memref<5x240x400xf32, #tpu.memory_space<vmem>>, %arg4: memref<4x200x500xf32, #tpu.memory_space<vmem>>, %arg5: memref<500x128xf32, #tpu.memory_space<vmem>>, %arg6: memref<1x240xf32, #tpu.memory_space<vmem>>, %arg7: memref<1x200xf32, #tpu.memory_space<vmem>>, %arg8: memref<1x500xf32, #tpu.memory_space<vmem>>, %arg9: memref<1x128xf32, #tpu.memory_space<vmem>>, %arg10: memref<8x128xf32, #tpu.memory_space<vmem>>) attributes {dimension_semantics = [#tpu.dimension_semantics<parallel>], iteration_bounds = array<i64: 1>, scalar_prefetch = 0 : i64, scratch_operands = 0 : i64, tpu.core_type = #tpu.core_type<tc>, window_params = [{transform_indices = @transform_0, window_bounds = array<i64: 224, 28>}, {pipeline_mode = #tpu.pipeline_mode<synchronous>, transform_indices = @transform_1, window_bounds = array<i64: 5, 28, 480>}, {pipeline_mode = #tpu.pipeline_mode<synchronous>, transform_indices = @transform_2, window_bounds = array<i64: 5, 240, 400>}, {pipeline_mode = #tpu.pipeline_mode<synchronous>, transform_indices = @transform_3, window_bounds = array<i64: 4, 200, 500>}, {pipeline_mode = #tpu.pipeline_mode<synchronous>, transform_indices = @transform_4, window_bounds = array<i64: 500, 128>}, {pipeline_mode = #tpu.pipeline_mode<synchronous>, transform_indices = @transform_5, window_bounds = array<i64: 1, 240>}, {pipeline_mode = #tpu.pipeline_mode<synchronous>, transform_indices = @transform_6, window_bounds = array<i64: 1, 200>}, {pipeline_mode = #tpu.pipeline_mode<synchronous>, transform_indices = @transform_7, window_bounds = array<i64: 1, 500>}, {pipeline_mode = #tpu.pipeline_mode<synchronous>, transform_indices = @transform_8, window_bounds = array<i64: 1, 128>}, {transform_indices = @transform_9, window_bounds = array<i64: 8, 128>}]} {
    %c0 = arith.constant 0 : index
    %c0_0 = arith.constant 0 : index
    %0 = vector.load %arg1[%c0, %c0_0] : memref<224x28xf32, #tpu.memory_space<vmem>>, vector<224x28xf32>
    %c0_1 = arith.constant 0 : index
    %c0_2 = arith.constant 0 : index
    %c0_3 = arith.constant 0 : index
    %1 = vector.load %arg2[%c0_1, %c0_2, %c0_3] : memref<5x28x480xf32, #tpu.memory_space<vmem>>, vector<1x28x480xf32>
    %2 = vector.shape_cast %1 : vector<1x28x480xf32> to vector<28x480xf32>
    %cst = arith.constant dense<0.000000e+00> : vector<224x480xf32>
    %3 = tpu.matmul %0, %2, %cst {dimension_numbers = #tpu.dot_dimension_numbers<[1], [0], [0], [1], [0, 0, 1, 1], [], []>} : vector<224x28xf32>, vector<28x480xf32>, vector<224x480xf32> -> vector<224x480xf32>
    %c1 = arith.constant 1 : index
    %c0_4 = arith.constant 0 : index
    %c0_5 = arith.constant 0 : index
    %4 = vector.load %arg2[%c1, %c0_4, %c0_5] : memref<5x28x480xf32, #tpu.memory_space<vmem>>, vector<1x28x480xf32>
    %5 = vector.shape_cast %4 : vector<1x28x480xf32> to vector<28x480xf32>
    %cst_6 = arith.constant dense<0.000000e+00> : vector<224x480xf32>
    %6 = tpu.matmul %0, %5, %cst_6 {dimension_numbers = #tpu.dot_dimension_numbers<[1], [0], [0], [1], [0, 0, 1, 1], [], []>} : vector<224x28xf32>, vector<28x480xf32>, vector<224x480xf32> -> vector<224x480xf32>
    %c2 = arith.constant 2 : index
    %c0_7 = arith.constant 0 : index
    %c0_8 = arith.constant 0 : index
    %7 = vector.load %arg2[%c2, %c0_7, %c0_8] : memref<5x28x480xf32, #tpu.memory_space<vmem>>, vector<1x28x480xf32>
    %8 = vector.shape_cast %7 : vector<1x28x480xf32> to vector<28x480xf32>
    %cst_9 = arith.constant dense<0.000000e+00> : vector<224x480xf32>
    %9 = tpu.matmul %0, %8, %cst_9 {dimension_numbers = #tpu.dot_dimension_numbers<[1], [0], [0], [1], [0, 0, 1, 1], [], []>} : vector<224x28xf32>, vector<28x480xf32>, vector<224x480xf32> -> vector<224x480xf32>
    %c3 = arith.constant 3 : index
    %c0_10 = arith.constant 0 : index
    %c0_11 = arith.constant 0 : index
    %10 = vector.load %arg2[%c3, %c0_10, %c0_11] : memref<5x28x480xf32, #tpu.memory_space<vmem>>, vector<1x28x480xf32>
    %11 = vector.shape_cast %10 : vector<1x28x480xf32> to vector<28x480xf32>
    %cst_12 = arith.constant dense<0.000000e+00> : vector<224x480xf32>
    %12 = tpu.matmul %0, %11, %cst_12 {dimension_numbers = #tpu.dot_dimension_numbers<[1], [0], [0], [1], [0, 0, 1, 1], [], []>} : vector<224x28xf32>, vector<28x480xf32>, vector<224x480xf32> -> vector<224x480xf32>
    %c4 = arith.constant 4 : index
    %c0_13 = arith.constant 0 : index
    %c0_14 = arith.constant 0 : index
    %13 = vector.load %arg2[%c4, %c0_13, %c0_14] : memref<5x28x480xf32, #tpu.memory_space<vmem>>, vector<1x28x480xf32>
    %14 = vector.shape_cast %13 : vector<1x28x480xf32> to vector<28x480xf32>
    %cst_15 = arith.constant dense<0.000000e+00> : vector<224x480xf32>
    %15 = tpu.matmul %0, %14, %cst_15 {dimension_numbers = #tpu.dot_dimension_numbers<[1], [0], [0], [1], [0, 0, 1, 1], [], []>} : vector<224x28xf32>, vector<28x480xf32>, vector<224x480xf32> -> vector<224x480xf32>
    %16 = vector.extract_strided_slice %3 {offsets = [0, 0], sizes = [48, 480], strides = [1, 1]} : vector<224x480xf32> to vector<48x480xf32>
    %17 = vector.extract_strided_slice %6 {offsets = [56, 0], sizes = [48, 480], strides = [1, 1]} : vector<224x480xf32> to vector<48x480xf32>
    %18 = arith.addf %16, %17 : vector<48x480xf32>
    %19 = vector.extract_strided_slice %9 {offsets = [112, 0], sizes = [48, 480], strides = [1, 1]} : vector<224x480xf32> to vector<48x480xf32>
    %20 = arith.addf %18, %19 : vector<48x480xf32>
    %21 = vector.extract_strided_slice %12 {offsets = [168, 0], sizes = [48, 480], strides = [1, 1]} : vector<224x480xf32> to vector<48x480xf32>
    %22 = arith.addf %20, %21 : vector<48x480xf32>
    %23 = vector.extract_strided_slice %15 {offsets = [8, 0], sizes = [48, 480], strides = [1, 1]} : vector<224x480xf32> to vector<48x480xf32>
    %24 = arith.addf %22, %23 : vector<48x480xf32>
    %25 = vector.extract_strided_slice %3 {offsets = [56, 0], sizes = [48, 480], strides = [1, 1]} : vector<224x480xf32> to vector<48x480xf32>
    %26 = vector.extract_strided_slice %6 {offsets = [112, 0], sizes = [48, 480], strides = [1, 1]} : vector<224x480xf32> to vector<48x480xf32>
    %27 = arith.addf %25, %26 : vector<48x480xf32>
    %28 = vector.extract_strided_slice %9 {offsets = [168, 0], sizes = [48, 480], strides = [1, 1]} : vector<224x480xf32> to vector<48x480xf32>
    %29 = arith.addf %27, %28 : vector<48x480xf32>
    %30 = vector.extract_strided_slice %12 {offsets = [8, 0], sizes = [48, 480], strides = [1, 1]} : vector<224x480xf32> to vector<48x480xf32>
    %31 = arith.addf %29, %30 : vector<48x480xf32>
    %32 = vector.extract_strided_slice %15 {offsets = [64, 0], sizes = [48, 480], strides = [1, 1]} : vector<224x480xf32> to vector<48x480xf32>
    %33 = arith.addf %31, %32 : vector<48x480xf32>
    %34 = vector.extract_strided_slice %3 {offsets = [112, 0], sizes = [48, 480], strides = [1, 1]} : vector<224x480xf32> to vector<48x480xf32>
    %35 = vector.extract_strided_slice %6 {offsets = [168, 0], sizes = [48, 480], strides = [1, 1]} : vector<224x480xf32> to vector<48x480xf32>
    %36 = arith.addf %34, %35 : vector<48x480xf32>
    %37 = vector.extract_strided_slice %9 {offsets = [8, 0], sizes = [48, 480], strides = [1, 1]} : vector<224x480xf32> to vector<48x480xf32>
    %38 = arith.addf %36, %37 : vector<48x480xf32>
    %39 = vector.extract_strided_slice %12 {offsets = [64, 0], sizes = [48, 480], strides = [1, 1]} : vector<224x480xf32> to vector<48x480xf32>
    %40 = arith.addf %38, %39 : vector<48x480xf32>
    %41 = vector.extract_strided_slice %15 {offsets = [120, 0], sizes = [48, 480], strides = [1, 1]} : vector<224x480xf32> to vector<48x480xf32>
    %42 = arith.addf %40, %41 : vector<48x480xf32>
    %43 = vector.extract_strided_slice %3 {offsets = [168, 0], sizes = [48, 480], strides = [1, 1]} : vector<224x480xf32> to vector<48x480xf32>
    %44 = vector.extract_strided_slice %6 {offsets = [8, 0], sizes = [48, 480], strides = [1, 1]} : vector<224x480xf32> to vector<48x480xf32>
    %45 = arith.addf %43, %44 : vector<48x480xf32>
    %46 = vector.extract_strided_slice %9 {offsets = [64, 0], sizes = [48, 480], strides = [1, 1]} : vector<224x480xf32> to vector<48x480xf32>
    %47 = arith.addf %45, %46 : vector<48x480xf32>
    %48 = vector.extract_strided_slice %12 {offsets = [120, 0], sizes = [48, 480], strides = [1, 1]} : vector<224x480xf32> to vector<48x480xf32>
    %49 = arith.addf %47, %48 : vector<48x480xf32>
    %50 = vector.extract_strided_slice %15 {offsets = [176, 0], sizes = [48, 480], strides = [1, 1]} : vector<224x480xf32> to vector<48x480xf32>
    %51 = arith.addf %49, %50 : vector<48x480xf32>
    %c0_16 = arith.constant 0 : index
    %c0_17 = arith.constant 0 : index
    %52 = vector.load %arg6[%c0_16, %c0_17] : memref<1x240xf32, #tpu.memory_space<vmem>>, vector<1x240xf32>
    %53 = vector.extract_strided_slice %24 {offsets = [0, 0], sizes = [48, 240], strides = [1, 1]} : vector<48x480xf32> to vector<48x240xf32>
    %54 = vector.extract_strided_slice %24 {offsets = [0, 240], sizes = [48, 240], strides = [1, 1]} : vector<48x480xf32> to vector<48x240xf32>
    %55 = arith.maximumf %53, %54 : vector<48x240xf32>
    %56 = vector.extract_strided_slice %33 {offsets = [0, 0], sizes = [48, 240], strides = [1, 1]} : vector<48x480xf32> to vector<48x240xf32>
    %57 = vector.extract_strided_slice %33 {offsets = [0, 240], sizes = [48, 240], strides = [1, 1]} : vector<48x480xf32> to vector<48x240xf32>
    %58 = arith.maximumf %56, %57 : vector<48x240xf32>
    %59 = arith.maximumf %55, %58 : vector<48x240xf32>
    %60 = vector.broadcast %52 : vector<1x240xf32> to vector<48x240xf32>
    %61 = arith.addf %59, %60 : vector<48x240xf32>
    %cst_18 = arith.constant 0.000000e+00 : f32
    %62 = vector.broadcast %cst_18 : f32 to vector<48x240xf32>
    %63 = arith.maximumf %61, %62 : vector<48x240xf32>
    %64 = vector.extract_strided_slice %42 {offsets = [0, 0], sizes = [48, 240], strides = [1, 1]} : vector<48x480xf32> to vector<48x240xf32>
    %65 = vector.extract_strided_slice %42 {offsets = [0, 240], sizes = [48, 240], strides = [1, 1]} : vector<48x480xf32> to vector<48x240xf32>
    %66 = arith.maximumf %64, %65 : vector<48x240xf32>
    %67 = vector.extract_strided_slice %51 {offsets = [0, 0], sizes = [48, 240], strides = [1, 1]} : vector<48x480xf32> to vector<48x240xf32>
    %68 = vector.extract_strided_slice %51 {offsets = [0, 240], sizes = [48, 240], strides = [1, 1]} : vector<48x480xf32> to vector<48x240xf32>
    %69 = arith.maximumf %67, %68 : vector<48x240xf32>
    %70 = arith.maximumf %66, %69 : vector<48x240xf32>
    %71 = vector.broadcast %52 : vector<1x240xf32> to vector<48x240xf32>
    %72 = arith.addf %70, %71 : vector<48x240xf32>
    %cst_19 = arith.constant 0.000000e+00 : f32
    %73 = vector.broadcast %cst_19 : f32 to vector<48x240xf32>
    %74 = arith.maximumf %72, %73 : vector<48x240xf32>
    %c0_20 = arith.constant 0 : index
    %c0_21 = arith.constant 0 : index
    %c0_22 = arith.constant 0 : index
    %75 = vector.load %arg3[%c0_20, %c0_21, %c0_22] : memref<5x240x400xf32, #tpu.memory_space<vmem>>, vector<1x240x400xf32>
    %76 = vector.shape_cast %75 : vector<1x240x400xf32> to vector<240x400xf32>
    %cst_23 = arith.constant dense<0.000000e+00> : vector<48x400xf32>
    %77 = tpu.matmul %63, %76, %cst_23 {dimension_numbers = #tpu.dot_dimension_numbers<[1], [0], [0], [1], [0, 0, 1, 1], [], []>} : vector<48x240xf32>, vector<240x400xf32>, vector<48x400xf32> -> vector<48x400xf32>
    %c1_24 = arith.constant 1 : index
    %c0_25 = arith.constant 0 : index
    %c0_26 = arith.constant 0 : index
    %78 = vector.load %arg3[%c1_24, %c0_25, %c0_26] : memref<5x240x400xf32, #tpu.memory_space<vmem>>, vector<1x240x400xf32>
    %79 = vector.shape_cast %78 : vector<1x240x400xf32> to vector<240x400xf32>
    %cst_27 = arith.constant dense<0.000000e+00> : vector<48x400xf32>
    %80 = tpu.matmul %63, %79, %cst_27 {dimension_numbers = #tpu.dot_dimension_numbers<[1], [0], [0], [1], [0, 0, 1, 1], [], []>} : vector<48x240xf32>, vector<240x400xf32>, vector<48x400xf32> -> vector<48x400xf32>
    %c2_28 = arith.constant 2 : index
    %c0_29 = arith.constant 0 : index
    %c0_30 = arith.constant 0 : index
    %81 = vector.load %arg3[%c2_28, %c0_29, %c0_30] : memref<5x240x400xf32, #tpu.memory_space<vmem>>, vector<1x240x400xf32>
    %82 = vector.shape_cast %81 : vector<1x240x400xf32> to vector<240x400xf32>
    %cst_31 = arith.constant dense<0.000000e+00> : vector<48x400xf32>
    %83 = tpu.matmul %63, %82, %cst_31 {dimension_numbers = #tpu.dot_dimension_numbers<[1], [0], [0], [1], [0, 0, 1, 1], [], []>} : vector<48x240xf32>, vector<240x400xf32>, vector<48x400xf32> -> vector<48x400xf32>
    %c3_32 = arith.constant 3 : index
    %c0_33 = arith.constant 0 : index
    %c0_34 = arith.constant 0 : index
    %84 = vector.load %arg3[%c3_32, %c0_33, %c0_34] : memref<5x240x400xf32, #tpu.memory_space<vmem>>, vector<1x240x400xf32>
    %85 = vector.shape_cast %84 : vector<1x240x400xf32> to vector<240x400xf32>
    %cst_35 = arith.constant dense<0.000000e+00> : vector<48x400xf32>
    %86 = tpu.matmul %63, %85, %cst_35 {dimension_numbers = #tpu.dot_dimension_numbers<[1], [0], [0], [1], [0, 0, 1, 1], [], []>} : vector<48x240xf32>, vector<240x400xf32>, vector<48x400xf32> -> vector<48x400xf32>
    %c4_36 = arith.constant 4 : index
    %c0_37 = arith.constant 0 : index
    %c0_38 = arith.constant 0 : index
    %87 = vector.load %arg3[%c4_36, %c0_37, %c0_38] : memref<5x240x400xf32, #tpu.memory_space<vmem>>, vector<1x240x400xf32>
    %88 = vector.shape_cast %87 : vector<1x240x400xf32> to vector<240x400xf32>
    %cst_39 = arith.constant dense<0.000000e+00> : vector<48x400xf32>
    %89 = tpu.matmul %63, %88, %cst_39 {dimension_numbers = #tpu.dot_dimension_numbers<[1], [0], [0], [1], [0, 0, 1, 1], [], []>} : vector<48x240xf32>, vector<240x400xf32>, vector<48x400xf32> -> vector<48x400xf32>
    %c0_40 = arith.constant 0 : index
    %c0_41 = arith.constant 0 : index
    %c0_42 = arith.constant 0 : index
    %90 = vector.load %arg3[%c0_40, %c0_41, %c0_42] : memref<5x240x400xf32, #tpu.memory_space<vmem>>, vector<1x240x400xf32>
    %91 = vector.shape_cast %90 : vector<1x240x400xf32> to vector<240x400xf32>
    %cst_43 = arith.constant dense<0.000000e+00> : vector<48x400xf32>
    %92 = tpu.matmul %74, %91, %cst_43 {dimension_numbers = #tpu.dot_dimension_numbers<[1], [0], [0], [1], [0, 0, 1, 1], [], []>} : vector<48x240xf32>, vector<240x400xf32>, vector<48x400xf32> -> vector<48x400xf32>
    %c1_44 = arith.constant 1 : index
    %c0_45 = arith.constant 0 : index
    %c0_46 = arith.constant 0 : index
    %93 = vector.load %arg3[%c1_44, %c0_45, %c0_46] : memref<5x240x400xf32, #tpu.memory_space<vmem>>, vector<1x240x400xf32>
    %94 = vector.shape_cast %93 : vector<1x240x400xf32> to vector<240x400xf32>
    %cst_47 = arith.constant dense<0.000000e+00> : vector<48x400xf32>
    %95 = tpu.matmul %74, %94, %cst_47 {dimension_numbers = #tpu.dot_dimension_numbers<[1], [0], [0], [1], [0, 0, 1, 1], [], []>} : vector<48x240xf32>, vector<240x400xf32>, vector<48x400xf32> -> vector<48x400xf32>
    %c2_48 = arith.constant 2 : index
    %c0_49 = arith.constant 0 : index
    %c0_50 = arith.constant 0 : index
    %96 = vector.load %arg3[%c2_48, %c0_49, %c0_50] : memref<5x240x400xf32, #tpu.memory_space<vmem>>, vector<1x240x400xf32>
    %97 = vector.shape_cast %96 : vector<1x240x400xf32> to vector<240x400xf32>
    %cst_51 = arith.constant dense<0.000000e+00> : vector<48x400xf32>
    %98 = tpu.matmul %74, %97, %cst_51 {dimension_numbers = #tpu.dot_dimension_numbers<[1], [0], [0], [1], [0, 0, 1, 1], [], []>} : vector<48x240xf32>, vector<240x400xf32>, vector<48x400xf32> -> vector<48x400xf32>
    %c3_52 = arith.constant 3 : index
    %c0_53 = arith.constant 0 : index
    %c0_54 = arith.constant 0 : index
    %99 = vector.load %arg3[%c3_52, %c0_53, %c0_54] : memref<5x240x400xf32, #tpu.memory_space<vmem>>, vector<1x240x400xf32>
    %100 = vector.shape_cast %99 : vector<1x240x400xf32> to vector<240x400xf32>
    %cst_55 = arith.constant dense<0.000000e+00> : vector<48x400xf32>
    %101 = tpu.matmul %74, %100, %cst_55 {dimension_numbers = #tpu.dot_dimension_numbers<[1], [0], [0], [1], [0, 0, 1, 1], [], []>} : vector<48x240xf32>, vector<240x400xf32>, vector<48x400xf32> -> vector<48x400xf32>
    %c4_56 = arith.constant 4 : index
    %c0_57 = arith.constant 0 : index
    %c0_58 = arith.constant 0 : index
    %102 = vector.load %arg3[%c4_56, %c0_57, %c0_58] : memref<5x240x400xf32, #tpu.memory_space<vmem>>, vector<1x240x400xf32>
    %103 = vector.shape_cast %102 : vector<1x240x400xf32> to vector<240x400xf32>
    %cst_59 = arith.constant dense<0.000000e+00> : vector<48x400xf32>
    %104 = tpu.matmul %74, %103, %cst_59 {dimension_numbers = #tpu.dot_dimension_numbers<[1], [0], [0], [1], [0, 0, 1, 1], [], []>} : vector<48x240xf32>, vector<240x400xf32>, vector<48x400xf32> -> vector<48x400xf32>
    %105 = vector.extract_strided_slice %77 {offsets = [0, 0], sizes = [32, 400], strides = [1, 1]} : vector<48x400xf32> to vector<32x400xf32>
    %106 = vector.extract_strided_slice %95 {offsets = [0, 0], sizes = [32, 400], strides = [1, 1]} : vector<48x400xf32> to vector<32x400xf32>
    %107 = arith.addf %105, %106 : vector<32x400xf32>
    %108 = vector.extract_strided_slice %83 {offsets = [8, 0], sizes = [32, 400], strides = [1, 1]} : vector<48x400xf32> to vector<32x400xf32>
    %109 = arith.addf %107, %108 : vector<32x400xf32>
    %110 = vector.extract_strided_slice %101 {offsets = [8, 0], sizes = [32, 400], strides = [1, 1]} : vector<48x400xf32> to vector<32x400xf32>
    %111 = arith.addf %109, %110 : vector<32x400xf32>
    %112 = vector.extract_strided_slice %89 {offsets = [16, 0], sizes = [32, 400], strides = [1, 1]} : vector<48x400xf32> to vector<32x400xf32>
    %113 = arith.addf %111, %112 : vector<32x400xf32>
    %114 = vector.extract_strided_slice %92 {offsets = [0, 0], sizes = [32, 400], strides = [1, 1]} : vector<48x400xf32> to vector<32x400xf32>
    %115 = vector.extract_strided_slice %80 {offsets = [8, 0], sizes = [32, 400], strides = [1, 1]} : vector<48x400xf32> to vector<32x400xf32>
    %116 = arith.addf %114, %115 : vector<32x400xf32>
    %117 = vector.extract_strided_slice %98 {offsets = [8, 0], sizes = [32, 400], strides = [1, 1]} : vector<48x400xf32> to vector<32x400xf32>
    %118 = arith.addf %116, %117 : vector<32x400xf32>
    %119 = vector.extract_strided_slice %86 {offsets = [16, 0], sizes = [32, 400], strides = [1, 1]} : vector<48x400xf32> to vector<32x400xf32>
    %120 = arith.addf %118, %119 : vector<32x400xf32>
    %121 = vector.extract_strided_slice %104 {offsets = [16, 0], sizes = [32, 400], strides = [1, 1]} : vector<48x400xf32> to vector<32x400xf32>
    %122 = arith.addf %120, %121 : vector<32x400xf32>
    %c0_60 = arith.constant 0 : index
    %c0_61 = arith.constant 0 : index
    %123 = vector.load %arg7[%c0_60, %c0_61] : memref<1x200xf32, #tpu.memory_space<vmem>>, vector<1x200xf32>
    %124 = vector.extract_strided_slice %113 {offsets = [0, 0], sizes = [32, 200], strides = [1, 1]} : vector<32x400xf32> to vector<32x200xf32>
    %125 = vector.extract_strided_slice %113 {offsets = [0, 200], sizes = [32, 200], strides = [1, 1]} : vector<32x400xf32> to vector<32x200xf32>
    %126 = arith.maximumf %124, %125 : vector<32x200xf32>
    %127 = vector.extract_strided_slice %122 {offsets = [0, 0], sizes = [32, 200], strides = [1, 1]} : vector<32x400xf32> to vector<32x200xf32>
    %128 = vector.extract_strided_slice %122 {offsets = [0, 200], sizes = [32, 200], strides = [1, 1]} : vector<32x400xf32> to vector<32x200xf32>
    %129 = arith.maximumf %127, %128 : vector<32x200xf32>
    %130 = arith.maximumf %126, %129 : vector<32x200xf32>
    %131 = vector.broadcast %123 : vector<1x200xf32> to vector<32x200xf32>
    %132 = arith.addf %130, %131 : vector<32x200xf32>
    %cst_62 = arith.constant 0.000000e+00 : f32
    %133 = vector.broadcast %cst_62 : f32 to vector<32x200xf32>
    %134 = arith.maximumf %132, %133 : vector<32x200xf32>
    %135 = vector.extract_strided_slice %134 {offsets = [0, 0], sizes = [8, 200], strides = [1, 1]} : vector<32x200xf32> to vector<8x200xf32>
    %c0_63 = arith.constant 0 : index
    %c0_64 = arith.constant 0 : index
    %c0_65 = arith.constant 0 : index
    %136 = vector.load %arg4[%c0_63, %c0_64, %c0_65] : memref<4x200x500xf32, #tpu.memory_space<vmem>>, vector<1x200x500xf32>
    %137 = vector.shape_cast %136 : vector<1x200x500xf32> to vector<200x500xf32>
    %cst_66 = arith.constant dense<0.000000e+00> : vector<8x500xf32>
    %138 = tpu.matmul %135, %137, %cst_66 {dimension_numbers = #tpu.dot_dimension_numbers<[1], [0], [0], [1], [0, 0, 1, 1], [], []>} : vector<8x200xf32>, vector<200x500xf32>, vector<8x500xf32> -> vector<8x500xf32>
    %139 = vector.extract_strided_slice %134 {offsets = [8, 0], sizes = [8, 200], strides = [1, 1]} : vector<32x200xf32> to vector<8x200xf32>
    %c1_67 = arith.constant 1 : index
    %c0_68 = arith.constant 0 : index
    %c0_69 = arith.constant 0 : index
    %140 = vector.load %arg4[%c1_67, %c0_68, %c0_69] : memref<4x200x500xf32, #tpu.memory_space<vmem>>, vector<1x200x500xf32>
    %141 = vector.shape_cast %140 : vector<1x200x500xf32> to vector<200x500xf32>
    %cst_70 = arith.constant dense<0.000000e+00> : vector<8x500xf32>
    %142 = tpu.matmul %139, %141, %cst_70 {dimension_numbers = #tpu.dot_dimension_numbers<[1], [0], [0], [1], [0, 0, 1, 1], [], []>} : vector<8x200xf32>, vector<200x500xf32>, vector<8x500xf32> -> vector<8x500xf32>
    %143 = arith.addf %138, %142 : vector<8x500xf32>
    %144 = vector.extract_strided_slice %134 {offsets = [16, 0], sizes = [8, 200], strides = [1, 1]} : vector<32x200xf32> to vector<8x200xf32>
    %c2_71 = arith.constant 2 : index
    %c0_72 = arith.constant 0 : index
    %c0_73 = arith.constant 0 : index
    %145 = vector.load %arg4[%c2_71, %c0_72, %c0_73] : memref<4x200x500xf32, #tpu.memory_space<vmem>>, vector<1x200x500xf32>
    %146 = vector.shape_cast %145 : vector<1x200x500xf32> to vector<200x500xf32>
    %cst_74 = arith.constant dense<0.000000e+00> : vector<8x500xf32>
    %147 = tpu.matmul %144, %146, %cst_74 {dimension_numbers = #tpu.dot_dimension_numbers<[1], [0], [0], [1], [0, 0, 1, 1], [], []>} : vector<8x200xf32>, vector<200x500xf32>, vector<8x500xf32> -> vector<8x500xf32>
    %148 = arith.addf %143, %147 : vector<8x500xf32>
    %149 = vector.extract_strided_slice %134 {offsets = [24, 0], sizes = [8, 200], strides = [1, 1]} : vector<32x200xf32> to vector<8x200xf32>
    %c3_75 = arith.constant 3 : index
    %c0_76 = arith.constant 0 : index
    %c0_77 = arith.constant 0 : index
    %150 = vector.load %arg4[%c3_75, %c0_76, %c0_77] : memref<4x200x500xf32, #tpu.memory_space<vmem>>, vector<1x200x500xf32>
    %151 = vector.shape_cast %150 : vector<1x200x500xf32> to vector<200x500xf32>
    %cst_78 = arith.constant dense<0.000000e+00> : vector<8x500xf32>
    %152 = tpu.matmul %149, %151, %cst_78 {dimension_numbers = #tpu.dot_dimension_numbers<[1], [0], [0], [1], [0, 0, 1, 1], [], []>} : vector<8x200xf32>, vector<200x500xf32>, vector<8x500xf32> -> vector<8x500xf32>
    %153 = arith.addf %148, %152 : vector<8x500xf32>
    %c0_79 = arith.constant 0 : index
    %c0_80 = arith.constant 0 : index
    %154 = vector.load %arg8[%c0_79, %c0_80] : memref<1x500xf32, #tpu.memory_space<vmem>>, vector<1x500xf32>
    %155 = vector.broadcast %154 : vector<1x500xf32> to vector<8x500xf32>
    %156 = arith.addf %153, %155 : vector<8x500xf32>
    %cst_81 = arith.constant 0.000000e+00 : f32
    %157 = vector.broadcast %cst_81 : f32 to vector<8x500xf32>
    %158 = arith.maximumf %156, %157 : vector<8x500xf32>
    %c0_82 = arith.constant 0 : index
    %c0_83 = arith.constant 0 : index
    %159 = vector.load %arg5[%c0_82, %c0_83] : memref<500x128xf32, #tpu.memory_space<vmem>>, vector<500x128xf32>
    %cst_84 = arith.constant dense<0.000000e+00> : vector<8x128xf32>
    %160 = tpu.matmul %158, %159, %cst_84 {dimension_numbers = #tpu.dot_dimension_numbers<[1], [0], [0], [1], [0, 0, 1, 1], [], []>} : vector<8x500xf32>, vector<500x128xf32>, vector<8x128xf32> -> vector<8x128xf32>
    %c0_85 = arith.constant 0 : index
    %c0_86 = arith.constant 0 : index
    %161 = vector.load %arg9[%c0_85, %c0_86] : memref<1x128xf32, #tpu.memory_space<vmem>>, vector<1x128xf32>
    %162 = vector.broadcast %161 : vector<1x128xf32> to vector<8x128xf32>
    %163 = arith.addf %160, %162 : vector<8x128xf32>
    %cst_87 = arith.constant dense<0xFF800000> : vector<8xf32>
    %164 = vector.multi_reduction <maximumf>, %163, %cst_87 [1] : vector<8x128xf32> to vector<8xf32>
    %165 = vector.shape_cast %164 : vector<8xf32> to vector<8x1xf32>
    %166 = vector.broadcast %165 : vector<8x1xf32> to vector<8x128xf32>
    %167 = arith.subf %163, %166 : vector<8x128xf32>
    %168 = math.exp %167 : vector<8x128xf32>
    %cst_88 = arith.constant dense<0.000000e+00> : vector<8xf32>
    %169 = vector.multi_reduction <add>, %168, %cst_88 [1] : vector<8x128xf32> to vector<8xf32>
    %170 = vector.shape_cast %169 : vector<8xf32> to vector<8x1xf32>
    %171 = math.log %170 : vector<8x1xf32>
    %172 = vector.broadcast %171 : vector<8x1xf32> to vector<8x128xf32>
    %173 = arith.subf %167, %172 : vector<8x128xf32>
    %c0_89 = arith.constant 0 : index
    %c0_90 = arith.constant 0 : index
    %174 = vector.load %arg10[%c0_89, %c0_90] : memref<8x128xf32, #tpu.memory_space<vmem>>, vector<8x128xf32>
    tpu.vector_store %arg10[%c0_89, %c0_90], %173 {strides = array<i32>} : memref<8x128xf32, #tpu.memory_space<vmem>>, vector<8x128xf32>,
    return
  }
  func.func @transform_0(%arg0: i32) -> (i32, i32) {
    %c0_i32 = arith.constant 0 : i32
    %c0_i32_0 = arith.constant 0 : i32
    return %arg0, %c0_i32 : i32, i32
  }
  func.func @transform_1(%arg0: i32) -> (i32, i32, i32) {
    %c0_i32 = arith.constant 0 : i32
    %c0_i32_0 = arith.constant 0 : i32
    %c0_i32_1 = arith.constant 0 : i32
    %c0_i32_2 = arith.constant 0 : i32
    return %c0_i32, %c0_i32_0, %c0_i32_1 : i32, i32, i32
  }
  func.func @transform_2(%arg0: i32) -> (i32, i32, i32) {
    %c0_i32 = arith.constant 0 : i32
    %c0_i32_0 = arith.constant 0 : i32
    %c0_i32_1 = arith.constant 0 : i32
    %c0_i32_2 = arith.constant 0 : i32
    return %c0_i32, %c0_i32_0, %c0_i32_1 : i32, i32, i32
  }
  func.func @transform_3(%arg0: i32) -> (i32, i32, i32) {
    %c0_i32 = arith.constant 0 : i32
    %c0_i32_0 = arith.constant 0 : i32
    %c0_i32_1 = arith.constant 0 : i32
    %c0_i32_2 = arith.constant 0 : i32
    return %c0_i32, %c0_i32_0, %c0_i32_1 : i32, i32, i32
  }
  func.func @transform_4(%arg0: i32) -> (i32, i32) {
    %c0_i32 = arith.constant 0 : i32
    %c0_i32_0 = arith.constant 0 : i32
    %c0_i32_1 = arith.constant 0 : i32
    return %c0_i32, %c0_i32_0 : i32, i32
  }
  func.func @transform_5(%arg0: i32) -> (i32, i32) {
    %c0_i32 = arith.constant 0 : i32
    %c0_i32_0 = arith.constant 0 : i32
    %c0_i32_1 = arith.constant 0 : i32
    return %c0_i32, %c0_i32_0 : i32, i32
  }
  func.func @transform_6(%arg0: i32) -> (i32, i32) {
    %c0_i32 = arith.constant 0 : i32
    %c0_i32_0 = arith.constant 0 : i32
    %c0_i32_1 = arith.constant 0 : i32
    return %c0_i32, %c0_i32_0 : i32, i32
  }
  func.func @transform_7(%arg0: i32) -> (i32, i32) {
    %c0_i32 = arith.constant 0 : i32
    %c0_i32_0 = arith.constant 0 : i32
    %c0_i32_1 = arith.constant 0 : i32
    return %c0_i32, %c0_i32_0 : i32, i32
  }
  func.func @transform_8(%arg0: i32) -> (i32, i32) {
    %c0_i32 = arith.constant 0 : i32
    %c0_i32_0 = arith.constant 0 : i32
    %c0_i32_1 = arith.constant 0 : i32
    return %c0_i32, %c0_i32_0 : i32, i32
  }
  func.func @transform_9(%arg0: i32) -> (i32, i32) {
    %c0_i32 = arith.constant 0 : i32
    %c0_i32_0 = arith.constant 0 : i32
    return %arg0, %c0_i32 : i32, i32
  }
}

</mosaic_0001>

<bundles_post_ra>
// kernel: tile.13
= control target key start
LH: loop header
LB: loop body
LE: loop exit
PB: predicated region body
PF: predicated region fallthrough
CT: control target
= control target key end

     0   :  { %s28_s0 = inlined_call_operand.vmem [shape: f32[20], index: 0, kind: input, shape index: {}]   ;;  %s29_s1 = inlined_call_operand.vmem [shape: f32[12,20], index: 1, kind: output, shape index: {}]  }
   0x1   :  { %v4_v0 = vld [vmem:[%s28_s0] ss:$0 sm:$0xff] }
   0x2   :  { %5 = vst [vmem:[%s29_s1] sm:$0xff] %v4_v0  ;;  %8 = vst [vmem:[%s29_s1 + $0x8] sm:$0xff] %v4_v0 }

// kernel: tile.14
= control target key start
LH: loop header
LB: loop body
LE: loop exit
PB: predicated region body
PF: predicated region fallthrough
CT: control target
= control target key end

     0   :  { %vm9_vm0 = vcmask 64512   ;;  %s118_s12 = smov 120   ;;  %s119_s13 = smov 92   ;;  %vm3_vm1 = vcmask 162816   ;;  %vm13_vm2 = vcmask 97280   ;;  %vm16_vm3 = vcmask 1048512   ;;  %s184_s0 = inlined_call_operand.vmem [shape: f32[12,20], index: 0, kind: input, shape index: {}]   ;;  %s185_s1 = inlined_call_operand.vmem [shape: f32[1,240], index: 1, kind: output, shape index: {}]  }
   0x1   :  { %v94_v0 = vld [vmem:[%s184_s0 + $0x6] sm:$0x1]   ;;  %v97_v3 = vld [vmem:[%s184_s0 + $0xb] sm:$0x1]   ;;  %v96_v4 = vld [vmem:[%s184_s0 + $0x5] sm:$0x1]  }
   0x2   :  { %v95_v1 = vld [vmem:[%s184_s0 + $0x6] sm:$0x1]   ;;  %26 = vrot.lane.b32.xlu1 %v97_v3, %s119_s13  ;;  %v98_v5 = vld [vmem:[%s184_s0 + $0x4] sm:$0x1]   ;;  %s120_s18 = smov 100   ;;  %s121_s19 = smov 80  }
   0x3   :  { %v10_v2 = vsel %vm9_vm0, %v95_v1, %v94_v0  ;;  %v2_v6 = vld [vmem:[%s184_s0] sm:$0x1]   ;;  %v99_v7 = vld [vmem:[%s184_s0 + $0xa] sm:$0x1]   ;;  %v100_v8 = vld [vmem:[%s184_s0 + $0x3] sm:$0x1]  }
   0x4   :  { %11 = vrot.lane.b32.xlu0 %v10_v2, %s118_s12  ;;  %4 = vst.msk [vmem:[#allocation0] sm:$0x1] %vm3_vm1, %v2_v6   ;;  %s122_s26 = smov 72   ;;  %s123_s27 = smov 60   ;;  %v101_v9 = vld [vmem:[%s184_s0 + $0x9] sm:$0x1]  }
   0x5   :  { %v102_v10 = vld [vmem:[%s184_s0 + $0x2] sm:$0x1]   ;;  %s124_s3 = smov 52   ;;  %s125_s4 = smov 40   ;;  %v103_v11 = vld [vmem:[%s184_s0 + $0x8] sm:$0x1]  }
   0x6   :  { %33 = vrot.lane.b32.xlu1 %v98_v5, %s121_s19  ;;  %v104_v12 = vld [vmem:[%s184_s0 + $0x1] sm:$0x1]   ;;  %s126_s9 = smov 32   ;;  %s127_s10 = smov 20   ;;  %v105_v13 = vld [vmem:[%s184_s0 + $0x7] sm:$0x1]  }
   0x7   :  { %s128_s0 = smov 12   ;;  %vm28_vm4 = vcmask 917216   ;;  %vm22_vm5 = vcmask 982816   ;;  %vm35_vm6 = vcmask 818816   ;;  %vm41_vm7 = vcmask 753216  }
   0x8   :  { %20 = vrot.lane.b32.xlu0 %v96_v4, %s120_s18  ;;  %vm48_vm8 = vcmask 654816   ;;  %vm54_vm9 = vcmask 589216   ;;  %vm61_vm10 = vcmask 490816   ;;  %vm67_vm11 = vcmask 425216  }
   0x9   :  { %vm74_vm12 = vcmask 326816   ;;  %vm80_vm13 = vcmask 261216  }
   0xa   :  { %46 = vrot.lane.b32.xlu1 %v100_v8, %s123_s27 }
   0xc   :  { %39 = vrot.lane.b32.xlu0 %v99_v7, %s122_s26 }
   0xe   :  { %59 = vrot.lane.b32.xlu1 %v102_v10, %s125_s4 }
  0x10   :  { %52 = vrot.lane.b32.xlu0 %v101_v9, %s124_s3 }
  0x12   :  { %72 = vrot.lane.b32.xlu1 %v104_v12, %s127_s10 }
  0x14   :  { %65 = vrot.lane.b32.xlu0 %v103_v11, %s126_s9 }
  0x18   :  { %78 = vrot.lane.b32.xlu0 %v105_v13, %s128_s0 }
  0x74   :  { %v27_v15 = vpop.permute.xlu1 %26  }
  0x76   :  { %v12_v14 = vpop.permute.xlu0 %11  }
  0x77   :  { %15 = vst.msk [vmem:[#allocation0 + $0x8] sm:$0x1] %vm13_vm2, %v12_v14  }
  0x78   :  { %17 = vst.msk [vmem:[#allocation0] sm:$0x1] %vm16_vm3, %v12_v14   ;;  %v34_v17 = vpop.permute.xlu1 %33  }
  0x79   :  { %30 = vst.msk [vmem:[#allocation0 + $0x8] sm:$0x1] %vm28_vm4, %v27_v15  }
  0x7a   :  { %v21_v16 = vpop.permute.xlu0 %20  }
  0x7b   :  { %23 = vst.msk [vmem:[#allocation0] sm:$0x1] %vm22_vm5, %v21_v16  }
  0x7c   :  { %36 = vst.msk [vmem:[#allocation0] sm:$0x1] %vm35_vm6, %v34_v17   ;;  %v47_v19 = vpop.permute.xlu1 %46  }
  0x7d   :  { %49 = vst.msk [vmem:[#allocation0] sm:$0x1] %vm48_vm8, %v47_v19  }
  0x7e   :  { %v40_v18 = vpop.permute.xlu0 %39  }
  0x7f   :  { %43 = vst.msk [vmem:[#allocation0 + $0x8] sm:$0x1] %vm41_vm7, %v40_v18  }
  0x80   :  { %v60_v21 = vpop.permute.xlu1 %59  }
  0x81   :  { %62 = vst.msk [vmem:[#allocation0] sm:$0x1] %vm61_vm10, %v60_v21  }
  0x82   :  { %v53_v20 = vpop.permute.xlu0 %52  }
  0x83   :  { %56 = vst.msk [vmem:[#allocation0 + $0x8] sm:$0x1] %vm54_vm9, %v53_v20  }
  0x84   :  { %v73_v23 = vpop.permute.xlu1 %72  }
  0x85   :  { %75 = vst.msk [vmem:[#allocation0] sm:$0x1] %vm74_vm12, %v73_v23  }
  0x86   :  { %v66_v22 = vpop.permute.xlu0 %65  }
  0x87   :  { %69 = vst.msk [vmem:[#allocation0 + $0x8] sm:$0x1] %vm67_vm11, %v66_v22  }
  0x8a   :  { %v79_v24 = vpop.permute.xlu0 %78  }
  0x8b   :  { %82 = vst.msk [vmem:[#allocation0 + $0x8] sm:$0x1] %vm80_vm13, %v79_v24  }
  0x8c   :  { %v86_v25 = vld [vmem:[#allocation0] sm:$0x1] }
  0x8d   :  { %88 = vst [vmem:[%s185_s1] sm:$0x1] %v86_v25 }
  0x92   :  { %v90_v26 = vld [vmem:[#allocation0 + $0x8] sm:$0x1] }
  0x93   :  { %106 = vst [vmem:[%s185_s1 + $0x1] sm:$0x1] %v90_v26 }

// kernel: tile.18
= control target key start
LH: loop header
LB: loop body
LE: loop exit
PB: predicated region body
PF: predicated region fallthrough
CT: control target
= control target key end

     0   :  { %s22_s0 = inlined_call_operand.vmem [shape: f32[50], index: 0, kind: input, shape index: {}]   ;;  %s23_s1 = inlined_call_operand.vmem [shape: f32[4,50], index: 1, kind: output, shape index: {}]  }
   0x1   :  { %v4_v0 = vld [vmem:[%s22_s0] ss:$0 sm:$0xff] }
   0x2   :  { %5 = vst [vmem:[%s23_s1] sm:$0xf] %v4_v0 }

// kernel: tile.19
= control target key start
LH: loop header
LB: loop body
LE: loop exit
PB: predicated region body
PF: predicated region fallthrough
CT: control target
= control target key end

     0   :  { %vm13_vm0 = vcmask 228352   ;;  %vm7_vm1 = vcmask 408576   ;;  %s51_s8 = smov 100   ;;  %s52_s9 = smov 50   ;;  %vm17_vm2 = vcmask 179200   ;;  %vm20_vm3 = vcmask 1048352   ;;  %s72_s0 = inlined_call_operand.vmem [shape: f32[4,50], index: 0, kind: input, shape index: {}]   ;;  %s73_s1 = inlined_call_operand.vmem [shape: f32[1,200], index: 1, kind: output, shape index: {}]  }
   0x1   :  { %v4_v0 = vld [vmem:[%s72_s0] sm:$0xf]  ;;  %s50_s0 = smov 22   ;;  %vm32_vm4 = vcmask 588976   ;;  %vm26_vm5 = vcmask 818576  }
   0x2   :  { %5 = vst [vmem:[#allocation1] sm:$0xf] %v4_v0 }
   0x9   :  { %v10_v1 = vld [vmem:[#allocation1 + $0x2] sm:$0x1]   ;;  %v29_v3 = vld [vmem:[#allocation1 + $0x3] sm:$0x1]   ;;  %v6_v5 = vld [vmem:[#allocation1] sm:$0x1]  }
   0xa   :  { %v12_v2 = vld [vmem:[#allocation1 + $0x2] sm:$0x1]   ;;  %30 = vrot.lane.b32.xlu1 %v29_v3, %s50_s0  ;;  %8 = vst.msk [vmem:[#allocation0] sm:$0x1] %vm7_vm1, %v6_v5   ;;  %v23_v6 = vld [vmem:[#allocation1 + $0x1] sm:$0x1]  }
   0xb   :  { %v14_v4 = vsel %vm13_vm0, %v12_v2, %v10_v1 }
   0xc   :  { %15 = vrot.lane.b32.xlu0 %v14_v4, %s51_s8 }
  0x10   :  { %24 = vrot.lane.b32.xlu0 %v23_v6, %s52_s9 }
  0x7c   :  { %v31_v7 = vpop.permute.xlu1 %30  }
  0x7e   :  { %v16_v8 = vpop.permute.xlu0 %15  }
  0x7f   :  { %19 = vst.msk [vmem:[#allocation0 + $0x8] sm:$0x1] %vm17_vm2, %v16_v8  }
  0x80   :  { %21 = vst.msk [vmem:[#allocation0] sm:$0x1] %vm20_vm3, %v16_v8  }
  0x81   :  { %34 = vst.msk [vmem:[#allocation0 + $0x8] sm:$0x1] %vm32_vm4, %v31_v7  }
  0x82   :  { %v25_v9 = vpop.permute.xlu0 %24  }
  0x83   :  { %27 = vst.msk [vmem:[#allocation0] sm:$0x1] %vm26_vm5, %v25_v9  }
  0x88   :  { %v42_v10 = vld [vmem:[#allocation0 + $0x8] sm:$0x1] }
  0x89   :  { %46 = vst [vmem:[%s73_s1 + $0x1] sm:$0x1] %v42_v10 }
  0x8a   :  { %v38_v11 = vld [vmem:[#allocation0] sm:$0x1] }
  0x8b   :  { %40 = vst [vmem:[%s73_s1] sm:$0x1] %v38_v11 }

// kernel: simple_cnn_forward.1
= control target key start
LH: loop header
LB: loop body
LE: loop exit
PB: predicated region body
PF: predicated region fallthrough
CT: control target
= control target key end

     0   :  { %vm161_vm0 = vcmask 1043456   ;;  %v18099_v3 = vmov 0.0   ;;  %vm11126_vm1 = vmmov 1   ;;  %vm76_vm3 = vcmask 228352   ;;  %s11127_s10 = smov 16   ;;  %s11128_s29 = smov 56   ;;  %s18089_s1 = inlined_call_operand.vmem [shape: f32[5,28,480], index: 1, kind: input, shape index: {}]   ;;  %s18090_s0 = inlined_call_operand.vmem [shape: f32[224,28], index: 0, kind: input, shape index: {}]   ;;  %s18091_s2 = inlined_call_operand.vmem [shape: f32[5,240,400], index: 2, kind: input, shape index: {}]   ;;  %s18092_s5 = inlined_call_operand.vmem [shape: f32[1,240], index: 5, kind: input, shape index: {}]   ;;  %s18093_s3 = inlined_call_operand.vmem [shape: f32[4,200,500], index: 3, kind: input, shape index: {}]   ;;  %s18094_s6 = inlined_call_operand.vmem [shape: f32[1,200], index: 6, kind: input, shape index: {}]   ;;  %s18095_s4 = inlined_call_operand.vmem [shape: f32[500,128], index: 4, kind: input, shape index: {}]   ;;  %s18096_s7 = inlined_call_operand.vmem [shape: f32[1,500], index: 7, kind: input, shape index: {}]   ;;  %s18097_s8 = inlined_call_operand.vmem [shape: f32[1,128], index: 8, kind: input, shape index: {}]   ;;  %s18098_s9 = inlined_call_operand.vmem [shape: f32[8,128], index: 9, kind: output, shape index: {}]  }
   0x1   :  { %v61_v0 = vld [vmem:[%s18089_s1 + $0x8] sm:$0xff]  ;;  %v63_v2 = vld [vmem:[%s18089_s1 + $0x18] sm:$0xff]  ;;  %238 = vmatprep.mubr.f32.mxu0 %v18099_v3  ;;  %481 = vmatprep.mubr.f32.mxu1 %v18099_v3  ;;  %v60_v6 = vld [vmem:[%s18089_s1] sm:$0xff]  ;;  %vm2979_vm4 = vcmask 130048   ;;  %vm3489_vm5 = vcmask 916480   ;;  %vm6115_vm6 = vcmask 457728  }
   0x2   :  { %v65_v1 = vld [vmem:[%s18089_s1 + $0x28] sm:$0xff]  ;;  %v67_v5 = vld [vmem:[%s18089_s1 + $0x38] sm:$0xff]  ;;  %v64_v7 = vld [vmem:[%s18089_s1 + $0x20] sm:$0xff]  ;;  %vm6436_vm7 = vcmask 588800   ;;  %vm7327_vm8 = vcmask 949248  }
   0x3   :  { %v8799_v4 = vpack.c.bf16 %v65_v1, %v61_v0  ;;  %v8809_v8 = vpack.c.bf16 %v67_v5, %v63_v2  ;;  %v8801_v9 = vpack.c.bf16 %v64_v7, %v60_v6  ;;  %v62_v10 = vld [vmem:[%s18089_s1 + $0x10] sm:$0xff]  ;;  %v69_v12 = vld [vmem:[%s18089_s1 + $0x48] sm:$0xff]  ;;  %vm11213_vm2 = vmpackc.low %vm161_vm0, %vm11126_vm1 }
   0x4   :  { %v66_v11 = vld [vmem:[%s18089_s1 + $0x30] sm:$0xff]  ;;  %v73_v14 = vld [vmem:[%s18089_s1 + $0x68] sm:$0xf]  ;;  %v71_v16 = vld [vmem:[%s18089_s1 + $0x58] sm:$0xff] }
   0x5   :  { %8800 = vmatprep.subr.bf16.mxu0 %v8799_v4  ;;  %v8811_v13 = vpack.c.bf16 %v66_v11, %v62_v10  ;;  %10560 = vmatprep.subr.bf16.mxu1 %v8809_v8  ;;  %v8803_v17 = vpack.c.bf16 %v73_v14, %v69_v12  ;;  %v75_v18 = vld [vmem:[%s18089_s1 + $0x78] sm:$0xf]  ;;  %v68_v19 = vld [vmem:[%s18089_s1 + $0x40] sm:$0xff]  ;;  %v70_v23 = vld [vmem:[%s18089_s1 + $0x50] sm:$0xff] }
   0x6   :  { %8802 = vmatpush1.bf16.msra.mxu0 %v8801_v9  ;;  %v72_v20 = vld [vmem:[%s18089_s1 + $0x60] sm:$0xf]  ;;  %v8813_v21 = vpack.c.bf16 %v75_v18, %v71_v16  ;;  %v74_v24 = vld [vmem:[%s18089_s1 + $0x70] sm:$0xf]  ;;  %v7552_v27 = vld [vmem:[%s18089_s1 + $0x98] sm:$0xff] }
   0x7   :  { %10562 = vmatpush1.bf16.msra.mxu1 %v8811_v13  ;;  %v8806_v22 = vpack.c.bf16 %v72_v20, %v68_v19  ;;  %8805 = vmatprep.subr.msk.bf16.mxu0 %vm11213_vm2, %v8803_v17  ;;  %v8816_v25 = vpack.c.bf16 %v74_v24, %v70_v23  ;;  %v11244_v26 = vld [vmem:[%s18090_s0] sm:$0xff]  ;;  %v7556_v28 = vld [vmem:[%s18089_s1 + $0xb8] sm:$0xff]  ;;  %v7551_v31 = vld [vmem:[%s18089_s1 + $0x90] sm:$0xff] }
   0x8   :  { %10561 = vmatprep.subr.msk.bf16.mxu1 %vm11213_vm2, %v8813_v21  ;;  %v11257_v29 = vld [vmem:[%s18090_s0 + $0x18] sm:$0xff]  ;;  %v8829_v30 = vpack.c.bf16 %v7556_v28, %v7552_v27  ;;  %v7555_v32 = vld [vmem:[%s18089_s1 + $0xb0] sm:$0xff]  ;;  %v11272_v34 = vld [vmem:[%s18090_s0 + $0x8] sm:$0xff] }
   0x9   :  { %v8831_v33 = vpack.c.bf16 %v7555_v32, %v7551_v31  ;;  %v11279_v35 = vld [vmem:[%s18090_s0 + $0x20] sm:$0xff]  ;;  %v7560_v36 = vld [vmem:[%s18089_s1 + $0xd8] sm:$0xff]  ;;  %v7559_v38 = vld [vmem:[%s18089_s1 + $0xd0] sm:$0xff] }
   0xa   :  { %8808 = vmatpush1.bf16.msk.msra.mxu0 %vm11213_vm2, %v8806_v22  ;;  %v7564_v37 = vld [vmem:[%s18089_s1 + $0xf8] sm:$0xf]  ;;  %v7563_v40 = vld [vmem:[%s18089_s1 + $0xf0] sm:$0xf]  ;;  %v11309_v43 = vld [vmem:[%s18090_s0 + $0x28] sm:$0xff] }
   0xb   :  { %10563 = vmatpush1.bf16.msk.msra.mxu1 %vm11213_vm2, %v8816_v25  ;;  %8810 = vmatprep.subr.bf16.mxu0 %v8809_v8  ;;  %v8833_v39 = vpack.c.bf16 %v7564_v37, %v7560_v36  ;;  %v11303_v41 = vld [vmem:[%s18090_s0 + $0x10] sm:$0xff]  ;;  %v8836_v42 = vpack.c.bf16 %v7563_v40, %v7559_v38  ;;  %v7550_v44 = vld [vmem:[%s18089_s1 + $0x88] sm:$0xff]  ;;  %v7628_v47 = vld [vmem:[%s18089_s1 + $0x118] sm:$0xff] }
   0xc   :  { %8830 = vmatprep.subr.bf16.mxu1 %v8829_v30  ;;  %v7554_v45 = vld [vmem:[%s18089_s1 + $0xa8] sm:$0xff]  ;;  %v7632_v48 = vld [vmem:[%s18089_s1 + $0x138] sm:$0xff]  ;;  %v11338_v50 = vld [vmem:[%s18090_s0 + $0x30] sm:$0xff] }
   0xd   :  { %7491 = vmatmul.mubr.msk.f32.vlgmr.msra.gmra.mrb[0].mxu0 %vm76_vm3, %v11244_v26  ;;  %v8819_v46 = vpack.c.bf16 %v7554_v45, %v7550_v44  ;;  %v8849_v49 = vpack.c.bf16 %v7632_v48, %v7628_v47  ;;  %v11349_v51 = vld [vmem:[%s18090_s0 + $0x38] sm:$0xff]  ;;  %v11360_v52 = vld [vmem:[%s18090_s0 + $0x40] sm:$0xff]  ;;  %v11371_v53 = vld [vmem:[%s18090_s0 + $0x48] sm:$0xff] }
   0xe   :  { %7524 = vmatmul.mubr.msk.f32.vlgmr.msra.gmra.mrb[0].mxu1 %vm76_vm3, %v11257_v29  ;;  %8812 = vmatpush1.bf16.msra.mxu0 %v8811_v13  ;;  %v11382_v54 = vld [vmem:[%s18090_s0 + $0x50] sm:$0xff]  ;;  %v11393_v55 = vld [vmem:[%s18090_s0 + $0x58] sm:$0xff]  ;;  %v11404_v56 = vld [vmem:[%s18090_s0 + $0x60] sm:$0xff] }
   0xf   :  { %244 = vmatprep.mubr.f32.mxu0 %v18099_v3  ;;  %487 = vmatprep.mubr.f32.mxu1 %v18099_v3  ;;  %v11415_v57 = vld [vmem:[%s18090_s0 + $0x68] sm:$0xff]  ;;  %v11426_v58 = vld [vmem:[%s18090_s0 + $0x70] sm:$0xff]  ;;  %v11437_v59 = vld [vmem:[%s18090_s0 + $0x78] sm:$0xff] }
  0x10   :  { %8832 = vmatpush1.bf16.msra.mxu1 %v8831_v33  ;;  %8815 = vmatprep.subr.msk.bf16.mxu0 %vm11213_vm2, %v8813_v21  ;;  %v11448_v60 = vld [vmem:[%s18090_s0 + $0x80] sm:$0xff]  ;;  %v11459_v61 = vld [vmem:[%s18090_s0 + $0x88] sm:$0xff]  ;;  %v11470_v62 = vld [vmem:[%s18090_s0 + $0x90] sm:$0xff] }
  0x11   :  { %7492 = vmatmul.mubr.msk.f32.gmra.mrb[2].mxu0 %vm76_vm3, %v11272_v34  ;;  %8835 = vmatprep.subr.msk.bf16.mxu1 %vm11213_vm2, %v8833_v39  ;;  %v11481_v63 = vld [vmem:[%s18090_s0 + $0x98] sm:$0xff]  ;;  %v11492_v0 = vld [vmem:[%s18090_s0 + $0xa0] sm:$0xff]  ;;  %v11503_v1 = vld [vmem:[%s18090_s0 + $0xa8] sm:$0xff] }
  0x12   :  { %7525 = vmatmul.mubr.msk.f32.gmra.mrb[2].mxu1 %vm76_vm3, %v11279_v35  ;;  %250 = vmatprep.mubr.f32.mxu0 %v18099_v3  ;;  %v11514_v2 = vld [vmem:[%s18090_s0 + $0xb0] sm:$0xff]  ;;  %v11525_v4 = vld [vmem:[%s18090_s0 + $0xb8] sm:$0xff]  ;;  %v11536_v5 = vld [vmem:[%s18090_s0 + $0xc0] sm:$0xff] }
  0x13   :  { %493 = vmatprep.mubr.f32.mxu1 %v18099_v3  ;;  %8818 = vmatpush1.bf16.msk.msra.mxu0 %vm11213_vm2, %v8816_v25  ;;  %v11547_v6 = vld [vmem:[%s18090_s0 + $0xc8] sm:$0xff]  ;;  %v11558_v7 = vld [vmem:[%s18090_s0 + $0xd0] sm:$0xff]  ;;  %v11569_v8 = vld [vmem:[%s18090_s0 + $0xd8] sm:$0xff] }
  0x14   :  { %8838 = vmatpush1.bf16.msk.msra.mxu1 %vm11213_vm2, %v8836_v42  ;;  %8820 = vmatprep.subr.bf16.mxu0 %v8819_v46  ;;  %v7627_v9 = vld [vmem:[%s18089_s1 + $0x110] sm:$0xff]  ;;  %v7636_v11 = vld [vmem:[%s18089_s1 + $0x158] sm:$0xff]  ;;  %v7549_v22 = vld [vmem:[%s18089_s1 + $0x80] sm:$0xff] }
  0x15   :  { %7493 = vmatmul.mubr.msk.f32.gmra.mrb[4].mxu0 %vm76_vm3, %v11303_v41  ;;  %8850 = vmatprep.subr.bf16.mxu1 %v8849_v49  ;;  %v7631_v10 = vld [vmem:[%s18089_s1 + $0x130] sm:$0xff]  ;;  %v7640_v12 = vld [vmem:[%s18089_s1 + $0x178] sm:$0xf]  ;;  %v7553_v23 = vld [vmem:[%s18089_s1 + $0xa0] sm:$0xff] }
  0x16   :  { %7526 = vmatmul.mubr.msk.f32.gmra.mrb[4].mxu1 %vm76_vm3, %v11309_v43  ;;  %256 = vmatprep.mubr.f32.mxu0 %v18099_v3  ;;  %v8851_v13 = vpack.c.bf16 %v7631_v10, %v7627_v9  ;;  %v8853_v14 = vpack.c.bf16 %v7640_v12, %v7636_v11  ;;  %v7635_v16 = vld [vmem:[%s18089_s1 + $0x150] sm:$0xff]  ;;  %v7704_v18 = vld [vmem:[%s18089_s1 + $0x198] sm:$0xff]  ;;  %v7558_v24 = vld [vmem:[%s18089_s1 + $0xc8] sm:$0xff]  ;;  %v8821_v27 = vpack.c.bf16 %v7553_v23, %v7549_v22 }
  0x17   :  { %499 = vmatprep.mubr.f32.mxu1 %v18099_v3  ;;  %v7639_v17 = vld [vmem:[%s18089_s1 + $0x170] sm:$0xf]  ;;  %v7708_v19 = vld [vmem:[%s18089_s1 + $0x1b8] sm:$0xff]  ;;  %v7562_v25 = vld [vmem:[%s18089_s1 + $0xe8] sm:$0xf] }
  0x18   :  { %v8856_v20 = vpack.c.bf16 %v7639_v17, %v7635_v16  ;;  %v8869_v21 = vpack.c.bf16 %v7708_v19, %v7704_v18  ;;  %v8823_v28 = vpack.c.bf16 %v7562_v25, %v7558_v24  ;;  %v7557_v30 = vld [vmem:[%s18089_s1 + $0xc0] sm:$0xff]  ;;  %v7626_v32 = vld [vmem:[%s18089_s1 + $0x108] sm:$0xff]  ;;  %v7703_v11 = vld [vmem:[%s18089_s1 + $0x190] sm:$0xff] }
  0x19   :  { %7494 = vmatmul.mubr.msk.f32.gmra.mrb[6].mxu0 %vm76_vm3, %v11257_v29  ;;  %v7561_v31 = vld [vmem:[%s18089_s1 + $0xe0] sm:$0xf]  ;;  %v7630_v33 = vld [vmem:[%s18089_s1 + $0x128] sm:$0xff]  ;;  %v7707_v12 = vld [vmem:[%s18089_s1 + $0x1b0] sm:$0xff] }
  0x1a   :  { %7527 = vmatmul.mubr.msk.f32.gmra.mrb[6].mxu1 %vm76_vm3, %v11338_v50  ;;  %262 = vmatprep.mubr.f32.mxu0 %v18099_v3  ;;  %v8826_v36 = vpack.c.bf16 %v7561_v31, %v7557_v30  ;;  %v8839_v37 = vpack.c.bf16 %v7630_v33, %v7626_v32  ;;  %v7625_v38 = vld [vmem:[%s18089_s1 + $0x100] sm:$0xff]  ;;  %v7634_v40 = vld [vmem:[%s18089_s1 + $0x148] sm:$0xff]  ;;  %v8871_v16 = vpack.c.bf16 %v7707_v12, %v7703_v11  ;;  %v7711_v18 = vld [vmem:[%s18089_s1 + $0x1d0] sm:$0xff] }
  0x1b   :  { %503 = vmatprep.mubr.f32.mxu1 %v18099_v3  ;;  %v7629_v39 = vld [vmem:[%s18089_s1 + $0x120] sm:$0xff]  ;;  %v7638_v42 = vld [vmem:[%s18089_s1 + $0x168] sm:$0xf]  ;;  %v7715_v19 = vld [vmem:[%s18089_s1 + $0x1f0] sm:$0xf] }
  0x1c   :  { %v8841_v44 = vpack.c.bf16 %v7629_v39, %v7625_v38  ;;  %v8843_v45 = vpack.c.bf16 %v7638_v42, %v7634_v40  ;;  %v7633_v46 = vld [vmem:[%s18089_s1 + $0x140] sm:$0xff]  ;;  %v7702_v48 = vld [vmem:[%s18089_s1 + $0x188] sm:$0xff]  ;;  %v8876_v22 = vpack.c.bf16 %v7715_v19, %v7711_v18  ;;  %v7779_v19 = vld [vmem:[%s18089_s1 + $0x210] sm:$0xff] }
  0x1d   :  { %7495 = vmatmul.mubr.msk.f32.gmra.mrb[8].mxu0 %vm76_vm3, %v11279_v35  ;;  %v7637_v47 = vld [vmem:[%s18089_s1 + $0x160] sm:$0xf]  ;;  %v7706_v49 = vld [vmem:[%s18089_s1 + $0x1a8] sm:$0xff]  ;;  %v12181_v15 = vld [vmem:[%s18090_s0 + $0x18] sm:$0xff] }
  0x1e   :  { %7528 = vmatmul.mubr.msk.f32.gmra.mrb[8].mxu1 %vm76_vm3, %v11349_v51  ;;  %268 = vmatprep.mubr.f32.mxu0 %v18099_v3  ;;  %v8846_v9 = vpack.c.bf16 %v7637_v47, %v7633_v46  ;;  %v8859_v10 = vpack.c.bf16 %v7706_v49, %v7702_v48  ;;  %v7710_v30 = vld [vmem:[%s18089_s1 + $0x1c8] sm:$0xff]  ;;  %v7713_v38 = vld [vmem:[%s18089_s1 + $0x1e0] sm:$0xf] }
  0x1f   :  { %509 = vmatprep.mubr.f32.mxu1 %v18099_v3  ;;  %v7714_v31 = vld [vmem:[%s18089_s1 + $0x1e8] sm:$0xf] }
  0x20   :  { %v7778_v40 = vld [vmem:[%s18089_s1 + $0x208] sm:$0xff] }
  0x21   :  { %7496 = vmatmul.mubr.msk.f32.gmra.mrb[10].mxu0 %vm76_vm3, %v11309_v43  ;;  %v7782_v42 = vld [vmem:[%s18089_s1 + $0x228] sm:$0xff] }
  0x22   :  { %7529 = vmatmul.mubr.msk.f32.gmra.mrb[10].mxu1 %vm76_vm3, %v11360_v52  ;;  %274 = vmatprep.mubr.f32.mxu0 %v18099_v3 }
  0x23   :  { %515 = vmatprep.mubr.f32.mxu1 %v18099_v3 }
  0x25   :  { %7497 = vmatmul.mubr.msk.f32.gmra.mrb[12].mxu0 %vm76_vm3, %v11338_v50 }
  0x26   :  { %7530 = vmatmul.mubr.msk.f32.gmra.mrb[12].mxu1 %vm76_vm3, %v11371_v53  ;;  %278 = vmatprep.mubr.f32.mxu0 %v18099_v3 }
  0x27   :  { %521 = vmatprep.mubr.f32.mxu1 %v18099_v3 }
  0x29   :  { %7498 = vmatmul.mubr.msk.f32.gmra.mrb[14].mxu0 %vm76_vm3, %v11349_v51 }
  0x2a   :  { %7531 = vmatmul.mubr.msk.f32.gmra.mrb[14].mxu1 %vm76_vm3, %v11382_v54  ;;  %284 = vmatprep.mubr.f32.mxu0 %v18099_v3 }
  0x2b   :  { %527 = vmatprep.mubr.f32.mxu1 %v18099_v3 }
  0x2d   :  { %7499 = vmatmul.mubr.msk.f32.gmra.mrb[16].mxu0 %vm76_vm3, %v11360_v52 }
  0x2e   :  { %7532 = vmatmul.mubr.msk.f32.gmra.mrb[16].mxu1 %vm76_vm3, %v11393_v55  ;;  %290 = vmatprep.mubr.f32.mxu0 %v18099_v3 }
  0x2f   :  { %533 = vmatprep.mubr.f32.mxu1 %v18099_v3 }
  0x31   :  { %7500 = vmatmul.mubr.msk.f32.gmra.mrb[18].mxu0 %vm76_vm3, %v11371_v53 }
  0x32   :  { %7533 = vmatmul.mubr.msk.f32.gmra.mrb[18].mxu1 %vm76_vm3, %v11404_v56  ;;  %296 = vmatprep.mubr.f32.mxu0 %v18099_v3 }
  0x33   :  { %539 = vmatprep.mubr.f32.mxu1 %v18099_v3 }
  0x35   :  { %7501 = vmatmul.mubr.msk.f32.gmra.mrb[20].mxu0 %vm76_vm3, %v11382_v54 }
  0x36   :  { %7534 = vmatmul.mubr.msk.f32.gmra.mrb[20].mxu1 %vm76_vm3, %v11415_v57  ;;  %302 = vmatprep.mubr.f32.mxu0 %v18099_v3 }
  0x37   :  { %543 = vmatprep.mubr.f32.mxu1 %v18099_v3 }
  0x39   :  { %7502 = vmatmul.mubr.msk.f32.gmra.mrb[22].mxu0 %vm76_vm3, %v11393_v55 }
  0x3a   :  { %7535 = vmatmul.mubr.msk.f32.gmra.mrb[22].mxu1 %vm76_vm3, %v11426_v58  ;;  %308 = vmatprep.mubr.f32.mxu0 %v18099_v3 }
  0x3b   :  { %549 = vmatprep.mubr.f32.mxu1 %v18099_v3 }
  0x3d   :  { %7503 = vmatmul.mubr.msk.f32.gmra.mrb[24].mxu0 %vm76_vm3, %v11404_v56 }
  0x3e   :  { %7536 = vmatmul.mubr.msk.f32.gmra.mrb[24].mxu1 %vm76_vm3, %v11437_v59  ;;  %314 = vmatprep.mubr.f32.mxu0 %v18099_v3 }
  0x3f   :  { %555 = vmatprep.mubr.f32.mxu1 %v18099_v3 }
  0x41   :  { %7504 = vmatmul.mubr.msk.f32.gmra.mrb[26].mxu0 %vm76_vm3, %v11415_v57 }
  0x42   :  { %7537 = vmatmul.mubr.msk.f32.gmra.mrb[26].mxu1 %vm76_vm3, %v11448_v60  ;;  %318 = vmatprep.mubr.f32.mxu0 %v18099_v3 }
  0x43   :  { %561 = vmatprep.mubr.f32.mxu1 %v18099_v3 }
  0x45   :  { %7505 = vmatmul.mubr.msk.f32.gmra.mrb[28].mxu0 %vm76_vm3, %v11426_v58 }
  0x46   :  { %7538 = vmatmul.mubr.msk.f32.gmra.mrb[28].mxu1 %vm76_vm3, %v11459_v61  ;;  %324 = vmatprep.mubr.f32.mxu0 %v18099_v3 }
  0x47   :  { %567 = vmatprep.mubr.f32.mxu1 %v18099_v3 }
  0x49   :  { %7506 = vmatmul.mubr.msk.f32.gmra.mrb[30].mxu0 %vm76_vm3, %v11437_v59 }
  0x4a   :  { %7539 = vmatmul.mubr.msk.f32.gmra.mrb[30].mxu1 %vm76_vm3, %v11470_v62  ;;  %330 = vmatprep.mubr.f32.mxu0 %v18099_v3 }
  0x4b   :  { %573 = vmatprep.mubr.f32.mxu1 %v18099_v3 }
  0x4d   :  { %7507 = vmatmul.mubr.msk.f32.gmra.mrb[32].mxu0 %vm76_vm3, %v11448_v60 }
  0x4e   :  { %7540 = vmatmul.mubr.msk.f32.gmra.mrb[32].mxu1 %vm76_vm3, %v11481_v63  ;;  %336 = vmatprep.mubr.f32.mxu0 %v18099_v3 }
  0x4f   :  { %579 = vmatprep.mubr.f32.mxu1 %v18099_v3 }
  0x51   :  { %7508 = vmatmul.mubr.msk.f32.gmra.mrb[34].mxu0 %vm76_vm3, %v11459_v61 }
  0x52   :  { %7541 = vmatmul.mubr.msk.f32.gmra.mrb[34].mxu1 %vm76_vm3, %v11492_v0  ;;  %342 = vmatprep.mubr.f32.mxu0 %v18099_v3 }
  0x53   :  { %583 = vmatprep.mubr.f32.mxu1 %v18099_v3 }
  0x55   :  { %7509 = vmatmul.mubr.msk.f32.gmra.mrb[36].mxu0 %vm76_vm3, %v11470_v62 }
  0x56   :  { %7542 = vmatmul.mubr.msk.f32.gmra.mrb[36].mxu1 %vm76_vm3, %v11503_v1  ;;  %348 = vmatprep.mubr.f32.mxu0 %v18099_v3 }
  0x57   :  { %589 = vmatprep.mubr.f32.mxu1 %v18099_v3 }
  0x59   :  { %7510 = vmatmul.mubr.msk.f32.gmra.mrb[38].mxu0 %vm76_vm3, %v11481_v63 }
  0x5a   :  { %7543 = vmatmul.mubr.msk.f32.gmra.mrb[38].mxu1 %vm76_vm3, %v11514_v2  ;;  %354 = vmatprep.mubr.f32.mxu0 %v18099_v3 }
  0x5b   :  { %595 = vmatprep.mubr.f32.mxu1 %v18099_v3 }
  0x5d   :  { %7511 = vmatmul.mubr.msk.f32.gmra.mrb[40].mxu0 %vm76_vm3, %v11492_v0 }
  0x5e   :  { %7544 = vmatmul.mubr.msk.f32.gmra.mrb[40].mxu1 %vm76_vm3, %v11525_v4  ;;  %358 = vmatprep.mubr.f32.mxu0 %v18099_v3 }
  0x5f   :  { %601 = vmatprep.mubr.f32.mxu1 %v18099_v3 }
  0x61   :  { %7512 = vmatmul.mubr.msk.f32.gmra.mrb[42].mxu0 %vm76_vm3, %v11503_v1 }
  0x62   :  { %7545 = vmatmul.mubr.msk.f32.gmra.mrb[42].mxu1 %vm76_vm3, %v11536_v5  ;;  %364 = vmatprep.mubr.f32.mxu0 %v18099_v3 }
  0x63   :  { %607 = vmatprep.mubr.f32.mxu1 %v18099_v3 }
  0x65   :  { %7513 = vmatmul.mubr.msk.f32.gmra.mrb[44].mxu0 %vm76_vm3, %v11514_v2 }
  0x66   :  { %7546 = vmatmul.mubr.msk.f32.gmra.mrb[44].mxu1 %vm76_vm3, %v11547_v6  ;;  %370 = vmatprep.mubr.f32.mxu0 %v18099_v3 }
  0x67   :  { %613 = vmatprep.mubr.f32.mxu1 %v18099_v3 }
  0x69   :  { %7514 = vmatmul.mubr.msk.f32.gmra.mrb[46].mxu0 %vm76_vm3, %v11525_v4 }
  0x6a   :  { %7547 = vmatmul.mubr.msk.f32.gmra.mrb[46].mxu1 %vm76_vm3, %v11558_v7  ;;  %376 = vmatprep.mubr.f32.mxu0 %v18099_v3 }
  0x6b   :  { %619 = vmatprep.mubr.f32.mxu1 %v18099_v3 }
  0x6d   :  { %7515 = vmatmul.mubr.msk.f32.gmra.mrb[48].mxu0 %vm76_vm3, %v11536_v5 }
  0x6e   :  { %7548 = vmatmul.mubr.msk.f32.gmra.mrb[48].mxu1 %vm76_vm3, %v11569_v8  ;;  %382 = vmatprep.mubr.f32.mxu0 %v18099_v3 }
  0x6f   :  { %942 = vmatprep.mubr.f32.mxu1 %v18099_v3 }
  0x71   :  { %7516 = vmatmul.mubr.msk.f32.gmra.mrb[50].mxu0 %vm76_vm3, %v11547_v6 }
  0x72   :  { %7597 = vmatmul.mubr.msk.f32.vlgmr.msra.gmra.mrb[50].mxu1 %vm76_vm3, %v11244_v26  ;;  %388 = vmatprep.mubr.f32.mxu0 %v18099_v3 }
  0x73   :  { %946 = vmatprep.mubr.f32.mxu1 %v18099_v3  ;;  %8852 = vmatpush1.bf16.msra.mxu1 %v8851_v13  ;;  %v7712_v13 = vld [vmem:[%s18089_s1 + $0x1d8] sm:$0xff] }
  0x74   :  { %8855 = vmatprep.subr.msk.bf16.mxu1 %vm11213_vm2, %v8853_v14  ;;  %v7716_v14 = vld [vmem:[%s18089_s1 + $0x1f8] sm:$0xf] }
  0x75   :  { %7517 = vmatmul.mubr.msk.f32.gmra.mrb[52].mxu0 %vm76_vm3, %v11558_v7  ;;  %v8873_v17 = vpack.c.bf16 %v7716_v14, %v7712_v13 }
  0x76   :  { %7598 = vmatmul.mubr.msk.f32.gmra.mrb[36].mxu1 %vm76_vm3, %v11272_v34  ;;  %394 = vmatprep.mubr.f32.mxu0 %v18099_v3 }
  0x77   :  { %952 = vmatprep.mubr.f32.mxu1 %v18099_v3  ;;  %8858 = vmatpush1.bf16.msk.msra.mxu1 %vm11213_vm2, %v8856_v20  ;;  %v7780_v20 = vld [vmem:[%s18089_s1 + $0x218] sm:$0xff] }
  0x78   :  { %8870 = vmatprep.subr.bf16.mxu1 %v8869_v21  ;;  %v7784_v21 = vld [vmem:[%s18089_s1 + $0x238] sm:$0xff] }
  0x79   :  { %7518 = vmatmul.mubr.msk.f32.gmra.mrb[54].mxu0 %vm76_vm3, %v11569_v8  ;;  %v8889_v23 = vpack.c.bf16 %v7784_v21, %v7780_v20  ;;  %v7783_v20 = vld [vmem:[%s18089_s1 + $0x230] sm:$0xff] }
  0x7a   :  { %7599 = vmatmul.mubr.msk.f32.gmra.mrb[38].mxu1 %vm76_vm3, %v11303_v41  ;;  %463 = vmatprep.mubr.f32.mxu0 %v18099_v3 }
  0x7b   :  { %958 = vmatprep.mubr.f32.mxu1 %v18099_v3 }
  0x7d   :  { %7521 = vmatmul.mubr.msk.f32.vlgmr.msra.gmra.mrb[56].mxu0 %vm76_vm3, %v11244_v26 }
  0x7e   :  { %7600 = vmatmul.mubr.msk.f32.gmra.mrb[40].mxu1 %vm76_vm3, %v11257_v29  ;;  %8822 = vmatpush1.bf16.msra.mxu0 %v8821_v27  ;;  %v7701_v27 = vld [vmem:[%s18089_s1 + $0x180] sm:$0xff] }
  0x7f   :  { %469 = vmatprep.mubr.f32.mxu0 %v18099_v3  ;;  %964 = vmatprep.mubr.f32.mxu1 %v18099_v3 }
  0x80   :  { %8825 = vmatprep.subr.msk.bf16.mxu0 %vm11213_vm2, %v8823_v28  ;;  %v7705_v28 = vld [vmem:[%s18089_s1 + $0x1a0] sm:$0xff] }
  0x81   :  { %7522 = vmatmul.mubr.msk.f32.gmra.mrb[58].mxu0 %vm76_vm3, %v11272_v34  ;;  %v8861_v32 = vpack.c.bf16 %v7705_v28, %v7701_v27  ;;  %v7787_v28 = vld [vmem:[%s18089_s1 + $0x250] sm:$0xff] }
  0x82   :  { %7601 = vmatmul.mubr.msk.f32.gmra.mrb[42].mxu1 %vm76_vm3, %v11279_v35  ;;  %475 = vmatprep.mubr.f32.mxu0 %v18099_v3 }
  0x83   :  { %8828 = vmatpush1.bf16.msk.msra.mxu0 %vm11213_vm2, %v8826_v36  ;;  %970 = vmatprep.mubr.f32.mxu1 %v18099_v3  ;;  %v8863_v36 = vpack.c.bf16 %v7714_v31, %v7710_v30  ;;  %v7791_v30 = vld [vmem:[%s18089_s1 + $0x270] sm:$0xf] }
  0x84   :  { %8840 = vmatprep.subr.bf16.mxu0 %v8839_v37  ;;  %v7709_v37 = vld [vmem:[%s18089_s1 + $0x1c0] sm:$0xff] }
  0x85   :  { %7523 = vmatmul.mubr.msk.f32.gmra.mrb[60].mxu0 %vm76_vm3, %v11303_v41 }
  0x86   :  { %7602 = vmatmul.mubr.msk.f32.gmra.mrb[44].mxu1 %vm76_vm3, %v11309_v43  ;;  %717 = vmatprep.mubr.f32.mxu0 %v18099_v3 }
  0x87   :  { %976 = vmatprep.mubr.f32.mxu1 %v18099_v3 }
  0x89   :  { %7567 = vmatmul.mubr.msk.f32.vlgmr.msra.gmra.mrb[62].mxu0 %vm76_vm3, %v11244_v26 }
  0x8a   :  { %7603 = vmatmul.mubr.msk.f32.gmra.mrb[46].mxu1 %vm76_vm3, %v11338_v50  ;;  %8842 = vmatpush1.bf16.msra.mxu0 %v8841_v44  ;;  %v8866_v44 = vpack.c.bf16 %v7713_v38, %v7709_v37 }
  0x8b   :  { %721 = vmatprep.mubr.f32.mxu0 %v18099_v3  ;;  %982 = vmatprep.mubr.f32.mxu1 %v18099_v3 }
  0x8c   :  { %8845 = vmatprep.subr.msk.bf16.mxu0 %vm11213_vm2, %v8843_v45  ;;  %v8879_v45 = vpack.c.bf16 %v7782_v42, %v7778_v40 }
  0x8d   :  { %7568 = vmatmul.mubr.msk.f32.gmra.mrb[42].mxu0 %vm76_vm3, %v11272_v34 }
  0x8e   :  { %7604 = vmatmul.mubr.msk.f32.gmra.mrb[52].mxu1 %vm76_vm3, %v11349_v51  ;;  %727 = vmatprep.mubr.f32.mxu0 %v18099_v3 }
  0x8f   :  { %988 = vmatprep.mubr.f32.mxu1 %v18099_v3  ;;  %8848 = vmatpush1.bf16.msk.msra.mxu0 %vm11213_vm2, %v8846_v9 }
  0x90   :  { %8860 = vmatprep.subr.bf16.mxu0 %v8859_v10 }
  0x91   :  { %7569 = vmatmul.mubr.msk.f32.gmra.mrb[44].mxu0 %vm76_vm3, %v11303_v41 }
  0x92   :  { %7605 = vmatmul.mubr.msk.f32.gmra.mrb[54].mxu1 %vm76_vm3, %v11360_v52  ;;  %733 = vmatprep.mubr.f32.mxu0 %v18099_v3 }
  0x93   :  { %994 = vmatprep.mubr.f32.mxu1 %v18099_v3 }
  0x95   :  { %7570 = vmatmul.mubr.msk.f32.gmra.mrb[46].mxu0 %vm76_vm3, %v11257_v29 }
  0x96   :  { %7606 = vmatmul.mubr.msk.f32.gmra.mrb[56].mxu1 %vm76_vm3, %v11371_v53  ;;  %739 = vmatprep.mubr.f32.mxu0 %v18099_v3 }
  0x97   :  { %1000 = vmatprep.mubr.f32.mxu1 %v18099_v3 }
  0x99   :  { %7571 = vmatmul.mubr.msk.f32.gmra.mrb[48].mxu0 %vm76_vm3, %v11279_v35 }
  0x9a   :  { %7607 = vmatmul.mubr.msk.f32.gmra.mrb[0].mxu1 %vm76_vm3, %v11382_v54  ;;  %745 = vmatprep.mubr.f32.mxu0 %v18099_v3 }
  0x9b   :  { %1006 = vmatprep.mubr.f32.mxu1 %v18099_v3 }
  0x9d   :  { %7572 = vmatmul.mubr.msk.f32.gmra.mrb[50].mxu0 %vm76_vm3, %v11309_v43 }
  0x9e   :  { %7608 = vmatmul.mubr.msk.f32.gmra.mrb[2].mxu1 %vm76_vm3, %v11393_v55  ;;  %751 = vmatprep.mubr.f32.mxu0 %v18099_v3 }
  0x9f   :  { %1012 = vmatprep.mubr.f32.mxu1 %v18099_v3 }
  0xa1   :  { %7573 = vmatmul.mubr.msk.f32.gmra.mrb[52].mxu0 %vm76_vm3, %v11338_v50 }
  0xa2   :  { %7609 = vmatmul.mubr.msk.f32.gmra.mrb[4].mxu1 %vm76_vm3, %v11404_v56  ;;  %757 = vmatprep.mubr.f32.mxu0 %v18099_v3 }
  0xa3   :  { %1018 = vmatprep.mubr.f32.mxu1 %v18099_v3 }
  0xa5   :  { %7574 = vmatmul.mubr.msk.f32.gmra.mrb[0].mxu0 %vm76_vm3, %v11349_v51 }
  0xa6   :  { %7610 = vmatmul.mubr.msk.f32.gmra.mrb[58].mxu1 %vm76_vm3, %v11415_v57  ;;  %763 = vmatprep.mubr.f32.mxu0 %v18099_v3 }
  0xa7   :  { %1022 = vmatprep.mubr.f32.mxu1 %v18099_v3 }
  0xa9   :  { %7575 = vmatmul.mubr.msk.f32.gmra.mrb[2].mxu0 %vm76_vm3, %v11360_v52 }
  0xaa   :  { %7611 = vmatmul.mubr.msk.f32.gmra.mrb[8].mxu1 %vm76_vm3, %v11426_v58  ;;  %769 = vmatprep.mubr.f32.mxu0 %v18099_v3 }
  0xab   :  { %1028 = vmatprep.mubr.f32.mxu1 %v18099_v3 }
  0xad   :  { %7576 = vmatmul.mubr.msk.f32.gmra.mrb[4].mxu0 %vm76_vm3, %v11371_v53 }
  0xae   :  { %7612 = vmatmul.mubr.msk.f32.gmra.mrb[10].mxu1 %vm76_vm3, %v11437_v59  ;;  %775 = vmatprep.mubr.f32.mxu0 %v18099_v3 }
  0xaf   :  { %1034 = vmatprep.mubr.f32.mxu1 %v18099_v3 }
  0xb1   :  { %7577 = vmatmul.mubr.msk.f32.gmra.mrb[6].mxu0 %vm76_vm3, %v11382_v54 }
  0xb2   :  { %7613 = vmatmul.mubr.msk.f32.gmra.mrb[12].mxu1 %vm76_vm3, %v11448_v60  ;;  %781 = vmatprep.mubr.f32.mxu0 %v18099_v3 }
  0xb3   :  { %1040 = vmatprep.mubr.f32.mxu1 %v18099_v3 }
  0xb5   :  { %7578 = vmatmul.mubr.msk.f32.gmra.mrb[8].mxu0 %vm76_vm3, %v11393_v55 }
  0xb6   :  { %7614 = vmatmul.mubr.msk.f32.gmra.mrb[14].mxu1 %vm76_vm3, %v11459_v61  ;;  %787 = vmatprep.mubr.f32.mxu0 %v18099_v3 }
  0xb7   :  { %1046 = vmatprep.mubr.f32.mxu1 %v18099_v3 }
  0xb9   :  { %7579 = vmatmul.mubr.msk.f32.gmra.mrb[10].mxu0 %vm76_vm3, %v11404_v56 }
  0xba   :  { %7615 = vmatmul.mubr.msk.f32.gmra.mrb[16].mxu1 %vm76_vm3, %v11470_v62  ;;  %793 = vmatprep.mubr.f32.mxu0 %v18099_v3 }
  0xbb   :  { %1052 = vmatprep.mubr.f32.mxu1 %v18099_v3 }
  0xbd   :  { %7580 = vmatmul.mubr.msk.f32.gmra.mrb[64].mxu0 %vm76_vm3, %v11415_v57 }
  0xbe   :  { %7616 = vmatmul.mubr.msk.f32.gmra.mrb[18].mxu1 %vm76_vm3, %v11481_v63  ;;  %797 = vmatprep.mubr.f32.mxu0 %v18099_v3 }
  0xbf   :  { %1058 = vmatprep.mubr.f32.mxu1 %v18099_v3 }
  0xc1   :  { %7581 = vmatmul.mubr.msk.f32.gmra.mrb[14].mxu0 %vm76_vm3, %v11426_v58 }
  0xc2   :  { %7617 = vmatmul.mubr.msk.f32.gmra.mrb[60].mxu1 %vm76_vm3, %v11492_v0  ;;  %803 = vmatprep.mubr.f32.mxu0 %v18099_v3 }
  0xc3   :  { %1062 = vmatprep.mubr.f32.mxu1 %v18099_v3 }
  0xc5   :  { %7582 = vmatmul.mubr.msk.f32.gmra.mrb[16].mxu0 %vm76_vm3, %v11437_v59 }
  0xc6   :  { %7618 = vmatmul.mubr.msk.f32.gmra.mrb[22].mxu1 %vm76_vm3, %v11503_v1  ;;  %809 = vmatprep.mubr.f32.mxu0 %v18099_v3 }
  0xc7   :  { %1068 = vmatprep.mubr.f32.mxu1 %v18099_v3 }
  0xc9   :  { %7583 = vmatmul.mubr.msk.f32.gmra.mrb[18].mxu0 %vm76_vm3, %v11448_v60 }
  0xca   :  { %7619 = vmatmul.mubr.msk.f32.gmra.mrb[24].mxu1 %vm76_vm3, %v11514_v2  ;;  %815 = vmatprep.mubr.f32.mxu0 %v18099_v3 }
  0xcb   :  { %1074 = vmatprep.mubr.f32.mxu1 %v18099_v3 }
  0xcd   :  { %7584 = vmatmul.mubr.msk.f32.gmra.mrb[20].mxu0 %vm76_vm3, %v11459_v61 }
  0xce   :  { %7620 = vmatmul.mubr.msk.f32.gmra.mrb[26].mxu1 %vm76_vm3, %v11525_v4  ;;  %821 = vmatprep.mubr.f32.mxu0 %v18099_v3 }
  0xcf   :  { %1080 = vmatprep.mubr.f32.mxu1 %v18099_v3 }
  0xd1   :  { %7585 = vmatmul.mubr.msk.f32.gmra.mrb[22].mxu0 %vm76_vm3, %v11470_v62 }
  0xd2   :  { %7621 = vmatmul.mubr.msk.f32.gmra.mrb[28].mxu1 %vm76_vm3, %v11536_v5  ;;  %827 = vmatprep.mubr.f32.mxu0 %v18099_v3 }
  0xd3   :  { %1086 = vmatprep.mubr.f32.mxu1 %v18099_v3 }
  0xd5   :  { %7586 = vmatmul.mubr.msk.f32.gmra.mrb[24].mxu0 %vm76_vm3, %v11481_v63 }
  0xd6   :  { %7622 = vmatmul.mubr.msk.f32.gmra.mrb[30].mxu1 %vm76_vm3, %v11547_v6  ;;  %833 = vmatprep.mubr.f32.mxu0 %v18099_v3 }
  0xd7   :  { %1092 = vmatprep.mubr.f32.mxu1 %v18099_v3 }
  0xd9   :  { %7587 = vmatmul.mubr.msk.f32.gmra.mrb[66].mxu0 %vm76_vm3, %v11492_v0 }
  0xda   :  { %7623 = vmatmul.mubr.msk.f32.gmra.mrb[32].mxu1 %vm76_vm3, %v11558_v7  ;;  %837 = vmatprep.mubr.f32.mxu0 %v18099_v3 }
  0xdb   :  { %1098 = vmatprep.mubr.f32.mxu1 %v18099_v3 }
  0xdd   :  { %7588 = vmatmul.mubr.msk.f32.gmra.mrb[28].mxu0 %vm76_vm3, %v11503_v1 }
  0xde   :  { %7624 = vmatmul.mubr.msk.f32.gmra.mrb[62].mxu1 %vm76_vm3, %v11569_v8  ;;  %843 = vmatprep.mubr.f32.mxu0 %v18099_v3 }
  0xdf   :  { %1421 = vmatprep.mubr.f32.mxu1 %v18099_v3 }
  0xe1   :  { %7589 = vmatmul.mubr.msk.f32.gmra.mrb[30].mxu0 %vm76_vm3, %v11514_v2 }
  0xe2   :  { %7673 = vmatmul.mubr.msk.f32.vlgmr.msra.gmra.mrb[64].mxu1 %vm76_vm3, %v11244_v26  ;;  %849 = vmatprep.mubr.f32.mxu0 %v18099_v3 }
  0xe3   :  { %1425 = vmatprep.mubr.f32.mxu1 %v18099_v3  ;;  %8872 = vmatpush1.bf16.msra.mxu1 %v8871_v16 }
  0xe4   :  { %8875 = vmatprep.subr.msk.bf16.mxu1 %vm11213_vm2, %v8873_v17 }
  0xe5   :  { %7590 = vmatmul.mubr.msk.f32.gmra.mrb[32].mxu0 %vm76_vm3, %v11525_v4 }
  0xe6   :  { %7674 = vmatmul.mubr.msk.f32.gmra.mrb[22].mxu1 %vm76_vm3, %v11272_v34  ;;  %855 = vmatprep.mubr.f32.mxu0 %v18099_v3 }
  0xe7   :  { %1431 = vmatprep.mubr.f32.mxu1 %v18099_v3  ;;  %8878 = vmatpush1.bf16.msk.msra.mxu1 %vm11213_vm2, %v8876_v22  ;;  %v7788_v22 = vld [vmem:[%s18089_s1 + $0x258] sm:$0xff] }
  0xe8   :  { %8890 = vmatprep.subr.bf16.mxu1 %v8889_v23  ;;  %v7792_v23 = vld [vmem:[%s18089_s1 + $0x278] sm:$0xf] }
  0xe9   :  { %7591 = vmatmul.mubr.msk.f32.gmra.mrb[34].mxu0 %vm76_vm3, %v11536_v5  ;;  %v8893_v27 = vpack.c.bf16 %v7792_v23, %v7788_v22  ;;  %v11115_v23 = vld [vmem:[%s18090_s0 + $0x90] sm:$0xff] }
  0xea   :  { %7675 = vmatmul.mubr.msk.f32.gmra.mrb[24].mxu1 %vm76_vm3, %v11303_v41  ;;  %861 = vmatprep.mubr.f32.mxu0 %v18099_v3 }
  0xeb   :  { %1437 = vmatprep.mubr.f32.mxu1 %v18099_v3 }
  0xed   :  { %7592 = vmatmul.mubr.msk.f32.gmra.mrb[36].mxu0 %vm76_vm3, %v11547_v6  ;;  %v501_v24 = vpop.f32.mrb[6].mxu1 }
  0xee   :  { %7676 = vmatmul.mubr.msk.f32.gmra.mrb[26].mxu1 %vm76_vm3, %v11257_v29  ;;  %867 = vmatprep.mubr.f32.mxu0 %v18099_v3  ;;  %v502_v25 = vpop.f32.mrb[7].mxu1  ;;  %v8891_v24 = vpack.c.bf16 %v7783_v20, %v7779_v19  ;;  %v11113_v19 = vld [vmem:[%s18090_s0 + $0x80] sm:$0xff] }
  0xef   :  { %1443 = vmatprep.mubr.f32.mxu1 %v18099_v3 }
  0xf1   :  { %7593 = vmatmul.mubr.msk.f32.gmra.mrb[38].mxu0 %vm76_vm3, %v11558_v7 }
  0xf2   :  { %7677 = vmatmul.mubr.msk.f32.gmra.mrb[28].mxu1 %vm76_vm3, %v11279_v35  ;;  %873 = vmatprep.mubr.f32.mxu0 %v18099_v3 }
  0xf3   :  { %1449 = vmatprep.mubr.f32.mxu1 %v18099_v3 }
  0xf5   :  { %7594 = vmatmul.mubr.msk.f32.gmra.mrb[68].mxu0 %vm76_vm3, %v11569_v8 }
  0xf6   :  { %7678 = vmatmul.mubr.msk.f32.gmra.mrb[30].mxu1 %vm76_vm3, %v11309_v43  ;;  %1196 = vmatprep.mubr.f32.mxu0 %v18099_v3 }
  0xf7   :  { %1455 = vmatprep.mubr.f32.mxu1 %v18099_v3 }
  0xf8   :  { %v276_v33 = vpop.f32.mrb[12].mxu0 }
  0xf9   :  { %v277_v39 = vpop.f32.mrb[13].mxu0  ;;  %7643 = vmatmul.mubr.msk.f32.vlgmr.msra.gmra.mrb[70].mxu0 %vm76_vm3, %v11244_v26 }
  0xfa   :  { %7679 = vmatmul.mubr.msk.f32.gmra.mrb[32].mxu1 %vm76_vm3, %v11338_v50  ;;  %8862 = vmatpush1.bf16.msra.mxu0 %v8861_v32  ;;  %v8896_v32 = vpack.c.bf16 %v7791_v30, %v7787_v28  ;;  %v7786_v39 = vld [vmem:[%s18089_s1 + $0x248] sm:$0xff]  ;;  %v11119_v30 = vld [vmem:[%s18090_s0 + $0xb0] sm:$0xff] }
  0xfb   :  { %1200 = vmatprep.mubr.f32.mxu0 %v18099_v3  ;;  %1461 = vmatprep.mubr.f32.mxu1 %v18099_v3  ;;  %v11118_v28 = vld [vmem:[%s18090_s0 + $0xa8] sm:$0xff] }
  0xfc   :  { %8865 = vmatprep.subr.msk.bf16.mxu0 %vm11213_vm2, %v8863_v36 }
  0xfd   :  { %7644 = vmatmul.mubr.msk.f32.gmra.mrb[28].mxu0 %vm76_vm3, %v11272_v34 }
  0xfe   :  { %7680 = vmatmul.mubr.msk.f32.gmra.mrb[66].mxu1 %vm76_vm3, %v11349_v51  ;;  %1206 = vmatprep.mubr.f32.mxu0 %v18099_v3 }
  0xff   :  { %1465 = vmatprep.mubr.f32.mxu1 %v18099_v3  ;;  %8868 = vmatpush1.bf16.msk.msra.mxu0 %vm11213_vm2, %v8866_v44  ;;  %v7785_v44 = vld [vmem:[%s18089_s1 + $0x240] sm:$0xff] }
 0x100   :  { %8880 = vmatprep.subr.bf16.mxu0 %v8879_v45  ;;  %v7789_v45 = vld [vmem:[%s18089_s1 + $0x260] sm:$0xf] }
 0x101   :  { %7645 = vmatmul.mubr.msk.f32.gmra.mrb[30].mxu0 %vm76_vm3, %v11303_v41 }
 0x102   :  { %7681 = vmatmul.mubr.msk.f32.gmra.mrb[36].mxu1 %vm76_vm3, %v11360_v52  ;;  %1212 = vmatprep.mubr.f32.mxu0 %v18099_v3 }
 0x103   :  { %1471 = vmatprep.mubr.f32.mxu1 %v18099_v3 }
 0x105   :  { %7646 = vmatmul.mubr.msk.f32.gmra.mrb[32].mxu0 %vm76_vm3, %v11257_v29 }
 0x106   :  { %7682 = vmatmul.mubr.msk.f32.gmra.mrb[38].mxu1 %vm76_vm3, %v11371_v53  ;;  %1218 = vmatprep.mubr.f32.mxu0 %v18099_v3 }
 0x107   :  { %1477 = vmatprep.mubr.f32.mxu1 %v18099_v3 }
 0x109   :  { %7647 = vmatmul.mubr.msk.f32.gmra.mrb[34].mxu0 %vm76_vm3, %v11279_v35  ;;  %v541_v46 = vpop.f32.mrb[20].mxu1 }
 0x10a   :  { %7683 = vmatmul.mubr.msk.f32.gmra.mrb[40].mxu1 %vm76_vm3, %v11382_v54  ;;  %1224 = vmatprep.mubr.f32.mxu0 %v18099_v3  ;;  %v542_v47 = vpop.f32.mrb[21].mxu1  ;;  %v12144_v46 = vld [vmem:[%s18090_s0] sm:$0xff] }
 0x10b   :  { %1483 = vmatprep.mubr.f32.mxu1 %v18099_v3  ;;  %v12157_v47 = vld [vmem:[%s18090_s0 + $0x8] sm:$0xff] }
 0x10d   :  { %7648 = vmatmul.mubr.msk.f32.gmra.mrb[36].mxu0 %vm76_vm3, %v11309_v43 }
 0x10e   :  { %7684 = vmatmul.mubr.msk.f32.gmra.mrb[42].mxu1 %vm76_vm3, %v11393_v55  ;;  %1230 = vmatprep.mubr.f32.mxu0 %v18099_v3 }
 0x10f   :  { %1489 = vmatprep.mubr.f32.mxu1 %v18099_v3 }
 0x111   :  { %7649 = vmatmul.mubr.msk.f32.gmra.mrb[38].mxu0 %vm76_vm3, %v11338_v50 }
 0x112   :  { %7685 = vmatmul.mubr.msk.f32.gmra.mrb[44].mxu1 %vm76_vm3, %v11404_v56  ;;  %1236 = vmatprep.mubr.f32.mxu0 %v18099_v3 }
 0x113   :  { %1495 = vmatprep.mubr.f32.mxu1 %v18099_v3 }
 0x114   :  { %v316_v48 = vpop.f32.mrb[26].mxu0 }
 0x115   :  { %v317_v49 = vpop.f32.mrb[27].mxu0  ;;  %7650 = vmatmul.mubr.msk.f32.gmra.mrb[72].mxu0 %vm76_vm3, %v11349_v51 }
 0x116   :  { %7686 = vmatmul.mubr.msk.f32.gmra.mrb[46].mxu1 %vm76_vm3, %v11415_v57  ;;  %1240 = vmatprep.mubr.f32.mxu0 %v18099_v3  ;;  %v12203_v49 = vld [vmem:[%s18090_s0 + $0x28] sm:$0xff] }
 0x117   :  { %1501 = vmatprep.mubr.f32.mxu1 %v18099_v3 }
 0x119   :  { %7651 = vmatmul.mubr.msk.f32.gmra.mrb[42].mxu0 %vm76_vm3, %v11360_v52 }
 0x11a   :  { %7687 = vmatmul.mubr.msk.f32.gmra.mrb[52].mxu1 %vm76_vm3, %v11426_v58  ;;  %1246 = vmatprep.mubr.f32.mxu0 %v18099_v3 }
 0x11b   :  { %1507 = vmatprep.mubr.f32.mxu1 %v18099_v3 }
 0x11d   :  { %7652 = vmatmul.mubr.msk.f32.gmra.mrb[44].mxu0 %vm76_vm3, %v11371_v53 }
 0x11e   :  { %7688 = vmatmul.mubr.msk.f32.gmra.mrb[54].mxu1 %vm76_vm3, %v11437_v59  ;;  %1252 = vmatprep.mubr.f32.mxu0 %v18099_v3 }
 0x11f   :  { %1513 = vmatprep.mubr.f32.mxu1 %v18099_v3 }
 0x121   :  { %7653 = vmatmul.mubr.msk.f32.gmra.mrb[46].mxu0 %vm76_vm3, %v11382_v54 }
 0x122   :  { %7689 = vmatmul.mubr.msk.f32.gmra.mrb[56].mxu1 %vm76_vm3, %v11448_v60  ;;  %1258 = vmatprep.mubr.f32.mxu0 %v18099_v3 }
 0x123   :  { %1519 = vmatprep.mubr.f32.mxu1 %v18099_v3 }
 0x125   :  { %7654 = vmatmul.mubr.msk.f32.gmra.mrb[48].mxu0 %vm76_vm3, %v11393_v55  ;;  %v581_v9 = vpop.f32.mrb[34].mxu1 }
 0x126   :  { %7690 = vmatmul.mubr.msk.f32.gmra.mrb[0].mxu1 %vm76_vm3, %v11459_v61  ;;  %1264 = vmatprep.mubr.f32.mxu0 %v18099_v3  ;;  %v582_v10 = vpop.f32.mrb[35].mxu1  ;;  %v12225_v9 = vld [vmem:[%s18090_s0 + $0x38] sm:$0xff] }
 0x127   :  { %1525 = vmatprep.mubr.f32.mxu1 %v18099_v3 }
 0x129   :  { %7655 = vmatmul.mubr.msk.f32.gmra.mrb[50].mxu0 %vm76_vm3, %v11404_v56 }
 0x12a   :  { %7691 = vmatmul.mubr.msk.f32.gmra.mrb[2].mxu1 %vm76_vm3, %v11470_v62  ;;  %1270 = vmatprep.mubr.f32.mxu0 %v18099_v3 }
 0x12b   :  { %1531 = vmatprep.mubr.f32.mxu1 %v18099_v3 }
 0x12d   :  { %7656 = vmatmul.mubr.msk.f32.gmra.mrb[52].mxu0 %vm76_vm3, %v11415_v57 }
 0x12e   :  { %7692 = vmatmul.mubr.msk.f32.gmra.mrb[4].mxu1 %vm76_vm3, %v11481_v63  ;;  %1276 = vmatprep.mubr.f32.mxu0 %v18099_v3 }
 0x12f   :  { %1537 = vmatprep.mubr.f32.mxu1 %v18099_v3 }
 0x130   :  { %v356_v11 = vpop.f32.mrb[40].mxu0 }
 0x131   :  { %v357_v12 = vpop.f32.mrb[41].mxu0  ;;  %7657 = vmatmul.mubr.msk.f32.gmra.mrb[0].mxu0 %vm76_vm3, %v11426_v58 }
 0x132   :  { %7693 = vmatmul.mubr.msk.f32.gmra.mrb[68].mxu1 %vm76_vm3, %v11492_v0  ;;  %1282 = vmatprep.mubr.f32.mxu0 %v18099_v3  ;;  %v12253_v12 = vld [vmem:[%s18090_s0 + $0x50] sm:$0xff] }
 0x133   :  { %1541 = vmatprep.mubr.f32.mxu1 %v18099_v3 }
 0x135   :  { %7658 = vmatmul.mubr.msk.f32.gmra.mrb[2].mxu0 %vm76_vm3, %v11437_v59 }
 0x136   :  { %7694 = vmatmul.mubr.msk.f32.gmra.mrb[8].mxu1 %vm76_vm3, %v11503_v1  ;;  %1288 = vmatprep.mubr.f32.mxu0 %v18099_v3 }
 0x137   :  { %1547 = vmatprep.mubr.f32.mxu1 %v18099_v3 }
 0x139   :  { %7659 = vmatmul.mubr.msk.f32.gmra.mrb[4].mxu0 %vm76_vm3, %v11448_v60 }
 0x13a   :  { %7695 = vmatmul.mubr.msk.f32.gmra.mrb[10].mxu1 %vm76_vm3, %v11514_v2  ;;  %1294 = vmatprep.mubr.f32.mxu0 %v18099_v3 }
 0x13b   :  { %1553 = vmatprep.mubr.f32.mxu1 %v18099_v3 }
 0x13d   :  { %7660 = vmatmul.mubr.msk.f32.gmra.mrb[6].mxu0 %vm76_vm3, %v11459_v61 }
 0x13e   :  { %7696 = vmatmul.mubr.msk.f32.gmra.mrb[12].mxu1 %vm76_vm3, %v11525_v4  ;;  %1300 = vmatprep.mubr.f32.mxu0 %v18099_v3 }
 0x13f   :  { %1559 = vmatprep.mubr.f32.mxu1 %v18099_v3 }
 0x141   :  { %7661 = vmatmul.mubr.msk.f32.gmra.mrb[8].mxu0 %vm76_vm3, %v11470_v62  ;;  %v621_v13 = vpop.f32.mrb[48].mxu1 }
 0x142   :  { %7697 = vmatmul.mubr.msk.f32.gmra.mrb[14].mxu1 %vm76_vm3, %v11536_v5  ;;  %1306 = vmatprep.mubr.f32.mxu0 %v18099_v3  ;;  %v622_v14 = vpop.f32.mrb[49].mxu1 }
 0x143   :  { %1565 = vmatprep.mubr.f32.mxu1 %v18099_v3  ;;  %v12270_v14 = vld [vmem:[%s18090_s0 + $0x60] sm:$0xff] }
 0x145   :  { %7662 = vmatmul.mubr.msk.f32.gmra.mrb[10].mxu0 %vm76_vm3, %v11481_v63  ;;  %v944_v16 = vpop.f32.mrb[50].mxu1 }
 0x146   :  { %7698 = vmatmul.mubr.msk.f32.gmra.mrb[16].mxu1 %vm76_vm3, %v11547_v6  ;;  %1312 = vmatprep.mubr.f32.mxu0 %v18099_v3  ;;  %v945_v17 = vpop.f32.mrb[51].mxu1  ;;  %v11110_v16 = vld [vmem:[%s18090_s0 + $0x68] sm:$0xff] }
 0x147   :  { %1571 = vmatprep.mubr.f32.mxu1 %v18099_v3  ;;  %v11111_v17 = vld [vmem:[%s18090_s0 + $0x70] sm:$0xff] }
 0x149   :  { %7663 = vmatmul.mubr.msk.f32.gmra.mrb[74].mxu0 %vm76_vm3, %v11492_v0 }
 0x14a   :  { %7699 = vmatmul.mubr.msk.f32.gmra.mrb[18].mxu1 %vm76_vm3, %v11558_v7  ;;  %1316 = vmatprep.mubr.f32.mxu0 %v18099_v3 }
 0x14b   :  { %1577 = vmatprep.mubr.f32.mxu1 %v18099_v3 }
 0x14c   :  { %v396_v18 = vpop.f32.mrb[54].mxu0 }
 0x14d   :  { %v397_v21 = vpop.f32.mrb[55].mxu0  ;;  %7664 = vmatmul.mubr.msk.f32.gmra.mrb[14].mxu0 %vm76_vm3, %v11503_v1  ;;  %v11112_v18 = vld [vmem:[%s18090_s0 + $0x78] sm:$0xff] }
 0x14e   :  { %7700 = vmatmul.mubr.msk.f32.gmra.mrb[70].mxu1 %vm76_vm3, %v11569_v8  ;;  %1322 = vmatprep.mubr.f32.mxu0 %v18099_v3  ;;  %v11114_v21 = vld [vmem:[%s18090_s0 + $0x88] sm:$0xff] }
 0x14f   :  { %1900 = vmatprep.mubr.f32.mxu1 %v18099_v3 }
 0x150   :  { %v12065_v25 = vpop.f32.mrb[56].mxu0 }
 0x151   :  { %v12073_v31 = vpop.f32.mrb[57].mxu0  ;;  %7665 = vmatmul.mubr.msk.f32.gmra.mrb[16].mxu0 %vm76_vm3, %v11514_v2 }
 0x152   :  { %7749 = vmatmul.mubr.msk.f32.vlgmr.msra.gmra.mrb[72].mxu1 %vm76_vm3, %v11244_v26  ;;  %1328 = vmatprep.mubr.f32.mxu0 %v18099_v3 }
 0x153   :  { %1904 = vmatprep.mubr.f32.mxu1 %v18099_v3  ;;  %8892 = vmatpush1.bf16.msra.mxu1 %v8891_v24  ;;  %v11116_v24 = vld [vmem:[%s18090_s0 + $0x98] sm:$0xff] }
 0x154   :  { %v12081_v33 = vpop.f32.mrb[58].mxu0  ;;  %8895 = vmatprep.subr.msk.bf16.mxu1 %vm11213_vm2, %v8893_v27  ;;  %v11117_v27 = vld [vmem:[%s18090_s0 + $0xa0] sm:$0xff] }
 0x155   :  { %v12085_v36 = vpop.f32.mrb[59].mxu0  ;;  %7666 = vmatmul.mubr.msk.f32.gmra.mrb[18].mxu0 %vm76_vm3, %v11525_v4 }
 0x156   :  { %7750 = vmatmul.mubr.msk.f32.gmra.mrb[8].mxu1 %vm76_vm3, %v11272_v34  ;;  %1334 = vmatprep.mubr.f32.mxu0 %v18099_v3 }
 0x157   :  { %1910 = vmatprep.mubr.f32.mxu1 %v18099_v3  ;;  %8898 = vmatpush1.bf16.msk.msra.mxu1 %vm11213_vm2, %v8896_v32 }
 0x158   :  { %v12095_v26 = vpop.f32.mrb[60].mxu0 }
 0x159   :  { %v12097_v37 = vpop.f32.mrb[61].mxu0  ;;  %7667 = vmatmul.mubr.msk.f32.gmra.mrb[20].mxu0 %vm76_vm3, %v11536_v5 }
 0x15a   :  { %7751 = vmatmul.mubr.msk.f32.gmra.mrb[10].mxu1 %vm76_vm3, %v11303_v41  ;;  %1340 = vmatprep.mubr.f32.mxu0 %v18099_v3  ;;  %v7777_v41 = vld [vmem:[%s18089_s1 + $0x200] sm:$0xff] }
 0x15b   :  { %1916 = vmatprep.mubr.f32.mxu1 %v18099_v3 }
 0x15c   :  { %v719_v34 = vpop.f32.mrb[62].mxu0 }
 0x15d   :  { %v720_v38 = vpop.f32.mrb[63].mxu0  ;;  %7668 = vmatmul.mubr.msk.f32.gmra.mrb[22].mxu0 %vm76_vm3, %v11547_v6 }
 0x15e   :  { %7752 = vmatmul.mubr.msk.f32.gmra.mrb[12].mxu1 %vm76_vm3, %v11257_v29  ;;  %1346 = vmatprep.mubr.f32.mxu0 %v18099_v3  ;;  %v7781_v29 = vld [vmem:[%s18089_s1 + $0x220] sm:$0xff]  ;;  %v11120_v38 = vld [vmem:[%s18090_s0 + $0xb8] sm:$0xff] }
 0x15f   :  { %1922 = vmatprep.mubr.f32.mxu1 %v18099_v3  ;;  %v8881_v40 = vpack.c.bf16 %v7781_v29, %v7777_v41  ;;  %v11121_v29 = vld [vmem:[%s18090_s0 + $0xc0] sm:$0xff] }
 0x161   :  { %7669 = vmatmul.mubr.msk.f32.gmra.mrb[24].mxu0 %vm76_vm3, %v11558_v7 }
 0x162   :  { %7753 = vmatmul.mubr.msk.f32.gmra.mrb[14].mxu1 %vm76_vm3, %v11279_v35  ;;  %1352 = vmatprep.mubr.f32.mxu0 %v18099_v3  ;;  %v7790_v35 = vld [vmem:[%s18089_s1 + $0x268] sm:$0xf] }
 0x163   :  { %1928 = vmatprep.mubr.f32.mxu1 %v18099_v3  ;;  %v8883_v42 = vpack.c.bf16 %v7790_v35, %v7786_v39 }
 0x165   :  { %7670 = vmatmul.mubr.msk.f32.gmra.mrb[76].mxu0 %vm76_vm3, %v11569_v8 }
 0x166   :  { %7754 = vmatmul.mubr.msk.f32.gmra.mrb[16].mxu1 %vm76_vm3, %v11309_v43  ;;  %1675 = vmatprep.mubr.f32.mxu0 %v18099_v3  ;;  %v8886_v43 = vpack.c.bf16 %v7789_v45, %v7785_v44  ;;  %v11123_v44 = vld [vmem:[%s18090_s0 + $0xd0] sm:$0xff]  ;;  %v11124_v45 = vld [vmem:[%s18090_s0 + $0xd8] sm:$0xff] }
 0x167   :  { %1934 = vmatprep.mubr.f32.mxu1 %v18099_v3 }
 0x169   :  { %7719 = vmatmul.mubr.msk.f32.vlgmr.msra.gmra.mrb[78].mxu0 %vm76_vm3, %v12144_v46 }
 0x16a   :  { %7755 = vmatmul.mubr.msk.f32.gmra.mrb[18].mxu1 %vm76_vm3, %v11338_v50  ;;  %8882 = vmatpush1.bf16.msra.mxu0 %v8881_v40  ;;  %v12170_v50 = vld [vmem:[%s18090_s0 + $0x10] sm:$0xff]  ;;  %v11122_v40 = vld [vmem:[%s18090_s0 + $0xc8] sm:$0xff] }
 0x16b   :  { %1679 = vmatprep.mubr.f32.mxu0 %v18099_v3  ;;  %1940 = vmatprep.mubr.f32.mxu1 %v18099_v3 }
 0x16c   :  { %8885 = vmatprep.subr.msk.bf16.mxu0 %vm11213_vm2, %v8883_v42 }
 0x16d   :  { %7720 = vmatmul.mubr.msk.f32.gmra.mrb[14].mxu0 %vm76_vm3, %v12157_v47 }
 0x16e   :  { %7756 = vmatmul.mubr.msk.f32.gmra.mrb[74].mxu1 %vm76_vm3, %v11349_v51  ;;  %1685 = vmatprep.mubr.f32.mxu0 %v18099_v3  ;;  %v12192_v51 = vld [vmem:[%s18090_s0 + $0x20] sm:$0xff] }
 0x16f   :  { %1944 = vmatprep.mubr.f32.mxu1 %v18099_v3  ;;  %8888 = vmatpush1.bf16.msk.msra.mxu0 %vm11213_vm2, %v8886_v43 }
 0x171   :  { %7721 = vmatmul.mubr.msk.f32.gmra.mrb[16].mxu0 %vm76_vm3, %v12170_v50 }
 0x172   :  { %7757 = vmatmul.mubr.msk.f32.gmra.mrb[22].mxu1 %vm76_vm3, %v11360_v52  ;;  %1691 = vmatprep.mubr.f32.mxu0 %v18099_v3 }
 0x173   :  { %1950 = vmatprep.mubr.f32.mxu1 %v18099_v3 }
 0x175   :  { %7722 = vmatmul.mubr.msk.f32.gmra.mrb[18].mxu0 %vm76_vm3, %v12181_v15 }
 0x176   :  { %7758 = vmatmul.mubr.msk.f32.gmra.mrb[24].mxu1 %vm76_vm3, %v11371_v53  ;;  %1697 = vmatprep.mubr.f32.mxu0 %v18099_v3 }
 0x177   :  { %1956 = vmatprep.mubr.f32.mxu1 %v18099_v3 }
 0x179   :  { %7723 = vmatmul.mubr.msk.f32.gmra.mrb[20].mxu0 %vm76_vm3, %v12192_v51  ;;  %v1020_v52 = vpop.f32.mrb[58].mxu1 }
 0x17a   :  { %7759 = vmatmul.mubr.msk.f32.gmra.mrb[26].mxu1 %vm76_vm3, %v11382_v54  ;;  %1703 = vmatprep.mubr.f32.mxu0 %v18099_v3  ;;  %v1021_v48 = vpop.f32.mrb[59].mxu1  ;;  %v12214_v54 = vld [vmem:[%s18090_s0 + $0x30] sm:$0xff] }
 0x17b   :  { %1962 = vmatprep.mubr.f32.mxu1 %v18099_v3 }
 0x17d   :  { %7724 = vmatmul.mubr.msk.f32.gmra.mrb[22].mxu0 %vm76_vm3, %v12203_v49 }
 0x17e   :  { %7760 = vmatmul.mubr.msk.f32.gmra.mrb[28].mxu1 %vm76_vm3, %v11393_v55  ;;  %1709 = vmatprep.mubr.f32.mxu0 %v18099_v3 }
 0x17f   :  { %1968 = vmatprep.mubr.f32.mxu1 %v18099_v3 }
 0x181   :  { %7725 = vmatmul.mubr.msk.f32.gmra.mrb[24].mxu0 %vm76_vm3, %v12214_v54 }
 0x182   :  { %7761 = vmatmul.mubr.msk.f32.gmra.mrb[30].mxu1 %vm76_vm3, %v11404_v56  ;;  %1715 = vmatprep.mubr.f32.mxu0 %v18099_v3  ;;  %v12236_v56 = vld [vmem:[%s18090_s0 + $0x40] sm:$0xff] }
 0x183   :  { %1974 = vmatprep.mubr.f32.mxu1 %v18099_v3 }
 0x185   :  { %7726 = vmatmul.mubr.msk.f32.gmra.mrb[80].mxu0 %vm76_vm3, %v12225_v9 }
 0x186   :  { %7762 = vmatmul.mubr.msk.f32.gmra.mrb[32].mxu1 %vm76_vm3, %v11415_v57  ;;  %1719 = vmatprep.mubr.f32.mxu0 %v18099_v3 }
 0x187   :  { %1980 = vmatprep.mubr.f32.mxu1 %v18099_v3 }
 0x189   :  { %7727 = vmatmul.mubr.msk.f32.gmra.mrb[28].mxu0 %vm76_vm3, %v12236_v56 }
 0x18a   :  { %7763 = vmatmul.mubr.msk.f32.gmra.mrb[76].mxu1 %vm76_vm3, %v11426_v58  ;;  %1725 = vmatprep.mubr.f32.mxu0 %v18099_v3 }
 0x18b   :  { %1984 = vmatprep.mubr.f32.mxu1 %v18099_v3 }
 0x18d   :  { %7728 = vmatmul.mubr.msk.f32.gmra.mrb[30].mxu0 %vm76_vm3, %v11371_v53 }
 0x18e   :  { %7764 = vmatmul.mubr.msk.f32.gmra.mrb[36].mxu1 %vm76_vm3, %v11437_v59  ;;  %1731 = vmatprep.mubr.f32.mxu0 %v18099_v3 }
 0x18f   :  { %1990 = vmatprep.mubr.f32.mxu1 %v18099_v3 }
 0x190   :  { %v795_v10 = vpop.f32.mrb[64].mxu0 }
 0x191   :  { %v796_v11 = vpop.f32.mrb[65].mxu0  ;;  %7729 = vmatmul.mubr.msk.f32.gmra.mrb[32].mxu0 %vm76_vm3, %v12253_v12  ;;  %v3375_v10 = vld [vmem:[%s18091_s2 + $0x30] sm:$0xff] }
 0x192   :  { %7765 = vmatmul.mubr.msk.f32.gmra.mrb[38].mxu1 %vm76_vm3, %v11448_v60  ;;  %1737 = vmatprep.mubr.f32.mxu0 %v18099_v3 }
 0x193   :  { %1996 = vmatprep.mubr.f32.mxu1 %v18099_v3 }
 0x195   :  { %7730 = vmatmul.mubr.msk.f32.gmra.mrb[34].mxu0 %vm76_vm3, %v11393_v55  ;;  %v1060_v53 = vpop.f32.mrb[60].mxu1 }
 0x196   :  { %7766 = vmatmul.mubr.msk.f32.gmra.mrb[40].mxu1 %vm76_vm3, %v11459_v61  ;;  %1743 = vmatprep.mubr.f32.mxu0 %v18099_v3  ;;  %v1061_v13 = vpop.f32.mrb[61].mxu1 }
 0x197   :  { %2002 = vmatprep.mubr.f32.mxu1 %v18099_v3  ;;  %v3370_v13 = vld [vmem:[%s18091_s2 + $0x8] sm:$0xff] }
 0x199   :  { %7731 = vmatmul.mubr.msk.f32.gmra.mrb[36].mxu0 %vm76_vm3, %v12270_v14 }
 0x19a   :  { %7767 = vmatmul.mubr.msk.f32.gmra.mrb[42].mxu1 %vm76_vm3, %v11470_v62  ;;  %1749 = vmatprep.mubr.f32.mxu0 %v18099_v3 }
 0x19b   :  { %2008 = vmatprep.mubr.f32.mxu1 %v18099_v3 }
 0x19d   :  { %7732 = vmatmul.mubr.msk.f32.gmra.mrb[38].mxu0 %vm76_vm3, %v11415_v57 }
 0x19e   :  { %7768 = vmatmul.mubr.msk.f32.gmra.mrb[44].mxu1 %vm76_vm3, %v11481_v63  ;;  %1755 = vmatprep.mubr.f32.mxu0 %v18099_v3 }
 0x19f   :  { %2014 = vmatprep.mubr.f32.mxu1 %v18099_v3 }
 0x1a1   :  { %7733 = vmatmul.mubr.msk.f32.gmra.mrb[82].mxu0 %vm76_vm3, %v11426_v58 }
 0x1a2   :  { %7769 = vmatmul.mubr.msk.f32.gmra.mrb[46].mxu1 %vm76_vm3, %v11492_v0  ;;  %1759 = vmatprep.mubr.f32.mxu0 %v18099_v3 }
 0x1a3   :  { %2020 = vmatprep.mubr.f32.mxu1 %v18099_v3 }
 0x1a5   :  { %7734 = vmatmul.mubr.msk.f32.gmra.mrb[42].mxu0 %vm76_vm3, %v11437_v59 }
 0x1a6   :  { %7770 = vmatmul.mubr.msk.f32.gmra.mrb[52].mxu1 %vm76_vm3, %v11503_v1  ;;  %1765 = vmatprep.mubr.f32.mxu0 %v18099_v3 }
 0x1a7   :  { %2026 = vmatprep.mubr.f32.mxu1 %v18099_v3 }
 0x1a9   :  { %7735 = vmatmul.mubr.msk.f32.gmra.mrb[44].mxu0 %vm76_vm3, %v11448_v60 }
 0x1aa   :  { %7771 = vmatmul.mubr.msk.f32.gmra.mrb[54].mxu1 %vm76_vm3, %v11514_v2  ;;  %1771 = vmatprep.mubr.f32.mxu0 %v18099_v3 }
 0x1ab   :  { %2032 = vmatprep.mubr.f32.mxu1 %v18099_v3 }
 0x1ac   :  { %v835_v55 = vpop.f32.mrb[66].mxu0 }
 0x1ad   :  { %v836_v57 = vpop.f32.mrb[67].mxu0  ;;  %7736 = vmatmul.mubr.msk.f32.gmra.mrb[46].mxu0 %vm76_vm3, %v11459_v61  ;;  %v3369_v55 = vld [vmem:[%s18091_s2] sm:$0xff] }
 0x1ae   :  { %7772 = vmatmul.mubr.msk.f32.gmra.mrb[56].mxu1 %vm76_vm3, %v11525_v4  ;;  %1777 = vmatprep.mubr.f32.mxu0 %v18099_v3 }
 0x1af   :  { %2038 = vmatprep.mubr.f32.mxu1 %v18099_v3 }
 0x1b1   :  { %7737 = vmatmul.mubr.msk.f32.gmra.mrb[48].mxu0 %vm76_vm3, %v11470_v62  ;;  %v1100_v58 = vpop.f32.mrb[62].mxu1 }
 0x1b2   :  { %7773 = vmatmul.mubr.msk.f32.gmra.mrb[0].mxu1 %vm76_vm3, %v11536_v5  ;;  %1783 = vmatprep.mubr.f32.mxu0 %v18099_v3  ;;  %v1101_v59 = vpop.f32.mrb[63].mxu1  ;;  %v3373_v58 = vld [vmem:[%s18091_s2 + $0x20] sm:$0xff] }
 0x1b3   :  { %2044 = vmatprep.mubr.f32.mxu1 %v18099_v3  ;;  %v12565_v59 = vpack.c.bf16 %v3373_v58, %v3369_v55  ;;  %v3416_v55 = vld [vmem:[%s18091_s2 + $0x178] sm:$0xff] }
 0x1b5   :  { %7738 = vmatmul.mubr.msk.f32.gmra.mrb[50].mxu0 %vm76_vm3, %v11481_v63  ;;  %v1423_v60 = vpop.f32.mrb[64].mxu1  ;;  %18386 = vst [vmem:[#allocation5_spill] sm:$0xff] %v12565_v59 }
 0x1b6   :  { %7774 = vmatmul.mubr.msk.f32.gmra.mrb[2].mxu1 %vm76_vm3, %v11547_v6  ;;  %1789 = vmatprep.mubr.f32.mxu0 %v18099_v3  ;;  %v1424_v61 = vpop.f32.mrb[65].mxu1  ;;  %v3380_v60 = vld [vmem:[%s18091_s2 + $0x58] sm:$0xff] }
 0x1b7   :  { %2050 = vmatprep.mubr.f32.mxu1 %v18099_v3  ;;  %v3384_v61 = vld [vmem:[%s18091_s2 + $0x78] sm:$0xff] }
 0x1b9   :  { %7739 = vmatmul.mubr.msk.f32.gmra.mrb[52].mxu0 %vm76_vm3, %v11492_v0 }
 0x1ba   :  { %7775 = vmatmul.mubr.msk.f32.gmra.mrb[4].mxu1 %vm76_vm3, %v11558_v7  ;;  %1795 = vmatprep.mubr.f32.mxu0 %v18099_v3 }
 0x1bb   :  { %2056 = vmatprep.mubr.f32.mxu1 %v18099_v3 }
 0x1bd   :  { %7740 = vmatmul.mubr.msk.f32.gmra.mrb[0].mxu0 %vm76_vm3, %v11503_v1 }
 0x1be   :  { %7776 = vmatmul.mubr.msk.f32.gmra.mrb[78].mxu1 %vm76_vm3, %v11569_v8  ;;  %1801 = vmatprep.mubr.f32.mxu0 %v18099_v3 }
 0x1bf   :  { %2379 = vmatprep.mubr.f32.mxu1 %v18099_v3 }
 0x1c1   :  { %7741 = vmatmul.mubr.msk.f32.gmra.mrb[2].mxu0 %vm76_vm3, %v11514_v2 }
 0x1c2   :  { %7825 = vmatmul.mubr.msk.f32.vlgmr.msra.gmra.mrb[80].mxu1 %vm76_vm3, %v12144_v46  ;;  %1807 = vmatprep.mubr.f32.mxu0 %v18099_v3 }
 0x1c3   :  { %2383 = vmatprep.mubr.f32.mxu1 %v18099_v3 }
 0x1c5   :  { %7742 = vmatmul.mubr.msk.f32.gmra.mrb[4].mxu0 %vm76_vm3, %v11525_v4 }
 0x1c6   :  { %7826 = vmatmul.mubr.msk.f32.gmra.mrb[52].mxu1 %vm76_vm3, %v12157_v47  ;;  %1813 = vmatprep.mubr.f32.mxu0 %v18099_v3 }
 0x1c7   :  { %2389 = vmatprep.mubr.f32.mxu1 %v18099_v3 }
 0x1c8   :  { %v875_v62 = vpop.f32.mrb[68].mxu0 }
 0x1c9   :  { %v876_v63 = vpop.f32.mrb[69].mxu0  ;;  %7743 = vmatmul.mubr.msk.f32.gmra.mrb[6].mxu0 %vm76_vm3, %v11536_v5  ;;  %v11108_v5 = vld [vmem:[%s18090_s0 + $0x48] sm:$0xff]  ;;  %v3379_v62 = vld [vmem:[%s18091_s2 + $0x50] sm:$0xff] }
 0x1ca   :  { %7827 = vmatmul.mubr.msk.f32.gmra.mrb[54].mxu1 %vm76_vm3, %v12170_v50  ;;  %1819 = vmatprep.mubr.f32.mxu0 %v18099_v3  ;;  %v12578_v63 = vpack.c.bf16 %v3384_v61, %v3380_v60  ;;  %v3411_v60 = vld [vmem:[%s18091_s2 + $0x150] sm:$0xff] }
 0x1cb   :  { %2395 = vmatprep.mubr.f32.mxu1 %v18099_v3  ;;  %v3415_v61 = vld [vmem:[%s18091_s2 + $0x170] sm:$0xff] }
 0x1cc   :  { %v1198_v0 = vpop.f32.mrb[70].mxu0  ;;  %18387 = vst [vmem:[#allocation6_spill] sm:$0xff] %v12578_v63 }
 0x1cd   :  { %v1199_v1 = vpop.f32.mrb[71].mxu0  ;;  %7744 = vmatmul.mubr.msk.f32.gmra.mrb[8].mxu0 %vm76_vm3, %v11547_v6  ;;  %v3383_v0 = vld [vmem:[%s18091_s2 + $0x70] sm:$0xff] }
 0x1ce   :  { %7828 = vmatmul.mubr.msk.f32.gmra.mrb[56].mxu1 %vm76_vm3, %v12181_v15  ;;  %1825 = vmatprep.mubr.f32.mxu0 %v18099_v3  ;;  %v12583_v1 = vpack.c.bf16 %v3383_v0, %v3379_v62  ;;  %v12727_v62 = vpack.c.bf16 %v3415_v61, %v3411_v60  ;;  %v3410_v0 = vld [vmem:[%s18091_s2 + $0x148] sm:$0xff]  ;;  %v3436_v61 = vld [vmem:[%s18091_s2 + $0x218] sm:$0xff] }
 0x1cf   :  { %2401 = vmatprep.mubr.f32.mxu1 %v18099_v3 }
 0x1d0   :  { %18388 = vst [vmem:[#allocation7_spill] sm:$0xff] %v12583_v1  ;;  %18404 = vst [vmem:[#allocation23_spill] sm:$0xff] %v12727_v62 }
 0x1d1   :  { %7745 = vmatmul.mubr.msk.f32.gmra.mrb[10].mxu0 %vm76_vm3, %v11558_v7  ;;  %v1463_v2 = vpop.f32.mrb[66].mxu1 }
 0x1d2   :  { %7829 = vmatmul.mubr.msk.f32.gmra.mrb[0].mxu1 %vm76_vm3, %v12192_v51  ;;  %1831 = vmatprep.mubr.f32.mxu0 %v18099_v3  ;;  %v1464_v4 = vpop.f32.mrb[67].mxu1  ;;  %v3378_v2 = vld [vmem:[%s18091_s2 + $0x48] sm:$0xff] }
 0x1d3   :  { %2407 = vmatprep.mubr.f32.mxu1 %v18099_v3  ;;  %v3382_v4 = vld [vmem:[%s18091_s2 + $0x68] sm:$0xff] }
 0x1d5   :  { %7746 = vmatmul.mubr.msk.f32.gmra.mrb[84].mxu0 %vm76_vm3, %v11569_v8  ;;  %v11109_v8 = vld [vmem:[%s18090_s0 + $0x58] sm:$0xff] }
 0x1d6   :  { %7830 = vmatmul.mubr.msk.f32.gmra.mrb[2].mxu1 %vm76_vm3, %v12203_v49  ;;  %2154 = vmatprep.mubr.f32.mxu0 %v18099_v3 }
 0x1d7   :  { %2413 = vmatprep.mubr.f32.mxu1 %v18099_v3 }
 0x1d9   :  { %7795 = vmatmul.mubr.msk.f32.vlgmr.msra.gmra.mrb[86].mxu0 %vm76_vm3, %v12144_v46 }
 0x1da   :  { %7831 = vmatmul.mubr.msk.f32.gmra.mrb[4].mxu1 %vm76_vm3, %v12214_v54  ;;  %2158 = vmatprep.mubr.f32.mxu0 %v18099_v3 }
 0x1db   :  { %2419 = vmatprep.mubr.f32.mxu1 %v18099_v3 }
 0x1dd   :  { %7796 = vmatmul.mubr.msk.f32.gmra.mrb[0].mxu0 %vm76_vm3, %v12157_v47 }
 0x1de   :  { %7832 = vmatmul.mubr.msk.f32.gmra.mrb[82].mxu1 %vm76_vm3, %v12225_v9  ;;  %2164 = vmatprep.mubr.f32.mxu0 %v18099_v3 }
 0x1df   :  { %2423 = vmatprep.mubr.f32.mxu1 %v18099_v3 }
 0x1e1   :  { %7797 = vmatmul.mubr.msk.f32.gmra.mrb[2].mxu0 %vm76_vm3, %v12170_v50 }
 0x1e2   :  { %7833 = vmatmul.mubr.msk.f32.gmra.mrb[8].mxu1 %vm76_vm3, %v12236_v56  ;;  %2170 = vmatprep.mubr.f32.mxu0 %v18099_v3 }
 0x1e3   :  { %2429 = vmatprep.mubr.f32.mxu1 %v18099_v3 }
 0x1e5   :  { %7798 = vmatmul.mubr.msk.f32.gmra.mrb[4].mxu0 %vm76_vm3, %v12181_v15 }
 0x1e6   :  { %7834 = vmatmul.mubr.msk.f32.gmra.mrb[10].mxu1 %vm76_vm3, %v11108_v5  ;;  %2176 = vmatprep.mubr.f32.mxu0 %v18099_v3 }
 0x1e7   :  { %2435 = vmatprep.mubr.f32.mxu1 %v18099_v3 }
 0x1e8   :  { %v1238_v6 = vpop.f32.mrb[72].mxu0 }
 0x1e9   :  { %v1239_v7 = vpop.f32.mrb[73].mxu0  ;;  %7799 = vmatmul.mubr.msk.f32.gmra.mrb[6].mxu0 %vm76_vm3, %v12192_v51  ;;  %v12596_v6 = vpack.c.bf16 %v3382_v4, %v3378_v2  ;;  %v3414_v2 = vld [vmem:[%s18091_s2 + $0x168] sm:$0xff]  ;;  %v3409_v4 = vld [vmem:[%s18091_s2 + $0x140] sm:$0xff] }
 0x1ea   :  { %7835 = vmatmul.mubr.msk.f32.gmra.mrb[12].mxu1 %vm76_vm3, %v12253_v12  ;;  %2182 = vmatprep.mubr.f32.mxu0 %v18099_v3  ;;  %v3381_v7 = vld [vmem:[%s18091_s2 + $0x60] sm:$0xff] }
 0x1eb   :  { %2441 = vmatprep.mubr.f32.mxu1 %v18099_v3  ;;  %18389 = vst [vmem:[#allocation8_spill] sm:$0xff] %v12596_v6 }
 0x1ed   :  { %7800 = vmatmul.mubr.msk.f32.gmra.mrb[8].mxu0 %vm76_vm3, %v12203_v49  ;;  %v3372_v49 = vld [vmem:[%s18091_s2 + $0x18] sm:$0xff] }
 0x1ee   :  { %7836 = vmatmul.mubr.msk.f32.gmra.mrb[14].mxu1 %vm76_vm3, %v11109_v8  ;;  %2188 = vmatprep.mubr.f32.mxu0 %v18099_v3 }
 0x1ef   :  { %2447 = vmatprep.mubr.f32.mxu1 %v18099_v3 }
 0x1f1   :  { %7801 = vmatmul.mubr.msk.f32.gmra.mrb[10].mxu0 %vm76_vm3, %v12214_v54  ;;  %v3376_v54 = vld [vmem:[%s18091_s2 + $0x38] sm:$0xff] }
 0x1f2   :  { %7837 = vmatmul.mubr.msk.f32.gmra.mrb[16].mxu1 %vm76_vm3, %v12270_v14  ;;  %2194 = vmatprep.mubr.f32.mxu0 %v18099_v3 }
 0x1f3   :  { %2453 = vmatprep.mubr.f32.mxu1 %v18099_v3 }
 0x1f5   :  { %7802 = vmatmul.mubr.msk.f32.gmra.mrb[88].mxu0 %vm76_vm3, %v12225_v9  ;;  %v3371_v9 = vld [vmem:[%s18091_s2 + $0x10] sm:$0xff] }
 0x1f6   :  { %7838 = vmatmul.mubr.msk.f32.gmra.mrb[18].mxu1 %vm76_vm3, %v11110_v16  ;;  %2198 = vmatprep.mubr.f32.mxu0 %v18099_v3 }
 0x1f7   :  { %2459 = vmatprep.mubr.f32.mxu1 %v18099_v3 }
 0x1f9   :  { %7803 = vmatmul.mubr.msk.f32.gmra.mrb[14].mxu0 %vm76_vm3, %v12236_v56  ;;  %v12542_v56 = vpack.c.bf16 %v3376_v54, %v3372_v49  ;;  %v3402_v54 = vld [vmem:[%s18091_s2 + $0x108] sm:$0xff] }
 0x1fa   :  { %7839 = vmatmul.mubr.msk.f32.gmra.mrb[84].mxu1 %vm76_vm3, %v11111_v17  ;;  %2204 = vmatprep.mubr.f32.mxu0 %v18099_v3 }
 0x1fb   :  { %2463 = vmatprep.mubr.f32.mxu1 %v18099_v3  ;;  %18383 = vst [vmem:[#allocation2_spill] sm:$0xff] %v12542_v56  ;;  %8960 = vmatprep.subr.bf16.mxu1 %v12542_v56 }
 0x1fd   :  { %7804 = vmatmul.mubr.msk.f32.gmra.mrb[16].mxu0 %vm76_vm3, %v11108_v5  ;;  %v3377_v5 = vld [vmem:[%s18091_s2 + $0x40] sm:$0xff] }
 0x1fe   :  { %7840 = vmatmul.mubr.msk.f32.gmra.mrb[22].mxu1 %vm76_vm3, %v11112_v18  ;;  %2210 = vmatprep.mubr.f32.mxu0 %v18099_v3 }
 0x1ff   :  { %2469 = vmatprep.mubr.f32.mxu1 %v18099_v3 }
 0x201   :  { %7805 = vmatmul.mubr.msk.f32.gmra.mrb[18].mxu0 %vm76_vm3, %v12253_v12  ;;  %v12547_v12 = vpack.c.bf16 %v3375_v10, %v3371_v9  ;;  %v3406_v9 = vld [vmem:[%s18091_s2 + $0x128] sm:$0xff] }
 0x202   :  { %7841 = vmatmul.mubr.msk.f32.gmra.mrb[24].mxu1 %vm76_vm3, %v11113_v19  ;;  %2216 = vmatprep.mubr.f32.mxu0 %v18099_v3  ;;  %v12701_v10 = vpack.c.bf16 %v3406_v9, %v3402_v54  ;;  %v3430_v54 = vld [vmem:[%s18091_s2 + $0x1e8] sm:$0xff]  ;;  %v3425_v9 = vld [vmem:[%s18091_s2 + $0x1c0] sm:$0xff] }
 0x203   :  { %2475 = vmatprep.mubr.f32.mxu1 %v18099_v3  ;;  %18384 = vst [vmem:[#allocation3_spill] sm:$0xff] %v12547_v12  ;;  %8962 = vmatpush1.bf16.msra.mxu1 %v12547_v12 }
 0x204   :  { %8964 = vmatprep.subr.bf16.mxu1 %v12578_v63  ;;  %18401 = vst [vmem:[#allocation20_spill] sm:$0xff] %v12701_v10 }
 0x205   :  { %7806 = vmatmul.mubr.msk.f32.gmra.mrb[20].mxu0 %vm76_vm3, %v11109_v8  ;;  %v1539_v20 = vpop.f32.mrb[68].mxu1  ;;  %v12601_v8 = vpack.c.bf16 %v3381_v7, %v3377_v5  ;;  %v12740_v5 = vpack.c.bf16 %v3414_v2, %v3410_v0  ;;  %v3413_v7 = vld [vmem:[%s18091_s2 + $0x160] sm:$0xff]  ;;  %v3440_v0 = vld [vmem:[%s18091_s2 + $0x238] sm:$0xff]  ;;  %v3435_v2 = vld [vmem:[%s18091_s2 + $0x210] sm:$0xff] }
 0x206   :  { %7842 = vmatmul.mubr.msk.f32.gmra.mrb[26].mxu1 %vm76_vm3, %v11114_v21  ;;  %2222 = vmatprep.mubr.f32.mxu0 %v18099_v3  ;;  %v1540_v22 = vpop.f32.mrb[69].mxu1  ;;  %v3391_v20 = vld [vmem:[%s18091_s2 + $0xb0] sm:$0xff] }
 0x207   :  { %2481 = vmatprep.mubr.f32.mxu1 %v18099_v3  ;;  %8966 = vmatpush1.bf16.msra.mxu1 %v12583_v1  ;;  %18390 = vst [vmem:[#allocation9_spill] sm:$0xff] %v12601_v8  ;;  %v3386_v22 = vld [vmem:[%s18091_s2 + $0x88] sm:$0xff]  ;;  %18405 = vst [vmem:[#allocation24_spill] sm:$0xff] %v12740_v5 }
 0x209   :  { %7807 = vmatmul.mubr.msk.f32.gmra.mrb[22].mxu0 %vm76_vm3, %v12270_v14  ;;  %v3374_v14 = vld [vmem:[%s18091_s2 + $0x28] sm:$0xff] }
 0x20a   :  { %7843 = vmatmul.mubr.msk.f32.gmra.mrb[28].mxu1 %vm76_vm3, %v11115_v23  ;;  %2228 = vmatprep.mubr.f32.mxu0 %v18099_v3  ;;  %v12560_v57 = vpack.c.bf16 %v3374_v14, %v3370_v13  ;;  %v3412_v14 = vld [vmem:[%s18091_s2 + $0x158] sm:$0xff] }
 0x20b   :  { %2487 = vmatprep.mubr.f32.mxu1 %v18099_v3  ;;  %v12719_v58 = vpack.c.bf16 %v3416_v55, %v3412_v14  ;;  %v3429_v14 = vld [vmem:[%s18091_s2 + $0x1e0] sm:$0xff] }
 0x20c   :  { %18385 = vst [vmem:[#allocation4_spill] sm:$0xff] %v12560_v57  ;;  %8900 = vmatprep.subr.bf16.mxu0 %v12560_v57  ;;  %v12817_v60 = vpack.c.bf16 %v3429_v14, %v3425_v9 }
 0x20d   :  { %7808 = vmatmul.mubr.msk.f32.gmra.mrb[24].mxu0 %vm76_vm3, %v11110_v16  ;;  %v3388_v16 = vld [vmem:[%s18091_s2 + $0x98] sm:$0xff]  ;;  %18403 = vst [vmem:[#allocation22_spill] sm:$0xff] %v12719_v58 }
 0x20e   :  { %7844 = vmatmul.mubr.msk.f32.gmra.mrb[30].mxu1 %vm76_vm3, %v11116_v24  ;;  %2234 = vmatprep.mubr.f32.mxu0 %v18099_v3  ;;  %18414 = vst [vmem:[#allocation33_spill] sm:$0xff] %v12817_v60 }
 0x20f   :  { %2493 = vmatprep.mubr.f32.mxu1 %v18099_v3  ;;  %8902 = vmatpush1.bf16.msra.mxu0 %v12565_v59 }
 0x210   :  { %8904 = vmatprep.subr.bf16.mxu0 %v12596_v6 }
 0x211   :  { %7809 = vmatmul.mubr.msk.f32.gmra.mrb[90].mxu0 %vm76_vm3, %v11111_v17  ;;  %v3392_v17 = vld [vmem:[%s18091_s2 + $0xb8] sm:$0xff] }
 0x212   :  { %7845 = vmatmul.mubr.msk.f32.gmra.mrb[32].mxu1 %vm76_vm3, %v11117_v27  ;;  %2238 = vmatprep.mubr.f32.mxu0 %v18099_v3 }
 0x213   :  { %2499 = vmatprep.mubr.f32.mxu1 %v18099_v3  ;;  %8906 = vmatpush1.bf16.msra.mxu0 %v12601_v8 }
 0x215   :  { %7810 = vmatmul.mubr.msk.f32.gmra.mrb[28].mxu0 %vm76_vm3, %v11112_v18  ;;  %v12610_v18 = vpack.c.bf16 %v3392_v17, %v3388_v16  ;;  %v12745_v16 = vpack.c.bf16 %v3413_v7, %v3409_v4  ;;  %v3420_v17 = vld [vmem:[%s18091_s2 + $0x198] sm:$0xff]  ;;  %v12830_v7 = vpack.c.bf16 %v3440_v0, %v3436_v61  ;;  %v3446_v0 = vld [vmem:[%s18091_s2 + $0x268] sm:$0xff] }
 0x216   :  { %7846 = vmatmul.mubr.msk.f32.gmra.mrb[86].mxu1 %vm76_vm3, %v11118_v28  ;;  %2244 = vmatprep.mubr.f32.mxu0 %v18099_v3 }
 0x217   :  { %2503 = vmatprep.mubr.f32.mxu1 %v18099_v3  ;;  %18391 = vst [vmem:[#allocation10_spill] sm:$0xff] %v12610_v18  ;;  %8968 = vmatprep.subr.bf16.mxu1 %v12610_v18  ;;  %18406 = vst [vmem:[#allocation25_spill] sm:$0xff] %v12745_v16 }
 0x218   :  { %18415 = vst [vmem:[#allocation34_spill] sm:$0xff] %v12830_v7 }
 0x219   :  { %7811 = vmatmul.mubr.msk.f32.gmra.mrb[30].mxu0 %vm76_vm3, %v11113_v19  ;;  %v3387_v19 = vld [vmem:[%s18091_s2 + $0x90] sm:$0xff] }
 0x21a   :  { %7847 = vmatmul.mubr.msk.f32.gmra.mrb[36].mxu1 %vm76_vm3, %v11119_v30  ;;  %2250 = vmatprep.mubr.f32.mxu0 %v18099_v3 }
 0x21b   :  { %2509 = vmatprep.mubr.f32.mxu1 %v18099_v3 }
 0x21c   :  { %v1314_v32 = vpop.f32.mrb[74].mxu0 }
 0x21d   :  { %v1315_v34 = vpop.f32.mrb[75].mxu0  ;;  %7812 = vmatmul.mubr.msk.f32.gmra.mrb[32].mxu0 %vm76_vm3, %v11114_v21  ;;  %v12620_v21 = vpack.c.bf16 %v3391_v20, %v3387_v19  ;;  %v3396_v32 = vld [vmem:[%s18091_s2 + $0xd8] sm:$0xff] }
 0x21e   :  { %7848 = vmatmul.mubr.msk.f32.gmra.mrb[38].mxu1 %vm76_vm3, %v11120_v38  ;;  %2256 = vmatprep.mubr.f32.mxu0 %v18099_v3  ;;  %v3400_v34 = vld [vmem:[%s18091_s2 + $0xf8] sm:$0xff] }
 0x21f   :  { %2515 = vmatprep.mubr.f32.mxu1 %v18099_v3  ;;  %18392 = vst [vmem:[#allocation11_spill] sm:$0xff] %v12620_v21  ;;  %8970 = vmatpush1.bf16.msra.mxu1 %v12620_v21  ;;  %v3424_v19 = vld [vmem:[%s18091_s2 + $0x1b8] sm:$0xff] }
 0x220   :  { %v12754_v20 = vpack.c.bf16 %v3424_v19, %v3420_v17  ;;  %v3439_v17 = vld [vmem:[%s18091_s2 + $0x230] sm:$0xff] }
 0x221   :  { %7813 = vmatmul.mubr.msk.f32.gmra.mrb[34].mxu0 %vm76_vm3, %v11115_v23  ;;  %v1579_v41 = vpop.f32.mrb[70].mxu1  ;;  %v3390_v23 = vld [vmem:[%s18091_s2 + $0xa8] sm:$0xff] }
 0x222   :  { %7849 = vmatmul.mubr.msk.f32.gmra.mrb[40].mxu1 %vm76_vm3, %v11121_v29  ;;  %2262 = vmatprep.mubr.f32.mxu0 %v18099_v3  ;;  %v1580_v39 = vpop.f32.mrb[71].mxu1  ;;  %v12650_v41 = vpack.c.bf16 %v3400_v34, %v3396_v32  ;;  %18407 = vst [vmem:[#allocation26_spill] sm:$0xff] %v12754_v20  ;;  %v3422_v32 = vld [vmem:[%s18091_s2 + $0x1a8] sm:$0xff] }
 0x223   :  { %2521 = vmatprep.mubr.f32.mxu1 %v18099_v3 }
 0x224   :  { %18395 = vst [vmem:[#allocation14_spill] sm:$0xff] %v12650_v41  ;;  %8972 = vmatprep.subr.bf16.mxu1 %v12650_v41 }
 0x225   :  { %7814 = vmatmul.mubr.msk.f32.gmra.mrb[36].mxu0 %vm76_vm3, %v11116_v24  ;;  %v1902_v35 = vpop.f32.mrb[72].mxu1  ;;  %v3385_v24 = vld [vmem:[%s18091_s2 + $0x80] sm:$0xff] }
 0x226   :  { %7850 = vmatmul.mubr.msk.f32.gmra.mrb[42].mxu1 %vm76_vm3, %v11122_v40  ;;  %2268 = vmatprep.mubr.f32.mxu0 %v18099_v3  ;;  %v1903_v42 = vpop.f32.mrb[73].mxu1 }
 0x227   :  { %2527 = vmatprep.mubr.f32.mxu1 %v18099_v3  ;;  %v3394_v42 = vld [vmem:[%s18091_s2 + $0xc8] sm:$0xff] }
 0x229   :  { %7815 = vmatmul.mubr.msk.f32.gmra.mrb[38].mxu0 %vm76_vm3, %v11117_v27  ;;  %v12632_v27 = vpack.c.bf16 %v3390_v23, %v3386_v22  ;;  %v3419_v22 = vld [vmem:[%s18091_s2 + $0x190] sm:$0xff] }
 0x22a   :  { %7851 = vmatmul.mubr.msk.f32.gmra.mrb[44].mxu1 %vm76_vm3, %v11123_v44  ;;  %2274 = vmatprep.mubr.f32.mxu0 %v18099_v3  ;;  %v3423_v23 = vld [vmem:[%s18091_s2 + $0x1b0] sm:$0xff] }
 0x22b   :  { %2533 = vmatprep.mubr.f32.mxu1 %v18099_v3  ;;  %18393 = vst [vmem:[#allocation12_spill] sm:$0xff] %v12632_v27  ;;  %8908 = vmatprep.subr.bf16.mxu0 %v12632_v27 }
 0x22d   :  { %7816 = vmatmul.mubr.msk.f32.gmra.mrb[92].mxu0 %vm76_vm3, %v11118_v28  ;;  %v3389_v28 = vld [vmem:[%s18091_s2 + $0xa0] sm:$0xff] }
 0x22e   :  { %7852 = vmatmul.mubr.msk.f32.gmra.mrb[46].mxu1 %vm76_vm3, %v11124_v45  ;;  %2278 = vmatprep.mubr.f32.mxu0 %v18099_v3 }
 0x231   :  { %7817 = vmatmul.mubr.msk.f32.gmra.mrb[42].mxu0 %vm76_vm3, %v11119_v30  ;;  %v12637_v30 = vpack.c.bf16 %v3389_v28, %v3385_v24  ;;  %v12764_v24 = vpack.c.bf16 %v3423_v23, %v3419_v22  ;;  %v3418_v28 = vld [vmem:[%s18091_s2 + $0x188] sm:$0xff]  ;;  %v12836_v23 = vpack.c.bf16 %v3439_v17, %v3435_v2  ;;  %v3441_v2 = vld [vmem:[%s18091_s2 + $0x240] sm:$0xff] }
 0x232   :  { %2284 = vmatprep.mubr.f32.mxu0 %v18099_v3  ;;  %v12773_v34 = vpack.c.bf16 %v3422_v32, %v3418_v28  ;;  %v3434_v28 = vld [vmem:[%s18091_s2 + $0x208] sm:$0xff]  ;;  %v3445_v17 = vld [vmem:[%s18091_s2 + $0x260] sm:$0xff] }
 0x233   :  { %18394 = vst [vmem:[#allocation13_spill] sm:$0xff] %v12637_v30  ;;  %8910 = vmatpush1.bf16.msra.mxu0 %v12637_v30  ;;  %18408 = vst [vmem:[#allocation27_spill] sm:$0xff] %v12764_v24  ;;  %v3438_v32 = vld [vmem:[%s18091_s2 + $0x228] sm:$0xff] }
 0x234   :  { %18409 = vst [vmem:[#allocation28_spill] sm:$0xff] %v12773_v34  ;;  %18416 = vst [vmem:[#allocation35_spill] sm:$0xff] %v12836_v23 }
 0x235   :  { %7818 = vmatmul.mubr.msk.f32.gmra.mrb[44].mxu0 %vm76_vm3, %v11120_v38  ;;  %v3395_v38 = vld [vmem:[%s18091_s2 + $0xd0] sm:$0xff] }
 0x236   :  { %2290 = vmatprep.mubr.f32.mxu0 %v18099_v3 }
 0x238   :  { %v1354_v46 = vpop.f32.mrb[76].mxu0 }
 0x239   :  { %v1355_v43 = vpop.f32.mrb[77].mxu0  ;;  %7819 = vmatmul.mubr.msk.f32.gmra.mrb[46].mxu0 %vm76_vm3, %v11121_v29  ;;  %v3399_v29 = vld [vmem:[%s18091_s2 + $0xf0] sm:$0xff] }
 0x23a   :  { %2296 = vmatprep.mubr.f32.mxu0 %v18099_v3  ;;  %v12655_v35 = vpack.c.bf16 %v3399_v29, %v3395_v38  ;;  %v3397_v43 = vld [vmem:[%s18091_s2 + $0xe0] sm:$0xff] }
 0x23b   :  { %v3417_v38 = vld [vmem:[%s18091_s2 + $0x180] sm:$0xff] }
 0x23c   :  { %v1677_v47 = vpop.f32.mrb[78].mxu0  ;;  %18396 = vst [vmem:[#allocation15_spill] sm:$0xff] %v12655_v35  ;;  %8974 = vmatpush1.bf16.msra.mxu1 %v12655_v35  ;;  %v3421_v29 = vld [vmem:[%s18091_s2 + $0x1a0] sm:$0xff] }
 0x23d   :  { %v1678_v50 = vpop.f32.mrb[79].mxu0  ;;  %7820 = vmatmul.mubr.msk.f32.gmra.mrb[48].mxu0 %vm76_vm3, %v11122_v40 }
 0x23e   :  { %2302 = vmatprep.mubr.f32.mxu0 %v18099_v3  ;;  %v3404_v50 = vld [vmem:[%s18091_s2 + $0x118] sm:$0xff] }
 0x241   :  { %7821 = vmatmul.mubr.msk.f32.gmra.mrb[50].mxu0 %vm76_vm3, %v11123_v44  ;;  %v1942_v15 = vpop.f32.mrb[74].mxu1  ;;  %v3398_v44 = vld [vmem:[%s18091_s2 + $0xe8] sm:$0xff] }
 0x242   :  { %2308 = vmatprep.mubr.f32.mxu0 %v18099_v3  ;;  %v1943_v51 = vpop.f32.mrb[75].mxu1  ;;  %v12668_v46 = vpack.c.bf16 %v3398_v44, %v3394_v42  ;;  %v3408_v15 = vld [vmem:[%s18091_s2 + $0x138] sm:$0xff]  ;;  %v3462_v3 = vld [vmem:[%s18091_s2 + $0x2e8] sm:$0xff] }
 0x243   :  { %v12683_v51 = vpack.c.bf16 %v3408_v15, %v3404_v50  ;;  %v3432_v42 = vld [vmem:[%s18091_s2 + $0x1f8] sm:$0xff] }
 0x244   :  { %18397 = vst [vmem:[#allocation16_spill] sm:$0xff] %v12668_v46  ;;  %8912 = vmatprep.subr.bf16.mxu0 %v12668_v46 }
 0x245   :  { %7822 = vmatmul.mubr.msk.f32.gmra.mrb[52].mxu0 %vm76_vm3, %v11124_v45  ;;  %v3393_v45 = vld [vmem:[%s18091_s2 + $0xc0] sm:$0xff]  ;;  %18399 = vst [vmem:[#allocation18_spill] sm:$0xff] %v12683_v51  ;;  %8976 = vmatprep.subr.bf16.mxu1 %v12683_v51 }
 0x246   :  { %v12673_v47 = vpack.c.bf16 %v3397_v43, %v3393_v45  ;;  %v3427_v45 = vld [vmem:[%s18091_s2 + $0x1d0] sm:$0xff] }
 0x247   :  { %v3431_v43 = vld [vmem:[%s18091_s2 + $0x1f0] sm:$0xff] }
 0x248   :  { %18398 = vst [vmem:[#allocation17_spill] sm:$0xff] %v12673_v47  ;;  %8914 = vmatpush1.bf16.msra.mxu0 %v12673_v47  ;;  %v12800_v15 = vpack.c.bf16 %v3431_v43, %v3427_v45 }
 0x249   :  { %8916 = vmatprep.subr.bf16.mxu0 %v12701_v10 }
 0x24a   :  { %18412 = vst [vmem:[#allocation31_spill] sm:$0xff] %v12800_v15 }
 0x258   :  { %v1717_v52 = vpop.f32.mrb[80].mxu0 }
 0x259   :  { %v1718_v48 = vpop.f32.mrb[81].mxu0  ;;  %v3403_v52 = vld [vmem:[%s18091_s2 + $0x110] sm:$0xff] }
 0x25a   :  { %v3407_v48 = vld [vmem:[%s18091_s2 + $0x130] sm:$0xff] }
 0x25b   :  { %v12691_v49 = vpack.c.bf16 %v3407_v48, %v3403_v52  ;;  %v3426_v48 = vld [vmem:[%s18091_s2 + $0x1c8] sm:$0xff] }
 0x25d   :  { %v1982_v11 = vpop.f32.mrb[76].mxu1  ;;  %18400 = vst [vmem:[#allocation19_spill] sm:$0xff] %v12691_v49  ;;  %8978 = vmatpush1.bf16.msra.mxu1 %v12691_v49 }
 0x25e   :  { %v1983_v53 = vpop.f32.mrb[77].mxu1  ;;  %v3401_v11 = vld [vmem:[%s18091_s2 + $0x100] sm:$0xff]  ;;  %8980 = vmatprep.subr.bf16.mxu1 %v12719_v58 }
 0x25f   :  { %v3405_v53 = vld [vmem:[%s18091_s2 + $0x120] sm:$0xff] }
 0x260   :  { %v12709_v13 = vpack.c.bf16 %v3405_v53, %v3401_v11  ;;  %v12812_v53 = vpack.c.bf16 %v3430_v54, %v3426_v48  ;;  %v3443_v48 = vld [vmem:[%s18091_s2 + $0x250] sm:$0xff] }
 0x261   :  { %8982 = vmatpush1.bf16.msra.mxu1 %v12727_v62 }
 0x262   :  { %18402 = vst [vmem:[#allocation21_spill] sm:$0xff] %v12709_v13  ;;  %8918 = vmatpush1.bf16.msra.mxu0 %v12709_v13  ;;  %8984 = vmatprep.subr.bf16.mxu1 %v12754_v20  ;;  %18413 = vst [vmem:[#allocation32_spill] sm:$0xff] %v12812_v53 }
 0x263   :  { %8920 = vmatprep.subr.bf16.mxu0 %v12740_v5 }
 0x265   :  { %8986 = vmatpush1.bf16.msra.mxu1 %v12764_v24 }
 0x266   :  { %8922 = vmatpush1.bf16.msra.mxu0 %v12745_v16 }
 0x267   :  { %8924 = vmatprep.subr.bf16.mxu0 %v12773_v34 }
 0x274   :  { %v1757_v39 = vpop.f32.mrb[82].mxu0 }
 0x275   :  { %v1758_v40 = vpop.f32.mrb[83].mxu0  ;;  %v12782_v39 = vpack.c.bf16 %v3421_v29, %v3417_v38  ;;  %v3433_v38 = vld [vmem:[%s18091_s2 + $0x200] sm:$0xff] }
 0x276   :  { %v3428_v40 = vld [vmem:[%s18091_s2 + $0x1d8] sm:$0xff] }
 0x277   :  { %18410 = vst [vmem:[#allocation29_spill] sm:$0xff] %v12782_v39  ;;  %8926 = vmatpush1.bf16.msra.mxu0 %v12782_v39  ;;  %v12791_v44 = vpack.c.bf16 %v3432_v42, %v3428_v40  ;;  %v3437_v40 = vld [vmem:[%s18091_s2 + $0x220] sm:$0xff] }
 0x278   :  { %8928 = vmatprep.subr.bf16.mxu0 %v12812_v53  ;;  %v12856_v42 = vpack.c.bf16 %v3437_v40, %v3433_v38  ;;  %v3451_v38 = vld [vmem:[%s18091_s2 + $0x290] sm:$0xff] }
 0x279   :  { %18411 = vst [vmem:[#allocation30_spill] sm:$0xff] %v12791_v44  ;;  %8988 = vmatprep.subr.bf16.mxu1 %v12791_v44  ;;  %v3455_v40 = vld [vmem:[%s18091_s2 + $0x2b0] sm:$0xff]  ;;  %v3485_v44 = vld [vmem:[%s18091_s2 + $0x3a0] sm:$0xff] }
 0x27a   :  { %8990 = vmatpush1.bf16.msra.mxu1 %v12800_v15  ;;  %18418 = vst [vmem:[#allocation37_spill] sm:$0xff] %v12856_v42 }
 0x27b   :  { %8930 = vmatpush1.bf16.msra.mxu0 %v12817_v60  ;;  %8992 = vmatprep.subr.bf16.mxu1 %v12830_v7 }
 0x27e   :  { %8994 = vmatpush1.bf16.msra.mxu1 %v12836_v23 }
 0x291   :  { %v2058_v50 = vpop.f32.mrb[78].mxu1 }
 0x292   :  { %v2059_v52 = vpop.f32.mrb[79].mxu1  ;;  %v3444_v50 = vld [vmem:[%s18091_s2 + $0x258] sm:$0xff] }
 0x293   :  { %v3448_v52 = vld [vmem:[%s18091_s2 + $0x278] sm:$0xff] }
 0x294   :  { %v12871_v9 = vpack.c.bf16 %v3448_v52, %v3444_v50  ;;  %v3454_v50 = vld [vmem:[%s18091_s2 + $0x2a8] sm:$0xff] }
 0x295   :  { %v2381_v11 = vpop.f32.mrb[80].mxu1 }
 0x296   :  { %v2382_v55 = vpop.f32.mrb[81].mxu1  ;;  %18419 = vst [vmem:[#allocation38_spill] sm:$0xff] %v12871_v9  ;;  %8996 = vmatprep.subr.bf16.mxu1 %v12871_v9 }
 0x299   :  { %v2385_v4 = vpop.f32.mrb[52].mxu1 }
 0x29a   :  { %v10564_v19 = vadd.f32 %v2385_v4, %v12065_v25  ;;  %v2387_v22 = vpop.f32.mrb[53].mxu1  ;;  %v12849_v25 = vpack.c.bf16 %v3438_v32, %v3434_v28  ;;  %v3456_v32 = vld [vmem:[%s18091_s2 + $0x2b8] sm:$0xff] }
 0x29b   :  { %v10565_v29 = vadd.f32 %v2387_v22, %v12073_v31 }
 0x29c   :  { %18417 = vst [vmem:[#allocation36_spill] sm:$0xff] %v12849_v25  ;;  %2945 = vrot.lane.b32.xlu0 %v10564_v19, %s11127_s10  ;;  %8932 = vmatprep.subr.bf16.mxu0 %v12849_v25  ;;  %v12903_v19 = vpack.c.bf16 %v3445_v17, %v3441_v2  ;;  %v3486_v25 = vld [vmem:[%s18091_s2 + $0x3a8] sm:$0xff] }
 0x29d   :  { %v2391_v45 = vpop.f32.mrb[54].mxu1  ;;  %8934 = vmatpush1.bf16.msra.mxu0 %v12856_v42 }
 0x29e   :  { %v10566_v31 = vadd.f32 %v2391_v45, %v12081_v33  ;;  %v2393_v43 = vpop.f32.mrb[55].mxu1  ;;  %v3447_v33 = vld [vmem:[%s18091_s2 + $0x270] sm:$0xff]  ;;  %18422 = vst [vmem:[#allocation41_spill] sm:$0xff] %v12903_v19 }
 0x29f   :  { %v10567_v54 = vadd.f32 %v2393_v43, %v12085_v36  ;;  %v12877_v11 = vpack.c.bf16 %v3447_v33, %v3443_v48  ;;  %v3442_v36 = vld [vmem:[%s18091_s2 + $0x248] sm:$0xff] }
 0x2a0   :  { %2947 = vrot.lane.b32.xlu0 %v10565_v29, %s11127_s10  ;;  %v3450_v43 = vld [vmem:[%s18091_s2 + $0x288] sm:$0xff] }
 0x2a1   :  { %18420 = vst [vmem:[#allocation39_spill] sm:$0xff] %v12877_v11  ;;  %v2397_v14 = vpop.f32.mrb[56].mxu1  ;;  %2953 = vrot.lane.b32.xlu1 %v10567_v54, %s11127_s10  ;;  %8998 = vmatpush1.bf16.msra.mxu1 %v12877_v11  ;;  %v12936_v54 = vpack.c.bf16 %v3454_v50, %v3450_v43  ;;  %v3460_v50 = vld [vmem:[%s18091_s2 + $0x2d8] sm:$0xff] }
 0x2a2   :  { %v12882_v55 = vadd.f32 %v2397_v14, %v12095_v26  ;;  %v2399_v61 = vpop.f32.mrb[57].mxu1  ;;  %v12897_v26 = vpack.c.bf16 %v3446_v0, %v3442_v36  ;;  %v3449_v14 = vld [vmem:[%s18091_s2 + $0x280] sm:$0xff] }
 0x2a3   :  { %v12895_v4 = vadd.f32 %v2399_v61, %v12097_v37  ;;  %v3452_v37 = vld [vmem:[%s18091_s2 + $0x298] sm:$0xff]  ;;  %18425 = vst [vmem:[#allocation44_spill] sm:$0xff] %v12936_v54  ;;  %v3453_v61 = vld [vmem:[%s18091_s2 + $0x2a0] sm:$0xff] }
 0x2a4   :  { %18421 = vst [vmem:[#allocation40_spill] sm:$0xff] %v12897_v26  ;;  %2951 = vrot.lane.b32.xlu0 %v10566_v31, %s11127_s10  ;;  %8936 = vmatprep.subr.bf16.mxu0 %v12897_v26  ;;  %v12920_v29 = vpack.c.bf16 %v3456_v32, %v3452_v37  ;;  %v12925_v31 = vpack.c.bf16 %v3455_v40, %v3451_v38  ;;  %v3478_v26 = vld [vmem:[%s18091_s2 + $0x368] sm:$0xff] }
 0x2a5   :  { %v12905_v22 = vpop.f32.mrb[0].mxu1  ;;  %8938 = vmatpush1.bf16.msra.mxu0 %v12903_v19  ;;  %v12948_v36 = vpack.c.bf16 %v3453_v61, %v3449_v14  ;;  %v3459_v14 = vld [vmem:[%s18091_s2 + $0x2d0] sm:$0xff]  ;;  %v3465_v19 = vld [vmem:[%s18091_s2 + $0x300] sm:$0xff] }
 0x2a6   :  { %v12908_v28 = vpop.f32.mrb[1].mxu1  ;;  %18423 = vst [vmem:[#allocation42_spill] sm:$0xff] %v12920_v29  ;;  %18424 = vst [vmem:[#allocation43_spill] sm:$0xff] %v12925_v31  ;;  %9000 = vmatprep.subr.bf16.mxu1 %v12920_v29  ;;  %8940 = vmatprep.subr.bf16.mxu0 %v12936_v54  ;;  %v3468_v54 = vld [vmem:[%s18091_s2 + $0x318] sm:$0xff] }
 0x2a7   :  { %9002 = vmatpush1.bf16.msra.mxu1 %v12925_v31  ;;  %18426 = vst [vmem:[#allocation45_spill] sm:$0xff] %v12948_v36 }
 0x2a8   :  { %v1833_v45 = vpop.f32.mrb[84].mxu0 }
 0x2a9   :  { %v12933_v52 = vpop.f32.mrb[2].mxu1  ;;  %v1834_v48 = vpop.f32.mrb[85].mxu0  ;;  %8942 = vmatpush1.bf16.msra.mxu0 %v12948_v36 }
 0x2aa   :  { %v12938_v33 = vpop.f32.mrb[3].mxu1  ;;  %v3464_v48 = vld [vmem:[%s18091_s2 + $0x2f8] sm:$0xff] }
 0x2ac   :  { %v2156_v0 = vpop.f32.mrb[86].mxu0 }
 0x2ad   :  { %v12950_v2 = vpop.f32.mrb[4].mxu1  ;;  %v2157_v17 = vpop.f32.mrb[87].mxu0 }
 0x2ae   :  { %v12953_v37 = vpop.f32.mrb[5].mxu1  ;;  %v12974_v17 = vpack.c.bf16 %v3464_v48, %v3460_v50  ;;  %v3457_v50 = vld [vmem:[%s18091_s2 + $0x2c0] sm:$0xff] }
 0x2af   :  { %v3461_v48 = vld [vmem:[%s18091_s2 + $0x2e0] sm:$0xff] }
 0x2b0   :  { %v12955_v32 = vpop.f32.mrb[0].mxu0  ;;  %18427 = vst [vmem:[#allocation46_spill] sm:$0xff] %v12974_v17  ;;  %9004 = vmatprep.subr.bf16.mxu1 %v12974_v17  ;;  %v13000_v11 = vpack.c.bf16 %v3461_v48, %v3457_v50  ;;  %v3466_v48 = vld [vmem:[%s18091_s2 + $0x308] sm:$0xff] }
 0x2b1   :  { %v12957_v38 = vpop.f32.mrb[1].mxu0  ;;  %v2421_v40 = vpop.f32.mrb[82].mxu1  ;;  %v3470_v17 = vld [vmem:[%s18091_s2 + $0x328] sm:$0xff] }
 0x2b2   :  { %2943 = vrot.lane.b32.xlu0 %v12957_v38, %s11127_s10  ;;  %v2422_v45 = vpop.f32.mrb[83].mxu1  ;;  %v3463_v40 = vld [vmem:[%s18091_s2 + $0x2f0] sm:$0xff]  ;;  %18430 = vst [vmem:[#allocation49_spill] sm:$0xff] %v13000_v11 }
 0x2b3   :  { %v3458_v45 = vld [vmem:[%s18091_s2 + $0x2c8] sm:$0xff]  ;;  %v12986_v36 = vpack.c.bf16 %v3463_v40, %v3459_v14  ;;  %v3467_v14 = vld [vmem:[%s18091_s2 + $0x310] sm:$0xff] }
 0x2b4   :  { %v12961_v43 = vpop.f32.mrb[2].mxu0  ;;  %v12988_v29 = vpack.c.bf16 %v3462_v3, %v3458_v45  ;;  %v3472_v3 = vld [vmem:[%s18091_s2 + $0x338] sm:$0xff] }
 0x2b5   :  { %v2425_v61 = vpop.f32.mrb[8].mxu1  ;;  %v12972_v0 = vpop.f32.mrb[3].mxu0  ;;  %18428 = vst [vmem:[#allocation47_spill] sm:$0xff] %v12986_v36  ;;  %9006 = vmatpush1.bf16.msra.mxu1 %v12986_v36  ;;  %v13015_v45 = vpack.c.bf16 %v3472_v3, %v3468_v54  ;;  %v13031_v54 = vpack.c.bf16 %v3470_v17, %v3466_v48  ;;  %v3469_v3 = vld [vmem:[%s18091_s2 + $0x320] sm:$0xff] }
 0x2b6   :  { %v2427_v31 = vpop.f32.mrb[9].mxu1  ;;  %3036 = vrot.lane.b32.xlu1 %v2425_v61, %s11127_s10  ;;  %18429 = vst [vmem:[#allocation48_spill] sm:$0xff] %v12988_v29  ;;  %v3471_v61 = vld [vmem:[%s18091_s2 + $0x330] sm:$0xff]  ;;  %8944 = vmatprep.subr.bf16.mxu0 %v12988_v29 }
 0x2b7   :  { %18431 = vst [vmem:[#allocation50_spill] sm:$0xff] %v13015_v45  ;;  %v13017_v50 = vpack.c.bf16 %v3471_v61, %v3467_v14  ;;  %8946 = vmatpush1.bf16.msra.mxu0 %v13000_v11  ;;  %18433 = vst [vmem:[#allocation52_spill] sm:$0xff] %v13031_v54  ;;  %v13040_v61 = vpack.c.bf16 %v3469_v3, %v3465_v19  ;;  %9008 = vmatprep.subr.bf16.mxu1 %v13015_v45  ;;  %v3480_v19 = vld [vmem:[%s18091_s2 + $0x378] sm:$0xff] }
 0x2b8   :  { %v13011_v40 = vpop.f32.mrb[4].mxu0  ;;  %8948 = vmatprep.subr.bf16.mxu0 %v13031_v54  ;;  %v3474_v54 = vld [vmem:[%s18091_s2 + $0x348] sm:$0xff] }
 0x2b9   :  { %18432 = vst [vmem:[#allocation51_spill] sm:$0xff] %v13017_v50  ;;  %v2431_v9 = vpop.f32.mrb[10].mxu1  ;;  %v13028_v36 = vpop.f32.mrb[5].mxu0  ;;  %18434 = vst [vmem:[#allocation53_spill] sm:$0xff] %v13040_v61  ;;  %9010 = vmatpush1.bf16.msra.mxu1 %v13017_v50  ;;  %v3479_v50 = vld [vmem:[%s18091_s2 + $0x370] sm:$0xff] }
 0x2ba   :  { %v13036_v14 = vpop.f32.mrb[11].mxu1  ;;  %3038 = vrot.lane.b32.xlu1 %v2427_v31, %s11127_s10  ;;  %3042 = vrot.lane.b32.xlu0 %v2431_v9, %s11127_s10  ;;  %v3476_v9 = vld [vmem:[%s18091_s2 + $0x358] sm:$0xff]  ;;  %v3475_v31 = vld [vmem:[%s18091_s2 + $0x350] sm:$0xff] }
 0x2bb   :  { %8950 = vmatpush1.bf16.msra.mxu0 %v13040_v61  ;;  %v13063_v3 = vpack.c.bf16 %v3480_v19, %v3476_v9  ;;  %v13070_v45 = vpack.c.bf16 %v3479_v50, %v3475_v31  ;;  %v13081_v9 = vpack.c.bf16 %v3478_v26, %v3474_v54  ;;  %v3473_v50 = vld [vmem:[%s18091_s2 + $0x340] sm:$0xff]  ;;  %v3484_v54 = vld [vmem:[%s18091_s2 + $0x398] sm:$0xff] }
 0x2bc   :  { %v13044_v29 = vpop.f32.mrb[6].mxu0  ;;  %v3477_v19 = vld [vmem:[%s18091_s2 + $0x360] sm:$0xff] }
 0x2bd   :  { %v2437_v17 = vpop.f32.mrb[12].mxu1  ;;  %v13047_v48 = vpop.f32.mrb[7].mxu0  ;;  %18435 = vst [vmem:[#allocation54_spill] sm:$0xff] %v13063_v3  ;;  %18436 = vst [vmem:[#allocation55_spill] sm:$0xff] %v13070_v45  ;;  %9012 = vmatprep.subr.bf16.mxu1 %v13063_v3  ;;  %v13094_v7 = vpack.c.bf16 %v3477_v19, %v3473_v50  ;;  %8952 = vmatprep.subr.bf16.mxu0 %v13081_v9  ;;  %v3488_v3 = vld [vmem:[%s18091_s2 + $0x3b8] sm:$0xff] }
 0x2be   :  { %v13050_v11 = vpop.f32.mrb[13].mxu1  ;;  %2949 = vrot.lane.b32.xlu0 %v12972_v0, %s11127_s10  ;;  %18437 = vst [vmem:[#allocation56_spill] sm:$0xff] %v13081_v9  ;;  %9014 = vmatpush1.bf16.msra.mxu1 %v13070_v45  ;;  %v13111_v45 = vpack.c.bf16 %v3488_v3, %v3484_v54  ;;  %v3487_v9 = vld [vmem:[%s18091_s2 + $0x3b0] sm:$0xff]  ;;  %v3481_v54 = vld [vmem:[%s18091_s2 + $0x380] sm:$0xff] }
 0x2bf   :  { %18438 = vst [vmem:[#allocation57_spill] sm:$0xff] %v13094_v7  ;;  %8954 = vmatpush1.bf16.msra.mxu0 %v13094_v7  ;;  %v3483_v7 = vld [vmem:[%s18091_s2 + $0x390] sm:$0xff]  ;;  %v13136_v53 = vpack.c.bf16 %v3485_v44, %v3481_v54 }
 0x2c0   :  { %v13068_v61 = vpop.f32.mrb[8].mxu0  ;;  %18439 = vst [vmem:[#allocation58_spill] sm:$0xff] %v13111_v45  ;;  %v13125_v60 = vpack.c.bf16 %v3487_v9, %v3483_v7  ;;  %9016 = vmatprep.subr.bf16.mxu1 %v13111_v45  ;;  %v7866_v7 = vld [vmem:[%s18091_s2 + $0x3c8] sm:$0xff] }
 0x2c1   :  { %v2443_v23 = vpop.f32.mrb[14].mxu1  ;;  %v13078_v42 = vpop.f32.mrb[9].mxu0  ;;  %18442 = vst [vmem:[#allocation61_spill] sm:$0xff] %v13136_v53 }
 0x2c2   :  { %v13089_v31 = vpop.f32.mrb[15].mxu1  ;;  %2957 = vrot.lane.b32.xlu0 %v12882_v55, %s11127_s10  ;;  %v3482_v55 = vld [vmem:[%s18091_s2 + $0x388] sm:$0xff]  ;;  %18440 = vst [vmem:[#allocation59_spill] sm:$0xff] %v13125_v60  ;;  %9018 = vmatpush1.bf16.msra.mxu1 %v13125_v60 }
 0x2c3   :  { %v13127_v3 = vpack.c.bf16 %v3486_v25, %v3482_v55  ;;  %v7870_v25 = vld [vmem:[%s18091_s2 + $0x3e8] sm:$0xff]  ;;  %v7872_v55 = vld [vmem:[%s18091_s2 + $0x3f8] sm:$0xff] }
 0x2c4   :  { %v13097_v26 = vpop.f32.mrb[10].mxu0 }
 0x2c5   :  { %v2449_v50 = vpop.f32.mrb[16].mxu1  ;;  %v13109_v19 = vpop.f32.mrb[11].mxu0  ;;  %18441 = vst [vmem:[#allocation60_spill] sm:$0xff] %v13127_v3  ;;  %8956 = vmatprep.subr.bf16.mxu0 %v13127_v3 }
 0x2c6   :  { %v13122_v15 = vpop.f32.mrb[17].mxu1  ;;  %3048 = vrot.lane.b32.xlu0 %v2437_v17, %s11127_s10  ;;  %v7868_v17 = vld [vmem:[%s18091_s2 + $0x3d8] sm:$0xff]  ;;  %8958 = vmatpush1.bf16.msra.mxu0 %v13136_v53 }
 0x2c7   :  { %v13159_v60 = vpack.c.bf16 %v7872_v55, %v7868_v17 }
 0x2c8   :  { %v2196_v24 = vpop.f32.mrb[88].mxu0 }
 0x2c9   :  { %v2455_v9 = vpop.f32.mrb[18].mxu1  ;;  %v2197_v44 = vpop.f32.mrb[89].mxu0  ;;  %v13150_v24 = vpack.c.bf16 %v7870_v25, %v7866_v7  ;;  %18444 = vst [vmem:[#allocation63_spill] sm:$0xff] %v13159_v60  ;;  %9080 = vmatprep.subr.bf16.mxu1 %v13159_v60 }
 0x2ca   :  { %v13155_v54 = vpop.f32.mrb[19].mxu1  ;;  %2955 = vrot.lane.b32.xlu0 %v13028_v36, %s11127_s10 }
 0x2cb   :  { %18443 = vst [vmem:[#allocation62_spill] sm:$0xff] %v13150_v24  ;;  %9020 = vmatprep.subr.bf16.mxu0 %v13150_v24 }
 0x2cc   :  { %v13162_v45 = vpop.f32.mrb[14].mxu0 }
 0x2cd   :  { %v13165_v44 = vpop.f32.mrb[15].mxu0  ;;  %v2461_v7 = vpop.f32.mrb[84].mxu1 }
 0x2ce   :  { %2963 = vrot.lane.b32.xlu0 %v12905_v22, %s11127_s10  ;;  %3034 = vrot.lane.b32.xlu1 %v13165_v44, %s11127_s10  ;;  %v2462_v25 = vpop.f32.mrb[85].mxu1 }
 0x2d0   :  { %v13171_v53 = vpop.f32.mrb[16].mxu0 }
 0x2d1   :  { %v2465_v17 = vpop.f32.mrb[22].mxu1  ;;  %v13173_v55 = vpop.f32.mrb[17].mxu0 }
 0x2d2   :  { %v13175_v24 = vpop.f32.mrb[23].mxu1  ;;  %3054 = vrot.lane.b32.xlu0 %v2443_v23, %s11127_s10  ;;  %3044 = vrot.lane.b32.xlu1 %v13036_v14, %s11127_s10 }
 0x2d4   :  { %v13180_v7 = vpop.f32.mrb[18].mxu0 }
 0x2d5   :  { %v2471_v60 = vpop.f32.mrb[24].mxu1  ;;  %v13182_v22 = vpop.f32.mrb[19].mxu0 }
 0x2d6   :  { %v13184_v3 = vpop.f32.mrb[25].mxu1  ;;  %2961 = vrot.lane.b32.xlu0 %v13047_v48, %s11127_s10  ;;  %2959 = vrot.lane.b32.xlu1 %v12895_v4, %s11127_s10 }
 0x2d8   :  { %v13190_v25 = vpop.f32.mrb[20].mxu0 }
 0x2d9   :  { %v13192_v39 = vpop.f32.mrb[26].mxu1  ;;  %v13194_v23 = vpop.f32.mrb[21].mxu0 }
 0x2da   :  { %v13196_v14 = vpop.f32.mrb[27].mxu1  ;;  %2969 = vrot.lane.b32.xlu0 %v12933_v52, %s11127_s10  ;;  %3050 = vrot.lane.b32.xlu1 %v13050_v11, %s11127_s10 }
 0x2dc   :  { %v13202_v20 = vpop.f32.mrb[22].mxu0 }
 0x2dd   :  { %v13204_v34 = vpop.f32.mrb[28].mxu1  ;;  %v13206_v62 = vpop.f32.mrb[23].mxu0 }
 0x2de   :  { %v13208_v4 = vpop.f32.mrb[29].mxu1  ;;  %3060 = vrot.lane.b32.xlu0 %v2449_v50, %s11127_s10  ;;  %2965 = vrot.lane.b32.xlu1 %v12908_v28, %s11127_s10 }
 0x2e0   :  { %v13213_v16 = vpop.f32.mrb[24].mxu0 }
 0x2e1   :  { %v13215_v58 = vpop.f32.mrb[30].mxu1  ;;  %v13217_v52 = vpop.f32.mrb[25].mxu0 }
 0x2e2   :  { %v13219_v11 = vpop.f32.mrb[31].mxu1  ;;  %2967 = vrot.lane.b32.xlu0 %v13078_v42, %s11127_s10  ;;  %3056 = vrot.lane.b32.xlu1 %v13089_v31, %s11127_s10 }
 0x2e4   :  { %v2236_v5 = vpop.f32.mrb[90].mxu0 }
 0x2e5   :  { %v13225_v49 = vpop.f32.mrb[32].mxu1  ;;  %v2237_v50 = vpop.f32.mrb[91].mxu0 }
 0x2e6   :  { %v13227_v13 = vpop.f32.mrb[33].mxu1  ;;  %2975 = vrot.lane.b32.xlu0 %v12950_v2, %s11127_s10  ;;  %2971 = vrot.lane.b32.xlu1 %v12938_v33, %s11127_s10 }
 0x2e8   :  { %v13233_v28 = vpop.f32.mrb[28].mxu0 }
 0x2e9   :  { %v13235_v51 = vpop.f32.mrb[29].mxu0  ;;  %v2501_v10 = vpop.f32.mrb[86].mxu1 }
 0x2ea   :  { %3066 = vrot.lane.b32.xlu0 %v2455_v9, %s11127_s10  ;;  %3062 = vrot.lane.b32.xlu1 %v13122_v15, %s11127_s10  ;;  %v2502_v5 = vpop.f32.mrb[87].mxu1 }
 0x2ec   :  { %v13240_v31 = vpop.f32.mrb[30].mxu0 }
 0x2ed   :  { %18445 = vst [vmem:[#allocation64_spill] sm:$0xff] %v13240_v31  ;;  %v2505_v50 = vpop.f32.mrb[36].mxu1  ;;  %v13242_v35 = vpop.f32.mrb[31].mxu0  ;;  %v7885_v31 = vld [vmem:[%s18091_s2 + $0x460] sm:$0xff] }
 0x2ee   :  { %v2507_v2 = vpop.f32.mrb[37].mxu1  ;;  %2973 = vrot.lane.b32.xlu0 %v13109_v19, %s11127_s10  ;;  %2977 = vrot.lane.b32.xlu1 %v12953_v37, %s11127_s10 }
 0x2f0   :  { %v13248_v33 = vpop.f32.mrb[32].mxu0 }
 0x2f1   :  { %18446 = vst [vmem:[#allocation65_spill] sm:$0xff] %v13248_v33  ;;  %v2511_v10 = vpop.f32.mrb[38].mxu1  ;;  %v13250_v9 = vpop.f32.mrb[33].mxu0 }
 0x2f2   :  { %v2513_v47 = vpop.f32.mrb[39].mxu1  ;;  %3173 = vrot.lane.b32.xlu0 %v2465_v17, %s11127_s10  ;;  %3068 = vrot.lane.b32.xlu1 %v13155_v54, %s11127_s10 }
 0x2f4   :  { %v13255_v15 = vpop.f32.mrb[34].mxu0 }
 0x2f5   :  { %18447 = vst [vmem:[#allocation66_spill] sm:$0xff] %v13255_v15  ;;  %v2517_v5 = vpop.f32.mrb[40].mxu1  ;;  %v13257_v41 = vpop.f32.mrb[35].mxu0 }
 0x2f6   :  { %18448 = vst [vmem:[#allocation67_spill] sm:$0xff] %v13257_v41  ;;  %v2519_v46 = vpop.f32.mrb[41].mxu1  ;;  %3171 = vrot.lane.b32.xlu0 %v13235_v51, %s11127_s10  ;;  %3040 = vrot.lane.b32.xlu1 %v13173_v55, %s11127_s10 }
 0x2f8   :  { %v13263_v37 = vpop.f32.mrb[36].mxu0 }
 0x2f9   :  { %18449 = vst [vmem:[#allocation68_spill] sm:$0xff] %v13263_v37  ;;  %v2523_v21 = vpop.f32.mrb[42].mxu1  ;;  %v13265_v30 = vpop.f32.mrb[37].mxu0 }
 0x2fa   :  { %18450 = vst [vmem:[#allocation69_spill] sm:$0xff] %v13265_v30  ;;  %v2525_v17 = vpop.f32.mrb[43].mxu1  ;;  %3263 = vrot.lane.b32.xlu0 %v2505_v50, %s11127_s10  ;;  %3046 = vrot.lane.b32.xlu1 %v13182_v22, %s11127_s10 }
 0x2fc   :  { %v13270_v54 = vpop.f32.mrb[38].mxu0 }
 0x2fd   :  { %18451 = vst [vmem:[#allocation70_spill] sm:$0xff] %v13270_v54  ;;  %v2529_v18 = vpop.f32.mrb[44].mxu1  ;;  %v13272_v27 = vpop.f32.mrb[39].mxu0 }
 0x2fe   :  { %18452 = vst [vmem:[#allocation71_spill] sm:$0xff] %v13272_v27  ;;  %v13274_v1 = vpop.f32.mrb[45].mxu1  ;;  %3179 = vrot.lane.b32.xlu0 %v2471_v60, %s11127_s10  ;;  %3052 = vrot.lane.b32.xlu1 %v13194_v23, %s11127_s10 }
 0x300   :  { %v2276_v8 = vpop.f32.mrb[92].mxu0 }
 0x301   :  { %v2535_v63 = vpop.f32.mrb[46].mxu1  ;;  %v2277_v6 = vpop.f32.mrb[93].mxu0 }
 0x302   :  { %v13279_v12 = vpop.f32.mrb[47].mxu1  ;;  %3269 = vrot.lane.b32.xlu0 %v2511_v10, %s11127_s10  ;;  %3058 = vrot.lane.b32.xlu1 %v13206_v62, %s11127_s10 }
 0x304   :  { %v13284_v50 = vpop.f32.mrb[42].mxu0 }
 0x305   :  { %v13286_v59 = vpop.f32.mrb[43].mxu0 }
 0x306   :  { %3177 = vrot.lane.b32.xlu0 %v13242_v35, %s11127_s10  ;;  %3064 = vrot.lane.b32.xlu1 %v13217_v52, %s11127_s10 }
 0x308   :  { %v13292_v8 = vpop.f32.mrb[44].mxu0 }
 0x309   :  { %18453 = vst [vmem:[#allocation72_spill] sm:$0xff] %v13292_v8  ;;  %v13294_v6 = vpop.f32.mrb[45].mxu0  ;;  %v7877_v8 = vld [vmem:[%s18091_s2 + $0x420] sm:$0xff] }
 0x30a   :  { %3185 = vrot.lane.b32.xlu0 %v13192_v39, %s11127_s10  ;;  %3175 = vrot.lane.b32.xlu1 %v13175_v24, %s11127_s10 }
 0x30c   :  { %v13300_v60 = vpop.f32.mrb[46].mxu0 }
 0x30d   :  { %18454 = vst [vmem:[#allocation73_spill] sm:$0xff] %v13300_v60  ;;  %v13302_v10 = vpop.f32.mrb[47].mxu0 }
 0x30e   :  { %3275 = vrot.lane.b32.xlu0 %v2517_v5, %s11127_s10  ;;  %3181 = vrot.lane.b32.xlu1 %v13184_v3, %s11127_s10  ;;  %v2946_v3 = vpop.permute.xlu0 %2945 }
 0x310   :  { %v13307_v56 = vpop.f32.mrb[48].mxu0 }
 0x311   :  { %18455 = vst [vmem:[#allocation74_spill] sm:$0xff] %v13307_v56  ;;  %v13309_v57 = vpop.f32.mrb[49].mxu0 }
 0x312   :  { %18456 = vst [vmem:[#allocation75_spill] sm:$0xff] %v13309_v57  ;;  %3183 = vrot.lane.b32.xlu0 %v13250_v9, %s11127_s10  ;;  %3265 = vrot.lane.b32.xlu1 %v2507_v2, %s11127_s10  ;;  %v2948_v2 = vpop.permute.xlu0 %2947 }
 0x314   :  { %v13314_v39 = vpop.f32.mrb[50].mxu0 }
 0x315   :  { %18457 = vst [vmem:[#allocation76_spill] sm:$0xff] %v13314_v39  ;;  %v13316_v24 = vpop.f32.mrb[51].mxu0 }
 0x316   :  { %18458 = vst [vmem:[#allocation77_spill] sm:$0xff] %v13316_v24  ;;  %3191 = vrot.lane.b32.xlu0 %v13204_v34, %s11127_s10  ;;  %3261 = vrot.lane.b32.xlu1 %v13286_v59, %s11127_s10  ;;  %v3119_v34 = vlaneseq  ;;  %v13335_v39 = vpop.permute.xlu0 %2951 }
 0x318   :  { %v13322_v5 = vpop.f32.mrb[52].mxu0 }
 0x319   :  { %18459 = vst [vmem:[#allocation78_spill] sm:$0xff] %v13322_v5  ;;  %v13324_v54 = vpop.f32.mrb[53].mxu0  ;;  %v2954_v5 = vpop.permute.xlu1 %2953 }
 0x31a   :  { %18460 = vst [vmem:[#allocation79_spill] sm:$0xff] %v13324_v54  ;;  %3281 = vrot.lane.b32.xlu0 %v2523_v21, %s11127_s10  ;;  %3271 = vrot.lane.b32.xlu1 %v2513_v47, %s11127_s10  ;;  %v13340_v21 = vshrl.u32 %v3119_v34, 7 }
 0x31c   :  { %18461 = vst [vmem:[#allocation80_spill] sm:$0xff] %v13340_v21 }
 0x31e   :  { %3189 = vrot.lane.b32.xlu0 %v13257_v41, %s11127_s10  ;;  %3187 = vrot.lane.b32.xlu1 %v13196_v14, %s11127_s10 }
 0x322   :  { %3197 = vrot.lane.b32.xlu0 %v13215_v58, %s11127_s10  ;;  %3277 = vrot.lane.b32.xlu1 %v2519_v46, %s11127_s10  ;;  %v13346_v46 = vsub.s32 1, %v13340_v21  ;;  %v2981_v58 = vsel %vm2979_vm4, %v2946_v3, %v2948_v2 }
 0x323   :  { %v3005_v56 = vmax.f32 %v12957_v38, %v2981_v58 }
 0x324   :  { %v2944_v47 = vpop.permute.xlu0 %2943  ;;  %18462 = vst [vmem:[#allocation81_spill] sm:$0xff] %v13346_v46 }
 0x326   :  { %3287 = vrot.lane.b32.xlu0 %v2529_v18, %s11127_s10  ;;  %3193 = vrot.lane.b32.xlu1 %v13208_v4, %s11127_s10  ;;  %v2924_v18 = vld [vmem:[%s18092_s5] sm:$0x3] }
 0x327   :  { %v13357_v15 = vrot.slane %v2924_v18, %v13346_v46 }
 0x328   :  { %v3037_v37 = vpop.permute.xlu1 %3036 }
 0x32a   :  { %3195 = vrot.lane.b32.xlu0 %v13265_v30, %s11127_s10  ;;  %3283 = vrot.lane.b32.xlu1 %v2525_v17, %s11127_s10  ;;  %v7909_v30 = vld [vmem:[%s18091_s2 + $0x520] sm:$0xff] }
 0x32c   :  { %v3039_v14 = vpop.permute.xlu1 %3038  ;;  %v13352_v4 = vpop.permute.xlu0 %3042 }
 0x32d   :  { %v3071_v34 = vsel %vm2979_vm4, %v3037_v37, %v3039_v14 }
 0x32e   :  { %v3095_v17 = vmax.f32 %v13165_v44, %v3071_v34  ;;  %3203 = vrot.lane.b32.xlu0 %v13225_v49, %s11127_s10  ;;  %3199 = vrot.lane.b32.xlu1 %v13219_v11, %s11127_s10  ;;  %v2980_v49 = vsel %vm2979_vm4, %v2944_v47, %v2946_v3  ;;  %v2983_v34 = vsel %vm2979_vm4, %v13335_v39, %v2954_v5  ;;  %v7865_v3 = vld [vmem:[%s18091_s2 + $0x3c0] sm:$0xff]  ;;  %v7871_v5 = vld [vmem:[%s18091_s2 + $0x3f0] sm:$0xff] }
 0x32f   :  { %v3004_v58 = vmax.f32 %v12955_v32, %v2980_v49  ;;  %v7869_v32 = vld [vmem:[%s18091_s2 + $0x3e0] sm:$0xff]  ;;  %v7878_v49 = vld [vmem:[%s18091_s2 + $0x428] sm:$0xff] }
 0x330   :  { %v3107_v2 = vmax.f32 %v3005_v56, %v3095_v17  ;;  %v13364_v60 = vpop.permute.xlu0 %2949 }
 0x332   :  { %v3130_v33 = vadd.f32 %v13357_v15, %v3107_v2  ;;  %3293 = vrot.lane.b32.xlu0 %v2535_v63, %s11127_s10  ;;  %3289 = vrot.lane.b32.xlu1 %v13274_v1, %s11127_s10  ;;  %v13389_v1 = vsub.s32 0, %v13340_v21  ;;  %v7874_v2 = vld [vmem:[%s18091_s2 + $0x408] sm:$0xff]  ;;  %v13439_v21 = vpack.c.bf16 %v7869_v32, %v7865_v3  ;;  %v7875_v3 = vld [vmem:[%s18091_s2 + $0x410] sm:$0xff] }
 0x333   :  { %v13450_v46 = vpack.c.bf16 %v7878_v49, %v7874_v2  ;;  %v7879_v32 = vld [vmem:[%s18091_s2 + $0x430] sm:$0xff]  ;;  %v7886_v2 = vld [vmem:[%s18091_s2 + $0x468] sm:$0xff] }
 0x334   :  { %v13370_v38 = vmax.f32 %v3130_v33, 0.0  ;;  %v13372_v44 = vpop.permute.xlu0 %2957  ;;  %18463 = vst [vmem:[#allocation82_spill] sm:$0xff] %v13389_v1  ;;  %v13399_v14 = vrot.slane %v2924_v18, %v13389_v1  ;;  %18464 = vst [vmem:[#allocation83_spill] sm:$0xff] %v13439_v21 }
 0x335   :  { %18466 = vst [vmem:[#allocation85_spill] sm:$0xff] %v13450_v46 }
 0x336   :  { %7853 = vmatprep.mubr.msk.f32.mxu0 %vm3489_vm5, %v13370_v38  ;;  %7859 = vmatprep.mubr.msk.f32.mxu1 %vm3489_vm5, %v13370_v38 }
 0x337   :  { %3201 = vrot.lane.b32.xlu0 %v13272_v27, %s11127_s10  ;;  %3205 = vrot.lane.b32.xlu1 %v13227_v13, %s11127_s10 }
 0x338   :  { %v13382_v56 = vpop.permute.xlu0 %3048 }
 0x33b   :  { %3295 = vrot.lane.b32.xlu1 %v13279_v12, %s11127_s10 }
 0x33c   :  { %v13386_v63 = vpop.permute.xlu0 %2955 }
 0x33f   :  { %3267 = vrot.lane.b32.xlu1 %v13294_v6, %s11127_s10 }
 0x340   :  { %v13394_v11 = vpop.permute.xlu0 %2963  ;;  %v3035_v33 = vpop.permute.xlu1 %3034 }
 0x341   :  { %v3070_v13 = vsel %vm2979_vm4, %v3035_v33, %v3037_v37  ;;  %v3007_v33 = vmax.f32 %v12972_v0, %v2983_v34  ;;  %v7873_v0 = vld [vmem:[%s18091_s2 + $0x400] sm:$0xff] }
 0x342   :  { %v3094_v12 = vmax.f32 %v13162_v45, %v3070_v13  ;;  %v7867_v45 = vld [vmem:[%s18091_s2 + $0x3d0] sm:$0xff] }
 0x343   :  { %3273 = vrot.lane.b32.xlu1 %v13302_v10, %s11127_s10  ;;  %v13441_v1 = vpack.c.bf16 %v7871_v5, %v7867_v45  ;;  %v7882_v5 = vld [vmem:[%s18091_s2 + $0x448] sm:$0xff] }
 0x344   :  { %v3106_v47 = vmax.f32 %v3004_v58, %v3094_v12  ;;  %v13409_v17 = vpop.permute.xlu0 %3054  ;;  %v3045_v37 = vpop.permute.xlu1 %3044  ;;  %v7876_v12 = vld [vmem:[%s18091_s2 + $0x418] sm:$0xff] }
 0x345   :  { %v3073_v18 = vsel %vm2979_vm4, %v13352_v4, %v3045_v37  ;;  %v7880_v37 = vld [vmem:[%s18091_s2 + $0x438] sm:$0xff]  ;;  %18465 = vst [vmem:[#allocation84_spill] sm:$0xff] %v13441_v1 }
 0x346   :  { %v3129_v13 = vadd.f32 %v13399_v14, %v3106_v47  ;;  %v3097_v58 = vmax.f32 %v13173_v55, %v3073_v18  ;;  %v13461_v45 = vpack.c.bf16 %v7880_v37, %v7876_v12  ;;  %v13482_v12 = vpack.c.bf16 %v7877_v8, %v7873_v0  ;;  %v7883_v0 = vld [vmem:[%s18091_s2 + $0x450] sm:$0xff] }
 0x347   :  { %3279 = vrot.lane.b32.xlu1 %v13309_v57, %s11127_s10  ;;  %v13484_v37 = vpack.c.bf16 %v7879_v32, %v7875_v3  ;;  %v13499_v8 = vpack.c.bf16 %v7886_v2, %v7882_v5  ;;  %v7887_v3 = vld [vmem:[%s18091_s2 + $0x470] sm:$0xff]  ;;  %v7890_v32 = vld [vmem:[%s18091_s2 + $0x488] sm:$0xff]  ;;  %v7892_v2 = vld [vmem:[%s18091_s2 + $0x498] sm:$0xff] }
 0x348   :  { %v13446_v55 = vmax.f32 %v3129_v13, 0.0  ;;  %v3109_v34 = vmax.f32 %v3007_v33, %v3097_v58  ;;  %v13448_v47 = vpop.permute.xlu0 %2961  ;;  %v2960_v18 = vpop.permute.xlu1 %2959  ;;  %18467 = vst [vmem:[#allocation86_spill] sm:$0xff] %v13461_v45  ;;  %v7884_v33 = vld [vmem:[%s18091_s2 + $0x458] sm:$0xff]  ;;  %18468 = vst [vmem:[#allocation87_spill] sm:$0xff] %v13482_v12  ;;  %v7894_v5 = vld [vmem:[%s18091_s2 + $0x4a8] sm:$0xff] }
 0x349   :  { %v7888_v13 = vld [vmem:[%s18091_s2 + $0x478] sm:$0xff]  ;;  %v2985_v58 = vsel %vm2979_vm4, %v13372_v44, %v2960_v18  ;;  %18469 = vst [vmem:[#allocation88_spill] sm:$0xff] %v13484_v37  ;;  %18470 = vst [vmem:[#allocation89_spill] sm:$0xff] %v13499_v8 }
 0x34a   :  { %v3132_v49 = vadd.f32 %v13357_v15, %v3109_v34  ;;  %3573 = vmatmul.mubr.f32.vlgmr.msra.gmra.mrb[94].mxu0 %v13446_v55  ;;  %3670 = vmatmul.mubr.f32.vlgmr.msra.gmra.mrb[88].mxu1 %v13446_v55  ;;  %v7881_v34 = vld [vmem:[%s18091_s2 + $0x440] sm:$0xff] }
 0x34b   :  { %9022 = vmatpush1.bf16.msra.mxu0 %v13439_v21  ;;  %9082 = vmatpush1.bf16.msra.mxu1 %v13441_v1  ;;  %v7896_v21 = vld [vmem:[%s18091_s2 + $0x4b8] sm:$0xff] }
 0x34c   :  { %v13492_v27 = vmax.f32 %v3132_v49, 0.0  ;;  %3285 = vrot.lane.b32.xlu1 %v13316_v24, %s11127_s10  ;;  %v13496_v18 = vpop.permute.xlu0 %2969  ;;  %v3051_v1 = vpop.permute.xlu1 %3050  ;;  %9024 = vmatprep.subr.bf16.mxu0 %v13450_v46  ;;  %v13513_v46 = vpack.c.bf16 %v7888_v13, %v7884_v33  ;;  %v3009_v24 = vmax.f32 %v13028_v36, %v2985_v58  ;;  %v13532_v33 = vpack.c.bf16 %v7885_v31, %v7881_v34  ;;  %v7889_v36 = vld [vmem:[%s18091_s2 + $0x480] sm:$0xff] }
 0x34d   :  { %v3075_v49 = vsel %vm2979_vm4, %v13382_v56, %v3051_v1  ;;  %9084 = vmatprep.subr.bf16.mxu1 %v13461_v45  ;;  %v13534_v13 = vpack.c.bf16 %v7887_v3, %v7883_v0  ;;  %v13549_v31 = vpack.c.bf16 %v7894_v5, %v7890_v32  ;;  %v13551_v34 = vpack.c.bf16 %v7896_v21, %v7892_v2  ;;  %v7891_v0 = vld [vmem:[%s18091_s2 + $0x490] sm:$0xff]  ;;  %v7898_v3 = vld [vmem:[%s18091_s2 + $0x4c8] sm:$0xff]  ;;  %v7900_v21 = vld [vmem:[%s18091_s2 + $0x4d8] sm:$0xff] }
 0x34e   :  { %18471 = vst [vmem:[#allocation90_spill] sm:$0xff] %v13513_v46  ;;  %v3099_v1 = vmax.f32 %v13182_v22, %v3075_v49  ;;  %7854 = vmatprep.mubr.msk.f32.mxu0 %vm3489_vm5, %v13492_v27  ;;  %7860 = vmatprep.mubr.msk.f32.mxu1 %vm3489_vm5, %v13492_v27  ;;  %18472 = vst [vmem:[#allocation91_spill] sm:$0xff] %v13532_v33  ;;  %v7893_v22 = vld [vmem:[%s18091_s2 + $0x4a0] sm:$0xff]  ;;  %v7902_v32 = vld [vmem:[%s18091_s2 + $0x4e8] sm:$0xff] }
 0x34f   :  { %9026 = vmatpush1.bf16.msra.mxu0 %v13482_v12  ;;  %9086 = vmatpush1.bf16.msra.mxu1 %v13484_v37  ;;  %18473 = vst [vmem:[#allocation92_spill] sm:$0xff] %v13534_v13  ;;  %18474 = vst [vmem:[#allocation93_spill] sm:$0xff] %v13549_v31  ;;  %v7904_v5 = vld [vmem:[%s18091_s2 + $0x4f8] sm:$0xff]  ;;  %v7901_v12 = vld [vmem:[%s18091_s2 + $0x4e0] sm:$0xff] }
 0x350   :  { %v13542_v58 = vmax.f32 %v3009_v24, %v3099_v1  ;;  %3291 = vrot.lane.b32.xlu1 %v13324_v54, %s11127_s10  ;;  %v13546_v49 = vpop.permute.xlu0 %3060  ;;  %v2966_v37 = vpop.permute.xlu1 %2965  ;;  %9028 = vmatprep.subr.bf16.mxu0 %v13499_v8  ;;  %18475 = vst [vmem:[#allocation94_spill] sm:$0xff] %v13551_v34  ;;  %v7895_v24 = vld [vmem:[%s18091_s2 + $0x4b0] sm:$0xff]  ;;  %v13576_v1 = vpack.c.bf16 %v7893_v22, %v7889_v36  ;;  %v7897_v8 = vld [vmem:[%s18091_s2 + $0x4c0] sm:$0xff] }
 0x351   :  { %9088 = vmatprep.subr.bf16.mxu1 %v13513_v46  ;;  %v2987_v2 = vsel %vm2979_vm4, %v13394_v11, %v2966_v37  ;;  %v13578_v46 = vpack.c.bf16 %v7895_v24, %v7891_v0  ;;  %v13590_v37 = vpack.c.bf16 %v7902_v32, %v7898_v3  ;;  %v13592_v36 = vpack.c.bf16 %v7904_v5, %v7900_v21  ;;  %v7899_v22 = vld [vmem:[%s18091_s2 + $0x4d0] sm:$0xff]  ;;  %v7906_v24 = vld [vmem:[%s18091_s2 + $0x508] sm:$0xff]  ;;  %v7908_v32 = vld [vmem:[%s18091_s2 + $0x518] sm:$0xff] }
 0x352   :  { %18476 = vst [vmem:[#allocation95_spill] sm:$0xff] %v13576_v1  ;;  %v7903_v0 = vld [vmem:[%s18091_s2 + $0x4f0] sm:$0xff]  ;;  %v7910_v3 = vld [vmem:[%s18091_s2 + $0x528] sm:$0xff]  ;;  %v7912_v21 = vld [vmem:[%s18091_s2 + $0x538] sm:$0xff]  ;;  %v3011_v5 = vmax.f32 %v13047_v48, %v2987_v2 }
 0x353   :  { %9030 = vmatpush1.bf16.msra.mxu0 %v13532_v33  ;;  %9090 = vmatpush1.bf16.msra.mxu1 %v13534_v13  ;;  %18477 = vst [vmem:[#allocation96_spill] sm:$0xff] %v13578_v46  ;;  %18478 = vst [vmem:[#allocation97_spill] sm:$0xff] %v13590_v37  ;;  %v13620_v13 = vpack.c.bf16 %v7903_v0, %v7899_v22  ;;  %v7905_v33 = vld [vmem:[%s18091_s2 + $0x500] sm:$0xff]  ;;  %v7914_v2 = vld [vmem:[%s18091_s2 + $0x548] sm:$0xff] }
 0x354   :  { %v13586_v45 = vpop.permute.xlu0 %2967  ;;  %v3057_v54 = vpop.permute.xlu1 %3056  ;;  %9032 = vmatprep.subr.bf16.mxu0 %v13549_v31  ;;  %9092 = vmatprep.subr.bf16.mxu1 %v13551_v34  ;;  %18479 = vst [vmem:[#allocation98_spill] sm:$0xff] %v13592_v36  ;;  %v7918_v22 = vld [vmem:[%s18091_s2 + $0x568] sm:$0xff]  ;;  %v7916_v0 = vld [vmem:[%s18091_s2 + $0x558] sm:$0xff] }
 0x355   :  { %v3077_v31 = vsel %vm2979_vm4, %v13409_v17, %v3057_v54  ;;  %v13618_v54 = vpack.c.bf16 %v7901_v12, %v7897_v8  ;;  %18481 = vst [vmem:[#allocation100_spill] sm:$0xff] %v13620_v13  ;;  %v13634_v12 = vpack.c.bf16 %v7910_v3, %v7906_v24  ;;  %v13636_v8 = vpack.c.bf16 %v7912_v21, %v7908_v32  ;;  %v7920_v24 = vld [vmem:[%s18091_s2 + $0x578] sm:$0xff] }
 0x356   :  { %v3101_v34 = vmax.f32 %v13194_v23, %v3077_v31  ;;  %v7907_v31 = vld [vmem:[%s18091_s2 + $0x510] sm:$0xff]  ;;  %v13660_v32 = vpack.c.bf16 %v7909_v30, %v7905_v33  ;;  %v13676_v30 = vpack.c.bf16 %v7920_v24, %v7916_v0  ;;  %v7928_v0 = vld [vmem:[%s18091_s2 + $0x5b8] sm:$0xff] }
 0x357   :  { %9034 = vmatpush1.bf16.msra.mxu0 %v13576_v1  ;;  %9094 = vmatpush1.bf16.msra.mxu1 %v13578_v46  ;;  %18480 = vst [vmem:[#allocation99_spill] sm:$0xff] %v13618_v54  ;;  %18482 = vst [vmem:[#allocation101_spill] sm:$0xff] %v13634_v12  ;;  %v7915_v33 = vld [vmem:[%s18091_s2 + $0x550] sm:$0xff]  ;;  %v7925_v1 = vld [vmem:[%s18091_s2 + $0x5a0] sm:$0xff] }
 0x358   :  { %v13628_v57 = vmax.f32 %v3011_v5, %v3101_v34  ;;  %v13630_v48 = vpop.permute.xlu0 %2975  ;;  %v2972_v23 = vpop.permute.xlu1 %2971  ;;  %9036 = vmatprep.subr.bf16.mxu0 %v13590_v37  ;;  %9096 = vmatprep.subr.bf16.mxu1 %v13592_v36  ;;  %18483 = vst [vmem:[#allocation102_spill] sm:$0xff] %v13636_v8  ;;  %v7911_v34 = vld [vmem:[%s18091_s2 + $0x530] sm:$0xff]  ;;  %18484 = vst [vmem:[#allocation103_spill] sm:$0xff] %v13660_v32  ;;  %v7913_v5 = vld [vmem:[%s18091_s2 + $0x540] sm:$0xff] }
 0x359   :  { %v2989_v3 = vsel %vm2979_vm4, %v13496_v18, %v2972_v23  ;;  %v13662_v21 = vpack.c.bf16 %v7911_v34, %v7907_v31  ;;  %v7917_v36 = vld [vmem:[%s18091_s2 + $0x560] sm:$0xff]  ;;  %v13674_v23 = vpack.c.bf16 %v7918_v22, %v7914_v2  ;;  %18487 = vst [vmem:[#allocation106_spill] sm:$0xff] %v13676_v30  ;;  %v7919_v31 = vld [vmem:[%s18091_s2 + $0x570] sm:$0xff]  ;;  %v7922_v34 = vld [vmem:[%s18091_s2 + $0x588] sm:$0xff] }
 0x35a   :  { %v7926_v2 = vld [vmem:[%s18091_s2 + $0x5a8] sm:$0xff]  ;;  %v7924_v22 = vld [vmem:[%s18091_s2 + $0x598] sm:$0xff]  ;;  %v3013_v24 = vmax.f32 %v13078_v42, %v2989_v3  ;;  %v7923_v3 = vld [vmem:[%s18091_s2 + $0x590] sm:$0xff] }
 0x35b   :  { %9038 = vmatpush1.bf16.msra.mxu0 %v13618_v54  ;;  %9098 = vmatpush1.bf16.msra.mxu1 %v13620_v13  ;;  %18485 = vst [vmem:[#allocation104_spill] sm:$0xff] %v13662_v21  ;;  %18486 = vst [vmem:[#allocation105_spill] sm:$0xff] %v13674_v23  ;;  %v13704_v13 = vpack.c.bf16 %v7919_v31, %v7915_v33  ;;  %v7921_v54 = vld [vmem:[%s18091_s2 + $0x580] sm:$0xff]  ;;  %v7934_v33 = vld [vmem:[%s18091_s2 + $0x5e8] sm:$0xff] }
 0x35c   :  { %v13670_v37 = vpop.permute.xlu0 %3066  ;;  %v3063_v46 = vpop.permute.xlu1 %3062  ;;  %9040 = vmatprep.subr.bf16.mxu0 %v13634_v12  ;;  %9100 = vmatprep.subr.bf16.mxu1 %v13636_v8  ;;  %v7932_v31 = vld [vmem:[%s18091_s2 + $0x5d8] sm:$0xff] }
 0x35d   :  { %v3079_v12 = vsel %vm2979_vm4, %v13546_v49, %v3063_v46  ;;  %v13702_v46 = vpack.c.bf16 %v7917_v36, %v7913_v5  ;;  %18489 = vst [vmem:[#allocation108_spill] sm:$0xff] %v13704_v13  ;;  %v13718_v36 = vpack.c.bf16 %v7926_v2, %v7922_v34  ;;  %v7930_v5 = vld [vmem:[%s18091_s2 + $0x5c8] sm:$0xff]  ;;  %v7936_v34 = vld [vmem:[%s18091_s2 + $0x5f8] sm:$0xff] }
 0x35e   :  { %v3103_v8 = vmax.f32 %v13206_v62, %v3079_v12  ;;  %v13720_v12 = vpack.c.bf16 %v7928_v0, %v7924_v22  ;;  %v13744_v22 = vpack.c.bf16 %v7925_v1, %v7921_v54  ;;  %v13760_v1 = vpack.c.bf16 %v7936_v34, %v7932_v31  ;;  %v7931_v54 = vld [vmem:[%s18091_s2 + $0x5d0] sm:$0xff]  ;;  %v7944_v31 = vld [vmem:[%s18091_s2 + $0x638] sm:$0xff] }
 0x35f   :  { %9042 = vmatpush1.bf16.msra.mxu0 %v13660_v32  ;;  %9102 = vmatpush1.bf16.msra.mxu1 %v13662_v21  ;;  %18488 = vst [vmem:[#allocation107_spill] sm:$0xff] %v13702_v46  ;;  %18490 = vst [vmem:[#allocation109_spill] sm:$0xff] %v13718_v36  ;;  %v7937_v32 = vld [vmem:[%s18091_s2 + $0x600] sm:$0xff] }
 0x360   :  { %v13712_v41 = vmax.f32 %v3013_v24, %v3103_v8  ;;  %v13714_v42 = vpop.permute.xlu0 %2973  ;;  %v2978_v62 = vpop.permute.xlu1 %2977  ;;  %9044 = vmatprep.subr.bf16.mxu0 %v13674_v23  ;;  %9104 = vmatprep.subr.bf16.mxu1 %v13676_v30  ;;  %18491 = vst [vmem:[#allocation110_spill] sm:$0xff] %v13720_v12  ;;  %v7927_v8 = vld [vmem:[%s18091_s2 + $0x5b0] sm:$0xff]  ;;  %v7929_v24 = vld [vmem:[%s18091_s2 + $0x5c0] sm:$0xff]  ;;  %18493 = vst [vmem:[#allocation112_spill] sm:$0xff] %v13760_v1 }
 0x361   :  { %v2991_v2 = vsel %vm2979_vm4, %v13630_v48, %v2978_v62  ;;  %v13746_v0 = vpack.c.bf16 %v7927_v8, %v7923_v3  ;;  %v7933_v30 = vld [vmem:[%s18091_s2 + $0x5e0] sm:$0xff]  ;;  %v13758_v62 = vpack.c.bf16 %v7934_v33, %v7930_v5  ;;  %v7935_v3 = vld [vmem:[%s18091_s2 + $0x5f0] sm:$0xff]  ;;  %v7938_v8 = vld [vmem:[%s18091_s2 + $0x608] sm:$0xff] }
 0x362   :  { %v7942_v5 = vld [vmem:[%s18091_s2 + $0x628] sm:$0xff]  ;;  %v7940_v33 = vld [vmem:[%s18091_s2 + $0x618] sm:$0xff]  ;;  %v3015_v34 = vmax.f32 %v13109_v19, %v2991_v2  ;;  %v7941_v19 = vld [vmem:[%s18091_s2 + $0x620] sm:$0xff] }
 0x363   :  { %9046 = vmatpush1.bf16.msra.mxu0 %v13702_v46  ;;  %9106 = vmatpush1.bf16.msra.mxu1 %v13704_v13  ;;  %18492 = vst [vmem:[#allocation111_spill] sm:$0xff] %v13758_v62  ;;  %v13789_v13 = vpack.c.bf16 %v7933_v30, %v7929_v24  ;;  %v13791_v46 = vpack.c.bf16 %v7935_v3, %v7931_v54  ;;  %v7939_v2 = vld [vmem:[%s18091_s2 + $0x610] sm:$0xff]  ;;  %v7946_v24 = vld [vmem:[%s18091_s2 + $0x648] sm:$0xff] }
 0x364   :  { %v13754_v23 = vpop.permute.xlu0 %3173  ;;  %v3069_v21 = vpop.permute.xlu1 %3068  ;;  %9048 = vmatprep.subr.bf16.mxu0 %v13718_v36  ;;  %9108 = vmatprep.subr.bf16.mxu1 %v13720_v12  ;;  %v13807_v30 = vpack.c.bf16 %v7944_v31, %v7940_v33  ;;  %v7950_v3 = vld [vmem:[%s18091_s2 + $0x668] sm:$0xff]  ;;  %v2984_v31 = vsel %vm2979_vm4, %v13386_v63, %v13372_v44  ;;  %v7949_v63 = vld [vmem:[%s18091_s2 + $0x660] sm:$0xff] }
 0x365   :  { %v3081_v36 = vsel %vm2979_vm4, %v13670_v37, %v3069_v21  ;;  %v2982_v21 = vsel %vm2979_vm4, %v13364_v60, %v13335_v39  ;;  %v13805_v39 = vpack.c.bf16 %v7942_v5, %v7938_v8  ;;  %v7948_v8 = vld [vmem:[%s18091_s2 + $0x658] sm:$0xff] }
 0x366   :  { %v3105_v12 = vmax.f32 %v13217_v52, %v3081_v36  ;;  %v7952_v5 = vld [vmem:[%s18091_s2 + $0x678] sm:$0xff]  ;;  %v3006_v33 = vmax.f32 %v12961_v43, %v2982_v21 }
 0x367   :  { %9050 = vmatpush1.bf16.msra.mxu0 %v13744_v22  ;;  %9110 = vmatpush1.bf16.msra.mxu1 %v13746_v0  ;;  %v13849_v44 = vpack.c.bf16 %v7952_v5, %v7948_v8  ;;  %v3134_v8 = vadd.f32 %v13357_v15, %v13542_v58  ;;  %v7957_v58 = vld [vmem:[%s18091_s2 + $0x6a0] sm:$0xff] }
 0x368   :  { %v13799_v52 = vmax.f32 %v3015_v34, %v3105_v12  ;;  %v13801_v36 = vpop.permute.xlu0 %3171  ;;  %v3041_v60 = vpop.permute.xlu1 %3040  ;;  %9052 = vmatprep.subr.bf16.mxu0 %v13758_v62  ;;  %9112 = vmatprep.subr.bf16.mxu1 %v13760_v1  ;;  %v7943_v12 = vld [vmem:[%s18091_s2 + $0x630] sm:$0xff]  ;;  %v13836_v34 = vpack.c.bf16 %v7941_v19, %v7937_v32  ;;  %v7945_v1 = vld [vmem:[%s18091_s2 + $0x640] sm:$0xff] }
 0x369   :  { %v3072_v54 = vsel %vm2979_vm4, %v3041_v60, %v13352_v4  ;;  %v13838_v60 = vpack.c.bf16 %v7943_v12, %v7939_v2  ;;  %18495 = vst [vmem:[#allocation114_spill] sm:$0xff] %v13849_v44  ;;  %v7947_v32 = vld [vmem:[%s18091_s2 + $0x650] sm:$0xff]  ;;  %v3008_v2 = vmax.f32 %v13011_v40, %v2984_v31 }
 0x36a   :  { %v3096_v4 = vmax.f32 %v13171_v53, %v3072_v54  ;;  %v13847_v53 = vpack.c.bf16 %v7950_v3, %v7946_v24  ;;  %v7951_v19 = vld [vmem:[%s18091_s2 + $0x670] sm:$0xff]  ;;  %v7954_v24 = vld [vmem:[%s18091_s2 + $0x688] sm:$0xff]  ;;  %v2986_v3 = vsel %vm2979_vm4, %v13448_v47, %v13394_v11  ;;  %v13884_v11 = vpack.c.bf16 %v7949_v63, %v7945_v1 }
 0x36b   :  { %9054 = vmatpush1.bf16.msra.mxu0 %v13789_v13  ;;  %9114 = vmatpush1.bf16.msra.mxu1 %v13791_v46  ;;  %v7958_v54 = vld [vmem:[%s18091_s2 + $0x6a8] sm:$0xff]  ;;  %v13886_v47 = vpack.c.bf16 %v7951_v19, %v7947_v32  ;;  %v7955_v63 = vld [vmem:[%s18091_s2 + $0x690] sm:$0xff] }
 0x36c   :  { %v3108_v62 = vmax.f32 %v3006_v33, %v3096_v4  ;;  %v13843_v43 = vpop.permute.xlu0 %3263  ;;  %v3047_v21 = vpop.permute.xlu1 %3046  ;;  %9056 = vmatprep.subr.bf16.mxu0 %v13805_v39  ;;  %9116 = vmatprep.subr.bf16.mxu1 %v13807_v30  ;;  %18494 = vst [vmem:[#allocation113_spill] sm:$0xff] %v13847_v53  ;;  %v7960_v33 = vld [vmem:[%s18091_s2 + $0x6b8] sm:$0xff]  ;;  %18496 = vst [vmem:[#allocation115_spill] sm:$0xff] %v13884_v11  ;;  %v13900_v1 = vpack.c.bf16 %v7958_v54, %v7954_v24  ;;  %v7959_v32 = vld [vmem:[%s18091_s2 + $0x6b0] sm:$0xff] }
 0x36d   :  { %v3074_v12 = vsel %vm2979_vm4, %v3047_v21, %v13382_v56  ;;  %v7956_v56 = vld [vmem:[%s18091_s2 + $0x698] sm:$0xff]  ;;  %18497 = vst [vmem:[#allocation116_spill] sm:$0xff] %v13886_v47  ;;  %v7962_v19 = vld [vmem:[%s18091_s2 + $0x6c8] sm:$0xff] }
 0x36e   :  { %v3131_v40 = vadd.f32 %v13399_v14, %v3108_v62  ;;  %v3098_v5 = vmax.f32 %v13180_v7, %v3074_v12  ;;  %v7953_v7 = vld [vmem:[%s18091_s2 + $0x680] sm:$0xff]  ;;  %18498 = vst [vmem:[#allocation117_spill] sm:$0xff] %v13900_v1  ;;  %v2988_v12 = vsel %vm2979_vm4, %v13586_v45, %v13496_v18  ;;  %v13917_v54 = vpack.c.bf16 %v7960_v33, %v7956_v56 }
 0x36f   :  { %9058 = vmatpush1.bf16.msra.mxu0 %v13836_v34  ;;  %9118 = vmatpush1.bf16.msra.mxu1 %v13838_v60  ;;  %v3136_v45 = vadd.f32 %v13357_v15, %v13628_v57  ;;  %v13938_v56 = vpack.c.bf16 %v7957_v58, %v7953_v7  ;;  %v13940_v33 = vpack.c.bf16 %v7959_v32, %v7955_v63  ;;  %v7961_v57 = vld [vmem:[%s18091_s2 + $0x6c0] sm:$0xff]  ;;  %v7963_v32 = vld [vmem:[%s18091_s2 + $0x6d0] sm:$0xff] }
 0x370   :  { %v13894_v62 = vmax.f32 %v3131_v40, 0.0  ;;  %v3110_v31 = vmax.f32 %v3008_v2, %v3098_v5  ;;  %v13896_v4 = vpop.permute.xlu0 %3179  ;;  %v3053_v21 = vpop.permute.xlu1 %3052  ;;  %9060 = vmatprep.subr.bf16.mxu0 %v13847_v53  ;;  %9120 = vmatprep.subr.bf16.mxu1 %v13849_v44  ;;  %v3010_v2 = vmax.f32 %v13044_v29, %v2986_v3  ;;  %18499 = vst [vmem:[#allocation118_spill] sm:$0xff] %v13917_v54  ;;  %v7966_v40 = vld [vmem:[%s18091_s2 + $0x6e8] sm:$0xff]  ;;  %v7964_v5 = vld [vmem:[%s18091_s2 + $0x6d8] sm:$0xff]  ;;  %v13928_v3 = vmax.f32 %v3134_v8, 0.0  ;;  %v7965_v63 = vld [vmem:[%s18091_s2 + $0x6e0] sm:$0xff] }
 0x371   :  { %v3076_v24 = vsel %vm2979_vm4, %v3053_v21, %v13409_v17  ;;  %v7968_v29 = vld [vmem:[%s18091_s2 + $0x6f8] sm:$0xff]  ;;  %18500 = vst [vmem:[#allocation119_spill] sm:$0xff] %v13938_v56  ;;  %18501 = vst [vmem:[#allocation120_spill] sm:$0xff] %v13940_v33  ;;  %v13953_v7 = vpack.c.bf16 %v7966_v40, %v7962_v19  ;;  %v2990_v19 = vsel %vm2979_vm4, %v13714_v42, %v13630_v48  ;;  %v8093_v53 = vld [vmem:[%s18091_s2 + $0xa80] sm:$0xff] }
 0x372   :  { %v3133_v17 = vadd.f32 %v13399_v14, %v3110_v31  ;;  %v3100_v18 = vmax.f32 %v13190_v25, %v3076_v24  ;;  %3579 = vmatmul.mubr.f32.gmra.mrb[96].mxu0 %v13894_v62  ;;  %3676 = vmatmul.mubr.f32.gmra.mrb[90].mxu1 %v13894_v62  ;;  %v13955_v58 = vpack.c.bf16 %v7968_v29, %v7964_v5  ;;  %v7970_v5 = vld [vmem:[%s18091_s2 + $0x708] sm:$0xff] }
 0x373   :  { %9062 = vmatpush1.bf16.msra.mxu0 %v13884_v11  ;;  %9122 = vmatpush1.bf16.msra.mxu1 %v13886_v47  ;;  %18502 = vst [vmem:[#allocation121_spill] sm:$0xff] %v13953_v7  ;;  %v3012_v24 = vmax.f32 %v13068_v61, %v2988_v12  ;;  %v7974_v29 = vld [vmem:[%s18091_s2 + $0x728] sm:$0xff]  ;;  %v13980_v61 = vmax.f32 %v3136_v45, 0.0  ;;  %v3138_v48 = vadd.f32 %v13357_v15, %v13712_v41  ;;  %v7972_v12 = vld [vmem:[%s18091_s2 + $0x718] sm:$0xff]  ;;  %v8077_v47 = vld [vmem:[%s18091_s2 + $0xa00] sm:$0xff] }
 0x374   :  { %v13945_v8 = vmax.f32 %v3133_v17, 0.0  ;;  %v3112_v31 = vmax.f32 %v3010_v2, %v3100_v18  ;;  %7855 = vmatprep.mubr.msk.f32.mxu0 %vm3489_vm5, %v13928_v3  ;;  %7861 = vmatprep.mubr.msk.f32.mxu1 %vm3489_vm5, %v13928_v3  ;;  %v13951_v25 = vpop.permute.xlu0 %3269  ;;  %v3059_v21 = vpop.permute.xlu1 %3058  ;;  %18503 = vst [vmem:[#allocation122_spill] sm:$0xff] %v13955_v58  ;;  %v7967_v2 = vld [vmem:[%s18091_s2 + $0x6f0] sm:$0xff]  ;;  %v7976_v45 = vld [vmem:[%s18091_s2 + $0x738] sm:$0xff]  ;;  %v13996_v41 = vpack.c.bf16 %v7965_v63, %v7961_v57  ;;  %v7973_v63 = vld [vmem:[%s18091_s2 + $0x720] sm:$0xff] }
 0x375   :  { %v3078_v40 = vsel %vm2979_vm4, %v3059_v21, %v13546_v49  ;;  %9064 = vmatprep.subr.bf16.mxu0 %v13900_v1  ;;  %9124 = vmatprep.subr.bf16.mxu1 %v13917_v54  ;;  %v13998_v17 = vpack.c.bf16 %v7967_v2, %v7963_v32  ;;  %v14011_v57 = vpack.c.bf16 %v7974_v29, %v7970_v5  ;;  %v7971_v32 = vld [vmem:[%s18091_s2 + $0x710] sm:$0xff]  ;;  %v7978_v29 = vld [vmem:[%s18091_s2 + $0x748] sm:$0xff] }
 0x376   :  { %v3135_v42 = vadd.f32 %v13399_v14, %v3112_v31  ;;  %v3102_v49 = vmax.f32 %v13202_v20, %v3078_v40  ;;  %3585 = vmatmul.mubr.f32.gmra.mrb[98].mxu0 %v13945_v8  ;;  %3682 = vmatmul.mubr.f32.gmra.mrb[92].mxu1 %v13945_v8  ;;  %18504 = vst [vmem:[#allocation123_spill] sm:$0xff] %v13996_v41  ;;  %v7969_v20 = vld [vmem:[%s18091_s2 + $0x700] sm:$0xff]  ;;  %v7975_v2 = vld [vmem:[%s18091_s2 + $0x730] sm:$0xff] }
 0x377   :  { %9066 = vmatpush1.bf16.msra.mxu0 %v13938_v56  ;;  %9126 = vmatpush1.bf16.msra.mxu1 %v13940_v33  ;;  %18505 = vst [vmem:[#allocation124_spill] sm:$0xff] %v13998_v17  ;;  %18506 = vst [vmem:[#allocation125_spill] sm:$0xff] %v14011_v57  ;;  %v14027_v5 = vpack.c.bf16 %v7976_v45, %v7972_v12  ;;  %v3140_v33 = vadd.f32 %v13357_v15, %v13799_v52  ;;  %v7984_v52 = vld [vmem:[%s18091_s2 + $0x778] sm:$0xff]  ;;  %v7977_v45 = vld [vmem:[%s18091_s2 + $0x740] sm:$0xff] }
 0x378   :  { %v14003_v18 = vmax.f32 %v3135_v42, 0.0  ;;  %v3114_v31 = vmax.f32 %v3012_v24, %v3102_v49  ;;  %7856 = vmatprep.mubr.msk.f32.mxu0 %vm3489_vm5, %v13980_v61  ;;  %7862 = vmatprep.mubr.msk.f32.mxu1 %vm3489_vm5, %v13980_v61  ;;  %v14009_v21 = vpop.permute.xlu0 %3177  ;;  %v3065_v40 = vpop.permute.xlu1 %3064  ;;  %v3014_v24 = vmax.f32 %v13097_v26, %v2990_v19  ;;  %v14032_v49 = vmax.f32 %v3138_v48, 0.0  ;;  %v7980_v48 = vld [vmem:[%s18091_s2 + $0x758] sm:$0xff]  ;;  %v8014_v56 = vld [vmem:[%s18091_s2 + $0x808] sm:$0xff] }
 0x379   :  { %v3080_v42 = vsel %vm2979_vm4, %v3065_v40, %v13670_v37  ;;  %9068 = vmatprep.subr.bf16.mxu0 %v13953_v7  ;;  %9128 = vmatprep.subr.bf16.mxu1 %v13955_v58  ;;  %18507 = vst [vmem:[#allocation126_spill] sm:$0xff] %v14027_v5  ;;  %v7982_v37 = vld [vmem:[%s18091_s2 + $0x768] sm:$0xff]  ;;  %v14053_v12 = vpack.c.bf16 %v7975_v2, %v7971_v32  ;;  %v7983_v32 = vld [vmem:[%s18091_s2 + $0x770] sm:$0xff] }
 0x37a   :  { %v3137_v26 = vadd.f32 %v13399_v14, %v3114_v31  ;;  %v3104_v19 = vmax.f32 %v13213_v16, %v3080_v42  ;;  %3591 = vmatmul.mubr.f32.gmra.mrb[100].mxu0 %v14003_v18  ;;  %3688 = vmatmul.mubr.f32.gmra.mrb[94].mxu1 %v14003_v18  ;;  %v14051_v16 = vpack.c.bf16 %v7973_v63, %v7969_v20  ;;  %v7981_v20 = vld [vmem:[%s18091_s2 + $0x760] sm:$0xff]  ;;  %v7979_v63 = vld [vmem:[%s18091_s2 + $0x750] sm:$0xff]  ;;  %v8010_v58 = vld [vmem:[%s18091_s2 + $0x7e8] sm:$0xff] }
 0x37b   :  { %9070 = vmatpush1.bf16.msra.mxu0 %v13996_v41  ;;  %9130 = vmatpush1.bf16.msra.mxu1 %v13998_v17  ;;  %18509 = vst [vmem:[#allocation128_spill] sm:$0xff] %v14053_v12  ;;  %v14077_v2 = vpack.c.bf16 %v7982_v37, %v7978_v29  ;;  %v8000_v29 = vld [vmem:[%s18091_s2 + $0x798] sm:$0xff] }
 0x37c   :  { %18508 = vst [vmem:[#allocation127_spill] sm:$0xff] %v14051_v16  ;;  %v14058_v31 = vmax.f32 %v3137_v26, 0.0  ;;  %v3116_v40 = vmax.f32 %v3014_v24, %v3104_v19  ;;  %7857 = vmatprep.mubr.msk.f32.mxu0 %vm3489_vm5, %v14032_v49  ;;  %7863 = vmatprep.mubr.msk.f32.mxu1 %vm3489_vm5, %v14032_v49  ;;  %v14064_v42 = vpop.permute.xlu0 %3185  ;;  %v3176_v17 = vpop.permute.xlu1 %3175  ;;  %v14079_v24 = vpack.c.bf16 %v7984_v52, %v7980_v48  ;;  %v7998_v26 = vld [vmem:[%s18091_s2 + $0x788] sm:$0xff]  ;;  %v14084_v19 = vmax.f32 %v3140_v33, 0.0  ;;  %v8004_v37 = vld [vmem:[%s18091_s2 + $0x7b8] sm:$0xff]  ;;  %v7997_v52 = vld [vmem:[%s18091_s2 + $0x780] sm:$0xff] }
 0x37d   :  { %9072 = vmatprep.subr.bf16.mxu0 %v14011_v57  ;;  %9132 = vmatprep.subr.bf16.mxu1 %v14027_v5  ;;  %18510 = vst [vmem:[#allocation129_spill] sm:$0xff] %v14077_v2  ;;  %v8002_v5 = vld [vmem:[%s18091_s2 + $0x7a8] sm:$0xff]  ;;  %v14100_v33 = vpack.c.bf16 %v7981_v20, %v7977_v45  ;;  %v14102_v48 = vpack.c.bf16 %v7983_v32, %v7979_v63  ;;  %v8001_v45 = vld [vmem:[%s18091_s2 + $0x7a0] sm:$0xff]  ;;  %v7999_v20 = vld [vmem:[%s18091_s2 + $0x790] sm:$0xff] }
 0x37e   :  { %18511 = vst [vmem:[#allocation130_spill] sm:$0xff] %v14079_v24  ;;  %v3139_v41 = vadd.f32 %v13399_v14, %v3116_v40  ;;  %3597 = vmatmul.mubr.f32.gmra.mrb[102].mxu0 %v14058_v31  ;;  %3694 = vmatmul.mubr.f32.gmra.mrb[96].mxu1 %v14058_v31  ;;  %v14128_v63 = vpack.c.bf16 %v8002_v5, %v7998_v26  ;;  %v8012_v5 = vld [vmem:[%s18091_s2 + $0x7f8] sm:$0xff] }
 0x37f   :  { %9074 = vmatpush1.bf16.msra.mxu0 %v14051_v16  ;;  %9134 = vmatpush1.bf16.msra.mxu1 %v14053_v12  ;;  %18512 = vst [vmem:[#allocation131_spill] sm:$0xff] %v14100_v33  ;;  %18513 = vst [vmem:[#allocation132_spill] sm:$0xff] %v14102_v48  ;;  %v14130_v32 = vpack.c.bf16 %v8004_v37, %v8000_v29  ;;  %v8006_v12 = vld [vmem:[%s18091_s2 + $0x7c8] sm:$0xff]  ;;  %v3208_v26 = vsel %vm2979_vm4, %v13754_v23, %v3176_v17 }
 0x380   :  { %v14107_v40 = vmax.f32 %v3139_v41, 0.0  ;;  %7858 = vmatprep.mubr.msk.f32.mxu0 %vm3489_vm5, %v14084_v19  ;;  %7864 = vmatprep.mubr.msk.f32.mxu1 %vm3489_vm5, %v14084_v19  ;;  %v14113_v57 = vpop.permute.xlu0 %3275  ;;  %v14115_v16 = vpop.permute.xlu1 %3181  ;;  %v8003_v41 = vld [vmem:[%s18091_s2 + $0x7b0] sm:$0xff]  ;;  %18514 = vst [vmem:[#allocation133_spill] sm:$0xff] %v14128_v63  ;;  %v14150_v29 = vpack.c.bf16 %v8001_v45, %v7997_v52  ;;  %v8009_v52 = vld [vmem:[%s18091_s2 + $0x7e0] sm:$0xff]  ;;  %v3232_v54 = vmax.f32 %v13235_v51, %v3208_v26 }
 0x381   :  { %9076 = vmatprep.subr.bf16.mxu0 %v14077_v2  ;;  %9136 = vmatprep.subr.bf16.mxu1 %v14079_v24  ;;  %18515 = vst [vmem:[#allocation134_spill] sm:$0xff] %v14130_v32  ;;  %v8008_v24 = vld [vmem:[%s18091_s2 + $0x7d8] sm:$0xff]  ;;  %v14152_v37 = vpack.c.bf16 %v8003_v41, %v7999_v20  ;;  %v8005_v2 = vld [vmem:[%s18091_s2 + $0x7c0] sm:$0xff]  ;;  %v8007_v45 = vld [vmem:[%s18091_s2 + $0x7d0] sm:$0xff] }
 0x382   :  { %3601 = vmatmul.mubr.f32.gmra.mrb[104].mxu0 %v14107_v40  ;;  %3698 = vmatmul.mubr.f32.gmra.mrb[98].mxu1 %v14107_v40  ;;  %18516 = vst [vmem:[#allocation135_spill] sm:$0xff] %v14150_v29  ;;  %v8011_v20 = vld [vmem:[%s18091_s2 + $0x7f0] sm:$0xff]  ;;  %v14201_v51 = vpack.c.bf16 %v8009_v52, %v8005_v2  ;;  %v8017_v2 = vld [vmem:[%s18091_s2 + $0x820] sm:$0xff] }
 0x383   :  { %9078 = vmatpush1.bf16.msra.mxu0 %v14100_v33  ;;  %9138 = vmatpush1.bf16.msra.mxu1 %v14102_v48  ;;  %18517 = vst [vmem:[#allocation136_spill] sm:$0xff] %v14152_v37  ;;  %v14176_v48 = vpack.c.bf16 %v8010_v58, %v8006_v12  ;;  %v14178_v33 = vpack.c.bf16 %v8012_v5, %v8008_v24  ;;  %v8016_v58 = vld [vmem:[%s18091_s2 + $0x818] sm:$0xff]  ;;  %v8013_v5 = vld [vmem:[%s18091_s2 + $0x800] sm:$0xff]  ;;  %v8015_v52 = vld [vmem:[%s18091_s2 + $0x810] sm:$0xff] }
 0x384   :  { %7985 = vmatprep.mubr.msk.f32.mxu0 %vm3489_vm5, %v13370_v38  ;;  %7991 = vmatprep.mubr.msk.f32.mxu1 %vm3489_vm5, %v13370_v38  ;;  %v14161_v7 = vpop.permute.xlu0 %3183  ;;  %v3266_v17 = vpop.permute.xlu1 %3265  ;;  %v8020_v12 = vld [vmem:[%s18091_s2 + $0x838] sm:$0xff]  ;;  %18520 = vst [vmem:[#allocation139_spill] sm:$0xff] %v14201_v51  ;;  %v14203_v24 = vpack.c.bf16 %v8011_v20, %v8007_v45 }
 0x385   :  { %v3298_v41 = vsel %vm2979_vm4, %v13843_v43, %v3266_v17  ;;  %9140 = vmatprep.subr.bf16.mxu0 %v14128_v63  ;;  %9200 = vmatprep.subr.bf16.mxu1 %v14130_v32  ;;  %18518 = vst [vmem:[#allocation137_spill] sm:$0xff] %v14176_v48  ;;  %18519 = vst [vmem:[#allocation138_spill] sm:$0xff] %v14178_v33  ;;  %v8018_v17 = vld [vmem:[%s18091_s2 + $0x828] sm:$0xff]  ;;  %v14231_v20 = vpack.c.bf16 %v8020_v12, %v8016_v58  ;;  %v8021_v12 = vld [vmem:[%s18091_s2 + $0x840] sm:$0xff] }
 0x386   :  { %v3322_v1 = vmax.f32 %v13286_v59, %v3298_v41  ;;  %3888 = vmatmul.mubr.f32.vlgmr.msra.gmra.mrb[106].mxu0 %v13446_v55  ;;  %3985 = vmatmul.mubr.f32.vlgmr.msra.gmra.mrb[100].mxu1 %v13446_v55  ;;  %v3207_v59 = vsel %vm2979_vm4, %v13801_v36, %v13754_v23  ;;  %18521 = vst [vmem:[#allocation140_spill] sm:$0xff] %v14203_v24  ;;  %v8022_v41 = vld [vmem:[%s18091_s2 + $0x848] sm:$0xff]  ;;  %v8065_v32 = vld [vmem:[%s18091_s2 + $0x9a0] sm:$0xff] }
 0x387   :  { %9142 = vmatpush1.bf16.msra.mxu0 %v14150_v29  ;;  %9202 = vmatpush1.bf16.msra.mxu1 %v14152_v37  ;;  %v14229_v45 = vpack.c.bf16 %v8018_v17, %v8014_v56  ;;  %18523 = vst [vmem:[#allocation142_spill] sm:$0xff] %v14231_v20  ;;  %v3231_v37 = vmax.f32 %v13233_v28, %v3207_v59  ;;  %v8024_v56 = vld [vmem:[%s18091_s2 + $0x858] sm:$0xff] }
 0x388   :  { %v14208_v26 = vmax.f32 %v3232_v54, %v3322_v1  ;;  %7986 = vmatprep.mubr.msk.f32.mxu0 %vm3489_vm5, %v13492_v27  ;;  %7992 = vmatprep.mubr.msk.f32.mxu1 %vm3489_vm5, %v13492_v27  ;;  %v14214_v23 = vpop.permute.xlu0 %3191  ;;  %v3262_v36 = vpop.permute.xlu1 %3261  ;;  %v8019_v1 = vld [vmem:[%s18091_s2 + $0x830] sm:$0xff]  ;;  %v8028_v17 = vld [vmem:[%s18091_s2 + $0x878] sm:$0xff]  ;;  %v3210_v28 = vsel %vm2979_vm4, %v13896_v4, %v14115_v16 }
 0x389   :  { %v3297_v54 = vsel %vm2979_vm4, %v3262_v36, %v13843_v43  ;;  %9144 = vmatprep.subr.bf16.mxu0 %v14176_v48  ;;  %9204 = vmatprep.subr.bf16.mxu1 %v14178_v33  ;;  %18522 = vst [vmem:[#allocation141_spill] sm:$0xff] %v14229_v45  ;;  %v8026_v43 = vld [vmem:[%s18091_s2 + $0x868] sm:$0xff]  ;;  %v14256_v58 = vpack.c.bf16 %v8019_v1, %v8015_v52  ;;  %v8061_v48 = vld [vmem:[%s18091_s2 + $0x980] sm:$0xff] }
 0x38a   :  { %v3321_v29 = vmax.f32 %v13284_v50, %v3297_v54  ;;  %3892 = vmatmul.mubr.f32.gmra.mrb[108].mxu0 %v13894_v62  ;;  %3989 = vmatmul.mubr.f32.gmra.mrb[102].mxu1 %v13894_v62  ;;  %v14254_v50 = vpack.c.bf16 %v8017_v2, %v8013_v5  ;;  %v8025_v5 = vld [vmem:[%s18091_s2 + $0x860] sm:$0xff]  ;;  %v8023_v2 = vld [vmem:[%s18091_s2 + $0x850] sm:$0xff]  ;;  %v14282_v52 = vpack.c.bf16 %v8026_v43, %v8022_v41  ;;  %v8030_v54 = vld [vmem:[%s18091_s2 + $0x888] sm:$0xff] }
 0x38b   :  { %9146 = vmatpush1.bf16.msra.mxu0 %v14201_v51  ;;  %9206 = vmatpush1.bf16.msra.mxu1 %v14203_v24  ;;  %18525 = vst [vmem:[#allocation144_spill] sm:$0xff] %v14256_v58  ;;  %v14284_v1 = vpack.c.bf16 %v8028_v17, %v8024_v56  ;;  %v3234_v24 = vmax.f32 %v13242_v35, %v3210_v28  ;;  %v8032_v41 = vld [vmem:[%s18091_s2 + $0x898] sm:$0xff]  ;;  %v8029_v56 = vld [vmem:[%s18091_s2 + $0x880] sm:$0xff] }
 0x38c   :  { %18524 = vst [vmem:[#allocation143_spill] sm:$0xff] %v14254_v50  ;;  %v14261_v59 = vmax.f32 %v3231_v37, %v3321_v29  ;;  %7987 = vmatprep.mubr.msk.f32.mxu0 %vm3489_vm5, %v13928_v3  ;;  %7993 = vmatprep.mubr.msk.f32.mxu1 %vm3489_vm5, %v13928_v3  ;;  %v14267_v16 = vpop.permute.xlu0 %3281  ;;  %v3272_v36 = vpop.permute.xlu1 %3271  ;;  %v8027_v29 = vld [vmem:[%s18091_s2 + $0x870] sm:$0xff]  ;;  %18526 = vst [vmem:[#allocation145_spill] sm:$0xff] %v14282_v52  ;;  %v8036_v43 = vld [vmem:[%s18091_s2 + $0x8b8] sm:$0xff]  ;;  %v14304_v35 = vpack.c.bf16 %v8025_v5, %v8021_v12 }
 0x38d   :  { %v3300_v37 = vsel %vm2979_vm4, %v13951_v25, %v3272_v36  ;;  %9148 = vmatprep.subr.bf16.mxu0 %v14229_v45  ;;  %9208 = vmatprep.subr.bf16.mxu1 %v14231_v20  ;;  %18527 = vst [vmem:[#allocation146_spill] sm:$0xff] %v14284_v1  ;;  %v8034_v36 = vld [vmem:[%s18091_s2 + $0x8a8] sm:$0xff]  ;;  %v8033_v12 = vld [vmem:[%s18091_s2 + $0x8a0] sm:$0xff]  ;;  %v8031_v5 = vld [vmem:[%s18091_s2 + $0x890] sm:$0xff] }
 0x38e   :  { %v3324_v51 = vmax.f32 %v13294_v6, %v3300_v37  ;;  %3898 = vmatmul.mubr.f32.gmra.mrb[110].mxu0 %v13945_v8  ;;  %3995 = vmatmul.mubr.f32.gmra.mrb[104].mxu1 %v13945_v8  ;;  %18528 = vst [vmem:[#allocation147_spill] sm:$0xff] %v14304_v35  ;;  %v14306_v6 = vpack.c.bf16 %v8027_v29, %v8023_v2  ;;  %v8038_v29 = vld [vmem:[%s18091_s2 + $0x8c8] sm:$0xff] }
 0x38f   :  { %9150 = vmatpush1.bf16.msra.mxu0 %v14254_v50  ;;  %9210 = vmatpush1.bf16.msra.mxu1 %v14256_v58  ;;  %v14332_v2 = vpack.c.bf16 %v8036_v43, %v8032_v41  ;;  %v8042_v58 = vld [vmem:[%s18091_s2 + $0x8e8] sm:$0xff]  ;;  %v14352_v41 = vpack.c.bf16 %v8033_v12, %v8029_v56  ;;  %v8039_v56 = vld [vmem:[%s18091_s2 + $0x8d0] sm:$0xff] }
 0x390   :  { %18529 = vst [vmem:[#allocation148_spill] sm:$0xff] %v14306_v6  ;;  %v14311_v17 = vmax.f32 %v3234_v24, %v3324_v51  ;;  %7988 = vmatprep.mubr.msk.f32.mxu0 %vm3489_vm5, %v13980_v61  ;;  %7994 = vmatprep.mubr.msk.f32.mxu1 %vm3489_vm5, %v13980_v61  ;;  %v14317_v28 = vpop.permute.xlu0 %3189  ;;  %v3188_v37 = vpop.permute.xlu1 %3187  ;;  %v8035_v51 = vld [vmem:[%s18091_s2 + $0x8b0] sm:$0xff]  ;;  %v14330_v24 = vpack.c.bf16 %v8034_v36, %v8030_v54  ;;  %v8044_v54 = vld [vmem:[%s18091_s2 + $0x8f8] sm:$0xff]  ;;  %v8046_v20 = vld [vmem:[%s18091_s2 + $0x908] sm:$0xff] }
 0x391   :  { %9152 = vmatprep.subr.bf16.mxu0 %v14282_v52  ;;  %9212 = vmatprep.subr.bf16.mxu1 %v14284_v1  ;;  %18531 = vst [vmem:[#allocation150_spill] sm:$0xff] %v14332_v2  ;;  %v8040_v1 = vld [vmem:[%s18091_s2 + $0x8d8] sm:$0xff]  ;;  %v3212_v36 = vsel %vm2979_vm4, %v14064_v42, %v3188_v37  ;;  %18532 = vst [vmem:[#allocation151_spill] sm:$0xff] %v14352_v41  ;;  %v14354_v43 = vpack.c.bf16 %v8035_v51, %v8031_v5  ;;  %v8037_v52 = vld [vmem:[%s18091_s2 + $0x8c0] sm:$0xff] }
 0x392   :  { %18530 = vst [vmem:[#allocation149_spill] sm:$0xff] %v14330_v24  ;;  %3904 = vmatmul.mubr.f32.gmra.mrb[112].mxu0 %v14003_v18  ;;  %4001 = vmatmul.mubr.f32.gmra.mrb[106].mxu1 %v14003_v18  ;;  %v8041_v37 = vld [vmem:[%s18091_s2 + $0x8e0] sm:$0xff]  ;;  %v8043_v12 = vld [vmem:[%s18091_s2 + $0x8f0] sm:$0xff]  ;;  %v3236_v45 = vmax.f32 %v13250_v9, %v3212_v36 }
 0x393   :  { %9154 = vmatpush1.bf16.msra.mxu0 %v14304_v35  ;;  %9214 = vmatpush1.bf16.msra.mxu1 %v14306_v6  ;;  %18533 = vst [vmem:[#allocation152_spill] sm:$0xff] %v14354_v43  ;;  %v14378_v6 = vpack.c.bf16 %v8042_v58, %v8038_v29  ;;  %v14380_v35 = vpack.c.bf16 %v8044_v54, %v8040_v1  ;;  %v8048_v58 = vld [vmem:[%s18091_s2 + $0x918] sm:$0xff]  ;;  %v8045_v29 = vld [vmem:[%s18091_s2 + $0x900] sm:$0xff] }
 0x394   :  { %7989 = vmatprep.mubr.msk.f32.mxu0 %vm3489_vm5, %v14032_v49  ;;  %7995 = vmatprep.mubr.msk.f32.mxu1 %vm3489_vm5, %v14032_v49  ;;  %v3278_v50 = vpop.permute.xlu1 %3277  ;;  %v14372_v5 = vpop.permute.xlu0 %3197  ;;  %v8052_v1 = vld [vmem:[%s18091_s2 + $0x938] sm:$0xff]  ;;  %v14400_v9 = vpack.c.bf16 %v8041_v37, %v8037_v52  ;;  %v8049_v54 = vld [vmem:[%s18091_s2 + $0x920] sm:$0xff]  ;;  %v8047_v37 = vld [vmem:[%s18091_s2 + $0x910] sm:$0xff] }
 0x395   :  { %v3302_v51 = vsel %vm2979_vm4, %v14113_v57, %v3278_v50  ;;  %9156 = vmatprep.subr.bf16.mxu0 %v14330_v24  ;;  %9216 = vmatprep.subr.bf16.mxu1 %v14332_v2  ;;  %18534 = vst [vmem:[#allocation153_spill] sm:$0xff] %v14378_v6  ;;  %18535 = vst [vmem:[#allocation154_spill] sm:$0xff] %v14380_v35  ;;  %v8050_v50 = vld [vmem:[%s18091_s2 + $0x928] sm:$0xff] }
 0x396   :  { %v3326_v33 = vmax.f32 %v13302_v10, %v3302_v51  ;;  %3910 = vmatmul.mubr.f32.gmra.mrb[114].mxu0 %v14058_v31  ;;  %4007 = vmatmul.mubr.f32.gmra.mrb[108].mxu1 %v14058_v31  ;;  %18536 = vst [vmem:[#allocation155_spill] sm:$0xff] %v14400_v9  ;;  %v14402_v10 = vpack.c.bf16 %v8043_v12, %v8039_v56  ;;  %v8051_v56 = vld [vmem:[%s18091_s2 + $0x930] sm:$0xff]  ;;  %v8058_v51 = vld [vmem:[%s18091_s2 + $0x968] sm:$0xff] }
 0x397   :  { %9158 = vmatpush1.bf16.msra.mxu0 %v14352_v41  ;;  %9218 = vmatpush1.bf16.msra.mxu1 %v14354_v43  ;;  %v14429_v12 = vpack.c.bf16 %v8052_v1, %v8048_v58  ;;  %v8056_v43 = vld [vmem:[%s18091_s2 + $0x958] sm:$0xff]  ;;  %v14448_v58 = vpack.c.bf16 %v8049_v54, %v8045_v29  ;;  %v14450_v1 = vpack.c.bf16 %v8051_v56, %v8047_v37  ;;  %v8055_v54 = vld [vmem:[%s18091_s2 + $0x950] sm:$0xff]  ;;  %v8062_v56 = vld [vmem:[%s18091_s2 + $0x988] sm:$0xff] }
 0x398   :  { %18537 = vst [vmem:[#allocation156_spill] sm:$0xff] %v14402_v10  ;;  %v14410_v36 = vmax.f32 %v3236_v45, %v3326_v33  ;;  %7990 = vmatprep.mubr.msk.f32.mxu0 %vm3489_vm5, %v14084_v19  ;;  %7996 = vmatprep.mubr.msk.f32.mxu1 %vm3489_vm5, %v14084_v19  ;;  %v3194_v52 = vpop.permute.xlu1 %3193  ;;  %v8054_v33 = vld [vmem:[%s18091_s2 + $0x948] sm:$0xff]  ;;  %v14427_v45 = vpack.c.bf16 %v8050_v50, %v8046_v20  ;;  %v8060_v41 = vld [vmem:[%s18091_s2 + $0x978] sm:$0xff]  ;;  %v14442_v20 = vpop.permute.xlu0 %3287  ;;  %v8059_v37 = vld [vmem:[%s18091_s2 + $0x970] sm:$0xff] }
 0x399   :  { %9160 = vmatprep.subr.bf16.mxu0 %v14378_v6  ;;  %9220 = vmatprep.subr.bf16.mxu1 %v14380_v35  ;;  %18539 = vst [vmem:[#allocation158_spill] sm:$0xff] %v14429_v12  ;;  %v3214_v50 = vsel %vm2979_vm4, %v14214_v23, %v3194_v52  ;;  %18540 = vst [vmem:[#allocation159_spill] sm:$0xff] %v14448_v58  ;;  %v8053_v35 = vld [vmem:[%s18091_s2 + $0x940] sm:$0xff]  ;;  %v14464_v29 = vpack.c.bf16 %v8060_v41, %v8056_v43  ;;  %v8066_v41 = vld [vmem:[%s18091_s2 + $0x9a8] sm:$0xff] }
 0x39a   :  { %18538 = vst [vmem:[#allocation157_spill] sm:$0xff] %v14427_v45  ;;  %3916 = vmatmul.mubr.f32.gmra.mrb[116].mxu0 %v14107_v40  ;;  %4013 = vmatmul.mubr.f32.gmra.mrb[110].mxu1 %v14107_v40  ;;  %18541 = vst [vmem:[#allocation160_spill] sm:$0xff] %v14450_v1  ;;  %v8057_v6 = vld [vmem:[%s18091_s2 + $0x960] sm:$0xff]  ;;  %v8064_v43 = vld [vmem:[%s18091_s2 + $0x998] sm:$0xff] }
 0x39b   :  { %9162 = vmatpush1.bf16.msra.mxu0 %v14400_v9  ;;  %9222 = vmatpush1.bf16.msra.mxu1 %v14402_v10  ;;  %v14462_v10 = vpack.c.bf16 %v8058_v51, %v8054_v33  ;;  %18543 = vst [vmem:[#allocation162_spill] sm:$0xff] %v14464_v29  ;;  %v8068_v33 = vld [vmem:[%s18091_s2 + $0x9b8] sm:$0xff]  ;;  %v18544_v51 = vld [vmem:[#allocation67_spill] sm:$0xff] }
 0x39c   :  { %8117 = vmatprep.mubr.msk.f32.mxu0 %vm3489_vm5, %v13370_v38  ;;  %8123 = vmatprep.mubr.msk.f32.mxu1 %vm3489_vm5, %v13370_v38  ;;  %v3284_v52 = vpop.permute.xlu1 %3283  ;;  %v3238_v2 = vmax.f32 %v18544_v51, %v3214_v50  ;;  %v18545_v24 = vld [vmem:[#allocation75_spill] sm:$0xff] }
 0x39d   :  { %18542 = vst [vmem:[#allocation161_spill] sm:$0xff] %v14462_v10  ;;  %v3304_v9 = vsel %vm2979_vm4, %v14267_v16, %v3284_v52  ;;  %9164 = vmatprep.subr.bf16.mxu0 %v14427_v45  ;;  %9224 = vmatprep.subr.bf16.mxu1 %v14429_v12  ;;  %v14492_v12 = vpack.c.bf16 %v8057_v6, %v8053_v35  ;;  %v8063_v6 = vld [vmem:[%s18091_s2 + $0x990] sm:$0xff] }
 0x39e   :  { %v3328_v52 = vmax.f32 %v18545_v24, %v3304_v9  ;;  %v14494_v45 = vpack.c.bf16 %v8059_v37, %v8055_v54  ;;  %v14506_v24 = vpack.c.bf16 %v8066_v41, %v8062_v56  ;;  %v14508_v35 = vpack.c.bf16 %v8068_v33, %v8064_v43  ;;  %v8067_v9 = vld [vmem:[%s18091_s2 + $0x9b0] sm:$0xff]  ;;  %v14519_v54 = vpop.permute.xlu0 %3195  ;;  %v8074_v37 = vld [vmem:[%s18091_s2 + $0x9e8] sm:$0xff]  ;;  %v8072_v56 = vld [vmem:[%s18091_s2 + $0x9d8] sm:$0xff] }
 0x39f   :  { %9166 = vmatpush1.bf16.msra.mxu0 %v14448_v58  ;;  %9226 = vmatpush1.bf16.msra.mxu1 %v14450_v1  ;;  %18546 = vst [vmem:[#allocation67_spill] sm:$0xff] %v14492_v12  ;;  %v8076_v41 = vld [vmem:[%s18091_s2 + $0x9f8] sm:$0xff]  ;;  %v14534_v33 = vpack.c.bf16 %v8065_v32, %v8061_v48  ;;  %v14536_v51 = vpack.c.bf16 %v8067_v9, %v8063_v6  ;;  %v8071_v48 = vld [vmem:[%s18091_s2 + $0x9d0] sm:$0xff]  ;;  %v8078_v6 = vld [vmem:[%s18091_s2 + $0xa08] sm:$0xff] }
 0x3a0   :  { %18547 = vst [vmem:[#allocation75_spill] sm:$0xff] %v14494_v45  ;;  %v14502_v63 = vmax.f32 %v3238_v2, %v3328_v52  ;;  %v3200_v50 = vpop.permute.xlu1 %3199  ;;  %9168 = vmatprep.subr.bf16.mxu0 %v14462_v10  ;;  %9228 = vmatprep.subr.bf16.mxu1 %v14464_v29  ;;  %18548 = vst [vmem:[#allocation163_spill] sm:$0xff] %v14506_v24  ;;  %v8070_v2 = vld [vmem:[%s18091_s2 + $0x9c8] sm:$0xff]  ;;  %v8069_v52 = vld [vmem:[%s18091_s2 + $0x9c0] sm:$0xff] }
 0x3a1   :  { %18549 = vst [vmem:[#allocation164_spill] sm:$0xff] %v14508_v35  ;;  %v3216_v43 = vsel %vm2979_vm4, %v14372_v5, %v3200_v50  ;;  %18550 = vst [vmem:[#allocation165_spill] sm:$0xff] %v14534_v33  ;;  %v8073_v29 = vld [vmem:[%s18091_s2 + $0x9e0] sm:$0xff]  ;;  %v14546_v50 = vpack.c.bf16 %v8074_v37, %v8070_v2  ;;  %v8075_v32 = vld [vmem:[%s18091_s2 + $0x9f0] sm:$0xff] }
 0x3a2   :  { %18551 = vst [vmem:[#allocation166_spill] sm:$0xff] %v14536_v51  ;;  %v8082_v2 = vld [vmem:[%s18091_s2 + $0xa28] sm:$0xff]  ;;  %v8080_v37 = vld [vmem:[%s18091_s2 + $0xa18] sm:$0xff]  ;;  %v14572_v1 = vpop.permute.xlu0 %3203  ;;  %v14578_v58 = vpack.c.bf16 %v8075_v32, %v8071_v48  ;;  %v8083_v48 = vld [vmem:[%s18091_s2 + $0xa30] sm:$0xff] }
 0x3a3   :  { %9170 = vmatpush1.bf16.msra.mxu0 %v14492_v12  ;;  %9230 = vmatpush1.bf16.msra.mxu1 %v14494_v45  ;;  %18552 = vst [vmem:[#allocation167_spill] sm:$0xff] %v14546_v50  ;;  %v14548_v45 = vpack.c.bf16 %v8076_v41, %v8072_v56  ;;  %v8084_v56 = vld [vmem:[%s18091_s2 + $0xa38] sm:$0xff]  ;;  %v8090_v32 = vld [vmem:[%s18091_s2 + $0xa68] sm:$0xff] }
 0x3a4   :  { %v3290_v10 = vpop.permute.xlu1 %3289  ;;  %9172 = vmatprep.subr.bf16.mxu0 %v14506_v24  ;;  %9232 = vmatprep.subr.bf16.mxu1 %v14508_v35  ;;  %v18554_v41 = vld [vmem:[#allocation69_spill] sm:$0xff] }
 0x3a5   :  { %18553 = vst [vmem:[#allocation168_spill] sm:$0xff] %v14548_v45  ;;  %v3306_v9 = vsel %vm2979_vm4, %v14442_v20, %v3290_v10  ;;  %v3240_v35 = vmax.f32 %v18554_v41, %v3216_v43  ;;  %v18555_v24 = vld [vmem:[#allocation77_spill] sm:$0xff]  ;;  %v14576_v10 = vpack.c.bf16 %v8073_v29, %v8069_v52  ;;  %v8081_v43 = vld [vmem:[%s18091_s2 + $0xa20] sm:$0xff]  ;;  %v14592_v29 = vpack.c.bf16 %v8084_v56, %v8080_v37  ;;  %v8079_v52 = vld [vmem:[%s18091_s2 + $0xa10] sm:$0xff] }
 0x3a6   :  { %v3330_v12 = vmax.f32 %v18555_v24, %v3306_v9  ;;  %18557 = vst [vmem:[#allocation77_spill] sm:$0xff] %v14578_v58  ;;  %v14590_v24 = vpack.c.bf16 %v8082_v2, %v8078_v6  ;;  %v8088_v6 = vld [vmem:[%s18091_s2 + $0xa58] sm:$0xff]  ;;  %v14614_v2 = vpack.c.bf16 %v8081_v43, %v8077_v47  ;;  %v14616_v37 = vpack.c.bf16 %v8083_v48, %v8079_v52  ;;  %v8085_v56 = vld [vmem:[%s18091_s2 + $0xa40] sm:$0xff]  ;;  %v8087_v43 = vld [vmem:[%s18091_s2 + $0xa50] sm:$0xff] }
 0x3a7   :  { %9174 = vmatpush1.bf16.msra.mxu0 %v14534_v33  ;;  %9234 = vmatpush1.bf16.msra.mxu1 %v14536_v51  ;;  %18556 = vst [vmem:[#allocation69_spill] sm:$0xff] %v14576_v10  ;;  %18559 = vst [vmem:[#allocation170_spill] sm:$0xff] %v14592_v29  ;;  %v8092_v9 = vld [vmem:[%s18091_s2 + $0xa78] sm:$0xff]  ;;  %v8091_v52 = vld [vmem:[%s18091_s2 + $0xa70] sm:$0xff] }
 0x3a8   :  { %v14586_v41 = vmax.f32 %v3240_v35, %v3330_v12  ;;  %9176 = vmatprep.subr.bf16.mxu0 %v14546_v50  ;;  %9236 = vmatprep.subr.bf16.mxu1 %v14548_v45  ;;  %18558 = vst [vmem:[#allocation169_spill] sm:$0xff] %v14590_v24  ;;  %v8086_v12 = vld [vmem:[%s18091_s2 + $0xa48] sm:$0xff]  ;;  %18560 = vst [vmem:[#allocation171_spill] sm:$0xff] %v14616_v37  ;;  %v8089_v45 = vld [vmem:[%s18091_s2 + $0xa60] sm:$0xff]  ;;  %v14630_v47 = vpack.c.bf16 %v8092_v9, %v8088_v6 }
 0x3a9   :  { %v3206_v35 = vpop.permute.xlu1 %3205  ;;  %v8094_v48 = vld [vmem:[%s18091_s2 + $0xa88] sm:$0xff]  ;;  %v8100_v6 = vld [vmem:[%s18091_s2 + $0xab8] sm:$0xff]  ;;  %v14660_v44 = vpack.c.bf16 %v8091_v52, %v8087_v43 }
 0x3aa   :  { %v3218_v50 = vsel %vm2979_vm4, %v14572_v1, %v3206_v35  ;;  %18562 = vst [vmem:[#allocation173_spill] sm:$0xff] %v14630_v47  ;;  %v14641_v35 = vpop.permute.xlu0 %3293  ;;  %v18564_v33 = vld [vmem:[#allocation79_spill] sm:$0xff] }
 0x3ab   :  { %9178 = vmatpush1.bf16.msra.mxu0 %v14576_v10  ;;  %9238 = vmatpush1.bf16.msra.mxu1 %v14578_v58  ;;  %v14628_v58 = vpack.c.bf16 %v8090_v32, %v8086_v12  ;;  %v8098_v12 = vld [vmem:[%s18091_s2 + $0xaa8] sm:$0xff]  ;;  %v8096_v32 = vld [vmem:[%s18091_s2 + $0xa98] sm:$0xff] }
 0x3ac   :  { %9180 = vmatprep.subr.bf16.mxu0 %v14590_v24  ;;  %9240 = vmatprep.subr.bf16.mxu1 %v14592_v29  ;;  %v14654_v29 = vpack.c.bf16 %v8089_v45, %v8085_v56  ;;  %v18563_v10 = vld [vmem:[#allocation71_spill] sm:$0xff]  ;;  %v3209_v45 = vsel %vm2979_vm4, %v14009_v21, %v13896_v4  ;;  %v8099_v56 = vld [vmem:[%s18091_s2 + $0xab0] sm:$0xff] }
 0x3ad   :  { %18561 = vst [vmem:[#allocation172_spill] sm:$0xff] %v14628_v58  ;;  %v3296_v24 = vpop.permute.xlu1 %3295  ;;  %v3242_v51 = vmax.f32 %v18563_v10, %v3218_v50  ;;  %v14675_v50 = vpack.c.bf16 %v8100_v6, %v8096_v32  ;;  %v8095_v10 = vld [vmem:[%s18091_s2 + $0xa90] sm:$0xff]  ;;  %v8102_v4 = vld [vmem:[%s18091_s2 + $0xac8] sm:$0xff] }
 0x3ae   :  { %v3308_v9 = vsel %vm2979_vm4, %v14641_v35, %v3296_v24  ;;  %v8097_v24 = vld [vmem:[%s18091_s2 + $0xaa0] sm:$0xff]  ;;  %v8106_v52 = vld [vmem:[%s18091_s2 + $0xae8] sm:$0xff] }
 0x3af   :  { %v3332_v11 = vmax.f32 %v18564_v33, %v3308_v9  ;;  %9182 = vmatpush1.bf16.msra.mxu0 %v14614_v2  ;;  %9242 = vmatpush1.bf16.msra.mxu1 %v14616_v37  ;;  %v14673_v33 = vpack.c.bf16 %v8098_v12, %v8094_v48  ;;  %18566 = vst [vmem:[#allocation79_spill] sm:$0xff] %v14675_v50  ;;  %v8104_v48 = vld [vmem:[%s18091_s2 + $0xad8] sm:$0xff]  ;;  %v18568_v9 = vld [vmem:[#allocation72_spill] sm:$0xff]  ;;  %v8101_v37 = vld [vmem:[%s18091_s2 + $0xac0] sm:$0xff] }
 0x3b0   :  { %9184 = vmatprep.subr.bf16.mxu0 %v14628_v58  ;;  %9244 = vmatprep.subr.bf16.mxu1 %v14630_v47  ;;  %v8108_v12 = vld [vmem:[%s18091_s2 + $0xaf8] sm:$0xff]  ;;  %v14699_v6 = vpack.c.bf16 %v8097_v24, %v8093_v53  ;;  %v14705_v58 = vpack.c.bf16 %v8099_v56, %v8095_v10  ;;  %v3211_v53 = vsel %vm2979_vm4, %v14161_v7, %v14064_v42  ;;  %v8103_v10 = vld [vmem:[%s18091_s2 + $0xad0] sm:$0xff]  ;;  %v8110_v7 = vld [vmem:[%s18091_s2 + $0xb08] sm:$0xff] }
 0x3b1   :  { %18565 = vst [vmem:[#allocation71_spill] sm:$0xff] %v14673_v33  ;;  %v14686_v21 = vmax.f32 %v3242_v51, %v3332_v11  ;;  %v3268_v43 = vpop.permute.xlu1 %3267  ;;  %v18567_v11 = vld [vmem:[#allocation64_spill] sm:$0xff]  ;;  %v14718_v24 = vpack.c.bf16 %v8106_v52, %v8102_v4  ;;  %v8114_v4 = vld [vmem:[%s18091_s2 + $0xb28] sm:$0xff]  ;;  %v8112_v52 = vld [vmem:[%s18091_s2 + $0xb18] sm:$0xff] }
 0x3b2   :  { %v3299_v32 = vsel %vm2979_vm4, %v3268_v43, %v13951_v25  ;;  %v3233_v51 = vmax.f32 %v18567_v11, %v3209_v45  ;;  %18569 = vst [vmem:[#allocation64_spill] sm:$0xff] %v14705_v58  ;;  %v8105_v25 = vld [vmem:[%s18091_s2 + $0xae0] sm:$0xff]  ;;  %v14720_v45 = vpack.c.bf16 %v8108_v12, %v8104_v48  ;;  %v8107_v56 = vld [vmem:[%s18091_s2 + $0xaf0] sm:$0xff]  ;;  %v8116_v48 = vld [vmem:[%s18091_s2 + $0xb38] sm:$0xff] }
 0x3b3   :  { %v3323_v47 = vmax.f32 %v18568_v9, %v3299_v32  ;;  %9186 = vmatpush1.bf16.msra.mxu0 %v14654_v29  ;;  %9246 = vmatpush1.bf16.msra.mxu1 %v14660_v44  ;;  %18570 = vst [vmem:[#allocation72_spill] sm:$0xff] %v14718_v24  ;;  %v14744_v32 = vpack.c.bf16 %v8105_v25, %v8101_v37 }
 0x3b4   :  { %9188 = vmatprep.subr.bf16.mxu0 %v14673_v33  ;;  %9248 = vmatprep.subr.bf16.mxu1 %v14675_v50  ;;  %18571 = vst [vmem:[#allocation174_spill] sm:$0xff] %v14720_v45  ;;  %v14750_v50 = vpack.c.bf16 %v8107_v56, %v8103_v10  ;;  %v8109_v33 = vld [vmem:[%s18091_s2 + $0xb00] sm:$0xff]  ;;  %v3213_v37 = vsel %vm2979_vm4, %v14317_v28, %v14214_v23  ;;  %v8111_v10 = vld [vmem:[%s18091_s2 + $0xb10] sm:$0xff]  ;;  %v8130_v23 = vld [vmem:[%s18091_s2 + $0xb48] sm:$0xff] }
 0x3b5   :  { %v14731_v42 = vmax.f32 %v3233_v51, %v3323_v47  ;;  %v3274_v43 = vpop.permute.xlu1 %3273  ;;  %v18572_v47 = vld [vmem:[#allocation65_spill] sm:$0xff]  ;;  %v14763_v25 = vpack.c.bf16 %v8114_v4, %v8110_v7  ;;  %v8115_v56 = vld [vmem:[%s18091_s2 + $0xb30] sm:$0xff]  ;;  %v8134_v7 = vld [vmem:[%s18091_s2 + $0xb68] sm:$0xff] }
 0x3b6   :  { %v3301_v12 = vsel %vm2979_vm4, %v3274_v43, %v14113_v57  ;;  %v3235_v11 = vmax.f32 %v18572_v47, %v3211_v53  ;;  %v18573_v51 = vld [vmem:[#allocation73_spill] sm:$0xff]  ;;  %v8113_v57 = vld [vmem:[%s18091_s2 + $0xb20] sm:$0xff]  ;;  %v14765_v53 = vpack.c.bf16 %v8116_v48, %v8112_v52 }
 0x3b7   :  { %v3325_v9 = vmax.f32 %v18573_v51, %v3301_v12  ;;  %9190 = vmatpush1.bf16.msra.mxu0 %v14699_v6  ;;  %9250 = vmatpush1.bf16.msra.mxu1 %v14705_v58  ;;  %v8132_v4 = vld [vmem:[%s18091_s2 + $0xb58] sm:$0xff]  ;;  %v14789_v12 = vpack.c.bf16 %v8113_v57, %v8109_v33  ;;  %v18575_v47 = vld [vmem:[#allocation66_spill] sm:$0xff]  ;;  %v3215_v57 = vsel %vm2979_vm4, %v14519_v54, %v14372_v5  ;;  %v8142_v5 = vld [vmem:[%s18091_s2 + $0xba8] sm:$0xff] }
 0x3b8   :  { %9192 = vmatprep.subr.bf16.mxu0 %v14718_v24  ;;  %9252 = vmatprep.subr.bf16.mxu1 %v14720_v45  ;;  %18574 = vst [vmem:[#allocation65_spill] sm:$0xff] %v14765_v53  ;;  %v8136_v52 = vld [vmem:[%s18091_s2 + $0xb78] sm:$0xff]  ;;  %v18576_v51 = vld [vmem:[#allocation74_spill] sm:$0xff]  ;;  %v14795_v45 = vpack.c.bf16 %v8115_v56, %v8111_v10  ;;  %v14799_v24 = vpack.c.bf16 %v8134_v7, %v8130_v23  ;;  %v8131_v10 = vld [vmem:[%s18091_s2 + $0xb50] sm:$0xff] }
 0x3b9   :  { %v14776_v28 = vmax.f32 %v3235_v11, %v3325_v9  ;;  %v3280_v43 = vpop.permute.xlu1 %3279  ;;  %v3237_v11 = vmax.f32 %v18575_v47, %v3213_v37  ;;  %v14801_v58 = vpack.c.bf16 %v8136_v52, %v8132_v4  ;;  %v8133_v33 = vld [vmem:[%s18091_s2 + $0xb60] sm:$0xff]  ;;  %v8135_v56 = vld [vmem:[%s18091_s2 + $0xb70] sm:$0xff]  ;;  %v8138_v23 = vld [vmem:[%s18091_s2 + $0xb88] sm:$0xff] }
 0x3ba   :  { %v3303_v48 = vsel %vm2979_vm4, %v3280_v43, %v14267_v16  ;;  %18577 = vst [vmem:[#allocation73_spill] sm:$0xff] %v14799_v24  ;;  %v8129_v16 = vld [vmem:[%s18091_s2 + $0xb40] sm:$0xff]  ;;  %v3202_v43 = vpop.permute.xlu0 %3201  ;;  %v8140_v54 = vld [vmem:[%s18091_s2 + $0xb98] sm:$0xff]  ;;  %v18579_v47 = vld [vmem:[#allocation68_spill] sm:$0xff] }
 0x3bb   :  { %v3327_v9 = vmax.f32 %v18576_v51, %v3303_v48  ;;  %9194 = vmatpush1.bf16.msra.mxu0 %v14744_v32  ;;  %9254 = vmatpush1.bf16.msra.mxu1 %v14750_v50  ;;  %18578 = vst [vmem:[#allocation66_spill] sm:$0xff] %v14801_v58  ;;  %v8144_v4 = vld [vmem:[%s18091_s2 + $0xbb8] sm:$0xff]  ;;  %v14836_v48 = vpack.c.bf16 %v8133_v33, %v8129_v16  ;;  %v18580_v51 = vld [vmem:[#allocation76_spill] sm:$0xff] }
 0x3bc   :  { %9196 = vmatprep.subr.bf16.mxu0 %v14763_v25  ;;  %9256 = vmatprep.subr.bf16.mxu1 %v14765_v53  ;;  %v14842_v53 = vpack.c.bf16 %v8135_v56, %v8131_v10  ;;  %v3217_v16 = vsel %vm2979_vm4, %v3202_v43, %v14572_v1  ;;  %v14852_v33 = vpack.c.bf16 %v8142_v5, %v8138_v23  ;;  %v8139_v10 = vld [vmem:[%s18091_s2 + $0xb90] sm:$0xff]  ;;  %v8150_v1 = vld [vmem:[%s18091_s2 + $0xbe8] sm:$0xff]  ;;  %v8148_v23 = vld [vmem:[%s18091_s2 + $0xbd8] sm:$0xff] }
 0x3bd   :  { %v14812_v37 = vmax.f32 %v3237_v11, %v3327_v9  ;;  %v3239_v11 = vmax.f32 %v18579_v47, %v3215_v57  ;;  %v14854_v57 = vpack.c.bf16 %v8144_v4, %v8140_v54  ;;  %v8143_v56 = vld [vmem:[%s18091_s2 + $0xbb0] sm:$0xff]  ;;  %v8152_v43 = vld [vmem:[%s18091_s2 + $0xbf8] sm:$0xff]  ;;  %v18582_v4 = vld [vmem:[#allocation70_spill] sm:$0xff] }
 0x3be   :  { %v3286_v7 = vpop.permute.xlu1 %3285 }
 0x3bf   :  { %v3305_v52 = vsel %vm2979_vm4, %v3286_v7, %v14442_v20  ;;  %9198 = vmatpush1.bf16.msra.mxu0 %v14789_v12  ;;  %9258 = vmatpush1.bf16.msra.mxu1 %v14795_v45  ;;  %v8137_v20 = vld [vmem:[%s18091_s2 + $0xb80] sm:$0xff] }
 0x3c0   :  { %v3329_v9 = vmax.f32 %v18580_v51, %v3305_v52  ;;  %9260 = vmatprep.subr.bf16.mxu0 %v14799_v24  ;;  %9320 = vmatprep.subr.bf16.mxu1 %v14801_v58  ;;  %v8141_v7 = vld [vmem:[%s18091_s2 + $0xba0] sm:$0xff]  ;;  %v8146_v52 = vld [vmem:[%s18091_s2 + $0xbc8] sm:$0xff]  ;;  %v14890_v24 = vpack.c.bf16 %v8143_v56, %v8139_v10  ;;  %v8151_v10 = vld [vmem:[%s18091_s2 + $0xbf0] sm:$0xff] }
 0x3c1   :  { %v14884_v54 = vpack.c.bf16 %v8141_v7, %v8137_v20  ;;  %v14900_v20 = vpack.c.bf16 %v8150_v1, %v8146_v52  ;;  %v14902_v7 = vpack.c.bf16 %v8152_v43, %v8148_v23  ;;  %v8154_v56 = vld [vmem:[%s18091_s2 + $0xc08] sm:$0xff]  ;;  %v8156_v1 = vld [vmem:[%s18091_s2 + $0xc18] sm:$0xff] }
 0x3c2   :  { %v14865_v47 = vmax.f32 %v3239_v11, %v3329_v9  ;;  %v3292_v51 = vpop.permute.xlu1 %3291  ;;  %4203 = vmatmul.mubr.f32.vlgmr.msra.gmra.mrb[118].mxu0 %v13446_v55  ;;  %4300 = vmatmul.mubr.f32.vlgmr.msra.gmra.mrb[112].mxu1 %v13446_v55  ;;  %v3241_v11 = vmax.f32 %v18582_v4, %v3217_v16  ;;  %v18583_v9 = vld [vmem:[#allocation78_spill] sm:$0xff]  ;;  %18584 = vst [vmem:[#allocation68_spill] sm:$0xff] %v14890_v24  ;;  %v8147_v16 = vld [vmem:[%s18091_s2 + $0xbd0] sm:$0xff]  ;;  %v8158_v52 = vld [vmem:[%s18091_s2 + $0xc28] sm:$0xff] }
 0x3c3   :  { %v3307_v5 = vsel %vm2979_vm4, %v3292_v51, %v14641_v35  ;;  %8118 = vmatprep.mubr.msk.f32.mxu0 %vm3489_vm5, %v13492_v27  ;;  %8124 = vmatprep.mubr.msk.f32.mxu1 %vm3489_vm5, %v13492_v27  ;;  %18581 = vst [vmem:[#allocation74_spill] sm:$0xff] %v14884_v54  ;;  %v8145_v35 = vld [vmem:[%s18091_s2 + $0xbc0] sm:$0xff]  ;;  %18585 = vst [vmem:[#allocation76_spill] sm:$0xff] %v14900_v20  ;;  %v8160_v23 = vld [vmem:[%s18091_s2 + $0xc38] sm:$0xff]  ;;  %v14934_v43 = vpack.c.bf16 %v8151_v10, %v8147_v16 }
 0x3c4   :  { %v3331_v58 = vmax.f32 %v18583_v9, %v3307_v5  ;;  %9262 = vmatpush1.bf16.msra.mxu0 %v14836_v48  ;;  %9322 = vmatpush1.bf16.msra.mxu1 %v14842_v53  ;;  %v8149_v51 = vld [vmem:[%s18091_s2 + $0xbe0] sm:$0xff]  ;;  %18586 = vst [vmem:[#allocation70_spill] sm:$0xff] %v14902_v7  ;;  %v14944_v9 = vpack.c.bf16 %v8158_v52, %v8154_v56  ;;  %v8162_v16 = vld [vmem:[%s18091_s2 + $0xc48] sm:$0xff]  ;;  %v8164_v56 = vld [vmem:[%s18091_s2 + $0xc58] sm:$0xff] }
 0x3c5   :  { %9264 = vmatprep.subr.bf16.mxu0 %v14852_v33  ;;  %9324 = vmatprep.subr.bf16.mxu1 %v14854_v57  ;;  %18588 = vst [vmem:[#allocation175_spill] sm:$0xff] %v14934_v43  ;;  %v8153_v4 = vld [vmem:[%s18091_s2 + $0xc00] sm:$0xff]  ;;  %v8166_v10 = vld [vmem:[%s18091_s2 + $0xc68] sm:$0xff]  ;;  %v8168_v52 = vld [vmem:[%s18091_s2 + $0xc78] sm:$0xff] }
 0x3c6   :  { %v14913_v5 = vmax.f32 %v3241_v11, %v3331_v58  ;;  %4207 = vmatmul.mubr.f32.gmra.mrb[94].mxu0 %v13894_v62  ;;  %4304 = vmatmul.mubr.f32.gmra.mrb[88].mxu1 %v13894_v62  ;;  %v14932_v58 = vpack.c.bf16 %v8149_v51, %v8145_v35  ;;  %v8157_v11 = vld [vmem:[%s18091_s2 + $0xc20] sm:$0xff]  ;;  %18589 = vst [vmem:[#allocation176_spill] sm:$0xff] %v14944_v9  ;;  %v8155_v35 = vld [vmem:[%s18091_s2 + $0xc10] sm:$0xff] }
 0x3c7   :  { %8119 = vmatprep.mubr.msk.f32.mxu0 %vm3489_vm5, %v13928_v3  ;;  %8125 = vmatprep.mubr.msk.f32.mxu1 %vm3489_vm5, %v13928_v3  ;;  %v8159_v51 = vld [vmem:[%s18091_s2 + $0xc30] sm:$0xff] }
 0x3c8   :  { %9266 = vmatpush1.bf16.msra.mxu0 %v14884_v54  ;;  %9326 = vmatpush1.bf16.msra.mxu1 %v14890_v24  ;;  %18587 = vst [vmem:[#allocation78_spill] sm:$0xff] %v14932_v58  ;;  %v14946_v54 = vpack.c.bf16 %v8160_v23, %v8156_v1  ;;  %v14974_v1 = vpack.c.bf16 %v8157_v11, %v8153_v4  ;;  %v8163_v4 = vld [vmem:[%s18091_s2 + $0xc50] sm:$0xff] }
 0x3c9   :  { %9268 = vmatprep.subr.bf16.mxu0 %v14900_v20  ;;  %9328 = vmatprep.subr.bf16.mxu1 %v14902_v7  ;;  %v14976_v23 = vpack.c.bf16 %v8159_v51, %v8155_v35  ;;  %v8161_v7 = vld [vmem:[%s18091_s2 + $0xc40] sm:$0xff]  ;;  %v14986_v24 = vpack.c.bf16 %v8166_v10, %v8162_v16  ;;  %v8167_v11 = vld [vmem:[%s18091_s2 + $0xc70] sm:$0xff]  ;;  %v8170_v35 = vld [vmem:[%s18091_s2 + $0xc88] sm:$0xff] }
 0x3ca   :  { %18590 = vst [vmem:[#allocation177_spill] sm:$0xff] %v14946_v54  ;;  %4213 = vmatmul.mubr.f32.gmra.mrb[96].mxu0 %v13945_v8  ;;  %4310 = vmatmul.mubr.f32.gmra.mrb[90].mxu1 %v13945_v8  ;;  %18591 = vst [vmem:[#allocation178_spill] sm:$0xff] %v14974_v1  ;;  %v8165_v20 = vld [vmem:[%s18091_s2 + $0xc60] sm:$0xff]  ;;  %v8174_v51 = vld [vmem:[%s18091_s2 + $0xca8] sm:$0xff] }
 0x3cb   :  { %8120 = vmatprep.mubr.msk.f32.mxu0 %vm3489_vm5, %v13980_v61  ;;  %8126 = vmatprep.mubr.msk.f32.mxu1 %vm3489_vm5, %v13980_v61  ;;  %18592 = vst [vmem:[#allocation179_spill] sm:$0xff] %v14976_v23  ;;  %18593 = vst [vmem:[#allocation180_spill] sm:$0xff] %v14986_v24  ;;  %v8172_v16 = vld [vmem:[%s18091_s2 + $0xc98] sm:$0xff] }
 0x3cc   :  { %9270 = vmatpush1.bf16.msra.mxu0 %v14932_v58  ;;  %9330 = vmatpush1.bf16.msra.mxu1 %v14934_v43  ;;  %v14988_v58 = vpack.c.bf16 %v8168_v52, %v8164_v56  ;;  %v8176_v10 = vld [vmem:[%s18091_s2 + $0xcb8] sm:$0xff]  ;;  %v15016_v56 = vpack.c.bf16 %v8165_v20, %v8161_v7  ;;  %v15018_v52 = vpack.c.bf16 %v8167_v11, %v8163_v4  ;;  %v8171_v20 = vld [vmem:[%s18091_s2 + $0xc90] sm:$0xff]  ;;  %v8178_v4 = vld [vmem:[%s18091_s2 + $0xcc8] sm:$0xff] }
 0x3cd   :  { %9272 = vmatprep.subr.bf16.mxu0 %v14944_v9  ;;  %9332 = vmatprep.subr.bf16.mxu1 %v14946_v54  ;;  %v8169_v54 = vld [vmem:[%s18091_s2 + $0xc80] sm:$0xff]  ;;  %v15028_v43 = vpack.c.bf16 %v8174_v51, %v8170_v35  ;;  %v8175_v7 = vld [vmem:[%s18091_s2 + $0xcb0] sm:$0xff]  ;;  %v8182_v11 = vld [vmem:[%s18091_s2 + $0xce8] sm:$0xff] }
 0x3ce   :  { %18594 = vst [vmem:[#allocation181_spill] sm:$0xff] %v14988_v58  ;;  %4219 = vmatmul.mubr.f32.gmra.mrb[98].mxu0 %v14003_v18  ;;  %4316 = vmatmul.mubr.f32.gmra.mrb[92].mxu1 %v14003_v18  ;;  %18595 = vst [vmem:[#allocation182_spill] sm:$0xff] %v15016_v56  ;;  %v8173_v9 = vld [vmem:[%s18091_s2 + $0xca0] sm:$0xff]  ;;  %v8180_v35 = vld [vmem:[%s18091_s2 + $0xcd8] sm:$0xff] }
 0x3cf   :  { %8121 = vmatprep.mubr.msk.f32.mxu0 %vm3489_vm5, %v14032_v49  ;;  %8127 = vmatprep.mubr.msk.f32.mxu1 %vm3489_vm5, %v14032_v49  ;;  %18596 = vst [vmem:[#allocation183_spill] sm:$0xff] %v15018_v52  ;;  %18597 = vst [vmem:[#allocation184_spill] sm:$0xff] %v15028_v43  ;;  %v8184_v51 = vld [vmem:[%s18091_s2 + $0xcf8] sm:$0xff] }
 0x3d0   :  { %9274 = vmatpush1.bf16.msra.mxu0 %v14974_v1  ;;  %9334 = vmatpush1.bf16.msra.mxu1 %v14976_v23  ;;  %v15030_v1 = vpack.c.bf16 %v8176_v10, %v8172_v16  ;;  %v15058_v16 = vpack.c.bf16 %v8173_v9, %v8169_v54  ;;  %v15060_v10 = vpack.c.bf16 %v8175_v7, %v8171_v20  ;;  %v8179_v54 = vld [vmem:[%s18091_s2 + $0xcd0] sm:$0xff]  ;;  %v8186_v20 = vld [vmem:[%s18091_s2 + $0xd08] sm:$0xff] }
 0x3d1   :  { %9276 = vmatprep.subr.bf16.mxu0 %v14986_v24  ;;  %9336 = vmatprep.subr.bf16.mxu1 %v14988_v58  ;;  %v8177_v58 = vld [vmem:[%s18091_s2 + $0xcc0] sm:$0xff]  ;;  %v15070_v23 = vpack.c.bf16 %v8182_v11, %v8178_v4  ;;  %v8183_v9 = vld [vmem:[%s18091_s2 + $0xcf0] sm:$0xff]  ;;  %v8190_v7 = vld [vmem:[%s18091_s2 + $0xd28] sm:$0xff] }
 0x3d2   :  { %18598 = vst [vmem:[#allocation185_spill] sm:$0xff] %v15030_v1  ;;  %4225 = vmatmul.mubr.f32.gmra.mrb[100].mxu0 %v14058_v31  ;;  %4322 = vmatmul.mubr.f32.gmra.mrb[94].mxu1 %v14058_v31  ;;  %18599 = vst [vmem:[#allocation186_spill] sm:$0xff] %v15058_v16  ;;  %v8181_v24 = vld [vmem:[%s18091_s2 + $0xce0] sm:$0xff]  ;;  %v8188_v4 = vld [vmem:[%s18091_s2 + $0xd18] sm:$0xff] }
 0x3d3   :  { %8122 = vmatprep.mubr.msk.f32.mxu0 %vm3489_vm5, %v14084_v19  ;;  %8128 = vmatprep.mubr.msk.f32.mxu1 %vm3489_vm5, %v14084_v19  ;;  %18600 = vst [vmem:[#allocation187_spill] sm:$0xff] %v15060_v10  ;;  %18601 = vst [vmem:[#allocation188_spill] sm:$0xff] %v15070_v23  ;;  %v8192_v11 = vld [vmem:[%s18091_s2 + $0xd38] sm:$0xff] }
 0x3d4   :  { %9278 = vmatpush1.bf16.msra.mxu0 %v15016_v56  ;;  %9338 = vmatpush1.bf16.msra.mxu1 %v15018_v52  ;;  %v15072_v56 = vpack.c.bf16 %v8184_v51, %v8180_v35  ;;  %v15100_v35 = vpack.c.bf16 %v8181_v24, %v8177_v58  ;;  %v15102_v51 = vpack.c.bf16 %v8183_v9, %v8179_v54  ;;  %v8187_v24 = vld [vmem:[%s18091_s2 + $0xd10] sm:$0xff]  ;;  %v8194_v54 = vld [vmem:[%s18091_s2 + $0xd48] sm:$0xff] }
 0x3d5   :  { %9280 = vmatprep.subr.bf16.mxu0 %v15028_v43  ;;  %9340 = vmatprep.subr.bf16.mxu1 %v15030_v1  ;;  %v8185_v1 = vld [vmem:[%s18091_s2 + $0xd00] sm:$0xff]  ;;  %v15112_v52 = vpack.c.bf16 %v8190_v7, %v8186_v20  ;;  %v8191_v58 = vld [vmem:[%s18091_s2 + $0xd30] sm:$0xff]  ;;  %v8198_v9 = vld [vmem:[%s18091_s2 + $0xd68] sm:$0xff] }
 0x3d6   :  { %18602 = vst [vmem:[#allocation189_spill] sm:$0xff] %v15072_v56  ;;  %4231 = vmatmul.mubr.f32.gmra.mrb[120].mxu0 %v14107_v40  ;;  %4328 = vmatmul.mubr.f32.gmra.mrb[114].mxu1 %v14107_v40  ;;  %18603 = vst [vmem:[#allocation190_spill] sm:$0xff] %v15100_v35  ;;  %v8189_v43 = vld [vmem:[%s18091_s2 + $0xd20] sm:$0xff]  ;;  %v8196_v20 = vld [vmem:[%s18091_s2 + $0xd58] sm:$0xff] }
 0x3d7   :  { %8249 = vmatprep.mubr.msk.f32.mxu0 %vm3489_vm5, %v13370_v38  ;;  %8255 = vmatprep.mubr.msk.f32.mxu1 %vm3489_vm5, %v13370_v38  ;;  %18604 = vst [vmem:[#allocation191_spill] sm:$0xff] %v15102_v51  ;;  %18605 = vst [vmem:[#allocation192_spill] sm:$0xff] %v15112_v52  ;;  %v8200_v7 = vld [vmem:[%s18091_s2 + $0xd78] sm:$0xff] }
 0x3d8   :  { %9282 = vmatpush1.bf16.msra.mxu0 %v15058_v16  ;;  %9342 = vmatpush1.bf16.msra.mxu1 %v15060_v10  ;;  %v15114_v16 = vpack.c.bf16 %v8192_v11, %v8188_v4  ;;  %v15136_v4 = vpack.c.bf16 %v8189_v43, %v8185_v1  ;;  %v15138_v11 = vpack.c.bf16 %v8191_v58, %v8187_v24  ;;  %v8195_v43 = vld [vmem:[%s18091_s2 + $0xd50] sm:$0xff]  ;;  %v8202_v24 = vld [vmem:[%s18091_s2 + $0xd88] sm:$0xff] }
 0x3d9   :  { %9284 = vmatprep.subr.bf16.mxu0 %v15070_v23  ;;  %9344 = vmatprep.subr.bf16.mxu1 %v15072_v56  ;;  %v8193_v56 = vld [vmem:[%s18091_s2 + $0xd40] sm:$0xff]  ;;  %v15148_v10 = vpack.c.bf16 %v8198_v9, %v8194_v54  ;;  %v8199_v1 = vld [vmem:[%s18091_s2 + $0xd70] sm:$0xff]  ;;  %v8206_v58 = vld [vmem:[%s18091_s2 + $0xda8] sm:$0xff] }
 0x3da   :  { %18606 = vst [vmem:[#allocation193_spill] sm:$0xff] %v15114_v16  ;;  %18607 = vst [vmem:[#allocation194_spill] sm:$0xff] %v15136_v4  ;;  %v8197_v23 = vld [vmem:[%s18091_s2 + $0xd60] sm:$0xff]  ;;  %v8204_v54 = vld [vmem:[%s18091_s2 + $0xd98] sm:$0xff] }
 0x3db   :  { %18608 = vst [vmem:[#allocation195_spill] sm:$0xff] %v15138_v11  ;;  %18609 = vst [vmem:[#allocation196_spill] sm:$0xff] %v15148_v10  ;;  %v8208_v9 = vld [vmem:[%s18091_s2 + $0xdb8] sm:$0xff] }
 0x3dc   :  { %9286 = vmatpush1.bf16.msra.mxu0 %v15100_v35  ;;  %9346 = vmatpush1.bf16.msra.mxu1 %v15102_v51  ;;  %v15150_v35 = vpack.c.bf16 %v8200_v7, %v8196_v20  ;;  %v15172_v20 = vpack.c.bf16 %v8197_v23, %v8193_v56  ;;  %v15174_v7 = vpack.c.bf16 %v8199_v1, %v8195_v43  ;;  %v8203_v23 = vld [vmem:[%s18091_s2 + $0xd90] sm:$0xff]  ;;  %v8210_v43 = vld [vmem:[%s18091_s2 + $0xdc8] sm:$0xff] }
 0x3dd   :  { %9288 = vmatprep.subr.bf16.mxu0 %v15112_v52  ;;  %9348 = vmatprep.subr.bf16.mxu1 %v15114_v16  ;;  %v8201_v16 = vld [vmem:[%s18091_s2 + $0xd80] sm:$0xff]  ;;  %v15184_v51 = vpack.c.bf16 %v8206_v58, %v8202_v24  ;;  %v8207_v56 = vld [vmem:[%s18091_s2 + $0xdb0] sm:$0xff]  ;;  %v8214_v1 = vld [vmem:[%s18091_s2 + $0xde8] sm:$0xff] }
 0x3de   :  { %18610 = vst [vmem:[#allocation197_spill] sm:$0xff] %v15150_v35  ;;  %18611 = vst [vmem:[#allocation198_spill] sm:$0xff] %v15172_v20  ;;  %v8205_v52 = vld [vmem:[%s18091_s2 + $0xda0] sm:$0xff]  ;;  %v8212_v24 = vld [vmem:[%s18091_s2 + $0xdd8] sm:$0xff] }
 0x3df   :  { %18612 = vst [vmem:[#allocation199_spill] sm:$0xff] %v15174_v7  ;;  %18613 = vst [vmem:[#allocation200_spill] sm:$0xff] %v15184_v51  ;;  %v8216_v58 = vld [vmem:[%s18091_s2 + $0xdf8] sm:$0xff] }
 0x3e0   :  { %9290 = vmatpush1.bf16.msra.mxu0 %v15136_v4  ;;  %9350 = vmatpush1.bf16.msra.mxu1 %v15138_v11  ;;  %v15186_v4 = vpack.c.bf16 %v8208_v9, %v8204_v54  ;;  %v15208_v54 = vpack.c.bf16 %v8205_v52, %v8201_v16  ;;  %v15210_v9 = vpack.c.bf16 %v8207_v56, %v8203_v23  ;;  %v8211_v52 = vld [vmem:[%s18091_s2 + $0xdd0] sm:$0xff]  ;;  %v8218_v23 = vld [vmem:[%s18091_s2 + $0xe08] sm:$0xff] }
 0x3e1   :  { %9292 = vmatprep.subr.bf16.mxu0 %v15148_v10  ;;  %9352 = vmatprep.subr.bf16.mxu1 %v15150_v35  ;;  %v8209_v35 = vld [vmem:[%s18091_s2 + $0xdc0] sm:$0xff]  ;;  %v15220_v11 = vpack.c.bf16 %v8214_v1, %v8210_v43  ;;  %v8215_v16 = vld [vmem:[%s18091_s2 + $0xdf0] sm:$0xff]  ;;  %v8222_v56 = vld [vmem:[%s18091_s2 + $0xe28] sm:$0xff] }
 0x3e2   :  { %18614 = vst [vmem:[#allocation201_spill] sm:$0xff] %v15186_v4  ;;  %18615 = vst [vmem:[#allocation202_spill] sm:$0xff] %v15208_v54  ;;  %v8213_v10 = vld [vmem:[%s18091_s2 + $0xde0] sm:$0xff]  ;;  %v8220_v43 = vld [vmem:[%s18091_s2 + $0xe18] sm:$0xff] }
 0x3e3   :  { %18616 = vst [vmem:[#allocation203_spill] sm:$0xff] %v15210_v9  ;;  %18617 = vst [vmem:[#allocation204_spill] sm:$0xff] %v15220_v11  ;;  %v8224_v1 = vld [vmem:[%s18091_s2 + $0xe38] sm:$0xff] }
 0x3e4   :  { %9294 = vmatpush1.bf16.msra.mxu0 %v15172_v20  ;;  %9354 = vmatpush1.bf16.msra.mxu1 %v15174_v7  ;;  %v15222_v20 = vpack.c.bf16 %v8216_v58, %v8212_v24  ;;  %v15244_v24 = vpack.c.bf16 %v8213_v10, %v8209_v35  ;;  %v15246_v58 = vpack.c.bf16 %v8215_v16, %v8211_v52  ;;  %v8219_v10 = vld [vmem:[%s18091_s2 + $0xe10] sm:$0xff]  ;;  %v8226_v52 = vld [vmem:[%s18091_s2 + $0xe48] sm:$0xff] }
 0x3e5   :  { %9296 = vmatprep.subr.bf16.mxu0 %v15184_v51  ;;  %9356 = vmatprep.subr.bf16.mxu1 %v15186_v4  ;;  %v8217_v4 = vld [vmem:[%s18091_s2 + $0xe00] sm:$0xff]  ;;  %v15256_v7 = vpack.c.bf16 %v8222_v56, %v8218_v23  ;;  %v8223_v35 = vld [vmem:[%s18091_s2 + $0xe30] sm:$0xff]  ;;  %v8230_v16 = vld [vmem:[%s18091_s2 + $0xe68] sm:$0xff] }
 0x3e6   :  { %18618 = vst [vmem:[#allocation205_spill] sm:$0xff] %v15222_v20  ;;  %18619 = vst [vmem:[#allocation206_spill] sm:$0xff] %v15244_v24  ;;  %v8221_v51 = vld [vmem:[%s18091_s2 + $0xe20] sm:$0xff]  ;;  %v8228_v23 = vld [vmem:[%s18091_s2 + $0xe58] sm:$0xff] }
 0x3e7   :  { %18620 = vst [vmem:[#allocation207_spill] sm:$0xff] %v15246_v58  ;;  %18621 = vst [vmem:[#allocation208_spill] sm:$0xff] %v15256_v7  ;;  %v8232_v56 = vld [vmem:[%s18091_s2 + $0xe78] sm:$0xff] }
 0x3e8   :  { %9298 = vmatpush1.bf16.msra.mxu0 %v15208_v54  ;;  %9358 = vmatpush1.bf16.msra.mxu1 %v15210_v9  ;;  %v15258_v54 = vpack.c.bf16 %v8224_v1, %v8220_v43  ;;  %v15280_v43 = vpack.c.bf16 %v8221_v51, %v8217_v4  ;;  %v15282_v1 = vpack.c.bf16 %v8223_v35, %v8219_v10  ;;  %v8227_v51 = vld [vmem:[%s18091_s2 + $0xe50] sm:$0xff]  ;;  %v8234_v10 = vld [vmem:[%s18091_s2 + $0xe88] sm:$0xff] }
 0x3e9   :  { %9300 = vmatprep.subr.bf16.mxu0 %v15220_v11  ;;  %9360 = vmatprep.subr.bf16.mxu1 %v15222_v20  ;;  %v8225_v20 = vld [vmem:[%s18091_s2 + $0xe40] sm:$0xff]  ;;  %v15292_v9 = vpack.c.bf16 %v8230_v16, %v8226_v52  ;;  %v8231_v4 = vld [vmem:[%s18091_s2 + $0xe70] sm:$0xff]  ;;  %v8238_v35 = vld [vmem:[%s18091_s2 + $0xea8] sm:$0xff] }
 0x3ea   :  { %18622 = vst [vmem:[#allocation209_spill] sm:$0xff] %v15258_v54  ;;  %18623 = vst [vmem:[#allocation210_spill] sm:$0xff] %v15280_v43  ;;  %v8229_v11 = vld [vmem:[%s18091_s2 + $0xe60] sm:$0xff]  ;;  %v8236_v52 = vld [vmem:[%s18091_s2 + $0xe98] sm:$0xff] }
 0x3eb   :  { %18624 = vst [vmem:[#allocation211_spill] sm:$0xff] %v15282_v1  ;;  %18625 = vst [vmem:[#allocation212_spill] sm:$0xff] %v15292_v9  ;;  %v8240_v16 = vld [vmem:[%s18091_s2 + $0xeb8] sm:$0xff] }
 0x3ec   :  { %9302 = vmatpush1.bf16.msra.mxu0 %v15244_v24  ;;  %9362 = vmatpush1.bf16.msra.mxu1 %v15246_v58  ;;  %v15294_v24 = vpack.c.bf16 %v8232_v56, %v8228_v23  ;;  %v15316_v23 = vpack.c.bf16 %v8229_v11, %v8225_v20  ;;  %v15318_v56 = vpack.c.bf16 %v8231_v4, %v8227_v51  ;;  %v8235_v11 = vld [vmem:[%s18091_s2 + $0xe90] sm:$0xff]  ;;  %v8242_v51 = vld [vmem:[%s18091_s2 + $0xec8] sm:$0xff] }
 0x3ed   :  { %9304 = vmatprep.subr.bf16.mxu0 %v15256_v7  ;;  %9364 = vmatprep.subr.bf16.mxu1 %v15258_v54  ;;  %v8233_v54 = vld [vmem:[%s18091_s2 + $0xe80] sm:$0xff]  ;;  %v15328_v58 = vpack.c.bf16 %v8238_v35, %v8234_v10  ;;  %v8239_v20 = vld [vmem:[%s18091_s2 + $0xeb0] sm:$0xff]  ;;  %v8246_v4 = vld [vmem:[%s18091_s2 + $0xee8] sm:$0xff] }
 0x3ee   :  { %18626 = vst [vmem:[#allocation213_spill] sm:$0xff] %v15294_v24  ;;  %18627 = vst [vmem:[#allocation214_spill] sm:$0xff] %v15316_v23  ;;  %v8237_v7 = vld [vmem:[%s18091_s2 + $0xea0] sm:$0xff]  ;;  %v8244_v10 = vld [vmem:[%s18091_s2 + $0xed8] sm:$0xff] }
 0x3ef   :  { %18628 = vst [vmem:[#allocation215_spill] sm:$0xff] %v15318_v56  ;;  %18629 = vst [vmem:[#allocation216_spill] sm:$0xff] %v15328_v58  ;;  %v8248_v35 = vld [vmem:[%s18091_s2 + $0xef8] sm:$0xff] }
 0x3f0   :  { %9306 = vmatpush1.bf16.msra.mxu0 %v15280_v43  ;;  %9366 = vmatpush1.bf16.msra.mxu1 %v15282_v1  ;;  %v15330_v43 = vpack.c.bf16 %v8240_v16, %v8236_v52  ;;  %v15352_v52 = vpack.c.bf16 %v8237_v7, %v8233_v54  ;;  %v15354_v16 = vpack.c.bf16 %v8239_v20, %v8235_v11  ;;  %v8243_v7 = vld [vmem:[%s18091_s2 + $0xed0] sm:$0xff]  ;;  %v8262_v11 = vld [vmem:[%s18091_s2 + $0xf08] sm:$0xff] }
 0x3f1   :  { %9308 = vmatprep.subr.bf16.mxu0 %v15292_v9  ;;  %9368 = vmatprep.subr.bf16.mxu1 %v15294_v24  ;;  %v8241_v24 = vld [vmem:[%s18091_s2 + $0xec0] sm:$0xff]  ;;  %v15364_v1 = vpack.c.bf16 %v8246_v4, %v8242_v51  ;;  %v8247_v54 = vld [vmem:[%s18091_s2 + $0xef0] sm:$0xff]  ;;  %v8266_v20 = vld [vmem:[%s18091_s2 + $0xf28] sm:$0xff] }
 0x3f2   :  { %18630 = vst [vmem:[#allocation217_spill] sm:$0xff] %v15330_v43  ;;  %18631 = vst [vmem:[#allocation218_spill] sm:$0xff] %v15352_v52  ;;  %v8245_v9 = vld [vmem:[%s18091_s2 + $0xee0] sm:$0xff]  ;;  %v8264_v51 = vld [vmem:[%s18091_s2 + $0xf18] sm:$0xff] }
 0x3f3   :  { %18632 = vst [vmem:[#allocation219_spill] sm:$0xff] %v15354_v16  ;;  %18633 = vst [vmem:[#allocation220_spill] sm:$0xff] %v15364_v1  ;;  %v8268_v4 = vld [vmem:[%s18091_s2 + $0xf38] sm:$0xff] }
 0x3f4   :  { %9310 = vmatpush1.bf16.msra.mxu0 %v15316_v23  ;;  %9370 = vmatpush1.bf16.msra.mxu1 %v15318_v56  ;;  %v15366_v23 = vpack.c.bf16 %v8248_v35, %v8244_v10  ;;  %v15388_v10 = vpack.c.bf16 %v8245_v9, %v8241_v24  ;;  %v15390_v35 = vpack.c.bf16 %v8247_v54, %v8243_v7  ;;  %v8261_v56 = vld [vmem:[%s18091_s2 + $0xf00] sm:$0xff]  ;;  %v8263_v9 = vld [vmem:[%s18091_s2 + $0xf10] sm:$0xff]  ;;  %v8270_v7 = vld [vmem:[%s18091_s2 + $0xf48] sm:$0xff] }
 0x3f5   :  { %9312 = vmatprep.subr.bf16.mxu0 %v15328_v58  ;;  %9372 = vmatprep.subr.bf16.mxu1 %v15330_v43  ;;  %v15394_v43 = vpack.c.bf16 %v8266_v20, %v8262_v11  ;;  %v15396_v58 = vpack.c.bf16 %v8268_v4, %v8264_v51  ;;  %v8267_v24 = vld [vmem:[%s18091_s2 + $0xf30] sm:$0xff]  ;;  %v8274_v54 = vld [vmem:[%s18091_s2 + $0xf68] sm:$0xff]  ;;  %v8272_v11 = vld [vmem:[%s18091_s2 + $0xf58] sm:$0xff] }
 0x3f6   :  { %18634 = vst [vmem:[#allocation221_spill] sm:$0xff] %v15366_v23  ;;  %18635 = vst [vmem:[#allocation222_spill] sm:$0xff] %v15388_v10  ;;  %v8276_v20 = vld [vmem:[%s18091_s2 + $0xf78] sm:$0xff]  ;;  %v15428_v4 = vpack.c.bf16 %v8267_v24, %v8263_v9  ;;  %v8282_v9 = vld [vmem:[%s18091_s2 + $0xfa8] sm:$0xff] }
 0x3f7   :  { %18636 = vst [vmem:[#allocation223_spill] sm:$0xff] %v15390_v35  ;;  %18637 = vst [vmem:[#allocation224_spill] sm:$0xff] %v15394_v43  ;;  %v8280_v24 = vld [vmem:[%s18091_s2 + $0xf98] sm:$0xff] }
 0x3f8   :  { %9314 = vmatpush1.bf16.msra.mxu0 %v15352_v52  ;;  %9374 = vmatpush1.bf16.msra.mxu1 %v15354_v16  ;;  %18638 = vst [vmem:[#allocation225_spill] sm:$0xff] %v15396_v58  ;;  %v8265_v16 = vld [vmem:[%s18091_s2 + $0xf20] sm:$0xff]  ;;  %18640 = vst [vmem:[#allocation227_spill] sm:$0xff] %v15428_v4  ;;  %v15436_v52 = vpack.c.bf16 %v8274_v54, %v8270_v7  ;;  %v8284_v7 = vld [vmem:[%s18091_s2 + $0xfb8] sm:$0xff] }
 0x3f9   :  { %9316 = vmatprep.subr.bf16.mxu0 %v15364_v1  ;;  %9376 = vmatprep.subr.bf16.mxu1 %v15366_v23  ;;  %v15426_v51 = vpack.c.bf16 %v8265_v16, %v8261_v56  ;;  %v8269_v23 = vld [vmem:[%s18091_s2 + $0xf40] sm:$0xff]  ;;  %v8275_v56 = vld [vmem:[%s18091_s2 + $0xf70] sm:$0xff]  ;;  %v8278_v16 = vld [vmem:[%s18091_s2 + $0xf88] sm:$0xff] }
 0x3fa   :  { %v8273_v1 = vld [vmem:[%s18091_s2 + $0xf60] sm:$0xff]  ;;  %18641 = vst [vmem:[#allocation228_spill] sm:$0xff] %v15436_v52 }
 0x3fb   :  { %18639 = vst [vmem:[#allocation226_spill] sm:$0xff] %v15426_v51  ;;  %v15466_v54 = vpack.c.bf16 %v8273_v1, %v8269_v23  ;;  %v8283_v1 = vld [vmem:[%s18091_s2 + $0xfb0] sm:$0xff]  ;;  %v8286_v23 = vld [vmem:[%s18091_s2 + $0xfc8] sm:$0xff] }
 0x3fc   :  { %9318 = vmatpush1.bf16.msra.mxu0 %v15388_v10  ;;  %9378 = vmatpush1.bf16.msra.mxu1 %v15390_v35  ;;  %v15438_v10 = vpack.c.bf16 %v8276_v20, %v8272_v11  ;;  %v8277_v20 = vld [vmem:[%s18091_s2 + $0xf80] sm:$0xff]  ;;  %v15478_v35 = vpack.c.bf16 %v8282_v9, %v8278_v16  ;;  %v8288_v16 = vld [vmem:[%s18091_s2 + $0xfd8] sm:$0xff] }
 0x3fd   :  { %9380 = vmatprep.subr.bf16.mxu0 %v15394_v43  ;;  %9440 = vmatprep.subr.bf16.mxu1 %v15396_v58  ;;  %v8271_v58 = vld [vmem:[%s18091_s2 + $0xf50] sm:$0xff]  ;;  %18643 = vst [vmem:[#allocation230_spill] sm:$0xff] %v15466_v54  ;;  %v8281_v43 = vld [vmem:[%s18091_s2 + $0xfa0] sm:$0xff]  ;;  %v8292_v9 = vld [vmem:[%s18091_s2 + $0xff8] sm:$0xff] }
 0x3fe   :  { %18642 = vst [vmem:[#allocation229_spill] sm:$0xff] %v15438_v10  ;;  %v15468_v11 = vpack.c.bf16 %v8275_v56, %v8271_v58  ;;  %18645 = vst [vmem:[#allocation232_spill] sm:$0xff] %v15478_v35  ;;  %v8279_v58 = vld [vmem:[%s18091_s2 + $0xf90] sm:$0xff]  ;;  %v8290_v56 = vld [vmem:[%s18091_s2 + $0xfe8] sm:$0xff] }
 0x3ff   :  { %4518 = vmatmul.mubr.f32.vlgmr.msra.gmra.mrb[122].mxu0 %v13446_v55  ;;  %4615 = vmatmul.mubr.f32.vlgmr.msra.gmra.mrb[116].mxu1 %v13446_v55 }
 0x400   :  { %8250 = vmatprep.mubr.msk.f32.mxu0 %vm3489_vm5, %v13492_v27  ;;  %8256 = vmatprep.mubr.msk.f32.mxu1 %vm3489_vm5, %v13492_v27  ;;  %18644 = vst [vmem:[#allocation231_spill] sm:$0xff] %v15468_v11 }
 0x401   :  { %9382 = vmatpush1.bf16.msra.mxu0 %v15426_v51  ;;  %9442 = vmatpush1.bf16.msra.mxu1 %v15428_v4  ;;  %v15480_v51 = vpack.c.bf16 %v8284_v7, %v8280_v24  ;;  %v15508_v24 = vpack.c.bf16 %v8281_v43, %v8277_v20  ;;  %v15510_v7 = vpack.c.bf16 %v8283_v1, %v8279_v58  ;;  %v8287_v43 = vld [vmem:[%s18091_s2 + $0xfd0] sm:$0xff]  ;;  %v8294_v58 = vld [vmem:[%s18091_s2 + $0x1008] sm:$0xff] }
 0x402   :  { %9384 = vmatprep.subr.bf16.mxu0 %v15436_v52  ;;  %9444 = vmatprep.subr.bf16.mxu1 %v15438_v10  ;;  %v8285_v10 = vld [vmem:[%s18091_s2 + $0xfc0] sm:$0xff]  ;;  %v15520_v4 = vpack.c.bf16 %v8290_v56, %v8286_v23  ;;  %v8291_v20 = vld [vmem:[%s18091_s2 + $0xff0] sm:$0xff]  ;;  %v8298_v1 = vld [vmem:[%s18091_s2 + $0x1028] sm:$0xff] }
 0x403   :  { %18646 = vst [vmem:[#allocation233_spill] sm:$0xff] %v15480_v51  ;;  %4522 = vmatmul.mubr.f32.gmra.mrb[124].mxu0 %v13894_v62  ;;  %4619 = vmatmul.mubr.f32.gmra.mrb[118].mxu1 %v13894_v62  ;;  %18647 = vst [vmem:[#allocation234_spill] sm:$0xff] %v15508_v24  ;;  %v8289_v52 = vld [vmem:[%s18091_s2 + $0xfe0] sm:$0xff]  ;;  %v8296_v23 = vld [vmem:[%s18091_s2 + $0x1018] sm:$0xff] }
 0x404   :  { %8251 = vmatprep.mubr.msk.f32.mxu0 %vm3489_vm5, %v13928_v3  ;;  %8257 = vmatprep.mubr.msk.f32.mxu1 %vm3489_vm5, %v13928_v3  ;;  %18648 = vst [vmem:[#allocation235_spill] sm:$0xff] %v15510_v7  ;;  %18649 = vst [vmem:[#allocation236_spill] sm:$0xff] %v15520_v4  ;;  %v8300_v56 = vld [vmem:[%s18091_s2 + $0x1038] sm:$0xff] }
 0x405   :  { %9386 = vmatpush1.bf16.msra.mxu0 %v15466_v54  ;;  %9446 = vmatpush1.bf16.msra.mxu1 %v15468_v11  ;;  %v15522_v54 = vpack.c.bf16 %v8292_v9, %v8288_v16  ;;  %v15550_v16 = vpack.c.bf16 %v8289_v52, %v8285_v10  ;;  %v15552_v9 = vpack.c.bf16 %v8291_v20, %v8287_v43  ;;  %v8295_v52 = vld [vmem:[%s18091_s2 + $0x1010] sm:$0xff]  ;;  %v8302_v43 = vld [vmem:[%s18091_s2 + $0x1048] sm:$0xff] }
 0x406   :  { %9388 = vmatprep.subr.bf16.mxu0 %v15478_v35  ;;  %9448 = vmatprep.subr.bf16.mxu1 %v15480_v51  ;;  %v8293_v51 = vld [vmem:[%s18091_s2 + $0x1000] sm:$0xff]  ;;  %v15562_v11 = vpack.c.bf16 %v8298_v1, %v8294_v58  ;;  %v8299_v10 = vld [vmem:[%s18091_s2 + $0x1030] sm:$0xff]  ;;  %v8306_v20 = vld [vmem:[%s18091_s2 + $0x1068] sm:$0xff] }
 0x407   :  { %18650 = vst [vmem:[#allocation237_spill] sm:$0xff] %v15522_v54  ;;  %4526 = vmatmul.mubr.f32.gmra.mrb[108].mxu0 %v13945_v8  ;;  %4623 = vmatmul.mubr.f32.gmra.mrb[102].mxu1 %v13945_v8  ;;  %18651 = vst [vmem:[#allocation238_spill] sm:$0xff] %v15550_v16  ;;  %v8297_v35 = vld [vmem:[%s18091_s2 + $0x1020] sm:$0xff]  ;;  %v8304_v58 = vld [vmem:[%s18091_s2 + $0x1058] sm:$0xff] }
 0x408   :  { %8252 = vmatprep.mubr.msk.f32.mxu0 %vm3489_vm5, %v13980_v61  ;;  %8258 = vmatprep.mubr.msk.f32.mxu1 %vm3489_vm5, %v13980_v61  ;;  %18652 = vst [vmem:[#allocation239_spill] sm:$0xff] %v15552_v9  ;;  %18653 = vst [vmem:[#allocation240_spill] sm:$0xff] %v15562_v11  ;;  %v8308_v1 = vld [vmem:[%s18091_s2 + $0x1078] sm:$0xff] }
 0x409   :  { %9390 = vmatpush1.bf16.msra.mxu0 %v15508_v24  ;;  %9450 = vmatpush1.bf16.msra.mxu1 %v15510_v7  ;;  %v15564_v24 = vpack.c.bf16 %v8300_v56, %v8296_v23  ;;  %v15592_v23 = vpack.c.bf16 %v8297_v35, %v8293_v51  ;;  %v15594_v56 = vpack.c.bf16 %v8299_v10, %v8295_v52  ;;  %v8303_v35 = vld [vmem:[%s18091_s2 + $0x1050] sm:$0xff]  ;;  %v8310_v52 = vld [vmem:[%s18091_s2 + $0x1088] sm:$0xff] }
 0x40a   :  { %9392 = vmatprep.subr.bf16.mxu0 %v15520_v4  ;;  %9452 = vmatprep.subr.bf16.mxu1 %v15522_v54  ;;  %v8301_v54 = vld [vmem:[%s18091_s2 + $0x1040] sm:$0xff]  ;;  %v15604_v7 = vpack.c.bf16 %v8306_v20, %v8302_v43  ;;  %v8307_v51 = vld [vmem:[%s18091_s2 + $0x1070] sm:$0xff]  ;;  %v8314_v10 = vld [vmem:[%s18091_s2 + $0x10a8] sm:$0xff] }
 0x40b   :  { %18654 = vst [vmem:[#allocation241_spill] sm:$0xff] %v15564_v24  ;;  %4532 = vmatmul.mubr.f32.gmra.mrb[110].mxu0 %v14003_v18  ;;  %4629 = vmatmul.mubr.f32.gmra.mrb[104].mxu1 %v14003_v18  ;;  %18655 = vst [vmem:[#allocation242_spill] sm:$0xff] %v15592_v23  ;;  %v8305_v4 = vld [vmem:[%s18091_s2 + $0x1060] sm:$0xff]  ;;  %v8312_v43 = vld [vmem:[%s18091_s2 + $0x1098] sm:$0xff] }
 0x40c   :  { %8253 = vmatprep.mubr.msk.f32.mxu0 %vm3489_vm5, %v14032_v49  ;;  %8259 = vmatprep.mubr.msk.f32.mxu1 %vm3489_vm5, %v14032_v49  ;;  %18656 = vst [vmem:[#allocation243_spill] sm:$0xff] %v15604_v7  ;;  %v8316_v20 = vld [vmem:[%s18091_s2 + $0x10b8] sm:$0xff] }
 0x40d   :  { %9394 = vmatpush1.bf16.msra.mxu0 %v15550_v16  ;;  %9454 = vmatpush1.bf16.msra.mxu1 %v15552_v9  ;;  %v15606_v16 = vpack.c.bf16 %v8308_v1, %v8304_v58  ;;  %v15634_v58 = vpack.c.bf16 %v8305_v4, %v8301_v54  ;;  %v15636_v1 = vpack.c.bf16 %v8307_v51, %v8303_v35  ;;  %v8311_v4 = vld [vmem:[%s18091_s2 + $0x1090] sm:$0xff]  ;;  %v8318_v35 = vld [vmem:[%s18091_s2 + $0x10c8] sm:$0xff] }
 0x40e   :  { %9396 = vmatprep.subr.bf16.mxu0 %v15562_v11  ;;  %9456 = vmatprep.subr.bf16.mxu1 %v15564_v24  ;;  %v8309_v24 = vld [vmem:[%s18091_s2 + $0x1080] sm:$0xff]  ;;  %v15646_v9 = vpack.c.bf16 %v8314_v10, %v8310_v52  ;;  %v8315_v54 = vld [vmem:[%s18091_s2 + $0x10b0] sm:$0xff]  ;;  %v8322_v51 = vld [vmem:[%s18091_s2 + $0x10e8] sm:$0xff] }
 0x40f   :  { %18657 = vst [vmem:[#allocation244_spill] sm:$0xff] %v15606_v16  ;;  %4538 = vmatmul.mubr.f32.gmra.mrb[112].mxu0 %v14058_v31  ;;  %4635 = vmatmul.mubr.f32.gmra.mrb[106].mxu1 %v14058_v31  ;;  %18658 = vst [vmem:[#allocation245_spill] sm:$0xff] %v15634_v58  ;;  %v8313_v11 = vld [vmem:[%s18091_s2 + $0x10a0] sm:$0xff]  ;;  %v8320_v52 = vld [vmem:[%s18091_s2 + $0x10d8] sm:$0xff] }
 0x410   :  { %8254 = vmatprep.mubr.msk.f32.mxu0 %vm3489_vm5, %v14084_v19  ;;  %8260 = vmatprep.mubr.msk.f32.mxu1 %vm3489_vm5, %v14084_v19  ;;  %18659 = vst [vmem:[#allocation246_spill] sm:$0xff] %v15636_v1  ;;  %18660 = vst [vmem:[#allocation247_spill] sm:$0xff] %v15646_v9  ;;  %v8324_v10 = vld [vmem:[%s18091_s2 + $0x10f8] sm:$0xff] }
 0x411   :  { %9398 = vmatpush1.bf16.msra.mxu0 %v15592_v23  ;;  %9458 = vmatpush1.bf16.msra.mxu1 %v15594_v56  ;;  %v15648_v23 = vpack.c.bf16 %v8316_v20, %v8312_v43  ;;  %v15676_v43 = vpack.c.bf16 %v8313_v11, %v8309_v24  ;;  %v15678_v20 = vpack.c.bf16 %v8315_v54, %v8311_v4  ;;  %v8319_v11 = vld [vmem:[%s18091_s2 + $0x10d0] sm:$0xff]  ;;  %v8326_v4 = vld [vmem:[%s18091_s2 + $0x1108] sm:$0xff] }
 0x412   :  { %9400 = vmatprep.subr.bf16.mxu0 %v15604_v7  ;;  %9460 = vmatprep.subr.bf16.mxu1 %v15606_v16  ;;  %v8317_v16 = vld [vmem:[%s18091_s2 + $0x10c0] sm:$0xff]  ;;  %v8323_v24 = vld [vmem:[%s18091_s2 + $0x10f0] sm:$0xff]  ;;  %v8330_v54 = vld [vmem:[%s18091_s2 + $0x1128] sm:$0xff] }
 0x413   :  { %18661 = vst [vmem:[#allocation248_spill] sm:$0xff] %v15648_v23  ;;  %4544 = vmatmul.mubr.f32.gmra.mrb[114].mxu0 %v14107_v40  ;;  %4641 = vmatmul.mubr.f32.gmra.mrb[108].mxu1 %v14107_v40  ;;  %18662 = vst [vmem:[#allocation249_spill] sm:$0xff] %v15676_v43  ;;  %v8321_v7 = vld [vmem:[%s18091_s2 + $0x10e0] sm:$0xff] }
 0x414   :  { %8381 = vmatprep.mubr.msk.f32.mxu0 %vm3489_vm5, %v13370_v38  ;;  %8387 = vmatprep.mubr.msk.f32.mxu1 %vm3489_vm5, %v13370_v38  ;;  %18663 = vst [vmem:[#allocation250_spill] sm:$0xff] %v15678_v20  ;;  %v15688_v38 = vpack.c.bf16 %v8322_v51, %v8318_v35  ;;  %v8328_v35 = vld [vmem:[%s18091_s2 + $0x1118] sm:$0xff] }
 0x415   :  { %9402 = vmatpush1.bf16.msra.mxu0 %v15634_v58  ;;  %9462 = vmatpush1.bf16.msra.mxu1 %v15636_v1  ;;  %v15690_v58 = vpack.c.bf16 %v8324_v10, %v8320_v52  ;;  %v8332_v51 = vld [vmem:[%s18091_s2 + $0x1138] sm:$0xff]  ;;  %v15712_v52 = vpack.c.bf16 %v8321_v7, %v8317_v16  ;;  %v15714_v10 = vpack.c.bf16 %v8323_v24, %v8319_v11  ;;  %v8327_v7 = vld [vmem:[%s18091_s2 + $0x1110] sm:$0xff]  ;;  %v8334_v11 = vld [vmem:[%s18091_s2 + $0x1148] sm:$0xff] }
 0x416   :  { %9404 = vmatprep.subr.bf16.mxu0 %v15646_v9  ;;  %9464 = vmatprep.subr.bf16.mxu1 %v15648_v23  ;;  %18664 = vst [vmem:[#allocation251_spill] sm:$0xff] %v15688_v38  ;;  %v8325_v23 = vld [vmem:[%s18091_s2 + $0x1100] sm:$0xff]  ;;  %v15724_v1 = vpack.c.bf16 %v8330_v54, %v8326_v4  ;;  %v8331_v16 = vld [vmem:[%s18091_s2 + $0x1130] sm:$0xff]  ;;  %v8338_v24 = vld [vmem:[%s18091_s2 + $0x1168] sm:$0xff] }
 0x417   :  { %18665 = vst [vmem:[#allocation252_spill] sm:$0xff] %v15690_v58  ;;  %18666 = vst [vmem:[#allocation253_spill] sm:$0xff] %v15712_v52  ;;  %v8329_v9 = vld [vmem:[%s18091_s2 + $0x1120] sm:$0xff]  ;;  %v8336_v4 = vld [vmem:[%s18091_s2 + $0x1158] sm:$0xff] }
 0x418   :  { %18667 = vst [vmem:[#allocation254_spill] sm:$0xff] %v15714_v10  ;;  %18668 = vst [vmem:[#allocation255_spill] sm:$0xff] %v15724_v1  ;;  %v8340_v54 = vld [vmem:[%s18091_s2 + $0x1178] sm:$0xff] }
 0x419   :  { %9406 = vmatpush1.bf16.msra.mxu0 %v15676_v43  ;;  %9466 = vmatpush1.bf16.msra.mxu1 %v15678_v20  ;;  %v15726_v43 = vpack.c.bf16 %v8332_v51, %v8328_v35  ;;  %v15748_v35 = vpack.c.bf16 %v8329_v9, %v8325_v23  ;;  %v15750_v51 = vpack.c.bf16 %v8331_v16, %v8327_v7  ;;  %v8335_v9 = vld [vmem:[%s18091_s2 + $0x1150] sm:$0xff]  ;;  %v8342_v7 = vld [vmem:[%s18091_s2 + $0x1188] sm:$0xff] }
 0x41a   :  { %9408 = vmatprep.subr.bf16.mxu0 %v15688_v38  ;;  %9468 = vmatprep.subr.bf16.mxu1 %v15690_v58  ;;  %v8333_v58 = vld [vmem:[%s18091_s2 + $0x1140] sm:$0xff]  ;;  %v15760_v20 = vpack.c.bf16 %v8338_v24, %v8334_v11  ;;  %v8339_v23 = vld [vmem:[%s18091_s2 + $0x1170] sm:$0xff]  ;;  %v8346_v16 = vld [vmem:[%s18091_s2 + $0x11a8] sm:$0xff] }
 0x41b   :  { %18669 = vst [vmem:[#allocation256_spill] sm:$0xff] %v15726_v43  ;;  %18670 = vst [vmem:[#allocation257_spill] sm:$0xff] %v15748_v35  ;;  %v8337_v38 = vld [vmem:[%s18091_s2 + $0x1160] sm:$0xff]  ;;  %v8344_v11 = vld [vmem:[%s18091_s2 + $0x1198] sm:$0xff] }
 0x41c   :  { %18671 = vst [vmem:[#allocation258_spill] sm:$0xff] %v15750_v51  ;;  %18672 = vst [vmem:[#allocation259_spill] sm:$0xff] %v15760_v20  ;;  %v8348_v24 = vld [vmem:[%s18091_s2 + $0x11b8] sm:$0xff] }
 0x41d   :  { %9410 = vmatpush1.bf16.msra.mxu0 %v15712_v52  ;;  %9470 = vmatpush1.bf16.msra.mxu1 %v15714_v10  ;;  %v15762_v52 = vpack.c.bf16 %v8340_v54, %v8336_v4  ;;  %v15784_v4 = vpack.c.bf16 %v8337_v38, %v8333_v58  ;;  %v15786_v54 = vpack.c.bf16 %v8339_v23, %v8335_v9  ;;  %v8343_v58 = vld [vmem:[%s18091_s2 + $0x1190] sm:$0xff]  ;;  %v8350_v9 = vld [vmem:[%s18091_s2 + $0x11c8] sm:$0xff] }
 0x41e   :  { %9412 = vmatprep.subr.bf16.mxu0 %v15724_v1  ;;  %9472 = vmatprep.subr.bf16.mxu1 %v15726_v43  ;;  %v8341_v43 = vld [vmem:[%s18091_s2 + $0x1180] sm:$0xff]  ;;  %v15796_v10 = vpack.c.bf16 %v8346_v16, %v8342_v7  ;;  %v8347_v38 = vld [vmem:[%s18091_s2 + $0x11b0] sm:$0xff]  ;;  %v8354_v23 = vld [vmem:[%s18091_s2 + $0x11e8] sm:$0xff] }
 0x41f   :  { %18673 = vst [vmem:[#allocation260_spill] sm:$0xff] %v15762_v52  ;;  %18674 = vst [vmem:[#allocation261_spill] sm:$0xff] %v15784_v4  ;;  %v8345_v1 = vld [vmem:[%s18091_s2 + $0x11a0] sm:$0xff]  ;;  %v8352_v7 = vld [vmem:[%s18091_s2 + $0x11d8] sm:$0xff] }
 0x420   :  { %18675 = vst [vmem:[#allocation262_spill] sm:$0xff] %v15786_v54  ;;  %18676 = vst [vmem:[#allocation263_spill] sm:$0xff] %v15796_v10  ;;  %v8356_v16 = vld [vmem:[%s18091_s2 + $0x11f8] sm:$0xff] }
 0x421   :  { %9414 = vmatpush1.bf16.msra.mxu0 %v15748_v35  ;;  %9474 = vmatpush1.bf16.msra.mxu1 %v15750_v51  ;;  %v15798_v35 = vpack.c.bf16 %v8348_v24, %v8344_v11  ;;  %v15820_v11 = vpack.c.bf16 %v8345_v1, %v8341_v43  ;;  %v15822_v24 = vpack.c.bf16 %v8347_v38, %v8343_v58  ;;  %v8351_v1 = vld [vmem:[%s18091_s2 + $0x11d0] sm:$0xff]  ;;  %v8358_v58 = vld [vmem:[%s18091_s2 + $0x1208] sm:$0xff] }
 0x422   :  { %9416 = vmatprep.subr.bf16.mxu0 %v15760_v20  ;;  %9476 = vmatprep.subr.bf16.mxu1 %v15762_v52  ;;  %v8349_v52 = vld [vmem:[%s18091_s2 + $0x11c0] sm:$0xff]  ;;  %v15832_v51 = vpack.c.bf16 %v8354_v23, %v8350_v9  ;;  %v8355_v43 = vld [vmem:[%s18091_s2 + $0x11f0] sm:$0xff]  ;;  %v8362_v38 = vld [vmem:[%s18091_s2 + $0x1228] sm:$0xff] }
 0x423   :  { %18677 = vst [vmem:[#allocation264_spill] sm:$0xff] %v15798_v35  ;;  %18678 = vst [vmem:[#allocation265_spill] sm:$0xff] %v15820_v11  ;;  %v8353_v20 = vld [vmem:[%s18091_s2 + $0x11e0] sm:$0xff]  ;;  %v8360_v9 = vld [vmem:[%s18091_s2 + $0x1218] sm:$0xff] }
 0x424   :  { %18679 = vst [vmem:[#allocation266_spill] sm:$0xff] %v15822_v24  ;;  %18680 = vst [vmem:[#allocation267_spill] sm:$0xff] %v15832_v51  ;;  %v8364_v23 = vld [vmem:[%s18091_s2 + $0x1238] sm:$0xff] }
 0x425   :  { %9418 = vmatpush1.bf16.msra.mxu0 %v15784_v4  ;;  %9478 = vmatpush1.bf16.msra.mxu1 %v15786_v54  ;;  %v15834_v4 = vpack.c.bf16 %v8356_v16, %v8352_v7  ;;  %v15856_v7 = vpack.c.bf16 %v8353_v20, %v8349_v52  ;;  %v15858_v16 = vpack.c.bf16 %v8355_v43, %v8351_v1  ;;  %v8359_v20 = vld [vmem:[%s18091_s2 + $0x1210] sm:$0xff]  ;;  %v8366_v1 = vld [vmem:[%s18091_s2 + $0x1248] sm:$0xff] }
 0x426   :  { %9420 = vmatprep.subr.bf16.mxu0 %v15796_v10  ;;  %9480 = vmatprep.subr.bf16.mxu1 %v15798_v35  ;;  %v8357_v35 = vld [vmem:[%s18091_s2 + $0x1200] sm:$0xff]  ;;  %v15868_v54 = vpack.c.bf16 %v8362_v38, %v8358_v58  ;;  %v8363_v52 = vld [vmem:[%s18091_s2 + $0x1230] sm:$0xff]  ;;  %v8370_v43 = vld [vmem:[%s18091_s2 + $0x1268] sm:$0xff] }
 0x427   :  { %18681 = vst [vmem:[#allocation268_spill] sm:$0xff] %v15834_v4  ;;  %18682 = vst [vmem:[#allocation269_spill] sm:$0xff] %v15856_v7  ;;  %v8361_v10 = vld [vmem:[%s18091_s2 + $0x1220] sm:$0xff]  ;;  %v8368_v58 = vld [vmem:[%s18091_s2 + $0x1258] sm:$0xff] }
 0x428   :  { %18683 = vst [vmem:[#allocation270_spill] sm:$0xff] %v15858_v16  ;;  %18684 = vst [vmem:[#allocation271_spill] sm:$0xff] %v15868_v54  ;;  %v8372_v38 = vld [vmem:[%s18091_s2 + $0x1278] sm:$0xff] }
 0x429   :  { %9422 = vmatpush1.bf16.msra.mxu0 %v15820_v11  ;;  %9482 = vmatpush1.bf16.msra.mxu1 %v15822_v24  ;;  %v15870_v11 = vpack.c.bf16 %v8364_v23, %v8360_v9  ;;  %v15892_v9 = vpack.c.bf16 %v8361_v10, %v8357_v35  ;;  %v15894_v23 = vpack.c.bf16 %v8363_v52, %v8359_v20  ;;  %v8367_v10 = vld [vmem:[%s18091_s2 + $0x1250] sm:$0xff]  ;;  %v8374_v20 = vld [vmem:[%s18091_s2 + $0x1288] sm:$0xff] }
 0x42a   :  { %9424 = vmatprep.subr.bf16.mxu0 %v15832_v51  ;;  %9484 = vmatprep.subr.bf16.mxu1 %v15834_v4  ;;  %v8365_v4 = vld [vmem:[%s18091_s2 + $0x1240] sm:$0xff]  ;;  %v15904_v24 = vpack.c.bf16 %v8370_v43, %v8366_v1  ;;  %v8371_v35 = vld [vmem:[%s18091_s2 + $0x1270] sm:$0xff]  ;;  %v8378_v52 = vld [vmem:[%s18091_s2 + $0x12a8] sm:$0xff] }
 0x42b   :  { %18685 = vst [vmem:[#allocation272_spill] sm:$0xff] %v15870_v11  ;;  %18686 = vst [vmem:[#allocation273_spill] sm:$0xff] %v15894_v23  ;;  %v8369_v51 = vld [vmem:[%s18091_s2 + $0x1260] sm:$0xff]  ;;  %v8376_v1 = vld [vmem:[%s18091_s2 + $0x1298] sm:$0xff] }
 0x42c   :  { %v8380_v43 = vld [vmem:[%s18091_s2 + $0x12b8] sm:$0xff] }
 0x42d   :  { %9426 = vmatpush1.bf16.msra.mxu0 %v15856_v7  ;;  %9486 = vmatpush1.bf16.msra.mxu1 %v15858_v16  ;;  %v15906_v7 = vpack.c.bf16 %v8372_v38, %v8368_v58  ;;  %v15928_v58 = vpack.c.bf16 %v8369_v51, %v8365_v4  ;;  %v15930_v38 = vpack.c.bf16 %v8371_v35, %v8367_v10  ;;  %v8375_v51 = vld [vmem:[%s18091_s2 + $0x1290] sm:$0xff] }
 0x42e   :  { %9428 = vmatprep.subr.bf16.mxu0 %v15868_v54  ;;  %9488 = vmatprep.subr.bf16.mxu1 %v15870_v11  ;;  %v8373_v11 = vld [vmem:[%s18091_s2 + $0x1280] sm:$0xff]  ;;  %v15937_v54 = vpack.c.bf16 %v8378_v52, %v8374_v20  ;;  %v15939_v16 = vpack.c.bf16 %v8380_v43, %v8376_v1  ;;  %v8379_v4 = vld [vmem:[%s18091_s2 + $0x12b0] sm:$0xff] }
 0x42f   :  { %v15954_v35 = vpack.c.bf16 %v8379_v4, %v8375_v51  ;;  %v18687_v20 = vld [vmem:[#allocation4_spill] sm:$0xff]  ;;  %v18688_v52 = vld [vmem:[#allocation2_spill] sm:$0xff] }
 0x430   :  { %v18691_v1 = vld [vmem:[#allocation8_spill] sm:$0xff]  ;;  %v18692_v43 = vld [vmem:[#allocation6_spill] sm:$0xff] }
 0x431   :  { %9430 = vmatpush1.bf16.msra.mxu0 %v15892_v9  ;;  %9490 = vmatpush1.bf16.msra.mxu1 %v15894_v23  ;;  %v8377_v23 = vld [vmem:[%s18091_s2 + $0x12a0] sm:$0xff]  ;;  %v18695_v51 = vld [vmem:[#allocation12_spill] sm:$0xff] }
 0x432   :  { %9432 = vmatprep.subr.bf16.mxu0 %v15904_v24  ;;  %9492 = vmatprep.subr.bf16.mxu1 %v15906_v7  ;;  %v15952_v10 = vpack.c.bf16 %v8377_v23, %v8373_v11  ;;  %v18689_v11 = vld [vmem:[#allocation5_spill] sm:$0xff]  ;;  %v18690_v23 = vld [vmem:[#allocation3_spill] sm:$0xff]  ;;  %v18696_v4 = vld [vmem:[#allocation10_spill] sm:$0xff] }
 0x435   :  { %9434 = vmatpush1.bf16.msra.mxu0 %v15928_v58  ;;  %9494 = vmatpush1.bf16.msra.mxu1 %v15930_v38 }
 0x436   :  { %9436 = vmatprep.subr.bf16.mxu0 %v15937_v54  ;;  %9496 = vmatprep.subr.bf16.mxu1 %v15939_v16 }
 0x439   :  { %9438 = vmatpush1.bf16.msra.mxu0 %v15952_v10  ;;  %9498 = vmatpush1.bf16.msra.mxu1 %v15954_v35 }
 0x43a   :  { %9500 = vmatprep.subr.bf16.mxu0 %v18687_v20  ;;  %9560 = vmatprep.subr.bf16.mxu1 %v18688_v52  ;;  %v18699_v20 = vld [vmem:[#allocation16_spill] sm:$0xff]  ;;  %v18700_v52 = vld [vmem:[#allocation14_spill] sm:$0xff] }
 0x43c   :  { %4833 = vmatmul.mubr.f32.vlgmr.msra.gmra.mrb[126].mxu0 %v13446_v55  ;;  %4930 = vmatmul.mubr.f32.vlgmr.msra.gmra.mrb[120].mxu1 %v13446_v55  ;;  %v18693_v55 = vld [vmem:[#allocation9_spill] sm:$0xff] }
 0x43d   :  { %8382 = vmatprep.mubr.msk.f32.mxu0 %vm3489_vm5, %v13492_v27  ;;  %8388 = vmatprep.mubr.msk.f32.mxu1 %vm3489_vm5, %v13492_v27  ;;  %v18694_v27 = vld [vmem:[#allocation7_spill] sm:$0xff] }
 0x43e   :  { %9502 = vmatpush1.bf16.msra.mxu0 %v18689_v11  ;;  %9562 = vmatpush1.bf16.msra.mxu1 %v18690_v23  ;;  %v3346_v11 = vadd.f32 %v14208_v26, %v13357_v15  ;;  %v18703_v23 = vld [vmem:[#allocation20_spill] sm:$0xff] }
 0x43f   :  { %9504 = vmatprep.subr.bf16.mxu0 %v18691_v1  ;;  %9564 = vmatprep.subr.bf16.mxu1 %v18692_v43  ;;  %v18704_v1 = vld [vmem:[#allocation18_spill] sm:$0xff]  ;;  %v18707_v26 = vld [vmem:[#allocation24_spill] sm:$0xff] }
 0x440   :  { %4837 = vmatmul.mubr.f32.gmra.mrb[128].mxu0 %v13894_v62  ;;  %4934 = vmatmul.mubr.f32.gmra.mrb[122].mxu1 %v13894_v62  ;;  %v18697_v62 = vld [vmem:[#allocation13_spill] sm:$0xff]  ;;  %v16012_v43 = vmax.f32 %v3346_v11, 0.0 }
 0x441   :  { %8383 = vmatprep.mubr.msk.f32.mxu0 %vm3489_vm5, %v13928_v3  ;;  %8389 = vmatprep.mubr.msk.f32.mxu1 %vm3489_vm5, %v13928_v3  ;;  %v18698_v3 = vld [vmem:[#allocation11_spill] sm:$0xff] }
 0x442   :  { %9506 = vmatpush1.bf16.msra.mxu0 %v18693_v55  ;;  %9566 = vmatpush1.bf16.msra.mxu1 %v18694_v27  ;;  %v18708_v55 = vld [vmem:[#allocation22_spill] sm:$0xff]  ;;  %v18709_v27 = vld [vmem:[#allocation25_spill] sm:$0xff] }
 0x443   :  { %9508 = vmatprep.subr.bf16.mxu0 %v18695_v51  ;;  %9568 = vmatprep.subr.bf16.mxu1 %v18696_v4  ;;  %v18710_v51 = vld [vmem:[#allocation23_spill] sm:$0xff] }
 0x444   :  { %4841 = vmatmul.mubr.f32.gmra.mrb[94].mxu0 %v13945_v8  ;;  %4938 = vmatmul.mubr.f32.gmra.mrb[88].mxu1 %v13945_v8  ;;  %v18701_v8 = vld [vmem:[#allocation17_spill] sm:$0xff] }
 0x445   :  { %8384 = vmatprep.mubr.msk.f32.mxu0 %vm3489_vm5, %v13980_v61  ;;  %8390 = vmatprep.mubr.msk.f32.mxu1 %vm3489_vm5, %v13980_v61  ;;  %v18702_v61 = vld [vmem:[#allocation15_spill] sm:$0xff] }
 0x446   :  { %9510 = vmatpush1.bf16.msra.mxu0 %v18697_v62  ;;  %9570 = vmatpush1.bf16.msra.mxu1 %v18698_v3  ;;  %v18711_v3 = vld [vmem:[#allocation28_spill] sm:$0xff] }
 0x447   :  { %9512 = vmatprep.subr.bf16.mxu0 %v18699_v20  ;;  %9572 = vmatprep.subr.bf16.mxu1 %v18700_v52  ;;  %v18712_v20 = vld [vmem:[#allocation26_spill] sm:$0xff] }
 0x448   :  { %4847 = vmatmul.mubr.f32.gmra.mrb[96].mxu0 %v14003_v18  ;;  %4944 = vmatmul.mubr.f32.gmra.mrb[90].mxu1 %v14003_v18  ;;  %v18705_v18 = vld [vmem:[#allocation21_spill] sm:$0xff] }
 0x449   :  { %8385 = vmatprep.mubr.msk.f32.mxu0 %vm3489_vm5, %v14032_v49  ;;  %8391 = vmatprep.mubr.msk.f32.mxu1 %vm3489_vm5, %v14032_v49  ;;  %v18706_v49 = vld [vmem:[#allocation19_spill] sm:$0xff] }
 0x44a   :  { %9514 = vmatpush1.bf16.msra.mxu0 %v18701_v8  ;;  %9574 = vmatpush1.bf16.msra.mxu1 %v18702_v61  ;;  %v18713_v8 = vld [vmem:[#allocation29_spill] sm:$0xff]  ;;  %v18714_v61 = vld [vmem:[#allocation27_spill] sm:$0xff] }
 0x44b   :  { %9516 = vmatprep.subr.bf16.mxu0 %v18703_v23  ;;  %9576 = vmatprep.subr.bf16.mxu1 %v18704_v1  ;;  %v18715_v1 = vld [vmem:[#allocation32_spill] sm:$0xff] }
 0x44c   :  { %4853 = vmatmul.mubr.f32.gmra.mrb[98].mxu0 %v14058_v31  ;;  %4950 = vmatmul.mubr.f32.gmra.mrb[92].mxu1 %v14058_v31 }
 0x44d   :  { %8386 = vmatprep.mubr.msk.f32.mxu0 %vm3489_vm5, %v14084_v19  ;;  %8392 = vmatprep.mubr.msk.f32.mxu1 %vm3489_vm5, %v14084_v19 }
 0x44e   :  { %9518 = vmatpush1.bf16.msra.mxu0 %v18705_v18  ;;  %9578 = vmatpush1.bf16.msra.mxu1 %v18706_v49  ;;  %v18716_v18 = vld [vmem:[#allocation30_spill] sm:$0xff] }
 0x44f   :  { %9520 = vmatprep.subr.bf16.mxu0 %v18707_v26  ;;  %9580 = vmatprep.subr.bf16.mxu1 %v18708_v55  ;;  %v18717_v55 = vld [vmem:[#allocation33_spill] sm:$0xff] }
 0x450   :  { %4859 = vmatmul.mubr.f32.gmra.mrb[100].mxu0 %v14107_v40  ;;  %4956 = vmatmul.mubr.f32.gmra.mrb[94].mxu1 %v14107_v40 }
 0x451   :  { %8393 = vmatprep.mubr.msk.f32.mxu0 %vm3489_vm5, %v16012_v43  ;;  %8399 = vmatprep.mubr.msk.f32.mxu1 %vm3489_vm5, %v16012_v43  ;;  %v3598_v31 = vpop.f32.mrb[102].mxu0  ;;  %v3695_v19 = vpop.f32.mrb[96].mxu1 }
 0x452   :  { %9522 = vmatpush1.bf16.msra.mxu0 %v18709_v27  ;;  %9582 = vmatpush1.bf16.msra.mxu1 %v18710_v51  ;;  %v3599_v4 = vpop.f32.mrb[103].mxu0  ;;  %v3696_v62 = vpop.f32.mrb[97].mxu1  ;;  %v18718_v31 = vld [vmem:[#allocation31_spill] sm:$0xff]  ;;  %v18719_v51 = vld [vmem:[#allocation36_spill] sm:$0xff] }
 0x453   :  { %9524 = vmatprep.subr.bf16.mxu0 %v18711_v3  ;;  %9584 = vmatprep.subr.bf16.mxu1 %v18712_v20  ;;  %v18720_v4 = vld [vmem:[#allocation34_spill] sm:$0xff]  ;;  %v18721_v62 = vld [vmem:[#allocation37_spill] sm:$0xff]  ;;  %v18722_v3 = vld [vmem:[#allocation35_spill] sm:$0xff] }
 0x454   :  { %v18723_v20 = vld [vmem:[#allocation40_spill] sm:$0xff] }
 0x455   :  { %v3602_v52 = vpop.f32.mrb[104].mxu0  ;;  %v3699_v40 = vpop.f32.mrb[98].mxu1 }
 0x456   :  { %9526 = vmatpush1.bf16.msra.mxu0 %v18713_v8  ;;  %9586 = vmatpush1.bf16.msra.mxu1 %v18714_v61  ;;  %v3603_v11 = vpop.f32.mrb[105].mxu0  ;;  %v3700_v23 = vpop.f32.mrb[99].mxu1  ;;  %v18724_v52 = vld [vmem:[#allocation38_spill] sm:$0xff]  ;;  %v18725_v40 = vld [vmem:[#allocation41_spill] sm:$0xff]  ;;  %v18726_v8 = vld [vmem:[#allocation39_spill] sm:$0xff] }
 0x457   :  { %9528 = vmatprep.subr.bf16.mxu0 %v18715_v1  ;;  %9588 = vmatprep.subr.bf16.mxu1 %v18716_v18  ;;  %v18727_v61 = vld [vmem:[#allocation44_spill] sm:$0xff]  ;;  %v18728_v11 = vld [vmem:[#allocation42_spill] sm:$0xff]  ;;  %v18729_v23 = vld [vmem:[#allocation45_spill] sm:$0xff] }
 0x458   :  { %v18730_v1 = vld [vmem:[#allocation43_spill] sm:$0xff]  ;;  %v18731_v18 = vld [vmem:[#allocation48_spill] sm:$0xff] }
 0x459   :  { %v3889_v49 = vpop.f32.mrb[106].mxu0  ;;  %v3986_v26 = vpop.f32.mrb[100].mxu1 }
 0x45a   :  { %9530 = vmatpush1.bf16.msra.mxu0 %v18717_v55  ;;  %9590 = vmatpush1.bf16.msra.mxu1 %v18718_v31  ;;  %v3890_v19 = vpop.f32.mrb[107].mxu0  ;;  %v3987_v27 = vpop.f32.mrb[101].mxu1  ;;  %v18732_v49 = vld [vmem:[#allocation46_spill] sm:$0xff]  ;;  %v18733_v26 = vld [vmem:[#allocation49_spill] sm:$0xff]  ;;  %v18734_v55 = vld [vmem:[#allocation47_spill] sm:$0xff] }
 0x45b   :  { %9532 = vmatprep.subr.bf16.mxu0 %v18719_v51  ;;  %9592 = vmatprep.subr.bf16.mxu1 %v18720_v4  ;;  %v18735_v31 = vld [vmem:[#allocation52_spill] sm:$0xff]  ;;  %v18736_v19 = vld [vmem:[#allocation50_spill] sm:$0xff]  ;;  %v18737_v4 = vld [vmem:[#allocation53_spill] sm:$0xff] }
 0x45e   :  { %9534 = vmatpush1.bf16.msra.mxu0 %v18721_v62  ;;  %9594 = vmatpush1.bf16.msra.mxu1 %v18722_v3  ;;  %v18738_v62 = vld [vmem:[#allocation51_spill] sm:$0xff] }
 0x45f   :  { %9536 = vmatprep.subr.bf16.mxu0 %v18723_v20  ;;  %9596 = vmatprep.subr.bf16.mxu1 %v18724_v52  ;;  %v18739_v52 = vld [vmem:[#allocation56_spill] sm:$0xff] }
 0x462   :  { %9538 = vmatpush1.bf16.msra.mxu0 %v18725_v40  ;;  %9598 = vmatpush1.bf16.msra.mxu1 %v18726_v8  ;;  %v18740_v40 = vld [vmem:[#allocation54_spill] sm:$0xff]  ;;  %v18741_v8 = vld [vmem:[#allocation57_spill] sm:$0xff] }
 0x463   :  { %9540 = vmatprep.subr.bf16.mxu0 %v18727_v61  ;;  %9600 = vmatprep.subr.bf16.mxu1 %v18728_v11  ;;  %v18742_v61 = vld [vmem:[#allocation55_spill] sm:$0xff]  ;;  %v3345_v11 = vadd.f32 %v14261_v59, %v13399_v14 }
 0x466   :  { %9542 = vmatpush1.bf16.msra.mxu0 %v18729_v23  ;;  %9602 = vmatpush1.bf16.msra.mxu1 %v18730_v1  ;;  %v18743_v23 = vld [vmem:[#allocation60_spill] sm:$0xff]  ;;  %v18744_v1 = vld [vmem:[#allocation58_spill] sm:$0xff] }
 0x467   :  { %9544 = vmatprep.subr.bf16.mxu0 %v18731_v18  ;;  %9604 = vmatprep.subr.bf16.mxu1 %v18732_v49  ;;  %v3348_v18 = vadd.f32 %v14311_v17, %v13357_v15  ;;  %v18745_v49 = vld [vmem:[#allocation61_spill] sm:$0xff] }
 0x469   :  { %v16070_v59 = vmax.f32 %v3348_v18, 0.0  ;;  %v3353_v18 = vadd.f32 %v14865_v47, %v13399_v14 }
 0x46a   :  { %9546 = vmatpush1.bf16.msra.mxu0 %v18733_v26  ;;  %9606 = vmatpush1.bf16.msra.mxu1 %v18734_v55  ;;  %v18746_v26 = vld [vmem:[#allocation59_spill] sm:$0xff]  ;;  %v16064_v55 = vmax.f32 %v3345_v11, 0.0  ;;  %v3354_v11 = vadd.f32 %v14586_v41, %v13357_v15 }
 0x46b   :  { %9548 = vmatprep.subr.bf16.mxu0 %v18735_v31  ;;  %9608 = vmatprep.subr.bf16.mxu1 %v18736_v19  ;;  %v3347_v31 = vadd.f32 %v14731_v42, %v13399_v14  ;;  %v18747_v19 = vld [vmem:[#allocation62_spill] sm:$0xff]  ;;  %v3349_v42 = vadd.f32 %v14776_v28, %v13399_v14  ;;  %v18757_v41 = vld [vmem:[#allocation91_spill] sm:$0xff]  ;;  %v16134_v47 = vmax.f32 %v3353_v18, 0.0  ;;  %v18775_v18 = vld [vmem:[#allocation109_spill] sm:$0xff] }
 0x46d   :  { %v3917_v27 = vpop.f32.mrb[116].mxu0  ;;  %v4014_v51 = vpop.f32.mrb[110].mxu1  ;;  %v16080_v17 = vmax.f32 %v3347_v31, 0.0  ;;  %v16098_v28 = vmax.f32 %v3349_v42, 0.0  ;;  %v3356_v31 = vadd.f32 %v14686_v21, %v13357_v15  ;;  %v18762_v21 = vld [vmem:[#allocation96_spill] sm:$0xff] }
 0x46e   :  { %9550 = vmatpush1.bf16.msra.mxu0 %v18737_v4  ;;  %9610 = vmatpush1.bf16.msra.mxu1 %v18738_v62  ;;  %v3918_v3 = vpop.f32.mrb[117].mxu0  ;;  %v4015_v20 = vpop.f32.mrb[111].mxu1  ;;  %v18748_v27 = vld [vmem:[#allocation63_spill] sm:$0xff]  ;;  %v3350_v51 = vadd.f32 %v14410_v36, %v13357_v15  ;;  %v18750_v62 = vld [vmem:[#allocation84_spill] sm:$0xff] }
 0x46f   :  { %9552 = vmatprep.subr.bf16.mxu0 %v18739_v52  ;;  %9612 = vmatprep.subr.bf16.mxu1 %v18740_v40  ;;  %v18749_v4 = vld [vmem:[#allocation83_spill] sm:$0xff]  ;;  %v3352_v3 = vadd.f32 %v14502_v63, %v13357_v15  ;;  %v18751_v20 = vld [vmem:[#allocation85_spill] sm:$0xff]  ;;  %v18752_v52 = vld [vmem:[#allocation86_spill] sm:$0xff]  ;;  %v3351_v40 = vadd.f32 %v14812_v37, %v13399_v14  ;;  %v16140_v42 = vmax.f32 %v3356_v31, 0.0 }
 0x470   :  { %v16086_v36 = vmax.f32 %v3350_v51, 0.0  ;;  %v18753_v63 = vld [vmem:[#allocation87_spill] sm:$0xff]  ;;  %v3355_v51 = vadd.f32 %v14913_v5, %v13399_v14 }
 0x471   :  { %v16116_v37 = vmax.f32 %v3351_v40, 0.0  ;;  %v18761_v15 = vld [vmem:[#allocation95_spill] sm:$0xff] }
 0x472   :  { %9554 = vmatpush1.bf16.msra.mxu0 %v18741_v8  ;;  %9614 = vmatpush1.bf16.msra.mxu1 %v18742_v61  ;;  %v18754_v8 = vld [vmem:[#allocation88_spill] sm:$0xff]  ;;  %v16104_v61 = vmax.f32 %v3352_v3, 0.0  ;;  %v16150_v14 = vmax.f32 %v3355_v51, 0.0  ;;  %v18765_v5 = vld [vmem:[#allocation99_spill] sm:$0xff] }
 0x473   :  { %9556 = vmatprep.subr.bf16.mxu0 %v18743_v23  ;;  %9616 = vmatprep.subr.bf16.mxu1 %v18744_v1  ;;  %v18755_v23 = vld [vmem:[#allocation89_spill] sm:$0xff]  ;;  %v18756_v1 = vld [vmem:[#allocation90_spill] sm:$0xff]  ;;  %v18766_v3 = vld [vmem:[#allocation100_spill] sm:$0xff] }
 0x474   :  { %v18769_v40 = vld [vmem:[#allocation103_spill] sm:$0xff] }
 0x475   :  { %v18777_v51 = vld [vmem:[#allocation111_spill] sm:$0xff] }
 0x476   :  { %9558 = vmatpush1.bf16.msra.mxu0 %v18745_v49  ;;  %9618 = vmatpush1.bf16.msra.mxu1 %v18746_v26  ;;  %v18758_v49 = vld [vmem:[#allocation92_spill] sm:$0xff]  ;;  %v16122_v26 = vmax.f32 %v3354_v11, 0.0  ;;  %v18772_v11 = vld [vmem:[#allocation106_spill] sm:$0xff] }
 0x477   :  { %9620 = vmatprep.subr.bf16.mxu0 %v18747_v19  ;;  %9680 = vmatprep.subr.bf16.mxu1 %v18748_v27  ;;  %v18759_v19 = vld [vmem:[#allocation93_spill] sm:$0xff]  ;;  %v18760_v27 = vld [vmem:[#allocation94_spill] sm:$0xff] }
 0x479   :  { %5045 = vmatmul.mubr.f32.vlgmr.msra.gmra.mrb[108].mxu0 %v16064_v55  ;;  %5142 = vmatmul.mubr.f32.vlgmr.msra.gmra.mrb[102].mxu1 %v16064_v55 }
 0x47a   :  { %8394 = vmatprep.mubr.msk.f32.mxu0 %vm3489_vm5, %v16070_v59  ;;  %8400 = vmatprep.mubr.msk.f32.mxu1 %vm3489_vm5, %v16070_v59 }
 0x47b   :  { %9622 = vmatpush1.bf16.msra.mxu0 %v18749_v4  ;;  %9682 = vmatpush1.bf16.msra.mxu1 %v18750_v62  ;;  %v18763_v4 = vld [vmem:[#allocation97_spill] sm:$0xff]  ;;  %v18764_v62 = vld [vmem:[#allocation98_spill] sm:$0xff] }
 0x47c   :  { %9624 = vmatprep.subr.bf16.mxu0 %v18751_v20  ;;  %9684 = vmatprep.subr.bf16.mxu1 %v18752_v52  ;;  %v18767_v20 = vld [vmem:[#allocation101_spill] sm:$0xff]  ;;  %v18768_v52 = vld [vmem:[#allocation102_spill] sm:$0xff] }
 0x47d   :  { %5051 = vmatmul.mubr.f32.gmra.mrb[110].mxu0 %v16080_v17  ;;  %5148 = vmatmul.mubr.f32.gmra.mrb[104].mxu1 %v16080_v17 }
 0x47e   :  { %8395 = vmatprep.mubr.msk.f32.mxu0 %vm3489_vm5, %v16086_v36  ;;  %8401 = vmatprep.mubr.msk.f32.mxu1 %vm3489_vm5, %v16086_v36 }
 0x47f   :  { %9626 = vmatpush1.bf16.msra.mxu0 %v18753_v63  ;;  %9686 = vmatpush1.bf16.msra.mxu1 %v18754_v8  ;;  %v18770_v63 = vld [vmem:[#allocation104_spill] sm:$0xff]  ;;  %v18771_v8 = vld [vmem:[#allocation105_spill] sm:$0xff] }
 0x480   :  { %9628 = vmatprep.subr.bf16.mxu0 %v18755_v23  ;;  %9688 = vmatprep.subr.bf16.mxu1 %v18756_v1  ;;  %v18773_v23 = vld [vmem:[#allocation107_spill] sm:$0xff]  ;;  %v18774_v1 = vld [vmem:[#allocation108_spill] sm:$0xff] }
 0x481   :  { %5057 = vmatmul.mubr.f32.gmra.mrb[112].mxu0 %v16098_v28  ;;  %5154 = vmatmul.mubr.f32.gmra.mrb[106].mxu1 %v16098_v28 }
 0x482   :  { %8396 = vmatprep.mubr.msk.f32.mxu0 %vm3489_vm5, %v16104_v61  ;;  %8402 = vmatprep.mubr.msk.f32.mxu1 %vm3489_vm5, %v16104_v61 }
 0x483   :  { %9630 = vmatpush1.bf16.msra.mxu0 %v18757_v41  ;;  %9690 = vmatpush1.bf16.msra.mxu1 %v18758_v49  ;;  %v18776_v41 = vld [vmem:[#allocation110_spill] sm:$0xff] }
 0x484   :  { %9632 = vmatprep.subr.bf16.mxu0 %v18759_v19  ;;  %9692 = vmatprep.subr.bf16.mxu1 %v18760_v27 }
 0x485   :  { %5063 = vmatmul.mubr.f32.gmra.mrb[114].mxu0 %v16116_v37  ;;  %5160 = vmatmul.mubr.f32.gmra.mrb[108].mxu1 %v16116_v37 }
 0x486   :  { %8397 = vmatprep.mubr.msk.f32.mxu0 %vm3489_vm5, %v16122_v26  ;;  %8403 = vmatprep.mubr.msk.f32.mxu1 %vm3489_vm5, %v16122_v26 }
 0x487   :  { %9634 = vmatpush1.bf16.msra.mxu0 %v18761_v15  ;;  %9694 = vmatpush1.bf16.msra.mxu1 %v18762_v21  ;;  %v18778_v15 = vld [vmem:[#allocation112_spill] sm:$0xff]  ;;  %v18779_v21 = vld [vmem:[#allocation113_spill] sm:$0xff] }
 0x488   :  { %9636 = vmatprep.subr.bf16.mxu0 %v18763_v4  ;;  %9696 = vmatprep.subr.bf16.mxu1 %v18764_v62  ;;  %v18782_v4 = vld [vmem:[#allocation116_spill] sm:$0xff]  ;;  %v18783_v62 = vld [vmem:[#allocation117_spill] sm:$0xff] }
 0x489   :  { %5069 = vmatmul.mubr.f32.gmra.mrb[130].mxu0 %v16134_v47  ;;  %5166 = vmatmul.mubr.f32.gmra.mrb[124].mxu1 %v16134_v47 }
 0x48a   :  { %8398 = vmatprep.mubr.msk.f32.mxu0 %vm3489_vm5, %v16140_v42  ;;  %8404 = vmatprep.mubr.msk.f32.mxu1 %vm3489_vm5, %v16140_v42 }
 0x48b   :  { %9638 = vmatpush1.bf16.msra.mxu0 %v18765_v5  ;;  %9698 = vmatpush1.bf16.msra.mxu1 %v18766_v3 }
 0x48c   :  { %9640 = vmatprep.subr.bf16.mxu0 %v18767_v20  ;;  %9700 = vmatprep.subr.bf16.mxu1 %v18768_v52  ;;  %v18789_v52 = vld [vmem:[#allocation123_spill] sm:$0xff] }
 0x48d   :  { %5073 = vmatmul.mubr.f32.gmra.mrb[132].mxu0 %v16150_v14  ;;  %5170 = vmatmul.mubr.f32.gmra.mrb[126].mxu1 %v16150_v14 }
 0x48e   :  { %8405 = vmatprep.mubr.msk.f32.mxu0 %vm3489_vm5, %v16012_v43  ;;  %8411 = vmatprep.mubr.msk.f32.mxu1 %vm3489_vm5, %v16012_v43 }
 0x48f   :  { %9642 = vmatpush1.bf16.msra.mxu0 %v18769_v40  ;;  %9702 = vmatpush1.bf16.msra.mxu1 %v18770_v63  ;;  %v18790_v40 = vld [vmem:[#allocation124_spill] sm:$0xff]  ;;  %v18791_v63 = vld [vmem:[#allocation125_spill] sm:$0xff] }
 0x490   :  { %9644 = vmatprep.subr.bf16.mxu0 %v18771_v8  ;;  %9704 = vmatprep.subr.bf16.mxu1 %v18772_v11  ;;  %v18792_v8 = vld [vmem:[#allocation126_spill] sm:$0xff]  ;;  %v18793_v11 = vld [vmem:[#allocation127_spill] sm:$0xff] }
 0x493   :  { %9646 = vmatpush1.bf16.msra.mxu0 %v18773_v23  ;;  %9706 = vmatpush1.bf16.msra.mxu1 %v18774_v1  ;;  %v18794_v23 = vld [vmem:[#allocation128_spill] sm:$0xff]  ;;  %v18795_v1 = vld [vmem:[#allocation129_spill] sm:$0xff] }
 0x494   :  { %9648 = vmatprep.subr.bf16.mxu0 %v18775_v18  ;;  %9708 = vmatprep.subr.bf16.mxu1 %v18776_v41  ;;  %v18796_v18 = vld [vmem:[#allocation130_spill] sm:$0xff]  ;;  %v18797_v41 = vld [vmem:[#allocation131_spill] sm:$0xff] }
 0x495   :  { %v4204_v49 = vpop.f32.mrb[118].mxu0  ;;  %v4301_v31 = vpop.f32.mrb[112].mxu1 }
 0x496   :  { %v4205_v19 = vpop.f32.mrb[119].mxu0  ;;  %v4302_v27 = vpop.f32.mrb[113].mxu1  ;;  %v18798_v49 = vld [vmem:[#allocation132_spill] sm:$0xff]  ;;  %v18799_v31 = vld [vmem:[#allocation133_spill] sm:$0xff] }
 0x497   :  { %9650 = vmatpush1.bf16.msra.mxu0 %v13744_v22  ;;  %9710 = vmatpush1.bf16.msra.mxu1 %v13746_v0  ;;  %v18780_v22 = vld [vmem:[#allocation114_spill] sm:$0xff]  ;;  %v18781_v0 = vld [vmem:[#allocation115_spill] sm:$0xff] }
 0x498   :  { %9652 = vmatprep.subr.bf16.mxu0 %v18777_v51  ;;  %9712 = vmatprep.subr.bf16.mxu1 %v18778_v15  ;;  %v18800_v19 = vld [vmem:[#allocation134_spill] sm:$0xff]  ;;  %v18801_v27 = vld [vmem:[#allocation135_spill] sm:$0xff]  ;;  %v18802_v51 = vld [vmem:[#allocation136_spill] sm:$0xff] }
 0x499   :  { %v18803_v15 = vld [vmem:[#allocation137_spill] sm:$0xff] }
 0x49b   :  { %9654 = vmatpush1.bf16.msra.mxu0 %v13789_v13  ;;  %9714 = vmatpush1.bf16.msra.mxu1 %v13791_v46  ;;  %v18784_v13 = vld [vmem:[#allocation118_spill] sm:$0xff]  ;;  %v18785_v46 = vld [vmem:[#allocation119_spill] sm:$0xff] }
 0x49c   :  { %9656 = vmatprep.subr.bf16.mxu0 %v13805_v39  ;;  %9716 = vmatprep.subr.bf16.mxu1 %v13807_v30  ;;  %v18786_v39 = vld [vmem:[#allocation120_spill] sm:$0xff]  ;;  %v18787_v30 = vld [vmem:[#allocation121_spill] sm:$0xff] }
 0x49f   :  { %9658 = vmatpush1.bf16.msra.mxu0 %v13836_v34  ;;  %9718 = vmatpush1.bf16.msra.mxu1 %v13838_v60  ;;  %v18788_v34 = vld [vmem:[#allocation122_spill] sm:$0xff] }
 0x4a0   :  { %9660 = vmatprep.subr.bf16.mxu0 %v18779_v21  ;;  %9720 = vmatprep.subr.bf16.mxu1 %v18780_v22  ;;  %v18804_v21 = vld [vmem:[#allocation138_spill] sm:$0xff]  ;;  %v18805_v22 = vld [vmem:[#allocation139_spill] sm:$0xff] }
 0x4a3   :  { %9662 = vmatpush1.bf16.msra.mxu0 %v18781_v0  ;;  %9722 = vmatpush1.bf16.msra.mxu1 %v18782_v4  ;;  %v18806_v0 = vld [vmem:[#allocation140_spill] sm:$0xff]  ;;  %v18807_v4 = vld [vmem:[#allocation141_spill] sm:$0xff] }
 0x4a4   :  { %9664 = vmatprep.subr.bf16.mxu0 %v18783_v62  ;;  %9724 = vmatprep.subr.bf16.mxu1 %v18784_v13  ;;  %v18808_v62 = vld [vmem:[#allocation142_spill] sm:$0xff]  ;;  %v18809_v13 = vld [vmem:[#allocation143_spill] sm:$0xff] }
 0x4a7   :  { %9666 = vmatpush1.bf16.msra.mxu0 %v18785_v46  ;;  %9726 = vmatpush1.bf16.msra.mxu1 %v18786_v39  ;;  %v18810_v46 = vld [vmem:[#allocation144_spill] sm:$0xff]  ;;  %v18811_v39 = vld [vmem:[#allocation145_spill] sm:$0xff] }
 0x4a8   :  { %9668 = vmatprep.subr.bf16.mxu0 %v18787_v30  ;;  %9728 = vmatprep.subr.bf16.mxu1 %v18788_v34  ;;  %v18812_v30 = vld [vmem:[#allocation146_spill] sm:$0xff]  ;;  %v18813_v34 = vld [vmem:[#allocation147_spill] sm:$0xff] }
 0x4a9   :  { %v4232_v60 = vpop.f32.mrb[120].mxu0  ;;  %v4329_v5 = vpop.f32.mrb[114].mxu1 }
 0x4aa   :  { %v4233_v3 = vpop.f32.mrb[121].mxu0  ;;  %v4330_v20 = vpop.f32.mrb[115].mxu1  ;;  %v18814_v60 = vld [vmem:[#allocation148_spill] sm:$0xff]  ;;  %v18815_v5 = vld [vmem:[#allocation149_spill] sm:$0xff] }
 0x4ab   :  { %9670 = vmatpush1.bf16.msra.mxu0 %v18789_v52  ;;  %9730 = vmatpush1.bf16.msra.mxu1 %v18790_v40  ;;  %v18816_v3 = vld [vmem:[#allocation150_spill] sm:$0xff]  ;;  %v18817_v20 = vld [vmem:[#allocation151_spill] sm:$0xff]  ;;  %v18818_v52 = vld [vmem:[#allocation152_spill] sm:$0xff] }
 0x4ac   :  { %9672 = vmatprep.subr.bf16.mxu0 %v18791_v63  ;;  %9732 = vmatprep.subr.bf16.mxu1 %v18792_v8  ;;  %v18819_v40 = vld [vmem:[#allocation153_spill] sm:$0xff]  ;;  %v18820_v63 = vld [vmem:[#allocation154_spill] sm:$0xff]  ;;  %v18821_v8 = vld [vmem:[#allocation155_spill] sm:$0xff] }
 0x4af   :  { %9674 = vmatpush1.bf16.msra.mxu0 %v18793_v11  ;;  %9734 = vmatpush1.bf16.msra.mxu1 %v18794_v23  ;;  %v18822_v11 = vld [vmem:[#allocation156_spill] sm:$0xff]  ;;  %v18823_v23 = vld [vmem:[#allocation157_spill] sm:$0xff] }
 0x4b0   :  { %9676 = vmatprep.subr.bf16.mxu0 %v18795_v1  ;;  %9736 = vmatprep.subr.bf16.mxu1 %v18796_v18  ;;  %v18824_v1 = vld [vmem:[#allocation158_spill] sm:$0xff]  ;;  %v18825_v18 = vld [vmem:[#allocation159_spill] sm:$0xff] }
 0x4b3   :  { %9678 = vmatpush1.bf16.msra.mxu0 %v18797_v41  ;;  %9738 = vmatpush1.bf16.msra.mxu1 %v18798_v49  ;;  %v18826_v41 = vld [vmem:[#allocation160_spill] sm:$0xff]  ;;  %v18827_v49 = vld [vmem:[#allocation161_spill] sm:$0xff] }
 0x4b4   :  { %9740 = vmatprep.subr.bf16.mxu0 %v18799_v31  ;;  %9800 = vmatprep.subr.bf16.mxu1 %v18800_v19  ;;  %v18828_v31 = vld [vmem:[#allocation162_spill] sm:$0xff] }
 0x4b6   :  { %5239 = vmatmul.mubr.f32.vlgmr.msra.gmra.mrb[94].mxu0 %v16064_v55  ;;  %5336 = vmatmul.mubr.f32.vlgmr.msra.gmra.mrb[88].mxu1 %v16064_v55 }
 0x4b7   :  { %8406 = vmatprep.mubr.msk.f32.mxu0 %vm3489_vm5, %v16070_v59  ;;  %8412 = vmatprep.mubr.msk.f32.mxu1 %vm3489_vm5, %v16070_v59 }
 0x4b8   :  { %9742 = vmatpush1.bf16.msra.mxu0 %v18801_v27  ;;  %9802 = vmatpush1.bf16.msra.mxu1 %v18802_v51 }
 0x4b9   :  { %9744 = vmatprep.subr.bf16.mxu0 %v18803_v15  ;;  %9804 = vmatprep.subr.bf16.mxu1 %v18804_v21  ;;  %v18829_v21 = vld [vmem:[#allocation67_spill] sm:$0xff] }
 0x4ba   :  { %5245 = vmatmul.mubr.f32.gmra.mrb[96].mxu0 %v16080_v17  ;;  %5342 = vmatmul.mubr.f32.gmra.mrb[90].mxu1 %v16080_v17 }
 0x4bb   :  { %8407 = vmatprep.mubr.msk.f32.mxu0 %vm3489_vm5, %v16086_v36  ;;  %8413 = vmatprep.mubr.msk.f32.mxu1 %vm3489_vm5, %v16086_v36 }
 0x4bc   :  { %9746 = vmatpush1.bf16.msra.mxu0 %v18805_v22  ;;  %9806 = vmatpush1.bf16.msra.mxu1 %v18806_v0  ;;  %v18830_v22 = vld [vmem:[#allocation75_spill] sm:$0xff] }
 0x4bd   :  { %9748 = vmatprep.subr.bf16.mxu0 %v18807_v4  ;;  %9808 = vmatprep.subr.bf16.mxu1 %v18808_v62  ;;  %v18831_v0 = vld [vmem:[#allocation163_spill] sm:$0xff]  ;;  %v18832_v4 = vld [vmem:[#allocation164_spill] sm:$0xff] }
 0x4be   :  { %5251 = vmatmul.mubr.f32.gmra.mrb[98].mxu0 %v16098_v28  ;;  %5348 = vmatmul.mubr.f32.gmra.mrb[92].mxu1 %v16098_v28 }
 0x4bf   :  { %8408 = vmatprep.mubr.msk.f32.mxu0 %vm3489_vm5, %v16104_v61  ;;  %8414 = vmatprep.mubr.msk.f32.mxu1 %vm3489_vm5, %v16104_v61 }
 0x4c0   :  { %9750 = vmatpush1.bf16.msra.mxu0 %v18809_v13  ;;  %9810 = vmatpush1.bf16.msra.mxu1 %v18810_v46 }
 0x4c1   :  { %9752 = vmatprep.subr.bf16.mxu0 %v18811_v39  ;;  %9812 = vmatprep.subr.bf16.mxu1 %v18812_v30  ;;  %v18833_v30 = vld [vmem:[#allocation165_spill] sm:$0xff] }
 0x4c2   :  { %5257 = vmatmul.mubr.f32.gmra.mrb[100].mxu0 %v16116_v37  ;;  %5354 = vmatmul.mubr.f32.gmra.mrb[94].mxu1 %v16116_v37 }
 0x4c3   :  { %8409 = vmatprep.mubr.msk.f32.mxu0 %vm3489_vm5, %v16122_v26  ;;  %8415 = vmatprep.mubr.msk.f32.mxu1 %vm3489_vm5, %v16122_v26 }
 0x4c4   :  { %9754 = vmatpush1.bf16.msra.mxu0 %v18813_v34  ;;  %9814 = vmatpush1.bf16.msra.mxu1 %v18814_v60  ;;  %v18834_v34 = vld [vmem:[#allocation166_spill] sm:$0xff]  ;;  %v18835_v60 = vld [vmem:[#allocation167_spill] sm:$0xff] }
 0x4c5   :  { %9756 = vmatprep.subr.bf16.mxu0 %v18815_v5  ;;  %9816 = vmatprep.subr.bf16.mxu1 %v18816_v3  ;;  %v18836_v5 = vld [vmem:[#allocation168_spill] sm:$0xff]  ;;  %v18837_v3 = vld [vmem:[#allocation69_spill] sm:$0xff] }
 0x4c6   :  { %5263 = vmatmul.mubr.f32.gmra.mrb[134].mxu0 %v16134_v47  ;;  %5360 = vmatmul.mubr.f32.gmra.mrb[128].mxu1 %v16134_v47 }
 0x4c7   :  { %8410 = vmatprep.mubr.msk.f32.mxu0 %vm3489_vm5, %v16140_v42  ;;  %8416 = vmatprep.mubr.msk.f32.mxu1 %vm3489_vm5, %v16140_v42 }
 0x4c8   :  { %9758 = vmatpush1.bf16.msra.mxu0 %v18817_v20  ;;  %9818 = vmatpush1.bf16.msra.mxu1 %v18818_v52  ;;  %v18838_v20 = vld [vmem:[#allocation77_spill] sm:$0xff] }
 0x4c9   :  { %9760 = vmatprep.subr.bf16.mxu0 %v18819_v40  ;;  %9820 = vmatprep.subr.bf16.mxu1 %v18820_v63  ;;  %v18839_v52 = vld [vmem:[#allocation169_spill] sm:$0xff]  ;;  %v18840_v40 = vld [vmem:[#allocation170_spill] sm:$0xff]  ;;  %v18841_v63 = vld [vmem:[#allocation171_spill] sm:$0xff] }
 0x4ca   :  { %5267 = vmatmul.mubr.f32.gmra.mrb[136].mxu0 %v16150_v14  ;;  %5364 = vmatmul.mubr.f32.gmra.mrb[130].mxu1 %v16150_v14 }
 0x4cb   :  { %8417 = vmatprep.mubr.msk.f32.mxu0 %vm3489_vm5, %v16012_v43  ;;  %8423 = vmatprep.mubr.msk.f32.mxu1 %vm3489_vm5, %v16012_v43 }
 0x4cc   :  { %9762 = vmatpush1.bf16.msra.mxu0 %v18821_v8  ;;  %9822 = vmatpush1.bf16.msra.mxu1 %v18822_v11  ;;  %v18842_v8 = vld [vmem:[#allocation172_spill] sm:$0xff]  ;;  %v18843_v11 = vld [vmem:[#allocation173_spill] sm:$0xff] }
 0x4cd   :  { %9764 = vmatprep.subr.bf16.mxu0 %v18823_v23  ;;  %9824 = vmatprep.subr.bf16.mxu1 %v18824_v1  ;;  %v18844_v23 = vld [vmem:[#allocation71_spill] sm:$0xff] }
 0x4ce   :  { %v18845_v1 = vld [vmem:[#allocation79_spill] sm:$0xff] }
 0x4d0   :  { %9766 = vmatpush1.bf16.msra.mxu0 %v18825_v18  ;;  %9826 = vmatpush1.bf16.msra.mxu1 %v18826_v41  ;;  %v18846_v18 = vld [vmem:[#allocation64_spill] sm:$0xff] }
 0x4d1   :  { %9768 = vmatprep.subr.bf16.mxu0 %v18827_v49  ;;  %9828 = vmatprep.subr.bf16.mxu1 %v18828_v31  ;;  %v18847_v41 = vld [vmem:[#allocation72_spill] sm:$0xff]  ;;  %v18861_v49 = vld [vmem:[#allocation179_spill] sm:$0xff] }
 0x4d2   :  { %v4519_v19 = vpop.f32.mrb[122].mxu0  ;;  %v4616_v27 = vpop.f32.mrb[116].mxu1  ;;  %v18862_v31 = vld [vmem:[#allocation180_spill] sm:$0xff] }
 0x4d3   :  { %v4520_v51 = vpop.f32.mrb[123].mxu0  ;;  %v4617_v15 = vpop.f32.mrb[117].mxu1  ;;  %v18863_v19 = vld [vmem:[#allocation181_spill] sm:$0xff]  ;;  %v18864_v27 = vld [vmem:[#allocation182_spill] sm:$0xff] }
 0x4d4   :  { %9770 = vmatpush1.bf16.msra.mxu0 %v18829_v21  ;;  %9830 = vmatpush1.bf16.msra.mxu1 %v18830_v22  ;;  %v18865_v51 = vld [vmem:[#allocation183_spill] sm:$0xff]  ;;  %v18866_v15 = vld [vmem:[#allocation184_spill] sm:$0xff]  ;;  %v18867_v21 = vld [vmem:[#allocation185_spill] sm:$0xff] }
 0x4d5   :  { %9772 = vmatprep.subr.bf16.mxu0 %v18831_v0  ;;  %9832 = vmatprep.subr.bf16.mxu1 %v18832_v4  ;;  %v18868_v22 = vld [vmem:[#allocation186_spill] sm:$0xff]  ;;  %v18869_v0 = vld [vmem:[#allocation187_spill] sm:$0xff]  ;;  %v18870_v4 = vld [vmem:[#allocation188_spill] sm:$0xff] }
 0x4d6   :  { %v4523_v62 = vpop.f32.mrb[124].mxu0  ;;  %v4620_v13 = vpop.f32.mrb[118].mxu1 }
 0x4d7   :  { %v4524_v46 = vpop.f32.mrb[125].mxu0  ;;  %v4621_v39 = vpop.f32.mrb[119].mxu1  ;;  %v18871_v62 = vld [vmem:[#allocation189_spill] sm:$0xff]  ;;  %v18872_v13 = vld [vmem:[#allocation190_spill] sm:$0xff] }
 0x4d8   :  { %9774 = vmatpush1.bf16.msra.mxu0 %v18833_v30  ;;  %9834 = vmatpush1.bf16.msra.mxu1 %v18834_v34  ;;  %v18873_v46 = vld [vmem:[#allocation191_spill] sm:$0xff]  ;;  %v18874_v39 = vld [vmem:[#allocation192_spill] sm:$0xff]  ;;  %v18875_v30 = vld [vmem:[#allocation193_spill] sm:$0xff] }
 0x4d9   :  { %9776 = vmatprep.subr.bf16.mxu0 %v18835_v60  ;;  %9836 = vmatprep.subr.bf16.mxu1 %v18836_v5 }
 0x4dc   :  { %9778 = vmatpush1.bf16.msra.mxu0 %v18837_v3  ;;  %9838 = vmatpush1.bf16.msra.mxu1 %v18838_v20  ;;  %v18876_v20 = vld [vmem:[#allocation194_spill] sm:$0xff] }
 0x4dd   :  { %9780 = vmatprep.subr.bf16.mxu0 %v18839_v52  ;;  %9840 = vmatprep.subr.bf16.mxu1 %v18840_v40  ;;  %v18877_v52 = vld [vmem:[#allocation195_spill] sm:$0xff]  ;;  %v18878_v40 = vld [vmem:[#allocation196_spill] sm:$0xff] }
 0x4e0   :  { %9782 = vmatpush1.bf16.msra.mxu0 %v14614_v2  ;;  %9842 = vmatpush1.bf16.msra.mxu1 %v18841_v63  ;;  %v18848_v2 = vld [vmem:[#allocation174_spill] sm:$0xff]  ;;  %v18879_v63 = vld [vmem:[#allocation197_spill] sm:$0xff] }
 0x4e1   :  { %9784 = vmatprep.subr.bf16.mxu0 %v18842_v8  ;;  %9844 = vmatprep.subr.bf16.mxu1 %v18843_v11 }
 0x4e4   :  { %9786 = vmatpush1.bf16.msra.mxu0 %v14654_v29  ;;  %9846 = vmatpush1.bf16.msra.mxu1 %v14660_v44  ;;  %v18849_v29 = vld [vmem:[#allocation65_spill] sm:$0xff] }
 0x4e5   :  { %9788 = vmatprep.subr.bf16.mxu0 %v18844_v23  ;;  %9848 = vmatprep.subr.bf16.mxu1 %v18845_v1  ;;  %v18850_v44 = vld [vmem:[#allocation73_spill] sm:$0xff] }
 0x4e8   :  { %9790 = vmatpush1.bf16.msra.mxu0 %v14699_v6  ;;  %9850 = vmatpush1.bf16.msra.mxu1 %v18846_v18  ;;  %v18851_v6 = vld [vmem:[#allocation66_spill] sm:$0xff] }
 0x4e9   :  { %9792 = vmatprep.subr.bf16.mxu0 %v18847_v41  ;;  %9852 = vmatprep.subr.bf16.mxu1 %v18848_v2  ;;  %v18880_v18 = vld [vmem:[#allocation198_spill] sm:$0xff]  ;;  %v18881_v41 = vld [vmem:[#allocation199_spill] sm:$0xff]  ;;  %v18882_v2 = vld [vmem:[#allocation200_spill] sm:$0xff] }
 0x4ec   :  { %9794 = vmatpush1.bf16.msra.mxu0 %v14744_v32  ;;  %9854 = vmatpush1.bf16.msra.mxu1 %v14750_v50  ;;  %v18852_v50 = vld [vmem:[#allocation74_spill] sm:$0xff]  ;;  %v18854_v32 = vld [vmem:[#allocation76_spill] sm:$0xff] }
 0x4ed   :  { %9796 = vmatprep.subr.bf16.mxu0 %v14763_v25  ;;  %9856 = vmatprep.subr.bf16.mxu1 %v18849_v29  ;;  %v18855_v25 = vld [vmem:[#allocation70_spill] sm:$0xff]  ;;  %v18883_v29 = vld [vmem:[#allocation201_spill] sm:$0xff] }
 0x4f0   :  { %9798 = vmatpush1.bf16.msra.mxu0 %v14789_v12  ;;  %9858 = vmatpush1.bf16.msra.mxu1 %v14795_v45  ;;  %v18853_v45 = vld [vmem:[#allocation68_spill] sm:$0xff]  ;;  %v18857_v12 = vld [vmem:[#allocation175_spill] sm:$0xff] }
 0x4f1   :  { %9860 = vmatprep.subr.bf16.mxu0 %v18850_v44  ;;  %9920 = vmatprep.subr.bf16.mxu1 %v18851_v6  ;;  %v18884_v44 = vld [vmem:[#allocation202_spill] sm:$0xff]  ;;  %v18885_v6 = vld [vmem:[#allocation203_spill] sm:$0xff] }
 0x4f3   :  { %5433 = vmatmul.mubr.f32.vlgmr.msra.gmra.mrb[138].mxu0 %v16064_v55  ;;  %5530 = vmatmul.mubr.f32.vlgmr.msra.gmra.mrb[132].mxu1 %v16064_v55 }
 0x4f4   :  { %8418 = vmatprep.mubr.msk.f32.mxu0 %vm3489_vm5, %v16070_v59  ;;  %8424 = vmatprep.mubr.msk.f32.mxu1 %vm3489_vm5, %v16070_v59 }
 0x4f5   :  { %9862 = vmatpush1.bf16.msra.mxu0 %v14836_v48  ;;  %9922 = vmatpush1.bf16.msra.mxu1 %v14842_v53  ;;  %v18856_v53 = vld [vmem:[#allocation78_spill] sm:$0xff]  ;;  %v18858_v48 = vld [vmem:[#allocation176_spill] sm:$0xff] }
 0x4f6   :  { %9864 = vmatprep.subr.bf16.mxu0 %v14852_v33  ;;  %9924 = vmatprep.subr.bf16.mxu1 %v14854_v57  ;;  %v18859_v33 = vld [vmem:[#allocation177_spill] sm:$0xff]  ;;  %v18860_v57 = vld [vmem:[#allocation178_spill] sm:$0xff] }
 0x4f7   :  { %5437 = vmatmul.mubr.f32.gmra.mrb[108].mxu0 %v16080_v17  ;;  %5534 = vmatmul.mubr.f32.gmra.mrb[102].mxu1 %v16080_v17 }
 0x4f8   :  { %8419 = vmatprep.mubr.msk.f32.mxu0 %vm3489_vm5, %v16086_v36  ;;  %8425 = vmatprep.mubr.msk.f32.mxu1 %vm3489_vm5, %v16086_v36 }
 0x4f9   :  { %9866 = vmatpush1.bf16.msra.mxu0 %v18852_v50  ;;  %9926 = vmatpush1.bf16.msra.mxu1 %v18853_v45  ;;  %v18886_v50 = vld [vmem:[#allocation204_spill] sm:$0xff]  ;;  %v18887_v45 = vld [vmem:[#allocation205_spill] sm:$0xff] }
 0x4fa   :  { %9868 = vmatprep.subr.bf16.mxu0 %v18854_v32  ;;  %9928 = vmatprep.subr.bf16.mxu1 %v18855_v25  ;;  %v18888_v32 = vld [vmem:[#allocation206_spill] sm:$0xff]  ;;  %v18889_v25 = vld [vmem:[#allocation207_spill] sm:$0xff] }
 0x4fb   :  { %5443 = vmatmul.mubr.f32.gmra.mrb[110].mxu0 %v16098_v28  ;;  %5540 = vmatmul.mubr.f32.gmra.mrb[104].mxu1 %v16098_v28 }
 0x4fc   :  { %8420 = vmatprep.mubr.msk.f32.mxu0 %vm3489_vm5, %v16104_v61  ;;  %8426 = vmatprep.mubr.msk.f32.mxu1 %vm3489_vm5, %v16104_v61 }
 0x4fd   :  { %9870 = vmatpush1.bf16.msra.mxu0 %v18856_v53  ;;  %9930 = vmatpush1.bf16.msra.mxu1 %v18857_v12  ;;  %v18890_v53 = vld [vmem:[#allocation208_spill] sm:$0xff]  ;;  %v18891_v12 = vld [vmem:[#allocation209_spill] sm:$0xff] }
 0x4fe   :  { %9872 = vmatprep.subr.bf16.mxu0 %v18858_v48  ;;  %9932 = vmatprep.subr.bf16.mxu1 %v18859_v33  ;;  %v18892_v48 = vld [vmem:[#allocation210_spill] sm:$0xff]  ;;  %v18893_v33 = vld [vmem:[#allocation211_spill] sm:$0xff] }
 0x4ff   :  { %5449 = vmatmul.mubr.f32.gmra.mrb[112].mxu0 %v16116_v37  ;;  %5546 = vmatmul.mubr.f32.gmra.mrb[106].mxu1 %v16116_v37 }
 0x500   :  { %8421 = vmatprep.mubr.msk.f32.mxu0 %vm3489_vm5, %v16122_v26  ;;  %8427 = vmatprep.mubr.msk.f32.mxu1 %vm3489_vm5, %v16122_v26 }
 0x501   :  { %9874 = vmatpush1.bf16.msra.mxu0 %v18860_v57  ;;  %9934 = vmatpush1.bf16.msra.mxu1 %v18861_v49  ;;  %v18894_v57 = vld [vmem:[#allocation212_spill] sm:$0xff]  ;;  %v18895_v49 = vld [vmem:[#allocation213_spill] sm:$0xff] }
 0x502   :  { %9876 = vmatprep.subr.bf16.mxu0 %v18862_v31  ;;  %9936 = vmatprep.subr.bf16.mxu1 %v18863_v19  ;;  %v18896_v31 = vld [vmem:[#allocation214_spill] sm:$0xff]  ;;  %v18897_v19 = vld [vmem:[#allocation215_spill] sm:$0xff] }
 0x503   :  { %5455 = vmatmul.mubr.f32.gmra.mrb[114].mxu0 %v16134_v47  ;;  %5552 = vmatmul.mubr.f32.gmra.mrb[108].mxu1 %v16134_v47 }
 0x504   :  { %8422 = vmatprep.mubr.msk.f32.mxu0 %vm3489_vm5, %v16140_v42  ;;  %8428 = vmatprep.mubr.msk.f32.mxu1 %vm3489_vm5, %v16140_v42 }
 0x505   :  { %9878 = vmatpush1.bf16.msra.mxu0 %v18864_v27  ;;  %9938 = vmatpush1.bf16.msra.mxu1 %v18865_v51  ;;  %v18898_v27 = vld [vmem:[#allocation216_spill] sm:$0xff]  ;;  %v18899_v51 = vld [vmem:[#allocation217_spill] sm:$0xff] }
 0x506   :  { %9880 = vmatprep.subr.bf16.mxu0 %v18866_v15  ;;  %9940 = vmatprep.subr.bf16.mxu1 %v18867_v21  ;;  %v18900_v15 = vld [vmem:[#allocation218_spill] sm:$0xff]  ;;  %v18901_v21 = vld [vmem:[#allocation219_spill] sm:$0xff] }
 0x507   :  { %5461 = vmatmul.mubr.f32.gmra.mrb[140].mxu0 %v16150_v14  ;;  %5558 = vmatmul.mubr.f32.gmra.mrb[134].mxu1 %v16150_v14 }
 0x508   :  { %8429 = vmatprep.mubr.msk.f32.mxu0 %vm3489_vm5, %v16012_v43  ;;  %8435 = vmatprep.mubr.msk.f32.mxu1 %vm3489_vm5, %v16012_v43 }
 0x509   :  { %9882 = vmatpush1.bf16.msra.mxu0 %v18868_v22  ;;  %9942 = vmatpush1.bf16.msra.mxu1 %v18869_v0  ;;  %v18902_v22 = vld [vmem:[#allocation220_spill] sm:$0xff]  ;;  %v18903_v0 = vld [vmem:[#allocation221_spill] sm:$0xff] }
 0x50a   :  { %9884 = vmatprep.subr.bf16.mxu0 %v18870_v4  ;;  %9944 = vmatprep.subr.bf16.mxu1 %v18871_v62  ;;  %v18904_v4 = vld [vmem:[#allocation222_spill] sm:$0xff]  ;;  %v18905_v62 = vld [vmem:[#allocation223_spill] sm:$0xff] }
 0x50d   :  { %9886 = vmatpush1.bf16.msra.mxu0 %v18872_v13  ;;  %9946 = vmatpush1.bf16.msra.mxu1 %v18873_v46  ;;  %v18906_v13 = vld [vmem:[#allocation224_spill] sm:$0xff]  ;;  %v18907_v46 = vld [vmem:[#allocation225_spill] sm:$0xff] }
 0x50e   :  { %9888 = vmatprep.subr.bf16.mxu0 %v18874_v39  ;;  %9948 = vmatprep.subr.bf16.mxu1 %v18875_v30  ;;  %v18908_v39 = vld [vmem:[#allocation226_spill] sm:$0xff]  ;;  %v18909_v30 = vld [vmem:[#allocation227_spill] sm:$0xff] }
 0x50f   :  { %v4834_v34 = vpop.f32.mrb[126].mxu0  ;;  %v4931_v60 = vpop.f32.mrb[120].mxu1 }
 0x510   :  { %v4835_v5 = vpop.f32.mrb[127].mxu0  ;;  %v4932_v3 = vpop.f32.mrb[121].mxu1  ;;  %v18910_v34 = vld [vmem:[#allocation228_spill] sm:$0xff]  ;;  %v18911_v60 = vld [vmem:[#allocation229_spill] sm:$0xff] }
 0x511   :  { %9890 = vmatpush1.bf16.msra.mxu0 %v18876_v20  ;;  %9950 = vmatpush1.bf16.msra.mxu1 %v18877_v52  ;;  %v18912_v5 = vld [vmem:[#allocation230_spill] sm:$0xff]  ;;  %v18913_v3 = vld [vmem:[#allocation231_spill] sm:$0xff]  ;;  %v18914_v20 = vld [vmem:[#allocation232_spill] sm:$0xff] }
 0x512   :  { %9892 = vmatprep.subr.bf16.mxu0 %v18878_v40  ;;  %9952 = vmatprep.subr.bf16.mxu1 %v18879_v63  ;;  %v18915_v52 = vld [vmem:[#allocation233_spill] sm:$0xff]  ;;  %v18916_v40 = vld [vmem:[#allocation234_spill] sm:$0xff]  ;;  %v18917_v63 = vld [vmem:[#allocation235_spill] sm:$0xff] }
 0x513   :  { %v4838_v8 = vpop.f32.mrb[128].mxu0  ;;  %v4935_v11 = vpop.f32.mrb[122].mxu1 }
 0x514   :  { %v4839_v23 = vpop.f32.mrb[129].mxu0  ;;  %v4936_v1 = vpop.f32.mrb[123].mxu1  ;;  %v18918_v8 = vld [vmem:[#allocation236_spill] sm:$0xff]  ;;  %v18919_v11 = vld [vmem:[#allocation237_spill] sm:$0xff] }
 0x515   :  { %9894 = vmatpush1.bf16.msra.mxu0 %v18880_v18  ;;  %9954 = vmatpush1.bf16.msra.mxu1 %v18881_v41  ;;  %v18920_v23 = vld [vmem:[#allocation238_spill] sm:$0xff]  ;;  %v18921_v1 = vld [vmem:[#allocation239_spill] sm:$0xff]  ;;  %v18922_v18 = vld [vmem:[#allocation240_spill] sm:$0xff] }
 0x516   :  { %9896 = vmatprep.subr.bf16.mxu0 %v18882_v2  ;;  %9956 = vmatprep.subr.bf16.mxu1 %v18883_v29  ;;  %v18923_v41 = vld [vmem:[#allocation241_spill] sm:$0xff]  ;;  %v18924_v2 = vld [vmem:[#allocation242_spill] sm:$0xff]  ;;  %v18925_v29 = vld [vmem:[#allocation243_spill] sm:$0xff] }
 0x519   :  { %9898 = vmatpush1.bf16.msra.mxu0 %v18884_v44  ;;  %9958 = vmatpush1.bf16.msra.mxu1 %v18885_v6  ;;  %v18926_v44 = vld [vmem:[#allocation244_spill] sm:$0xff]  ;;  %v18927_v6 = vld [vmem:[#allocation245_spill] sm:$0xff] }
 0x51a   :  { %9900 = vmatprep.subr.bf16.mxu0 %v18886_v50  ;;  %9960 = vmatprep.subr.bf16.mxu1 %v18887_v45  ;;  %v18928_v50 = vld [vmem:[#allocation246_spill] sm:$0xff]  ;;  %v18929_v45 = vld [vmem:[#allocation247_spill] sm:$0xff] }
 0x51d   :  { %9902 = vmatpush1.bf16.msra.mxu0 %v18888_v32  ;;  %9962 = vmatpush1.bf16.msra.mxu1 %v18889_v25  ;;  %v18931_v32 = vld [vmem:[#allocation249_spill] sm:$0xff]  ;;  %v18932_v25 = vld [vmem:[#allocation250_spill] sm:$0xff] }
 0x51e   :  { %9904 = vmatprep.subr.bf16.mxu0 %v18890_v53  ;;  %9964 = vmatprep.subr.bf16.mxu1 %v18891_v12  ;;  %v18933_v53 = vld [vmem:[#allocation251_spill] sm:$0xff]  ;;  %v18934_v12 = vld [vmem:[#allocation252_spill] sm:$0xff] }
 0x521   :  { %9906 = vmatpush1.bf16.msra.mxu0 %v18892_v48  ;;  %9966 = vmatpush1.bf16.msra.mxu1 %v18893_v33  ;;  %v18935_v48 = vld [vmem:[#allocation253_spill] sm:$0xff]  ;;  %v18936_v33 = vld [vmem:[#allocation254_spill] sm:$0xff] }
 0x522   :  { %9908 = vmatprep.subr.bf16.mxu0 %v18894_v57  ;;  %9968 = vmatprep.subr.bf16.mxu1 %v18895_v49  ;;  %v18938_v57 = vld [vmem:[#allocation256_spill] sm:$0xff]  ;;  %v18939_v49 = vld [vmem:[#allocation257_spill] sm:$0xff] }
 0x525   :  { %9910 = vmatpush1.bf16.msra.mxu0 %v18896_v31  ;;  %9970 = vmatpush1.bf16.msra.mxu1 %v18897_v19  ;;  %v18940_v31 = vld [vmem:[#allocation258_spill] sm:$0xff]  ;;  %v18941_v19 = vld [vmem:[#allocation259_spill] sm:$0xff] }
 0x526   :  { %9912 = vmatprep.subr.bf16.mxu0 %v18898_v27  ;;  %9972 = vmatprep.subr.bf16.mxu1 %v18899_v51  ;;  %v18942_v27 = vld [vmem:[#allocation260_spill] sm:$0xff]  ;;  %v18943_v51 = vld [vmem:[#allocation261_spill] sm:$0xff] }
 0x529   :  { %9914 = vmatpush1.bf16.msra.mxu0 %v18900_v15  ;;  %9974 = vmatpush1.bf16.msra.mxu1 %v18901_v21  ;;  %v18944_v15 = vld [vmem:[#allocation262_spill] sm:$0xff]  ;;  %v18945_v21 = vld [vmem:[#allocation263_spill] sm:$0xff] }
 0x52a   :  { %9916 = vmatprep.subr.bf16.mxu0 %v18902_v22  ;;  %9976 = vmatprep.subr.bf16.mxu1 %v18903_v0  ;;  %v18946_v22 = vld [vmem:[#allocation264_spill] sm:$0xff]  ;;  %v18947_v0 = vld [vmem:[#allocation265_spill] sm:$0xff] }
 0x52d   :  { %9918 = vmatpush1.bf16.msra.mxu0 %v18904_v4  ;;  %9978 = vmatpush1.bf16.msra.mxu1 %v18905_v62  ;;  %v18948_v4 = vld [vmem:[#allocation266_spill] sm:$0xff]  ;;  %v18949_v62 = vld [vmem:[#allocation267_spill] sm:$0xff] }
 0x52e   :  { %9980 = vmatprep.subr.bf16.mxu0 %v18906_v13  ;;  %10040 = vmatprep.subr.bf16.mxu1 %v18907_v46  ;;  %v18950_v13 = vld [vmem:[#allocation268_spill] sm:$0xff] }
 0x530   :  { %5627 = vmatmul.mubr.f32.vlgmr.msra.gmra.mrb[142].mxu0 %v16064_v55  ;;  %5724 = vmatmul.mubr.f32.vlgmr.msra.gmra.mrb[136].mxu1 %v16064_v55 }
 0x531   :  { %8430 = vmatprep.mubr.msk.f32.mxu0 %vm3489_vm5, %v16070_v59  ;;  %8436 = vmatprep.mubr.msk.f32.mxu1 %vm3489_vm5, %v16070_v59 }
 0x532   :  { %9982 = vmatpush1.bf16.msra.mxu0 %v18908_v39  ;;  %10042 = vmatpush1.bf16.msra.mxu1 %v18909_v30 }
 0x533   :  { %9984 = vmatprep.subr.bf16.mxu0 %v18910_v34  ;;  %10044 = vmatprep.subr.bf16.mxu1 %v18911_v60  ;;  %v18951_v60 = vld [vmem:[#allocation269_spill] sm:$0xff] }
 0x534   :  { %5631 = vmatmul.mubr.f32.gmra.mrb[94].mxu0 %v16080_v17  ;;  %5728 = vmatmul.mubr.f32.gmra.mrb[88].mxu1 %v16080_v17 }
 0x535   :  { %8431 = vmatprep.mubr.msk.f32.mxu0 %vm3489_vm5, %v16086_v36  ;;  %8437 = vmatprep.mubr.msk.f32.mxu1 %vm3489_vm5, %v16086_v36 }
 0x536   :  { %9986 = vmatpush1.bf16.msra.mxu0 %v18912_v5  ;;  %10046 = vmatpush1.bf16.msra.mxu1 %v18913_v3  ;;  %v18952_v5 = vld [vmem:[#allocation270_spill] sm:$0xff]  ;;  %v18953_v3 = vld [vmem:[#allocation271_spill] sm:$0xff] }
 0x537   :  { %9988 = vmatprep.subr.bf16.mxu0 %v18914_v20  ;;  %10048 = vmatprep.subr.bf16.mxu1 %v18915_v52  ;;  %v18954_v20 = vld [vmem:[#allocation272_spill] sm:$0xff] }
 0x538   :  { %5637 = vmatmul.mubr.f32.gmra.mrb[96].mxu0 %v16098_v28  ;;  %5734 = vmatmul.mubr.f32.gmra.mrb[90].mxu1 %v16098_v28 }
 0x539   :  { %8432 = vmatprep.mubr.msk.f32.mxu0 %vm3489_vm5, %v16104_v61  ;;  %8438 = vmatprep.mubr.msk.f32.mxu1 %vm3489_vm5, %v16104_v61 }
 0x53a   :  { %9990 = vmatpush1.bf16.msra.mxu0 %v18916_v40  ;;  %10050 = vmatpush1.bf16.msra.mxu1 %v18917_v63 }
 0x53b   :  { %9992 = vmatprep.subr.bf16.mxu0 %v18918_v8  ;;  %10052 = vmatprep.subr.bf16.mxu1 %v18919_v11  ;;  %v18955_v11 = vld [vmem:[#allocation273_spill] sm:$0xff] }
 0x53c   :  { %5643 = vmatmul.mubr.f32.gmra.mrb[98].mxu0 %v16116_v37  ;;  %5740 = vmatmul.mubr.f32.gmra.mrb[92].mxu1 %v16116_v37 }
 0x53d   :  { %8433 = vmatprep.mubr.msk.f32.mxu0 %vm3489_vm5, %v16122_v26  ;;  %8439 = vmatprep.mubr.msk.f32.mxu1 %vm3489_vm5, %v16122_v26 }
 0x53e   :  { %9994 = vmatpush1.bf16.msra.mxu0 %v18920_v23  ;;  %10054 = vmatpush1.bf16.msra.mxu1 %v18921_v1 }
 0x53f   :  { %9996 = vmatprep.subr.bf16.mxu0 %v18922_v18  ;;  %10056 = vmatprep.subr.bf16.mxu1 %v18923_v41  ;;  %v8460_v18 = vld [vmem:[%s18093_s3 + $0x358] sm:$0xff]  ;;  %v8453_v41 = vld [vmem:[%s18093_s3 + $0x320] sm:$0xff] }
 0x540   :  { %5649 = vmatmul.mubr.f32.gmra.mrb[100].mxu0 %v16134_v47  ;;  %5746 = vmatmul.mubr.f32.gmra.mrb[94].mxu1 %v16134_v47 }
 0x541   :  { %8434 = vmatprep.mubr.msk.f32.mxu0 %vm3489_vm5, %v16140_v42  ;;  %8440 = vmatprep.mubr.msk.f32.mxu1 %vm3489_vm5, %v16140_v42 }
 0x542   :  { %9998 = vmatpush1.bf16.msra.mxu0 %v18924_v2  ;;  %10058 = vmatpush1.bf16.msra.mxu1 %v15594_v56  ;;  %v18930_v56 = vld [vmem:[#allocation248_spill] sm:$0xff]  ;;  %v8457_v2 = vld [vmem:[%s18093_s3 + $0x340] sm:$0xff] }
 0x543   :  { %10000 = vmatprep.subr.bf16.mxu0 %v18925_v29  ;;  %10060 = vmatprep.subr.bf16.mxu1 %v18926_v44 }
 0x544   :  { %5655 = vmatmul.mubr.f32.gmra.mrb[144].mxu0 %v16150_v14  ;;  %5752 = vmatmul.mubr.f32.gmra.mrb[138].mxu1 %v16150_v14 }
 0x545   :  { %8441 = vmatprep.mubr.msk.f32.mxu0 %vm3489_vm5, %v16012_v43  ;;  %8447 = vmatprep.mubr.msk.f32.mxu1 %vm3489_vm5, %v16012_v43  ;;  %v18937_v43 = vld [vmem:[#allocation255_spill] sm:$0xff] }
 0x546   :  { %10002 = vmatpush1.bf16.msra.mxu0 %v18927_v6  ;;  %10062 = vmatpush1.bf16.msra.mxu1 %v18928_v50  ;;  %v10101_v50 = vpack.c.bf16 %v8457_v2, %v8453_v41 }
 0x547   :  { %10004 = vmatprep.subr.bf16.mxu0 %v18929_v45  ;;  %10064 = vmatprep.subr.bf16.mxu1 %v18930_v56  ;;  %v8455_v45 = vld [vmem:[%s18093_s3 + $0x330] sm:$0xff] }
 0x548   :  { %v8459_v56 = vld [vmem:[%s18093_s3 + $0x350] sm:$0xff] }
 0x54a   :  { %10006 = vmatpush1.bf16.msra.mxu0 %v18931_v32  ;;  %10066 = vmatpush1.bf16.msra.mxu1 %v18932_v25  ;;  %v8462_v32 = vld [vmem:[%s18093_s3 + $0x368] sm:$0xff]  ;;  %v10149_v25 = vpack.c.bf16 %v8459_v56, %v8455_v45  ;;  %v8500_v45 = vld [vmem:[%s18093_s3 + $0x498] sm:$0xff] }
 0x54b   :  { %10008 = vmatprep.subr.bf16.mxu0 %v18933_v53  ;;  %10068 = vmatprep.subr.bf16.mxu1 %v18934_v12  ;;  %v8466_v53 = vld [vmem:[%s18093_s3 + $0x388] sm:$0xff]  ;;  %v8464_v12 = vld [vmem:[%s18093_s3 + $0x378] sm:$0xff] }
 0x54e   :  { %10010 = vmatpush1.bf16.msra.mxu0 %v18935_v48  ;;  %10070 = vmatpush1.bf16.msra.mxu1 %v18936_v33  ;;  %v8468_v48 = vld [vmem:[%s18093_s3 + $0x398] sm:$0xff]  ;;  %v10103_v33 = vpack.c.bf16 %v8466_v53, %v8462_v32 }
 0x54f   :  { %10012 = vmatprep.subr.bf16.mxu0 %v18937_v43  ;;  %10072 = vmatprep.subr.bf16.mxu1 %v18938_v57  ;;  %v10151_v43 = vpack.c.bf16 %v8468_v48, %v8464_v12  ;;  %v8461_v57 = vld [vmem:[%s18093_s3 + $0x360] sm:$0xff] }
 0x550   :  { %v8493_v48 = vld [vmem:[%s18093_s3 + $0x460] sm:$0xff] }
 0x552   :  { %10014 = vmatpush1.bf16.msra.mxu0 %v18939_v49  ;;  %10074 = vmatpush1.bf16.msra.mxu1 %v18940_v31  ;;  %v8465_v49 = vld [vmem:[%s18093_s3 + $0x380] sm:$0xff]  ;;  %v8463_v31 = vld [vmem:[%s18093_s3 + $0x370] sm:$0xff] }
 0x553   :  { %10016 = vmatprep.subr.bf16.mxu0 %v18941_v19  ;;  %10076 = vmatprep.subr.bf16.mxu1 %v18942_v27 }
 0x556   :  { %10018 = vmatpush1.bf16.msra.mxu0 %v18943_v51  ;;  %10078 = vmatpush1.bf16.msra.mxu1 %v18944_v15  ;;  %v10105_v51 = vpack.c.bf16 %v8465_v49, %v8461_v57  ;;  %v8467_v15 = vld [vmem:[%s18093_s3 + $0x390] sm:$0xff] }
 0x557   :  { %10020 = vmatprep.subr.bf16.mxu0 %v18945_v21  ;;  %10080 = vmatprep.subr.bf16.mxu1 %v18946_v22  ;;  %v8470_v21 = vld [vmem:[%s18093_s3 + $0x3a8] sm:$0xff] }
 0x558   :  { %v8474_v22 = vld [vmem:[%s18093_s3 + $0x3c8] sm:$0xff] }
 0x55a   :  { %10022 = vmatpush1.bf16.msra.mxu0 %v18947_v0  ;;  %10082 = vmatpush1.bf16.msra.mxu1 %v18948_v4 }
 0x55b   :  { %10024 = vmatprep.subr.bf16.mxu0 %v18949_v62  ;;  %10084 = vmatprep.subr.bf16.mxu1 %v18950_v13  ;;  %v10153_v62 = vpack.c.bf16 %v8467_v15, %v8463_v31  ;;  %v10107_v13 = vpack.c.bf16 %v8474_v22, %v8470_v21  ;;  %v8502_v15 = vld [vmem:[%s18093_s3 + $0x4a8] sm:$0xff]  ;;  %v8504_v22 = vld [vmem:[%s18093_s3 + $0x4b8] sm:$0xff] }
 0x55c   :  { %v5070_v46 = vpop.f32.mrb[130].mxu0  ;;  %v5167_v39 = vpop.f32.mrb[124].mxu1  ;;  %v8506_v21 = vld [vmem:[%s18093_s3 + $0x4c8] sm:$0xff] }
 0x55d   :  { %v5071_v30 = vpop.f32.mrb[131].mxu0  ;;  %v5168_v34 = vpop.f32.mrb[125].mxu1  ;;  %v8472_v46 = vld [vmem:[%s18093_s3 + $0x3b8] sm:$0xff] }
 0x55e   :  { %10026 = vmatpush1.bf16.msra.mxu0 %v18951_v60  ;;  %10086 = vmatpush1.bf16.msra.mxu1 %v18952_v5  ;;  %v8476_v39 = vld [vmem:[%s18093_s3 + $0x3d8] sm:$0xff]  ;;  %v8469_v30 = vld [vmem:[%s18093_s3 + $0x3a0] sm:$0xff]  ;;  %v8471_v5 = vld [vmem:[%s18093_s3 + $0x3b0] sm:$0xff] }
 0x55f   :  { %10028 = vmatprep.subr.bf16.mxu0 %v18953_v3  ;;  %10088 = vmatprep.subr.bf16.mxu1 %v18954_v20  ;;  %v10155_v34 = vpack.c.bf16 %v8476_v39, %v8472_v46  ;;  %v8473_v60 = vld [vmem:[%s18093_s3 + $0x3c0] sm:$0xff]  ;;  %v8475_v3 = vld [vmem:[%s18093_s3 + $0x3d0] sm:$0xff] }
 0x560   :  { %v5074_v52 = vpop.f32.mrb[132].mxu0  ;;  %v5171_v40 = vpop.f32.mrb[126].mxu1  ;;  %v10109_v20 = vpack.c.bf16 %v8473_v60, %v8469_v30  ;;  %v8501_v60 = vld [vmem:[%s18093_s3 + $0x4a0] sm:$0xff] }
 0x561   :  { %v5075_v63 = vpop.f32.mrb[133].mxu0  ;;  %v5172_v8 = vpop.f32.mrb[127].mxu1  ;;  %v8478_v52 = vld [vmem:[%s18093_s3 + $0x3e8] sm:$0xff] }
 0x562   :  { %10030 = vmatpush1.bf16.msra.mxu0 %v15892_v9  ;;  %10090 = vmatpush1.bf16.msra.mxu1 %v18955_v11  ;;  %v8482_v40 = vld [vmem:[%s18093_s3 + $0x408] sm:$0xff]  ;;  %v8480_v63 = vld [vmem:[%s18093_s3 + $0x3f8] sm:$0xff] }
 0x563   :  { %10032 = vmatprep.subr.bf16.mxu0 %v15904_v24  ;;  %10092 = vmatprep.subr.bf16.mxu1 %v15906_v7 }
 0x566   :  { %10034 = vmatpush1.bf16.msra.mxu0 %v15928_v58  ;;  %10094 = vmatpush1.bf16.msra.mxu1 %v15930_v38 }
 0x567   :  { %10036 = vmatprep.subr.bf16.mxu0 %v15937_v54  ;;  %10096 = vmatprep.subr.bf16.mxu1 %v15939_v16 }
 0x56a   :  { %10038 = vmatpush1.bf16.msra.mxu0 %v15952_v10  ;;  %10098 = vmatpush1.bf16.msra.mxu1 %v15954_v35 }
 0x56d   :  { %5821 = vmatmul.mubr.f32.vlgmr.msra.gmra.mrb[146].mxu0 %v16064_v55  ;;  %5918 = vmatmul.mubr.f32.vlgmr.msra.gmra.mrb[140].mxu1 %v16064_v55 }
 0x56e   :  { %8442 = vmatprep.mubr.msk.f32.mxu0 %vm3489_vm5, %v16070_v59  ;;  %8448 = vmatprep.mubr.msk.f32.mxu1 %vm3489_vm5, %v16070_v59 }
 0x571   :  { %5825 = vmatmul.mubr.f32.gmra.mrb[148].mxu0 %v16080_v17  ;;  %5922 = vmatmul.mubr.f32.gmra.mrb[142].mxu1 %v16080_v17 }
 0x572   :  { %8443 = vmatprep.mubr.msk.f32.mxu0 %vm3489_vm5, %v16086_v36  ;;  %8449 = vmatprep.mubr.msk.f32.mxu1 %vm3489_vm5, %v16086_v36 }
 0x575   :  { %5829 = vmatmul.mubr.f32.gmra.mrb[108].mxu0 %v16098_v28  ;;  %5926 = vmatmul.mubr.f32.gmra.mrb[102].mxu1 %v16098_v28 }
 0x576   :  { %8444 = vmatprep.mubr.msk.f32.mxu0 %vm3489_vm5, %v16104_v61  ;;  %8450 = vmatprep.mubr.msk.f32.mxu1 %vm3489_vm5, %v16104_v61 }
 0x579   :  { %5835 = vmatmul.mubr.f32.gmra.mrb[110].mxu0 %v16116_v37  ;;  %5932 = vmatmul.mubr.f32.gmra.mrb[104].mxu1 %v16116_v37 }
 0x57a   :  { %8445 = vmatprep.mubr.msk.f32.mxu0 %vm3489_vm5, %v16122_v26  ;;  %8451 = vmatprep.mubr.msk.f32.mxu1 %vm3489_vm5, %v16122_v26  ;;  %v8454_v26 = vld [vmem:[%s18093_s3 + $0x328] sm:$0xff] }
 0x57d   :  { %5841 = vmatmul.mubr.f32.gmra.mrb[112].mxu0 %v16134_v47  ;;  %5938 = vmatmul.mubr.f32.gmra.mrb[106].mxu1 %v16134_v47  ;;  %v8458_v47 = vld [vmem:[%s18093_s3 + $0x348] sm:$0xff] }
 0x57e   :  { %8446 = vmatprep.mubr.msk.f32.mxu0 %vm3489_vm5, %v16140_v42  ;;  %8452 = vmatprep.mubr.msk.f32.mxu1 %vm3489_vm5, %v16140_v42  ;;  %v8456_v42 = vld [vmem:[%s18093_s3 + $0x338] sm:$0xff]  ;;  %v10099_v1 = vpack.c.bf16 %v8458_v47, %v8454_v26 }
 0x57f   :  { %v10147_v6 = vpack.c.bf16 %v8460_v18, %v8456_v42 }
 0x580   :  { %10100 = vmatprep.subr.bf16.mxu0 %v10099_v1  ;;  %v8487_v1 = vld [vmem:[%s18093_s3 + $0x430] sm:$0xff] }
 0x581   :  { %5847 = vmatmul.mubr.f32.gmra.mrb[114].mxu0 %v16150_v14  ;;  %5944 = vmatmul.mubr.f32.gmra.mrb[108].mxu1 %v16150_v14 }
 0x582   :  { %10148 = vmatprep.subr.bf16.mxu1 %v10147_v6  ;;  %10102 = vmatpush1.bf16.msra.mxu0 %v10101_v50  ;;  %v8498_v6 = vld [vmem:[%s18093_s3 + $0x488] sm:$0xff]  ;;  %v8496_v50 = vld [vmem:[%s18093_s3 + $0x478] sm:$0xff] }
 0x583   :  { %10150 = vmatpush1.bf16.msra.mxu1 %v10149_v25  ;;  %10104 = vmatprep.subr.bf16.mxu0 %v10103_v33  ;;  %v8497_v33 = vld [vmem:[%s18093_s3 + $0x480] sm:$0xff]  ;;  %v10167_v31 = vpack.c.bf16 %v8500_v45, %v8496_v50  ;;  %v8528_v50 = vld [vmem:[%s18093_s3 + $0x578] sm:$0xff] }
 0x584   :  { %10152 = vmatprep.subr.bf16.mxu1 %v10151_v43  ;;  %v8495_v43 = vld [vmem:[%s18093_s3 + $0x470] sm:$0xff]  ;;  %v8532_v45 = vld [vmem:[%s18093_s3 + $0x598] sm:$0xff] }
 0x586   :  { %10106 = vmatpush1.bf16.msra.mxu0 %v10105_v51  ;;  %v8499_v51 = vld [vmem:[%s18093_s3 + $0x490] sm:$0xff] }
 0x587   :  { %10154 = vmatpush1.bf16.msra.mxu1 %v10153_v62  ;;  %10108 = vmatprep.subr.bf16.mxu0 %v10107_v13  ;;  %v8508_v62 = vld [vmem:[%s18093_s3 + $0x4d8] sm:$0xff]  ;;  %v10121_v13 = vpack.c.bf16 %v8497_v33, %v8493_v48  ;;  %v10169_v30 = vpack.c.bf16 %v8499_v51, %v8495_v43  ;;  %v8526_v48 = vld [vmem:[%s18093_s3 + $0x568] sm:$0xff]  ;;  %v8531_v51 = vld [vmem:[%s18093_s3 + $0x590] sm:$0xff] }
 0x588   :  { %10156 = vmatprep.subr.bf16.mxu1 %v10155_v34  ;;  %v10123_v34 = vpack.c.bf16 %v8506_v21, %v8502_v15  ;;  %v8530_v33 = vld [vmem:[%s18093_s3 + $0x588] sm:$0xff]  ;;  %v8525_v15 = vld [vmem:[%s18093_s3 + $0x560] sm:$0xff] }
 0x589   :  { %v10135_v43 = vpack.c.bf16 %v8530_v33, %v8526_v48  ;;  %v6240_v48 = vld [vmem:[%s18093_s3 + $0x28] sm:$0xff] }
 0x58a   :  { %10110 = vmatpush1.bf16.msra.mxu0 %v10109_v20 }
 0x599   :  { %v5264_v54 = vpop.f32.mrb[134].mxu0  ;;  %v5361_v24 = vpop.f32.mrb[128].mxu1 }
 0x59a   :  { %v5265_v7 = vpop.f32.mrb[135].mxu0  ;;  %v5362_v16 = vpop.f32.mrb[129].mxu1  ;;  %v10157_v54 = vpack.c.bf16 %v8475_v3, %v8471_v5  ;;  %v10111_v24 = vpack.c.bf16 %v8482_v40, %v8478_v52  ;;  %v8505_v5 = vld [vmem:[%s18093_s3 + $0x4c0] sm:$0xff]  ;;  %v8503_v3 = vld [vmem:[%s18093_s3 + $0x4b0] sm:$0xff]  ;;  %v10171_v40 = vpack.c.bf16 %v8508_v62, %v8504_v22 }
 0x59b   :  { %v8484_v7 = vld [vmem:[%s18093_s3 + $0x418] sm:$0xff]  ;;  %v8477_v16 = vld [vmem:[%s18093_s3 + $0x3e0] sm:$0xff] }
 0x59c   :  { %10158 = vmatpush1.bf16.msra.mxu1 %v10157_v54  ;;  %10112 = vmatprep.subr.bf16.mxu0 %v10111_v24  ;;  %v8514_v54 = vld [vmem:[%s18093_s3 + $0x508] sm:$0xff]  ;;  %v8512_v24 = vld [vmem:[%s18093_s3 + $0x4f8] sm:$0xff]  ;;  %v8529_v22 = vld [vmem:[%s18093_s3 + $0x580] sm:$0xff] }
 0x59d   :  { %v5268_v9 = vpop.f32.mrb[136].mxu0  ;;  %v5365_v58 = vpop.f32.mrb[130].mxu1  ;;  %v10137_v62 = vpack.c.bf16 %v8529_v22, %v8525_v15  ;;  %v6242_v15 = vld [vmem:[%s18093_s3 + $0x38] sm:$0xff] }
 0x59e   :  { %v5269_v38 = vpop.f32.mrb[137].mxu0  ;;  %v5366_v10 = vpop.f32.mrb[131].mxu1  ;;  %v8481_v9 = vld [vmem:[%s18093_s3 + $0x400] sm:$0xff] }
 0x59f   :  { %v10159_v10 = vpack.c.bf16 %v8484_v7, %v8480_v63  ;;  %v8507_v63 = vld [vmem:[%s18093_s3 + $0x4d0] sm:$0xff]  ;;  %v8516_v7 = vld [vmem:[%s18093_s3 + $0x518] sm:$0xff] }
 0x5a1   :  { %10160 = vmatprep.subr.bf16.mxu1 %v10159_v10  ;;  %v8509_v10 = vld [vmem:[%s18093_s3 + $0x4e0] sm:$0xff] }
 0x5c6   :  { %v5434_v35 = vpop.f32.mrb[138].mxu0  ;;  %v5531_v55 = vpop.f32.mrb[132].mxu1 }
 0x5c7   :  { %v5435_v59 = vpop.f32.mrb[139].mxu0  ;;  %v5532_v17 = vpop.f32.mrb[133].mxu1  ;;  %v8479_v35 = vld [vmem:[%s18093_s3 + $0x3f0] sm:$0xff] }
 0x5c8   :  { %v8483_v55 = vld [vmem:[%s18093_s3 + $0x410] sm:$0xff]  ;;  %v8486_v59 = vld [vmem:[%s18093_s3 + $0x428] sm:$0xff] }
 0x5c9   :  { %v8490_v17 = vld [vmem:[%s18093_s3 + $0x448] sm:$0xff]  ;;  %v10161_v47 = vpack.c.bf16 %v8483_v55, %v8479_v35  ;;  %v8513_v35 = vld [vmem:[%s18093_s3 + $0x500] sm:$0xff]  ;;  %v8511_v55 = vld [vmem:[%s18093_s3 + $0x4f0] sm:$0xff] }
 0x5ca   :  { %v10115_v42 = vpack.c.bf16 %v8490_v17, %v8486_v59  ;;  %v10175_v59 = vpack.c.bf16 %v8516_v7, %v8512_v24  ;;  %v8515_v17 = vld [vmem:[%s18093_s3 + $0x510] sm:$0xff] }
 0x5cb   :  { %10162 = vmatpush1.bf16.msra.mxu1 %v10161_v47  ;;  %v8524_v47 = vld [vmem:[%s18093_s3 + $0x558] sm:$0xff] }
 0x5da   :  { %v5462_v36 = vpop.f32.mrb[140].mxu0  ;;  %v5559_v28 = vpop.f32.mrb[134].mxu1 }
 0x5db   :  { %v5463_v61 = vpop.f32.mrb[141].mxu0  ;;  %v5560_v37 = vpop.f32.mrb[135].mxu1  ;;  %v8488_v36 = vld [vmem:[%s18093_s3 + $0x438] sm:$0xff] }
 0x5dc   :  { %v8492_v28 = vld [vmem:[%s18093_s3 + $0x458] sm:$0xff]  ;;  %v10113_v61 = vpack.c.bf16 %v8481_v9, %v8477_v16  ;;  %v10125_v16 = vpack.c.bf16 %v8505_v5, %v8501_v60  ;;  %v10173_v9 = vpack.c.bf16 %v8507_v63, %v8503_v3  ;;  %v8537_v63 = vld [vmem:[%s18093_s3 + $0x5c0] sm:$0xff] }
 0x5dd   :  { %v10163_v2 = vpack.c.bf16 %v8492_v28, %v8488_v36  ;;  %v8518_v36 = vld [vmem:[%s18093_s3 + $0x528] sm:$0xff]  ;;  %v8536_v3 = vld [vmem:[%s18093_s3 + $0x5b8] sm:$0xff] }
 0x5de   :  { %10114 = vmatpush1.bf16.msra.mxu0 %v10113_v61  ;;  %v8522_v28 = vld [vmem:[%s18093_s3 + $0x548] sm:$0xff]  ;;  %v8520_v61 = vld [vmem:[%s18093_s3 + $0x538] sm:$0xff] }
 0x5df   :  { %10116 = vmatprep.subr.bf16.mxu0 %v10115_v42  ;;  %10164 = vmatprep.subr.bf16.mxu1 %v10163_v2  ;;  %v10129_v42 = vpack.c.bf16 %v8513_v35, %v8509_v10  ;;  %v8521_v2 = vld [vmem:[%s18093_s3 + $0x540] sm:$0xff]  ;;  %v8546_v10 = vld [vmem:[%s18093_s3 + $0x608] sm:$0xff]  ;;  %v8544_v35 = vld [vmem:[%s18093_s3 + $0x5f8] sm:$0xff] }
 0x603   :  { %v5628_v14 = vpop.f32.mrb[142].mxu0  ;;  %v5725_v23 = vpop.f32.mrb[136].mxu1 }
 0x604   :  { %v5629_v29 = vpop.f32.mrb[143].mxu0  ;;  %v5726_v44 = vpop.f32.mrb[137].mxu1  ;;  %v8485_v14 = vld [vmem:[%s18093_s3 + $0x420] sm:$0xff] }
 0x605   :  { %v8489_v23 = vld [vmem:[%s18093_s3 + $0x440] sm:$0xff]  ;;  %v8491_v29 = vld [vmem:[%s18093_s3 + $0x450] sm:$0xff]  ;;  %v8494_v44 = vld [vmem:[%s18093_s3 + $0x468] sm:$0xff] }
 0x606   :  { %v10117_v56 = vpack.c.bf16 %v8489_v23, %v8485_v14  ;;  %v10165_v53 = vpack.c.bf16 %v8491_v29, %v8487_v1  ;;  %v10119_v12 = vpack.c.bf16 %v8498_v6, %v8494_v44  ;;  %v10177_v14 = vpack.c.bf16 %v8515_v17, %v8511_v55  ;;  %v8517_v1 = vld [vmem:[%s18093_s3 + $0x520] sm:$0xff]  ;;  %v8519_v44 = vld [vmem:[%s18093_s3 + $0x530] sm:$0xff] }
 0x607   :  { %v16565_v19 = vpop.f32.mrb[94].mxu0  ;;  %v16567_v27 = vpop.f32.mrb[88].mxu1  ;;  %v10131_v23 = vpack.c.bf16 %v8522_v28, %v8518_v36  ;;  %v10179_v29 = vpack.c.bf16 %v8524_v47, %v8520_v61  ;;  %v8523_v6 = vld [vmem:[%s18093_s3 + $0x550] sm:$0xff]  ;;  %v8548_v36 = vld [vmem:[%s18093_s3 + $0x618] sm:$0xff]  ;;  %v8541_v28 = vld [vmem:[%s18093_s3 + $0x5e0] sm:$0xff] }
 0x608   :  { %v16578_v0 = vpop.f32.mrb[95].mxu0  ;;  %v16580_v4 = vpop.f32.mrb[89].mxu1  ;;  %10118 = vmatpush1.bf16.msra.mxu0 %v10117_v56  ;;  %10166 = vmatpush1.bf16.msra.mxu1 %v10165_v53  ;;  %v10133_v56 = vpack.c.bf16 %v8521_v2, %v8517_v1  ;;  %v10181_v53 = vpack.c.bf16 %v8523_v6, %v8519_v44  ;;  %v8545_v61 = vld [vmem:[%s18093_s3 + $0x600] sm:$0xff]  ;;  %v10191_v47 = vpack.c.bf16 %v8548_v36, %v8544_v35 }
 0x609   :  { %10120 = vmatprep.subr.bf16.mxu0 %v10119_v12  ;;  %10168 = vmatprep.subr.bf16.mxu1 %v10167_v31  ;;  %v10183_v12 = vpack.c.bf16 %v8532_v45, %v8528_v50  ;;  %v8527_v31 = vld [vmem:[%s18093_s3 + $0x570] sm:$0xff]  ;;  %v8550_v50 = vld [vmem:[%s18093_s3 + $0x628] sm:$0xff]  ;;  %v8552_v45 = vld [vmem:[%s18093_s3 + $0x638] sm:$0xff] }
 0x60a   :  { %v10185_v21 = vpack.c.bf16 %v8531_v51, %v8527_v31  ;;  %v6238_v51 = vld [vmem:[%s18093_s3 + $0x18] sm:$0xff]  ;;  %v18957_v35 = vld [vmem:[#allocation82_spill] sm:$0xff] }
 0x60b   :  { %v16609_v8 = vpop.f32.mrb[96].mxu0  ;;  %v5735_v11 = vpop.f32.mrb[90].mxu1  ;;  %v6239_v36 = vld [vmem:[%s18093_s3 + $0x20] sm:$0xff] }
 0x60c   :  { %6099 = vrot.lane.b32.xlu0 %v5735_v11, %s11128_s29  ;;  %v16621_v58 = vpop.f32.mrb[97].mxu0  ;;  %v5737_v38 = vpop.f32.mrb[91].mxu1  ;;  %v8510_v11 = vld [vmem:[%s18093_s3 + $0x4e8] sm:$0xff]  ;;  %10122 = vmatpush1.bf16.msra.mxu0 %v10121_v13 }
 0x60d   :  { %6101 = vrot.lane.b32.xlu1 %v5737_v38, %s11128_s29  ;;  %10170 = vmatpush1.bf16.msra.mxu1 %v10169_v30  ;;  %v10127_v38 = vpack.c.bf16 %v8514_v54, %v8510_v11  ;;  %v8538_v30 = vld [vmem:[%s18093_s3 + $0x5c8] sm:$0xff]  ;;  %v8535_v11 = vld [vmem:[%s18093_s3 + $0x5b0] sm:$0xff] }
 0x60e   :  { %10124 = vmatprep.subr.bf16.mxu0 %v10123_v34  ;;  %10172 = vmatprep.subr.bf16.mxu1 %v10171_v40  ;;  %v8539_v54 = vld [vmem:[%s18093_s3 + $0x5d0] sm:$0xff] }
 0x60f   :  { %v16642_v37 = vpop.f32.mrb[98].mxu0  ;;  %v16644_v26 = vpop.f32.mrb[92].mxu1  ;;  %v10189_v7 = vpack.c.bf16 %v8539_v54, %v8535_v11 }
 0x610   :  { %v16655_v18 = vpop.f32.mrb[99].mxu0  ;;  %v16657_v41 = vpop.f32.mrb[93].mxu1  ;;  %10126 = vmatpush1.bf16.msra.mxu0 %v10125_v16 }
 0x611   :  { %10174 = vmatpush1.bf16.msra.mxu1 %v10173_v9  ;;  %10128 = vmatprep.subr.bf16.mxu0 %v10127_v38  ;;  %v8542_v38 = vld [vmem:[%s18093_s3 + $0x5e8] sm:$0xff] }
 0x612   :  { %10176 = vmatprep.subr.bf16.mxu1 %v10175_v59  ;;  %v10143_v17 = vpack.c.bf16 %v8546_v10, %v8542_v38 }
 0x613   :  { %v16674_v32 = vpop.f32.mrb[100].mxu0  ;;  %v16676_v25 = vpop.f32.mrb[94].mxu1 }
 0x614   :  { %v16687_v57 = vpop.f32.mrb[101].mxu0  ;;  %v16689_v49 = vpop.f32.mrb[95].mxu1  ;;  %10130 = vmatpush1.bf16.msra.mxu0 %v10129_v42  ;;  %v10145_v42 = vpack.c.bf16 %v8545_v61, %v8541_v28 }
 0x615   :  { %10178 = vmatpush1.bf16.msra.mxu1 %v10177_v14  ;;  %10132 = vmatprep.subr.bf16.mxu0 %v10131_v23  ;;  %v8543_v14 = vld [vmem:[%s18093_s3 + $0x5f0] sm:$0xff] }
 0x616   :  { %10180 = vmatprep.subr.bf16.mxu1 %v10179_v29  ;;  %v8547_v23 = vld [vmem:[%s18093_s3 + $0x610] sm:$0xff] }
 0x617   :  { %v5656_v46 = vpop.f32.mrb[144].mxu0  ;;  %v5753_v39 = vpop.f32.mrb[138].mxu1  ;;  %v10193_v1 = vpack.c.bf16 %v8547_v23, %v8543_v14  ;;  %v6244_v14 = vld [vmem:[%s18093_s3 + $0x48] sm:$0xff] }
 0x618   :  { %v5657_v20 = vpop.f32.mrb[145].mxu0  ;;  %v5754_v52 = vpop.f32.mrb[139].mxu1  ;;  %10134 = vmatpush1.bf16.msra.mxu0 %v10133_v56  ;;  %v8534_v39 = vld [vmem:[%s18093_s3 + $0x5a8] sm:$0xff] }
 0x619   :  { %10182 = vmatpush1.bf16.msra.mxu1 %v10181_v53  ;;  %10136 = vmatprep.subr.bf16.mxu0 %v10135_v43  ;;  %v10139_v5 = vpack.c.bf16 %v8538_v30, %v8534_v39  ;;  %v8540_v20 = vld [vmem:[%s18093_s3 + $0x5d8] sm:$0xff]  ;;  %v8533_v52 = vld [vmem:[%s18093_s3 + $0x5a0] sm:$0xff]  ;;  %v6236_v56 = vld [vmem:[%s18093_s3 + $0x8] sm:$0xff] }
 0x61a   :  { %10184 = vmatprep.subr.bf16.mxu1 %v10183_v12  ;;  %v10187_v40 = vpack.c.bf16 %v8540_v20, %v8536_v3  ;;  %v10141_v24 = vpack.c.bf16 %v8537_v63, %v8533_v52  ;;  %v8549_v53 = vld [vmem:[%s18093_s3 + $0x620] sm:$0xff]  ;;  %v8551_v12 = vld [vmem:[%s18093_s3 + $0x630] sm:$0xff]  ;;  %v10195_v31 = vpack.c.bf16 %v6240_v48, %v6236_v56  ;;  %v6248_v23 = vld [vmem:[%s18093_s3 + $0x68] sm:$0xff] }
 0x61b   :  { %v6247_v48 = vld [vmem:[%s18093_s3 + $0x60] sm:$0xff] }
 0x61c   :  { %10138 = vmatpush1.bf16.msra.mxu0 %v10137_v62  ;;  %v10243_v62 = vpack.c.bf16 %v6242_v15, %v6238_v51  ;;  %v10199_v51 = vpack.c.bf16 %v6248_v23, %v6244_v14 }
 0x61d   :  { %10186 = vmatpush1.bf16.msra.mxu1 %v10185_v21  ;;  %10140 = vmatprep.subr.bf16.mxu0 %v10139_v5 }
 0x61e   :  { %10188 = vmatprep.subr.bf16.mxu1 %v10187_v40  ;;  %v18956_v40 = vld [vmem:[#allocation81_spill] sm:$0xff] }
 0x620   :  { %10142 = vmatpush1.bf16.msra.mxu0 %v10141_v24 }
 0x621   :  { %10190 = vmatpush1.bf16.msra.mxu1 %v10189_v7  ;;  %10144 = vmatprep.subr.bf16.mxu0 %v10143_v17  ;;  %v6235_v17 = vld [vmem:[%s18093_s3] sm:$0xff] }
 0x622   :  { %10192 = vmatprep.subr.bf16.mxu1 %v10191_v47  ;;  %v6237_v47 = vld [vmem:[%s18093_s3 + $0x10] sm:$0xff]  ;;  %v10197_v56 = vpack.c.bf16 %v6239_v36, %v6235_v17 }
 0x624   :  { %10146 = vmatpush1.bf16.msra.mxu0 %v10145_v42  ;;  %v6241_v42 = vld [vmem:[%s18093_s3 + $0x30] sm:$0xff] }
 0x625   :  { %10194 = vmatpush1.bf16.msra.mxu1 %v10193_v1  ;;  %6488 = vmatprep.subr.mxu0 %v8550_v50  ;;  %v6246_v1 = vld [vmem:[%s18093_s3 + $0x58] sm:$0xff] }
 0x626   :  { %6559 = vmatprep.subr.mxu1 %v8552_v45 }
 0x628   :  { %6489 = vmatpush1.msra.mxu0 %v8549_v53  ;;  %v10245_v53 = vpack.c.bf16 %v6241_v42, %v6237_v47 }
 0x629   :  { %6560 = vmatpush1.msra.mxu1 %v8551_v12  ;;  %10196 = vmatprep.subr.bf16.mxu0 %v10195_v31  ;;  %v6243_v12 = vld [vmem:[%s18093_s3 + $0x40] sm:$0xff] }
 0x62a   :  { %10244 = vmatprep.subr.bf16.mxu1 %v10243_v62  ;;  %v6256_v62 = vld [vmem:[%s18093_s3 + $0xa8] sm:$0xff] }
 0x640   :  { %v5822_v13 = vpop.f32.mrb[146].mxu0  ;;  %v5919_v46 = vpop.f32.mrb[140].mxu1 }
 0x641   :  { %v5823_v34 = vpop.f32.mrb[147].mxu0  ;;  %v5920_v60 = vpop.f32.mrb[141].mxu1 }
 0x644   :  { %v5826_v16 = vpop.f32.mrb[148].mxu0  ;;  %v5923_v9 = vpop.f32.mrb[142].mxu1 }
 0x645   :  { %v5827_v55 = vpop.f32.mrb[149].mxu0  ;;  %v5924_v59 = vpop.f32.mrb[143].mxu1 }
 0x648   :  { %v16838_v2 = vpop.f32.mrb[108].mxu0  ;;  %v5927_v29 = vpop.f32.mrb[102].mxu1 }
 0x649   :  { %v16840_v44 = vpop.f32.mrb[109].mxu0  ;;  %v5929_v6 = vpop.f32.mrb[103].mxu1 }
 0x64c   :  { %v16860_v33 = vpop.f32.mrb[110].mxu0  ;;  %v5933_v43 = vpop.f32.mrb[104].mxu1 }
 0x64d   :  { %6160 = vrot.lane.b32.xlu0 %v5933_v43, %s11128_s29  ;;  %v5838_v21 = vpop.f32.mrb[111].mxu0  ;;  %v5935_v22 = vpop.f32.mrb[105].mxu1 }
 0x64e   :  { %6162 = vrot.lane.b32.xlu1 %v5935_v22, %s11128_s29  ;;  %v6252_v22 = vld [vmem:[%s18093_s3 + $0x88] sm:$0xff] }
 0x650   :  { %v16870_v13 = vpop.f32.mrb[112].mxu0  ;;  %v5939_v46 = vpop.f32.mrb[106].mxu1 }
 0x651   :  { %v5941_v39 = vpop.f32.mrb[107].mxu1  ;;  %6097 = vrot.lane.b32.xlu0 %v16621_v58, %s11128_s29  ;;  %v16874_v30 = vpop.f32.mrb[113].mxu0 }
 0x652   :  { %6158 = vrot.lane.b32.xlu1 %v5838_v21, %s11128_s29 }
 0x654   :  { %v16877_v34 = vpop.f32.mrb[114].mxu0  ;;  %v5945_v60 = vpop.f32.mrb[108].mxu1 }
 0x655   :  { %v5947_v5 = vpop.f32.mrb[109].mxu1  ;;  %6093 = vrot.lane.b32.xlu0 %v16567_v27, %s11128_s29  ;;  %v16881_v3 = vpop.f32.mrb[115].mxu0 }
 0x656   :  { %6095 = vrot.lane.b32.xlu1 %v16580_v4, %s11128_s29 }
 0x659   :  { %6154 = vrot.lane.b32.xlu0 %v5927_v29, %s11128_s29  ;;  %v6250_v29 = vld [vmem:[%s18093_s3 + $0x78] sm:$0xff] }
 0x65a   :  { %6156 = vrot.lane.b32.xlu1 %v5929_v6, %s11128_s29  ;;  %v10247_v15 = vpack.c.bf16 %v6250_v29, %v6246_v1  ;;  %v6261_v1 = vld [vmem:[%s18093_s3 + $0xd0] sm:$0xff] }
 0x65b   :  { %v6265_v29 = vld [vmem:[%s18093_s3 + $0xf0] sm:$0xff] }
 0x65d   :  { %6091 = vrot.lane.b32.xlu0 %v16578_v0, %s11128_s29 }
 0x65e   :  { %6152 = vrot.lane.b32.xlu1 %v16840_v44, %s11128_s29 }
 0x661   :  { %6105 = vrot.lane.b32.xlu0 %v16644_v26, %s11128_s29 }
 0x662   :  { %6107 = vrot.lane.b32.xlu1 %v16657_v41, %s11128_s29 }
 0x665   :  { %6166 = vrot.lane.b32.xlu0 %v5939_v46, %s11128_s29 }
 0x666   :  { %6168 = vrot.lane.b32.xlu1 %v5941_v39, %s11128_s29  ;;  %v6254_v39 = vld [vmem:[%s18093_s3 + $0x98] sm:$0xff] }
 0x669   :  { %6103 = vrot.lane.b32.xlu0 %v16655_v18, %s11128_s29 }
 0x66a   :  { %6164 = vrot.lane.b32.xlu1 %v16874_v30, %s11128_s29 }
 0x66d   :  { %6111 = vrot.lane.b32.xlu0 %v16676_v25, %s11128_s29  ;;  %v6078_v25 = vld [vmem:[%s18094_s6] sm:$0x3] }
 0x66e   :  { %6113 = vrot.lane.b32.xlu1 %v16689_v49, %s11128_s29  ;;  %v16918_v63 = vrot.slane %v6078_v25, %v18956_v40  ;;  %v16925_v55 = vrot.slane %v6078_v25, %v18957_v35  ;;  %v10203_v25 = vpack.c.bf16 %v6256_v62, %v6252_v22  ;;  %v6273_v62 = vld [vmem:[%s18093_s3 + $0x130] sm:$0xff] }
 0x671   :  { %6172 = vrot.lane.b32.xlu0 %v5945_v60, %s11128_s29  ;;  %v6258_v60 = vld [vmem:[%s18093_s3 + $0xb8] sm:$0xff] }
 0x672   :  { %6174 = vrot.lane.b32.xlu1 %v5947_v5, %s11128_s29 }
 0x675   :  { %6109 = vrot.lane.b32.xlu0 %v16687_v57, %s11128_s29 }
 0x676   :  { %6170 = vrot.lane.b32.xlu1 %v16881_v3, %s11128_s29 }
 0x67e   :  { %v6100_v27 = vpop.permute.xlu0 %6099 }
 0x67f   :  { %v6102_v4 = vpop.permute.xlu1 %6101 }
 0x680   :  { %v6119_v26 = vsel %vm6115_vm6, %v6100_v27, %v6102_v4 }
 0x681   :  { %v6135_v52 = vmax.f32 %v16621_v58, %v6119_v26  ;;  %v10201_v26 = vpack.c.bf16 %v6247_v48, %v6243_v12 }
 0x6bf   :  { %v6161_v41 = vpop.permute.xlu0 %6160 }
 0x6c0   :  { %v6163_v49 = vpop.permute.xlu1 %6162 }
 0x6c1   :  { %v6179_v20 = vsel %vm6115_vm6, %v6161_v41, %v6163_v49  ;;  %v6251_v49 = vld [vmem:[%s18093_s3 + $0x80] sm:$0xff] }
 0x6c2   :  { %v6195_v11 = vmax.f32 %v5838_v21, %v6179_v20  ;;  %v6249_v21 = vld [vmem:[%s18093_s3 + $0x70] sm:$0xff]  ;;  %v6255_v20 = vld [vmem:[%s18093_s3 + $0xa0] sm:$0xff] }
 0x6c3   :  { %v6098_v54 = vpop.permute.xlu0 %6097  ;;  %v10205_v36 = vpack.c.bf16 %v6255_v20, %v6251_v49 }
 0x6c4   :  { %v6203_v24 = vmax.f32 %v6135_v52, %v6195_v11  ;;  %v6118_v7 = vsel %vm6115_vm6, %v6098_v54, %v6100_v27  ;;  %v6159_v16 = vpop.permute.xlu1 %6158  ;;  %v10251_v11 = vpack.c.bf16 %v6258_v60, %v6254_v39  ;;  %v6253_v54 = vld [vmem:[%s18093_s3 + $0x90] sm:$0xff]  ;;  %v6280_v39 = vld [vmem:[%s18093_s3 + $0x168] sm:$0xff] }
 0x6c5   :  { %v6134_v9 = vmax.f32 %v16609_v8, %v6118_v7  ;;  %v6178_v38 = vsel %vm6115_vm6, %v6159_v16, %v6161_v41  ;;  %v6260_v7 = vld [vmem:[%s18093_s3 + $0xc8] sm:$0xff] }
 0x6c6   :  { %v6222_v10 = vadd.f32 %v16918_v63, %v6203_v24  ;;  %v6194_v58 = vmax.f32 %v16860_v33, %v6178_v38  ;;  %v6245_v33 = vld [vmem:[%s18093_s3 + $0x50] sm:$0xff]  ;;  %v6264_v38 = vld [vmem:[%s18093_s3 + $0xe8] sm:$0xff] }
 0x6c7   :  { %v6094_v59 = vpop.permute.xlu0 %6093  ;;  %v10249_v41 = vpack.c.bf16 %v6249_v21, %v6245_v33  ;;  %v6257_v24 = vld [vmem:[%s18093_s3 + $0xb0] sm:$0xff]  ;;  %v10257_v33 = vpack.c.bf16 %v6265_v29, %v6261_v1  ;;  %v6296_v1 = vld [vmem:[%s18093_s3 + $0x1e8] sm:$0xff]  ;;  %v6294_v29 = vld [vmem:[%s18093_s3 + $0x1d8] sm:$0xff] }
 0x6c8   :  { %v6230_v8 = vmax.f32 %v6222_v10, 0.0  ;;  %v6202_v28 = vmax.f32 %v6134_v9, %v6194_v58  ;;  %v6096_v61 = vpop.permute.xlu1 %6095  ;;  %v6262_v10 = vld [vmem:[%s18093_s3 + $0xd8] sm:$0xff] }
 0x6c9   :  { %v6117_v50 = vsel %vm6115_vm6, %v6094_v59, %v6096_v61  ;;  %v6266_v58 = vld [vmem:[%s18093_s3 + $0xf8] sm:$0xff]  ;;  %v6263_v61 = vld [vmem:[%s18093_s3 + $0xe0] sm:$0xff] }
 0x6ca   :  { %v6221_v6 = vadd.f32 %v16925_v55, %v6202_v28  ;;  %8553 = vmatprep.mubr.msk.f32.mxu0 %vm6436_vm7, %v6230_v8  ;;  %8554 = vmatprep.mubr.msk.f32.mxu1 %vm6436_vm7, %v6230_v8  ;;  %v6133_v5 = vmax.f32 %v16578_v0, %v6117_v50  ;;  %v10253_v8 = vpack.c.bf16 %v6257_v24, %v6253_v54  ;;  %v6259_v28 = vld [vmem:[%s18093_s3 + $0xc0] sm:$0xff]  ;;  %v6272_v50 = vld [vmem:[%s18093_s3 + $0x128] sm:$0xff]  ;;  %v6277_v54 = vld [vmem:[%s18093_s3 + $0x150] sm:$0xff] }
 0x6cb   :  { %v6155_v45 = vpop.permute.xlu0 %6154  ;;  %v10255_v23 = vpack.c.bf16 %v6266_v58, %v6262_v10  ;;  %v10209_v48 = vpack.c.bf16 %v6263_v61, %v6259_v28  ;;  %v6281_v24 = vld [vmem:[%s18093_s3 + $0x170] sm:$0xff]  ;;  %v6286_v10 = vld [vmem:[%s18093_s3 + $0x198] sm:$0xff] }
 0x6cc   :  { %v6229_v43 = vmax.f32 %v6221_v6, 0.0  ;;  %v6157_v31 = vpop.permute.xlu1 %6156  ;;  %v6268_v6 = vld [vmem:[%s18093_s3 + $0x108] sm:$0xff]  ;;  %v6290_v58 = vld [vmem:[%s18093_s3 + $0x1b8] sm:$0xff] }
 0x6cd   :  { %v6177_v46 = vsel %vm6115_vm6, %v6155_v45, %v6157_v31  ;;  %v6271_v31 = vld [vmem:[%s18093_s3 + $0x120] sm:$0xff]  ;;  %v10211_v21 = vpack.c.bf16 %v6272_v50, %v6268_v6  ;;  %v6298_v6 = vld [vmem:[%s18093_s3 + $0x1f8] sm:$0xff] }
 0x6ce   :  { %v6193_v27 = vmax.f32 %v16840_v44, %v6177_v46  ;;  %6505 = vmatmul.mubr.f32.vlgmr.msra.gmra.mrb[150].mxu0 %v6229_v43  ;;  %6576 = vmatmul.mubr.f32.vlgmr.msra.gmra.mrb[144].mxu1 %v6229_v43  ;;  %v6267_v43 = vld [vmem:[%s18093_s3 + $0x100] sm:$0xff]  ;;  %v6276_v46 = vld [vmem:[%s18093_s3 + $0x148] sm:$0xff] }
 0x6cf   :  { %10198 = vmatpush1.bf16.msra.mxu0 %v10197_v56  ;;  %10246 = vmatpush1.bf16.msra.mxu1 %v10245_v53  ;;  %v6092_v4 = vpop.permute.xlu0 %6091  ;;  %v6274_v56 = vld [vmem:[%s18093_s3 + $0x138] sm:$0xff]  ;;  %v10215_v20 = vpack.c.bf16 %v6280_v39, %v6276_v46 }
 0x6d0   :  { %v6201_v52 = vmax.f32 %v6133_v5, %v6193_v27  ;;  %v6116_v0 = vsel %vm6115_vm6, %v6092_v4, %v6094_v59  ;;  %v6153_v44 = vpop.permute.xlu1 %6152  ;;  %10200 = vmatprep.subr.bf16.mxu0 %v10199_v51  ;;  %10248 = vmatprep.subr.bf16.mxu1 %v10247_v15  ;;  %v6269_v51 = vld [vmem:[%s18093_s3 + $0x110] sm:$0xff]  ;;  %v6278_v5 = vld [vmem:[%s18093_s3 + $0x158] sm:$0xff] }
 0x6d1   :  { %v6132_v16 = vmax.f32 %v16565_v19, %v6116_v0  ;;  %v6176_v9 = vsel %vm6115_vm6, %v6153_v44, %v6155_v45  ;;  %v6270_v45 = vld [vmem:[%s18093_s3 + $0x118] sm:$0xff]  ;;  %v10261_v49 = vpack.c.bf16 %v6273_v62, %v6269_v51  ;;  %v6279_v0 = vld [vmem:[%s18093_s3 + $0x160] sm:$0xff]  ;;  %v6304_v62 = vld [vmem:[%s18093_s3 + $0x228] sm:$0xff] }
 0x6d2   :  { %v6220_v59 = vadd.f32 %v16918_v63, %v6201_v52  ;;  %v6192_v17 = vmax.f32 %v16838_v2, %v6176_v9  ;;  %v10207_v2 = vpack.c.bf16 %v6264_v38, %v6260_v7  ;;  %v10259_v22 = vpack.c.bf16 %v6274_v56, %v6270_v45  ;;  %v6282_v27 = vld [vmem:[%s18093_s3 + $0x178] sm:$0xff]  ;;  %v6275_v52 = vld [vmem:[%s18093_s3 + $0x140] sm:$0xff]  ;;  %v6284_v7 = vld [vmem:[%s18093_s3 + $0x188] sm:$0xff] }
 0x6d3   :  { %10202 = vmatpush1.bf16.msra.mxu0 %v10201_v26  ;;  %10250 = vmatpush1.bf16.msra.mxu1 %v10249_v41  ;;  %v6106_v19 = vpop.permute.xlu0 %6105  ;;  %v6288_v38 = vld [vmem:[%s18093_s3 + $0x1a8] sm:$0xff]  ;;  %v6302_v39 = vld [vmem:[%s18093_s3 + $0x218] sm:$0xff] }
 0x6d4   :  { %v6228_v47 = vmax.f32 %v6220_v59, 0.0  ;;  %v17018_v42 = vmax.f32 %v6132_v16, %v6192_v17  ;;  %v6108_v14 = vpop.permute.xlu1 %6107  ;;  %10204 = vmatprep.subr.bf16.mxu0 %v10203_v25  ;;  %10252 = vmatprep.subr.bf16.mxu1 %v10251_v11  ;;  %v10213_v25 = vpack.c.bf16 %v6271_v31, %v6267_v43  ;;  %v6293_v43 = vld [vmem:[%s18093_s3 + $0x1d0] sm:$0xff] }
 0x6d5   :  { %v6121_v53 = vsel %vm6115_vm6, %v6106_v19, %v6108_v14  ;;  %v10267_v14 = vpack.c.bf16 %v6290_v58, %v6286_v10 }
 0x6d6   :  { %8555 = vmatprep.mubr.msk.f32.mxu0 %vm6436_vm7, %v6228_v47  ;;  %8556 = vmatprep.mubr.msk.f32.mxu1 %vm6436_vm7, %v6228_v47  ;;  %v6137_v4 = vmax.f32 %v16655_v18, %v6121_v53  ;;  %v10219_v47 = vpack.c.bf16 %v6288_v38, %v6284_v7  ;;  %v6312_v7 = vld [vmem:[%s18093_s3 + $0x268] sm:$0xff] }
 0x6d7   :  { %10206 = vmatpush1.bf16.msra.mxu0 %v10205_v36  ;;  %10254 = vmatpush1.bf16.msra.mxu1 %v10253_v8  ;;  %v6167_v12 = vpop.permute.xlu0 %6166  ;;  %v6283_v36 = vld [vmem:[%s18093_s3 + $0x180] sm:$0xff] }
 0x6d8   :  { %v6169_v15 = vpop.permute.xlu1 %6168  ;;  %10208 = vmatprep.subr.bf16.mxu0 %v10207_v2  ;;  %10256 = vmatprep.subr.bf16.mxu1 %v10255_v23  ;;  %v6287_v8 = vld [vmem:[%s18093_s3 + $0x1a0] sm:$0xff]  ;;  %v6289_v2 = vld [vmem:[%s18093_s3 + $0x1b0] sm:$0xff]  ;;  %v6292_v23 = vld [vmem:[%s18093_s3 + $0x1c8] sm:$0xff] }
 0x6d9   :  { %v6181_v60 = vsel %vm6115_vm6, %v6167_v12, %v6169_v15  ;;  %v10221_v53 = vpack.c.bf16 %v6287_v8, %v6283_v36  ;;  %v10223_v51 = vpack.c.bf16 %v6296_v1, %v6292_v23  ;;  %v10271_v15 = vpack.c.bf16 %v6298_v6, %v6294_v29  ;;  %v6313_v8 = vld [vmem:[%s18093_s3 + $0x270] sm:$0xff]  ;;  %v6315_v1 = vld [vmem:[%s18093_s3 + $0x280] sm:$0xff] }
 0x6da   :  { %v6197_v26 = vmax.f32 %v16874_v30, %v6181_v60  ;;  %v10263_v30 = vpack.c.bf16 %v6282_v27, %v6278_v5  ;;  %v6306_v60 = vld [vmem:[%s18093_s3 + $0x238] sm:$0xff]  ;;  %v6319_v29 = vld [vmem:[%s18093_s3 + $0x2a0] sm:$0xff] }
 0x6db   :  { %10210 = vmatpush1.bf16.msra.mxu0 %v10209_v48  ;;  %10258 = vmatpush1.bf16.msra.mxu1 %v10257_v33  ;;  %v6104_v41 = vpop.permute.xlu0 %6103  ;;  %v6291_v48 = vld [vmem:[%s18093_s3 + $0x1c0] sm:$0xff] }
 0x6dc   :  { %v17074_v44 = vmax.f32 %v6137_v4, %v6197_v26  ;;  %v6120_v18 = vsel %vm6115_vm6, %v6104_v41, %v6106_v19  ;;  %v6165_v11 = vpop.permute.xlu1 %6164  ;;  %10212 = vmatprep.subr.bf16.mxu0 %v10211_v21  ;;  %10260 = vmatprep.subr.bf16.mxu1 %v10259_v22  ;;  %v10265_v19 = vpack.c.bf16 %v6281_v24, %v6277_v54  ;;  %v6295_v33 = vld [vmem:[%s18093_s3 + $0x1e0] sm:$0xff]  ;;  %v6297_v21 = vld [vmem:[%s18093_s3 + $0x1f0] sm:$0xff]  ;;  %v6300_v22 = vld [vmem:[%s18093_s3 + $0x208] sm:$0xff] }
 0x6dd   :  { %v6136_v16 = vmax.f32 %v16642_v37, %v6120_v18  ;;  %v6180_v9 = vsel %vm6115_vm6, %v6165_v11, %v6167_v12  ;;  %v10217_v37 = vpack.c.bf16 %v6279_v0, %v6275_v52  ;;  %v10225_v26 = vpack.c.bf16 %v6295_v33, %v6291_v48  ;;  %v6301_v18 = vld [vmem:[%s18093_s3 + $0x210] sm:$0xff]  ;;  %v6328_v48 = vld [vmem:[%s18093_s3 + $0x2e8] sm:$0xff]  ;;  %v6326_v33 = vld [vmem:[%s18093_s3 + $0x2d8] sm:$0xff] }
 0x6de   :  { %v6196_v59 = vmax.f32 %v16870_v13, %v6180_v9  ;;  %v6285_v13 = vld [vmem:[%s18093_s3 + $0x190] sm:$0xff]  ;;  %v10273_v41 = vpack.c.bf16 %v6297_v21, %v6293_v43  ;;  %v6314_v9 = vld [vmem:[%s18093_s3 + $0x278] sm:$0xff] }
 0x6df   :  { %10214 = vmatpush1.bf16.msra.mxu0 %v10213_v25  ;;  %10262 = vmatpush1.bf16.msra.mxu1 %v10261_v49  ;;  %v6112_v17 = vpop.permute.xlu0 %6111  ;;  %v10269_v12 = vpack.c.bf16 %v6289_v2, %v6285_v13  ;;  %v10227_v25 = vpack.c.bf16 %v6304_v62, %v6300_v22  ;;  %v6299_v49 = vld [vmem:[%s18093_s3 + $0x200] sm:$0xff]  ;;  %v6305_v11 = vld [vmem:[%s18093_s3 + $0x230] sm:$0xff]  ;;  %v6330_v43 = vld [vmem:[%s18093_s3 + $0x2f8] sm:$0xff] }
 0x6e0   :  { %v6204_v28 = vmax.f32 %v6136_v16, %v6196_v59  ;;  %v6114_v61 = vpop.permute.xlu1 %6113  ;;  %10216 = vmatprep.subr.bf16.mxu0 %v10215_v20  ;;  %10264 = vmatprep.subr.bf16.mxu1 %v10263_v30  ;;  %v6303_v20 = vld [vmem:[%s18093_s3 + $0x220] sm:$0xff]  ;;  %v6308_v30 = vld [vmem:[%s18093_s3 + $0x248] sm:$0xff]  ;;  %v6310_v16 = vld [vmem:[%s18093_s3 + $0x258] sm:$0xff]  ;;  %v10277_v58 = vpack.c.bf16 %v6305_v11, %v6301_v18  ;;  %v10287_v22 = vpack.c.bf16 %v6330_v43, %v6326_v33 }
 0x6e1   :  { %v6123_v45 = vsel %vm6115_vm6, %v6112_v17, %v6114_v61  ;;  %v6307_v59 = vld [vmem:[%s18093_s3 + $0x240] sm:$0xff]  ;;  %v10279_v36 = vpack.c.bf16 %v6314_v9, %v6310_v16  ;;  %v6320_v61 = vld [vmem:[%s18093_s3 + $0x2a8] sm:$0xff]  ;;  %v8563_v18 = vld [vmem:[%s18093_s3 + $0x670] sm:$0xff] }
 0x6e2   :  { %v17123_v50 = vadd.f32 %v16925_v55, %v6204_v28  ;;  %v6139_v5 = vmax.f32 %v16687_v57, %v6123_v45  ;;  %v6316_v28 = vld [vmem:[%s18093_s3 + $0x288] sm:$0xff]  ;;  %v6327_v62 = vld [vmem:[%s18093_s3 + $0x2e0] sm:$0xff] }
 0x6e3   :  { %10218 = vmatpush1.bf16.msra.mxu0 %v10217_v37  ;;  %10266 = vmatpush1.bf16.msra.mxu1 %v10265_v19  ;;  %v6173_v56 = vpop.permute.xlu0 %6172  ;;  %v10231_v19 = vpack.c.bf16 %v6312_v7, %v6308_v30  ;;  %v10235_v6 = vpack.c.bf16 %v6320_v61, %v6316_v28  ;;  %v8566_v11 = vld [vmem:[%s18093_s3 + $0x688] sm:$0xff]  ;;  %v8580_v28 = vld [vmem:[%s18093_s3 + $0x6f8] sm:$0xff] }
 0x6e4   :  { %v6175_v31 = vpop.permute.xlu1 %6174  ;;  %10220 = vmatprep.subr.bf16.mxu0 %v10219_v47  ;;  %10268 = vmatprep.subr.bf16.mxu1 %v10267_v14  ;;  %v6318_v47 = vld [vmem:[%s18093_s3 + $0x298] sm:$0xff] }
 0x6e5   :  { %v6183_v46 = vsel %vm6115_vm6, %v6173_v56, %v6175_v31  ;;  %v6322_v14 = vld [vmem:[%s18093_s3 + $0x2b8] sm:$0xff]  ;;  %v10237_v31 = vpack.c.bf16 %v6319_v29, %v6315_v1  ;;  %v8575_v1 = vld [vmem:[%s18093_s3 + $0x6d0] sm:$0xff] }
 0x6e6   :  { %v6199_v27 = vmax.f32 %v16881_v3, %v6183_v46  ;;  %v10275_v3 = vpack.c.bf16 %v6306_v60, %v6302_v39  ;;  %v10283_v45 = vpack.c.bf16 %v6322_v14, %v6318_v47  ;;  %v6325_v46 = vld [vmem:[%s18093_s3 + $0x2d0] sm:$0xff] }
 0x6e7   :  { %10222 = vmatpush1.bf16.msra.mxu0 %v10221_v53  ;;  %10270 = vmatpush1.bf16.msra.mxu1 %v10269_v12  ;;  %v6110_v4 = vpop.permute.xlu0 %6109  ;;  %v6321_v53 = vld [vmem:[%s18093_s3 + $0x2b0] sm:$0xff]  ;;  %v6324_v12 = vld [vmem:[%s18093_s3 + $0x2c8] sm:$0xff] }
 0x6e8   :  { %v6207_v52 = vmax.f32 %v6139_v5, %v6199_v27  ;;  %v6122_v0 = vsel %vm6115_vm6, %v6110_v4, %v6112_v17  ;;  %v6171_v57 = vpop.permute.xlu1 %6170  ;;  %10224 = vmatprep.subr.bf16.mxu0 %v10223_v51  ;;  %10272 = vmatprep.subr.bf16.mxu1 %v10271_v15  ;;  %v6311_v17 = vld [vmem:[%s18093_s3 + $0x260] sm:$0xff]  ;;  %v10239_v21 = vpack.c.bf16 %v6328_v48, %v6324_v12  ;;  %v6329_v39 = vld [vmem:[%s18093_s3 + $0x2f0] sm:$0xff]  ;;  %v6332_v27 = vld [vmem:[%s18093_s3 + $0x308] sm:$0xff] }
 0x6e9   :  { %v6138_v54 = vmax.f32 %v16674_v32, %v6122_v0  ;;  %v6182_v24 = vsel %vm6115_vm6, %v6171_v57, %v6173_v56  ;;  %v10229_v32 = vpack.c.bf16 %v6303_v20, %v6299_v49  ;;  %v10233_v2 = vpack.c.bf16 %v6311_v17, %v6307_v59  ;;  %v6317_v56 = vld [vmem:[%s18093_s3 + $0x290] sm:$0xff]  ;;  %v6323_v15 = vld [vmem:[%s18093_s3 + $0x2c0] sm:$0xff]  ;;  %v6334_v4 = vld [vmem:[%s18093_s3 + $0x318] sm:$0xff] }
 0x6ea   :  { %v17181_v38 = vadd.f32 %v16918_v63, %v6207_v52  ;;  %v6198_v10 = vmax.f32 %v16877_v34, %v6182_v24  ;;  %v6309_v34 = vld [vmem:[%s18093_s3 + $0x250] sm:$0xff]  ;;  %v10285_v51 = vpack.c.bf16 %v6321_v53, %v6317_v56  ;;  %v10241_v60 = vpack.c.bf16 %v6327_v62, %v6323_v15  ;;  %v8562_v49 = vld [vmem:[%s18093_s3 + $0x668] sm:$0xff]  ;;  %v8560_v20 = vld [vmem:[%s18093_s3 + $0x658] sm:$0xff] }
 0x6eb   :  { %10226 = vmatpush1.bf16.msra.mxu0 %v10225_v26  ;;  %10274 = vmatpush1.bf16.msra.mxu1 %v10273_v41  ;;  %v10281_v23 = vpack.c.bf16 %v6313_v8, %v6309_v34  ;;  %v10289_v5 = vpack.c.bf16 %v6329_v39, %v6325_v46  ;;  %v8558_v26 = vld [vmem:[%s18093_s3 + $0x648] sm:$0xff]  ;;  %v6219_v41 = vadd.f32 %v16925_v55, %v17018_v42  ;;  %v8564_v52 = vld [vmem:[%s18093_s3 + $0x678] sm:$0xff]  ;;  %v8557_v42 = vld [vmem:[%s18093_s3 + $0x640] sm:$0xff] }
 0x6ec   :  { %v6206_v37 = vmax.f32 %v6138_v54, %v6198_v10  ;;  %10228 = vmatprep.subr.bf16.mxu0 %v10227_v25  ;;  %10276 = vmatprep.subr.bf16.mxu1 %v10275_v3  ;;  %v6331_v25 = vld [vmem:[%s18093_s3 + $0x300] sm:$0xff]  ;;  %v6224_v57 = vadd.f32 %v16918_v63, %v17074_v44  ;;  %v8559_v3 = vld [vmem:[%s18093_s3 + $0x650] sm:$0xff]  ;;  %v10291_v30 = vpack.c.bf16 %v8562_v49, %v8558_v26  ;;  %v8570_v63 = vld [vmem:[%s18093_s3 + $0x6a8] sm:$0xff] }
 0x6ed   :  { %v8561_v0 = vld [vmem:[%s18093_s3 + $0x660] sm:$0xff]  ;;  %v10339_v54 = vpack.c.bf16 %v8564_v52, %v8560_v20  ;;  %v8568_v44 = vld [vmem:[%s18093_s3 + $0x698] sm:$0xff]  ;;  %v6227_v7 = vmax.f32 %v6219_v41, 0.0  ;;  %v10341_v9 = vpack.c.bf16 %v8563_v18, %v8559_v3  ;;  %v10295_v17 = vpack.c.bf16 %v8570_v63, %v8566_v11  ;;  %v8578_v34 = vld [vmem:[%s18093_s3 + $0x6e8] sm:$0xff] }
 0x6ee   :  { %v17209_v13 = vadd.f32 %v16925_v55, %v6206_v37  ;;  %v6333_v55 = vld [vmem:[%s18093_s3 + $0x310] sm:$0xff]  ;;  %v8572_v24 = vld [vmem:[%s18093_s3 + $0x6b8] sm:$0xff]  ;;  %v10293_v16 = vpack.c.bf16 %v8561_v0, %v8557_v42  ;;  %v8565_v10 = vld [vmem:[%s18093_s3 + $0x680] sm:$0xff]  ;;  %v6232_v59 = vmax.f32 %v6224_v57, 0.0 }
 0x6ef   :  { %10230 = vmatpush1.bf16.msra.mxu0 %v10229_v32  ;;  %10278 = vmatpush1.bf16.msra.mxu1 %v10277_v58  ;;  %v8569_v32 = vld [vmem:[%s18093_s3 + $0x6a0] sm:$0xff]  ;;  %v8567_v58 = vld [vmem:[%s18093_s3 + $0x690] sm:$0xff]  ;;  %v10343_v37 = vpack.c.bf16 %v8572_v24, %v8568_v44  ;;  %v8576_v8 = vld [vmem:[%s18093_s3 + $0x6d8] sm:$0xff] }
 0x6f0   :  { %10232 = vmatprep.subr.bf16.mxu0 %v10231_v19  ;;  %10280 = vmatprep.subr.bf16.mxu1 %v10279_v36  ;;  %v8571_v19 = vld [vmem:[%s18093_s3 + $0x6b0] sm:$0xff]  ;;  %v8574_v36 = vld [vmem:[%s18093_s3 + $0x6c8] sm:$0xff]  ;;  %v10297_v61 = vpack.c.bf16 %v8569_v32, %v8565_v10  ;;  %v10347_v29 = vpack.c.bf16 %v8580_v28, %v8576_v8  ;;  %v8584_v53 = vld [vmem:[%s18093_s3 + $0x718] sm:$0xff] }
 0x6f1   :  { %v10345_v47 = vpack.c.bf16 %v8571_v19, %v8567_v58  ;;  %v10299_v14 = vpack.c.bf16 %v8578_v34, %v8574_v36  ;;  %v8586_v56 = vld [vmem:[%s18093_s3 + $0x728] sm:$0xff]  ;;  %v8588_v12 = vld [vmem:[%s18093_s3 + $0x738] sm:$0xff]  ;;  %v8583_v15 = vld [vmem:[%s18093_s3 + $0x710] sm:$0xff] }
 0x6f2   :  { %v8590_v62 = vld [vmem:[%s18093_s3 + $0x748] sm:$0xff]  ;;  %v8592_v39 = vld [vmem:[%s18093_s3 + $0x758] sm:$0xff]  ;;  %v8589_v26 = vld [vmem:[%s18093_s3 + $0x740] sm:$0xff] }
 0x6f3   :  { %10234 = vmatpush1.bf16.msra.mxu0 %v10233_v2  ;;  %10282 = vmatpush1.bf16.msra.mxu1 %v10281_v23  ;;  %v8573_v2 = vld [vmem:[%s18093_s3 + $0x6c0] sm:$0xff]  ;;  %v8594_v46 = vld [vmem:[%s18093_s3 + $0x768] sm:$0xff]  ;;  %v8595_v20 = vld [vmem:[%s18093_s3 + $0x770] sm:$0xff] }
 0x6f4   :  { %10236 = vmatprep.subr.bf16.mxu0 %v10235_v6  ;;  %10284 = vmatprep.subr.bf16.mxu1 %v10283_v45  ;;  %v8577_v23 = vld [vmem:[%s18093_s3 + $0x6e0] sm:$0xff]  ;;  %v8579_v6 = vld [vmem:[%s18093_s3 + $0x6f0] sm:$0xff]  ;;  %v8582_v45 = vld [vmem:[%s18093_s3 + $0x708] sm:$0xff] }
 0x6f5   :  { %v10301_v48 = vpack.c.bf16 %v8577_v23, %v8573_v2  ;;  %v10349_v33 = vpack.c.bf16 %v8579_v6, %v8575_v1  ;;  %v10303_v43 = vpack.c.bf16 %v8586_v56, %v8582_v45  ;;  %v8593_v41 = vld [vmem:[%s18093_s3 + $0x760] sm:$0xff]  ;;  %v8598_v52 = vld [vmem:[%s18093_s3 + $0x788] sm:$0xff]  ;;  %v8600_v42 = vld [vmem:[%s18093_s3 + $0x798] sm:$0xff] }
 0x6f6   :  { %v8604_v0 = vld [vmem:[%s18093_s3 + $0x7b8] sm:$0xff]  ;;  %v10309_v57 = vpack.c.bf16 %v8593_v41, %v8589_v26  ;;  %v8597_v11 = vld [vmem:[%s18093_s3 + $0x780] sm:$0xff]  ;;  %v8603_v44 = vld [vmem:[%s18093_s3 + $0x7b0] sm:$0xff] }
 0x6f7   :  { %10238 = vmatpush1.bf16.msra.mxu0 %v10237_v31  ;;  %10286 = vmatpush1.bf16.msra.mxu1 %v10285_v51  ;;  %v8581_v31 = vld [vmem:[%s18093_s3 + $0x700] sm:$0xff]  ;;  %v10359_v63 = vpack.c.bf16 %v8604_v0, %v8600_v42  ;;  %v8606_v24 = vld [vmem:[%s18093_s3 + $0x7c8] sm:$0xff]  ;;  %v8611_v36 = vld [vmem:[%s18093_s3 + $0x7f0] sm:$0xff] }
 0x6f8   :  { %10240 = vmatprep.subr.bf16.mxu0 %v10239_v21  ;;  %10288 = vmatprep.subr.bf16.mxu1 %v10287_v22  ;;  %v8585_v51 = vld [vmem:[%s18093_s3 + $0x720] sm:$0xff]  ;;  %v10351_v21 = vpack.c.bf16 %v8588_v12, %v8584_v53  ;;  %v8587_v22 = vld [vmem:[%s18093_s3 + $0x730] sm:$0xff]  ;;  %v8614_v34 = vld [vmem:[%s18093_s3 + $0x808] sm:$0xff] }
 0x6f9   :  { %v8618_v8 = vld [vmem:[%s18093_s3 + $0x828] sm:$0xff]  ;;  %v8616_v28 = vld [vmem:[%s18093_s3 + $0x818] sm:$0xff]  ;;  %v8613_v23 = vld [vmem:[%s18093_s3 + $0x800] sm:$0xff] }
 0x6fa   :  { %v10319_v2 = vpack.c.bf16 %v8618_v8, %v8614_v34  ;;  %v8617_v1 = vld [vmem:[%s18093_s3 + $0x820] sm:$0xff]  ;;  %v8619_v45 = vld [vmem:[%s18093_s3 + $0x830] sm:$0xff]  ;;  %v8622_v56 = vld [vmem:[%s18093_s3 + $0x848] sm:$0xff] }
 0x6fb   :  { %10242 = vmatpush1.bf16.msra.mxu0 %v10241_v60  ;;  %10290 = vmatpush1.bf16.msra.mxu1 %v10289_v5  ;;  %v8596_v60 = vld [vmem:[%s18093_s3 + $0x778] sm:$0xff]  ;;  %v10305_v5 = vpack.c.bf16 %v8585_v51, %v8581_v31  ;;  %v8626_v53 = vld [vmem:[%s18093_s3 + $0x868] sm:$0xff]  ;;  %v8621_v51 = vld [vmem:[%s18093_s3 + $0x840] sm:$0xff] }
 0x6fc   :  { %6633 = vmatprep.subr.mxu0 %v6332_v27  ;;  %6704 = vmatprep.subr.mxu1 %v6334_v4  ;;  %v10353_v27 = vpack.c.bf16 %v8587_v22, %v8583_v15  ;;  %v10307_v4 = vpack.c.bf16 %v8594_v46, %v8590_v62  ;;  %v10355_v49 = vpack.c.bf16 %v8596_v60, %v8592_v39  ;;  %v8624_v12 = vld [vmem:[%s18093_s3 + $0x858] sm:$0xff]  ;;  %v8625_v15 = vld [vmem:[%s18093_s3 + $0x860] sm:$0xff]  ;;  %v8627_v62 = vld [vmem:[%s18093_s3 + $0x870] sm:$0xff] }
 0x6fd   :  { %v10323_v31 = vpack.c.bf16 %v8626_v53, %v8622_v56  ;;  %v8630_v46 = vld [vmem:[%s18093_s3 + $0x888] sm:$0xff]  ;;  %v8632_v60 = vld [vmem:[%s18093_s3 + $0x898] sm:$0xff]  ;;  %v8629_v41 = vld [vmem:[%s18093_s3 + $0x880] sm:$0xff] }
 0x6fe   :  { %v8634_v39 = vld [vmem:[%s18093_s3 + $0x8a8] sm:$0xff]  ;;  %v8640_v0 = vld [vmem:[%s18093_s3 + $0x8d8] sm:$0xff]  ;;  %v8651_v34 = vld [vmem:[%s18093_s3 + $0x930] sm:$0xff] }
 0x6ff   :  { %6634 = vmatpush1.msra.mxu0 %v6331_v25  ;;  %6705 = vmatpush1.msra.mxu1 %v6333_v55  ;;  %v8591_v25 = vld [vmem:[%s18093_s3 + $0x750] sm:$0xff]  ;;  %v8602_v55 = vld [vmem:[%s18093_s3 + $0x7a8] sm:$0xff]  ;;  %v10327_v26 = vpack.c.bf16 %v8634_v39, %v8630_v46  ;;  %v8667_v46 = vld [vmem:[%s18093_s3 + $0x9a0] sm:$0xff] }
 0x700   :  { %6650 = vmatmul.mubr.f32.vlgmr.msra.gmra.mrb[150].mxu0 %v6227_v7  ;;  %6721 = vmatmul.mubr.f32.vlgmr.msra.gmra.mrb[144].mxu1 %v6227_v7  ;;  %v10357_v3 = vpack.c.bf16 %v8595_v20, %v8591_v25  ;;  %v10311_v18 = vpack.c.bf16 %v8602_v55, %v8598_v52  ;;  %v8610_v7 = vld [vmem:[%s18093_s3 + $0x7e8] sm:$0xff]  ;;  %v8633_v25 = vld [vmem:[%s18093_s3 + $0x8a0] sm:$0xff]  ;;  %v8635_v52 = vld [vmem:[%s18093_s3 + $0x8b0] sm:$0xff] }
 0x701   :  { %10292 = vmatprep.subr.bf16.mxu0 %v10291_v30  ;;  %10340 = vmatprep.subr.bf16.mxu1 %v10339_v54  ;;  %v8601_v30 = vld [vmem:[%s18093_s3 + $0x7a0] sm:$0xff]  ;;  %v8599_v54 = vld [vmem:[%s18093_s3 + $0x790] sm:$0xff]  ;;  %v10315_v58 = vpack.c.bf16 %v8610_v7, %v8606_v24  ;;  %v8638_v55 = vld [vmem:[%s18093_s3 + $0x8c8] sm:$0xff] }
 0x702   :  { %10294 = vmatpush1.bf16.msra.mxu0 %v10293_v16  ;;  %8657 = vmatprep.mubr.msk.f32.mxu0 %vm6436_vm7, %v6232_v59  ;;  %v8608_v16 = vld [vmem:[%s18093_s3 + $0x7d8] sm:$0xff]  ;;  %v10313_v10 = vpack.c.bf16 %v8601_v30, %v8597_v11  ;;  %v10361_v32 = vpack.c.bf16 %v8603_v44, %v8599_v54  ;;  %v8642_v42 = vld [vmem:[%s18093_s3 + $0x8e8] sm:$0xff]  ;;  %v8637_v30 = vld [vmem:[%s18093_s3 + $0x8c0] sm:$0xff] }
 0x703   :  { %10342 = vmatpush1.bf16.msra.mxu1 %v10341_v9  ;;  %8658 = vmatprep.mubr.msk.f32.mxu1 %vm6436_vm7, %v6232_v59  ;;  %v8612_v9 = vld [vmem:[%s18093_s3 + $0x7f8] sm:$0xff]  ;;  %v8605_v59 = vld [vmem:[%s18093_s3 + $0x7c0] sm:$0xff]  ;;  %v10331_v11 = vpack.c.bf16 %v8642_v42, %v8638_v55  ;;  %v8643_v24 = vld [vmem:[%s18093_s3 + $0x8f0] sm:$0xff] }
 0x704   :  { %10296 = vmatprep.subr.bf16.mxu0 %v10295_v17  ;;  %10344 = vmatprep.subr.bf16.mxu1 %v10343_v37  ;;  %v8609_v17 = vld [vmem:[%s18093_s3 + $0x7e0] sm:$0xff]  ;;  %v8607_v37 = vld [vmem:[%s18093_s3 + $0x7d0] sm:$0xff]  ;;  %v10363_v19 = vpack.c.bf16 %v8612_v9, %v8608_v16  ;;  %v8646_v7 = vld [vmem:[%s18093_s3 + $0x908] sm:$0xff] }
 0x705   :  { %v8641_v54 = vld [vmem:[%s18093_s3 + $0x8e0] sm:$0xff]  ;;  %v8650_v16 = vld [vmem:[%s18093_s3 + $0x928] sm:$0xff]  ;;  %v8648_v9 = vld [vmem:[%s18093_s3 + $0x918] sm:$0xff] }
 0x706   :  { %10298 = vmatpush1.bf16.msra.mxu0 %v10297_v61  ;;  %v8620_v61 = vld [vmem:[%s18093_s3 + $0x838] sm:$0xff]  ;;  %v8661_v56 = vld [vmem:[%s18093_s3 + $0x970] sm:$0xff]  ;;  %v8679_v42 = vld [vmem:[%s18093_s3 + $0xa00] sm:$0xff] }
 0x707   :  { %10346 = vmatpush1.bf16.msra.mxu1 %v10345_v47  ;;  %10300 = vmatprep.subr.bf16.mxu0 %v10299_v14  ;;  %v10317_v47 = vpack.c.bf16 %v8609_v17, %v8605_v59  ;;  %v10365_v14 = vpack.c.bf16 %v8611_v36, %v8607_v37  ;;  %v10367_v6 = vpack.c.bf16 %v8620_v61, %v8616_v28  ;;  %v8645_v17 = vld [vmem:[%s18093_s3 + $0x900] sm:$0xff]  ;;  %v8647_v36 = vld [vmem:[%s18093_s3 + $0x910] sm:$0xff]  ;;  %v8654_v61 = vld [vmem:[%s18093_s3 + $0x948] sm:$0xff] }
 0x708   :  { %10348 = vmatprep.subr.bf16.mxu1 %v10347_v29  ;;  %v8615_v29 = vld [vmem:[%s18093_s3 + $0x810] sm:$0xff]  ;;  %v10335_v59 = vpack.c.bf16 %v8650_v16, %v8646_v7  ;;  %v8649_v37 = vld [vmem:[%s18093_s3 + $0x920] sm:$0xff]  ;;  %v10385_v28 = vpack.c.bf16 %v8651_v34, %v8647_v36 }
 0x709   :  { %v10337_v8 = vpack.c.bf16 %v8649_v37, %v8645_v17  ;;  %v8665_v53 = vld [vmem:[%s18093_s3 + $0x990] sm:$0xff]  ;;  %v8683_v7 = vld [vmem:[%s18093_s3 + $0xa20] sm:$0xff]  ;;  %v8694_v17 = vld [vmem:[%s18093_s3 + $0xa78] sm:$0xff] }
 0x70a   :  { %10302 = vmatpush1.bf16.msra.mxu0 %v10301_v48  ;;  %v8628_v48 = vld [vmem:[%s18093_s3 + $0x878] sm:$0xff]  ;;  %v8669_v39 = vld [vmem:[%s18093_s3 + $0x9b0] sm:$0xff]  ;;  %v8687_v16 = vld [vmem:[%s18093_s3 + $0xa40] sm:$0xff] }
 0x70b   :  { %10350 = vmatpush1.bf16.msra.mxu1 %v10349_v33  ;;  %10304 = vmatprep.subr.bf16.mxu0 %v10303_v43  ;;  %v10321_v33 = vpack.c.bf16 %v8617_v1, %v8613_v23  ;;  %v10369_v43 = vpack.c.bf16 %v8619_v45, %v8615_v29  ;;  %v10371_v22 = vpack.c.bf16 %v8628_v48, %v8624_v12  ;;  %v8662_v23 = vld [vmem:[%s18093_s3 + $0x978] sm:$0xff]  ;;  %v8659_v29 = vld [vmem:[%s18093_s3 + $0x960] sm:$0xff]  ;;  %v8655_v12 = vld [vmem:[%s18093_s3 + $0x950] sm:$0xff] }
 0x70c   :  { %10352 = vmatprep.subr.bf16.mxu1 %v10351_v21  ;;  %v8623_v21 = vld [vmem:[%s18093_s3 + $0x850] sm:$0xff]  ;;  %v8666_v1 = vld [vmem:[%s18093_s3 + $0x998] sm:$0xff]  ;;  %v8653_v45 = vld [vmem:[%s18093_s3 + $0x940] sm:$0xff] }
 0x70d   :  { %v8698_v37 = vld [vmem:[%s18093_s3 + $0xa98] sm:$0xff] }
 0x70e   :  { %10306 = vmatpush1.bf16.msra.mxu0 %v10305_v5  ;;  %v8636_v5 = vld [vmem:[%s18093_s3 + $0x8b8] sm:$0xff] }
 0x70f   :  { %10354 = vmatpush1.bf16.msra.mxu1 %v10353_v27  ;;  %10308 = vmatprep.subr.bf16.mxu0 %v10307_v4  ;;  %v10325_v27 = vpack.c.bf16 %v8625_v15, %v8621_v51  ;;  %v10373_v4 = vpack.c.bf16 %v8627_v62, %v8623_v21  ;;  %v10375_v20 = vpack.c.bf16 %v8636_v5, %v8632_v60  ;;  %v8670_v21 = vld [vmem:[%s18093_s3 + $0x9b8] sm:$0xff]  ;;  %v8673_v5 = vld [vmem:[%s18093_s3 + $0x9d0] sm:$0xff] }
 0x710   :  { %10356 = vmatprep.subr.bf16.mxu1 %v10355_v49  ;;  %v8631_v49 = vld [vmem:[%s18093_s3 + $0x890] sm:$0xff]  ;;  %v10435_v51 = vpack.c.bf16 %v8666_v1, %v8662_v23  ;;  %v10437_v62 = vpack.c.bf16 %v8665_v53, %v8661_v56  ;;  %v8704_v23 = vld [vmem:[%s18093_s3 + $0xac8] sm:$0xff]  ;;  %v8702_v1 = vld [vmem:[%s18093_s3 + $0xab8] sm:$0xff] }
 0x711   :  { %v8699_v53 = vld [vmem:[%s18093_s3 + $0xaa0] sm:$0xff] }
 0x712   :  { %10310 = vmatpush1.bf16.msra.mxu0 %v10309_v57  ;;  %v8644_v57 = vld [vmem:[%s18093_s3 + $0x8f8] sm:$0xff] }
 0x713   :  { %10358 = vmatpush1.bf16.msra.mxu1 %v10357_v3  ;;  %10312 = vmatprep.subr.bf16.mxu0 %v10311_v18  ;;  %v10329_v3 = vpack.c.bf16 %v8633_v25, %v8629_v41  ;;  %v10377_v18 = vpack.c.bf16 %v8635_v52, %v8631_v49  ;;  %v10379_v44 = vpack.c.bf16 %v8644_v57, %v8640_v0  ;;  %v8678_v25 = vld [vmem:[%s18093_s3 + $0x9f8] sm:$0xff]  ;;  %v8677_v0 = vld [vmem:[%s18093_s3 + $0x9f0] sm:$0xff] }
 0x714   :  { %10360 = vmatprep.subr.bf16.mxu1 %v10359_v63  ;;  %v8639_v63 = vld [vmem:[%s18093_s3 + $0x8d0] sm:$0xff]  ;;  %v8682_v49 = vld [vmem:[%s18093_s3 + $0xa18] sm:$0xff]  ;;  %v10441_v52 = vpack.c.bf16 %v8673_v5, %v8669_v39  ;;  %v8711_v39 = vld [vmem:[%s18093_s3 + $0xb00] sm:$0xff] }
 0x715   :  { %v10443_v57 = vpack.c.bf16 %v8682_v49, %v8678_v25  ;;  %v8722_v25 = vld [vmem:[%s18093_s3 + $0xb58] sm:$0xff] }
 0x716   :  { %10314 = vmatpush1.bf16.msra.mxu0 %v10313_v10  ;;  %v8652_v10 = vld [vmem:[%s18093_s3 + $0x938] sm:$0xff] }
 0x717   :  { %10362 = vmatpush1.bf16.msra.mxu1 %v10361_v32  ;;  %10316 = vmatprep.subr.bf16.mxu0 %v10315_v58  ;;  %v10333_v32 = vpack.c.bf16 %v8641_v54, %v8637_v30  ;;  %v10381_v58 = vpack.c.bf16 %v8643_v24, %v8639_v63  ;;  %v8686_v30 = vld [vmem:[%s18093_s3 + $0xa38] sm:$0xff] }
 0x718   :  { %10364 = vmatprep.subr.bf16.mxu1 %v10363_v19  ;;  %v10383_v19 = vpack.c.bf16 %v8652_v10, %v8648_v9  ;;  %v8690_v54 = vld [vmem:[%s18093_s3 + $0xa58] sm:$0xff]  ;;  %v8685_v9 = vld [vmem:[%s18093_s3 + $0xa30] sm:$0xff] }
 0x719   :  { %v10447_v10 = vpack.c.bf16 %v8690_v54, %v8686_v30  ;;  %v8730_v30 = vld [vmem:[%s18093_s3 + $0xb98] sm:$0xff] }
 0x71a   :  { %10318 = vmatpush1.bf16.msra.mxu0 %v10317_v47  ;;  %v8656_v47 = vld [vmem:[%s18093_s3 + $0x958] sm:$0xff] }
 0x71b   :  { %10366 = vmatpush1.bf16.msra.mxu1 %v10365_v14  ;;  %10320 = vmatprep.subr.bf16.mxu0 %v10319_v2  ;;  %v8660_v14 = vld [vmem:[%s18093_s3 + $0x968] sm:$0xff] }
 0x71c   :  { %10368 = vmatprep.subr.bf16.mxu1 %v10367_v6  ;;  %v8664_v2 = vld [vmem:[%s18093_s3 + $0x988] sm:$0xff]  ;;  %v8663_v6 = vld [vmem:[%s18093_s3 + $0x980] sm:$0xff] }
 0x71d   :  { %v10387_v48 = vpack.c.bf16 %v8664_v2, %v8660_v14  ;;  %v10389_v15 = vpack.c.bf16 %v8663_v6, %v8659_v29  ;;  %v8697_v14 = vld [vmem:[%s18093_s3 + $0xa90] sm:$0xff]  ;;  %v8700_v2 = vld [vmem:[%s18093_s3 + $0xaa8] sm:$0xff]  ;;  %v8706_v29 = vld [vmem:[%s18093_s3 + $0xad8] sm:$0xff] }
 0x71e   :  { %10322 = vmatpush1.bf16.msra.mxu0 %v10321_v33  ;;  %v8668_v33 = vld [vmem:[%s18093_s3 + $0x9a8] sm:$0xff]  ;;  %v10407_v56 = vpack.c.bf16 %v8704_v23, %v8700_v2  ;;  %v8742_v23 = vld [vmem:[%s18093_s3 + $0xbf8] sm:$0xff] }
 0x71f   :  { %10370 = vmatpush1.bf16.msra.mxu1 %v10369_v43  ;;  %10324 = vmatprep.subr.bf16.mxu0 %v10323_v31  ;;  %v8672_v43 = vld [vmem:[%s18093_s3 + $0x9c8] sm:$0xff]  ;;  %v6231_v31 = vmax.f32 %v17123_v50, 0.0  ;;  %v8671_v50 = vld [vmem:[%s18093_s3 + $0x9c0] sm:$0xff] }
 0x720   :  { %10372 = vmatprep.subr.bf16.mxu1 %v10371_v22  ;;  %v8674_v22 = vld [vmem:[%s18093_s3 + $0x9d8] sm:$0xff]  ;;  %v10391_v60 = vpack.c.bf16 %v8672_v43, %v8668_v33  ;;  %v10455_v33 = vpack.c.bf16 %v8706_v29, %v8702_v1  ;;  %v8705_v43 = vld [vmem:[%s18093_s3 + $0xad0] sm:$0xff]  ;;  %v8744_v2 = vld [vmem:[%s18093_s3 + $0xc08] sm:$0xff] }
 0x721   :  { %v10439_v41 = vpack.c.bf16 %v8674_v22, %v8670_v21  ;;  %v8714_v21 = vld [vmem:[%s18093_s3 + $0xb18] sm:$0xff] }
 0x722   :  { %10326 = vmatpush1.bf16.msra.mxu0 %v10325_v27  ;;  %v8676_v27 = vld [vmem:[%s18093_s3 + $0x9e8] sm:$0xff]  ;;  %v8746_v1 = vld [vmem:[%s18093_s3 + $0xc18] sm:$0xff] }
 0x723   :  { %10374 = vmatpush1.bf16.msra.mxu1 %v10373_v4  ;;  %10328 = vmatprep.subr.bf16.mxu0 %v10327_v26  ;;  %v8680_v4 = vld [vmem:[%s18093_s3 + $0xa08] sm:$0xff]  ;;  %v6234_v26 = vmax.f32 %v17181_v38, 0.0  ;;  %v8675_v38 = vld [vmem:[%s18093_s3 + $0x9e0] sm:$0xff] }
 0x724   :  { %10376 = vmatprep.subr.bf16.mxu1 %v10375_v20  ;;  %v10393_v20 = vpack.c.bf16 %v8671_v50, %v8667_v46  ;;  %v10395_v55 = vpack.c.bf16 %v8680_v4, %v8676_v27  ;;  %v10397_v63 = vpack.c.bf16 %v8679_v42, %v8675_v38  ;;  %v8707_v50 = vld [vmem:[%s18093_s3 + $0xae0] sm:$0xff]  ;;  %v8713_v27 = vld [vmem:[%s18093_s3 + $0xb10] sm:$0xff]  ;;  %v8716_v4 = vld [vmem:[%s18093_s3 + $0xb28] sm:$0xff] }
 0x725   :  { %v10413_v49 = vpack.c.bf16 %v8711_v39, %v8707_v50  ;;  %v8719_v38 = vld [vmem:[%s18093_s3 + $0xb40] sm:$0xff]  ;;  %v8717_v42 = vld [vmem:[%s18093_s3 + $0xb30] sm:$0xff] }
 0x726   :  { %10330 = vmatpush1.bf16.msra.mxu0 %v10329_v3  ;;  %v8681_v3 = vld [vmem:[%s18093_s3 + $0xa10] sm:$0xff]  ;;  %v8751_v50 = vld [vmem:[%s18093_s3 + $0xc40] sm:$0xff] }
 0x727   :  { %10378 = vmatpush1.bf16.msra.mxu1 %v10377_v18  ;;  %10332 = vmatprep.subr.bf16.mxu0 %v10331_v11  ;;  %v8684_v18 = vld [vmem:[%s18093_s3 + $0xa28] sm:$0xff] }
 0x728   :  { %10380 = vmatprep.subr.bf16.mxu1 %v10379_v44  ;;  %v8688_v11 = vld [vmem:[%s18093_s3 + $0xa48] sm:$0xff]  ;;  %v10445_v44 = vpack.c.bf16 %v8681_v3, %v8677_v0 }
 0x729   :  { %v10399_v24 = vpack.c.bf16 %v8688_v11, %v8684_v18  ;;  %v8724_v3 = vld [vmem:[%s18093_s3 + $0xb68] sm:$0xff]  ;;  %v8726_v11 = vld [vmem:[%s18093_s3 + $0xb78] sm:$0xff] }
 0x72a   :  { %10334 = vmatpush1.bf16.msra.mxu0 %v10333_v32  ;;  %v8689_v32 = vld [vmem:[%s18093_s3 + $0xa50] sm:$0xff]  ;;  %v8728_v18 = vld [vmem:[%s18093_s3 + $0xb88] sm:$0xff] }
 0x72b   :  { %10382 = vmatpush1.bf16.msra.mxu1 %v10381_v58  ;;  %10336 = vmatprep.subr.bf16.mxu0 %v10335_v59  ;;  %v8692_v58 = vld [vmem:[%s18093_s3 + $0xa68] sm:$0xff]  ;;  %v10449_v36 = vpack.c.bf16 %v8689_v32, %v8685_v9  ;;  %v10467_v9 = vpack.c.bf16 %v8730_v30, %v8726_v11 }
 0x72c   :  { %10384 = vmatprep.subr.bf16.mxu1 %v10383_v19  ;;  %v8696_v59 = vld [vmem:[%s18093_s3 + $0xa88] sm:$0xff]  ;;  %v10401_v19 = vpack.c.bf16 %v8687_v16, %v8683_v7  ;;  %v8727_v7 = vld [vmem:[%s18093_s3 + $0xb80] sm:$0xff]  ;;  %v8725_v16 = vld [vmem:[%s18093_s3 + $0xb70] sm:$0xff] }
 0x72d   :  { %v10403_v34 = vpack.c.bf16 %v8696_v59, %v8692_v58  ;;  %v8732_v32 = vld [vmem:[%s18093_s3 + $0xba8] sm:$0xff]  ;;  %v8734_v59 = vld [vmem:[%s18093_s3 + $0xbb8] sm:$0xff] }
 0x72e   :  { %10338 = vmatpush1.bf16.msra.mxu0 %v10337_v8  ;;  %v8691_v8 = vld [vmem:[%s18093_s3 + $0xa60] sm:$0xff]  ;;  %v8736_v58 = vld [vmem:[%s18093_s3 + $0xbc8] sm:$0xff] }
 0x72f   :  { %10386 = vmatpush1.bf16.msra.mxu1 %v10385_v28  ;;  %6879 = vmatprep.subr.mxu0 %v8654_v61  ;;  %v8695_v28 = vld [vmem:[%s18093_s3 + $0xa80] sm:$0xff]  ;;  %v8693_v61 = vld [vmem:[%s18093_s3 + $0xa70] sm:$0xff] }
 0x730   :  { %6950 = vmatprep.subr.mxu1 %v8656_v47  ;;  %v10451_v47 = vpack.c.bf16 %v8698_v37, %v8694_v17  ;;  %v10405_v6 = vpack.c.bf16 %v8695_v28, %v8691_v8  ;;  %v8738_v17 = vld [vmem:[%s18093_s3 + $0xbd8] sm:$0xff]  ;;  %v8735_v8 = vld [vmem:[%s18093_s3 + $0xbc0] sm:$0xff]  ;;  %v8733_v28 = vld [vmem:[%s18093_s3 + $0xbb0] sm:$0xff] }
 0x732   :  { %6880 = vmatpush1.msra.mxu0 %v8653_v45  ;;  %v10453_v45 = vpack.c.bf16 %v8697_v14, %v8693_v61  ;;  %v10471_v61 = vpack.c.bf16 %v8738_v17, %v8734_v59  ;;  %v8740_v14 = vld [vmem:[%s18093_s3 + $0xbe8] sm:$0xff] }
 0x733   :  { %6951 = vmatpush1.msra.mxu1 %v8655_v12  ;;  %6896 = vmatmul.mubr.f32.vlgmr.msra.gmra.mrb[150].mxu0 %v6231_v31  ;;  %v8703_v12 = vld [vmem:[%s18093_s3 + $0xac0] sm:$0xff]  ;;  %v7294_v59 = vld [vmem:[%s18095_s4 + $0x128] sm:$0xff] }
 0x734   :  { %6967 = vmatmul.mubr.f32.vlgmr.msra.gmra.mrb[144].mxu1 %v6231_v31  ;;  %10388 = vmatprep.subr.bf16.mxu0 %v10387_v48  ;;  %v8701_v48 = vld [vmem:[%s18093_s3 + $0xab0] sm:$0xff]  ;;  %v8708_v31 = vld [vmem:[%s18093_s3 + $0xae8] sm:$0xff]  ;;  %v10409_v22 = vpack.c.bf16 %v8703_v12, %v8699_v53  ;;  %v8743_v53 = vld [vmem:[%s18093_s3 + $0xc00] sm:$0xff] }
 0x735   :  { %10436 = vmatprep.subr.bf16.mxu1 %v10435_v51  ;;  %10390 = vmatpush1.bf16.msra.mxu0 %v10389_v15  ;;  %v8712_v51 = vld [vmem:[%s18093_s3 + $0xb08] sm:$0xff]  ;;  %v8710_v15 = vld [vmem:[%s18093_s3 + $0xaf8] sm:$0xff]  ;;  %v8741_v12 = vld [vmem:[%s18093_s3 + $0xbf0] sm:$0xff] }
 0x736   :  { %8759 = vmatprep.mubr.msk.f32.mxu0 %vm6436_vm7, %v6234_v26  ;;  %10438 = vmatpush1.bf16.msra.mxu1 %v10437_v62  ;;  %v10457_v62 = vpack.c.bf16 %v8705_v43, %v8701_v48  ;;  %v10411_v46 = vpack.c.bf16 %v8712_v51, %v8708_v31  ;;  %v10459_v5 = vpack.c.bf16 %v8714_v21, %v8710_v15  ;;  %v8748_v43 = vld [vmem:[%s18093_s3 + $0xc28] sm:$0xff]  ;;  %v8750_v51 = vld [vmem:[%s18093_s3 + $0xc38] sm:$0xff] }
 0x737   :  { %8760 = vmatprep.mubr.msk.f32.mxu1 %vm6436_vm7, %v6234_v26  ;;  %10392 = vmatprep.subr.bf16.mxu0 %v10391_v60  ;;  %v8709_v60 = vld [vmem:[%s18093_s3 + $0xaf0] sm:$0xff]  ;;  %v8720_v26 = vld [vmem:[%s18093_s3 + $0xb48] sm:$0xff]  ;;  %v10475_v48 = vpack.c.bf16 %v8746_v1, %v8742_v23  ;;  %v8754_v15 = vld [vmem:[%s18093_s3 + $0xc58] sm:$0xff] }
 0x738   :  { %10440 = vmatprep.subr.bf16.mxu1 %v10439_v41  ;;  %v8718_v41 = vld [vmem:[%s18093_s3 + $0xb38] sm:$0xff]  ;;  %v8752_v31 = vld [vmem:[%s18093_s3 + $0xc48] sm:$0xff]  ;;  %v10479_v39 = vpack.c.bf16 %v8754_v15, %v8750_v51  ;;  %v7263_v23 = vld [vmem:[%s18095_s4 + $0x30] sm:$0xff] }
 0x739   :  { %10394 = vmatpush1.bf16.msra.mxu0 %v10393_v20  ;;  %v10461_v20 = vpack.c.bf16 %v8713_v27, %v8709_v60  ;;  %v10463_v0 = vpack.c.bf16 %v8722_v25, %v8718_v41  ;;  %v8749_v60 = vld [vmem:[%s18093_s3 + $0xc30] sm:$0xff]  ;;  %v8758_v41 = vld [vmem:[%s18093_s3 + $0xc78] sm:$0xff]  ;;  %v7289_v25 = vld [vmem:[%s18095_s4 + $0x100] sm:$0xff] }
 0x73a   :  { %10442 = vmatpush1.bf16.msra.mxu1 %v10441_v52  ;;  %10396 = vmatprep.subr.bf16.mxu0 %v10395_v55  ;;  %v10415_v52 = vpack.c.bf16 %v8720_v26, %v8716_v4  ;;  %v8715_v55 = vld [vmem:[%s18093_s3 + $0xb20] sm:$0xff]  ;;  %v8756_v26 = vld [vmem:[%s18093_s3 + $0xc68] sm:$0xff]  ;;  %v7264_v1 = vld [vmem:[%s18095_s4 + $0x38] sm:$0xff] }
 0x73b   :  { %10444 = vmatprep.subr.bf16.mxu1 %v10443_v57  ;;  %v8721_v57 = vld [vmem:[%s18093_s3 + $0xb50] sm:$0xff]  ;;  %v10417_v54 = vpack.c.bf16 %v8719_v38, %v8715_v55  ;;  %v8755_v55 = vld [vmem:[%s18093_s3 + $0xc60] sm:$0xff]  ;;  %v7284_v51 = vld [vmem:[%s18095_s4 + $0xd8] sm:$0xff] }
 0x73c   :  { %v7257_v38 = vld [vmem:[%s18095_s4] sm:$0xff] }
 0x73d   :  { %10398 = vmatpush1.bf16.msra.mxu0 %v10397_v63  ;;  %v10465_v63 = vpack.c.bf16 %v8721_v57, %v8717_v42  ;;  %v7258_v42 = vld [vmem:[%s18095_s4 + $0x8] sm:$0xff]  ;;  %v7275_v57 = vld [vmem:[%s18095_s4 + $0x90] sm:$0xff] }
 0x73e   :  { %10446 = vmatpush1.bf16.msra.mxu1 %v10445_v44  ;;  %10400 = vmatprep.subr.bf16.mxu0 %v10399_v24  ;;  %v10419_v44 = vpack.c.bf16 %v8728_v18, %v8724_v3  ;;  %v8723_v24 = vld [vmem:[%s18093_s3 + $0xb60] sm:$0xff]  ;;  %v7276_v3 = vld [vmem:[%s18095_s4 + $0x98] sm:$0xff]  ;;  %v6233_v18 = vmax.f32 %v17209_v13, 0.0 }
 0x73f   :  { %10448 = vmatprep.subr.bf16.mxu1 %v10447_v10  ;;  %v8729_v10 = vld [vmem:[%s18093_s3 + $0xb90] sm:$0xff]  ;;  %v10421_v37 = vpack.c.bf16 %v8727_v7, %v8723_v24  ;;  %v10487_v24 = vpack.c.bf16 %v7276_v3, %v7275_v57  ;;  %v7260_v13 = vld [vmem:[%s18095_s4 + $0x18] sm:$0xff] }
 0x740   :  { %v7259_v7 = vld [vmem:[%s18095_s4 + $0x10] sm:$0xff]  ;;  %v7308_v3 = vld [vmem:[%s18095_s4 + $0x198] sm:$0xff] }
 0x741   :  { %10402 = vmatpush1.bf16.msra.mxu0 %v10401_v19  ;;  %v10469_v19 = vpack.c.bf16 %v8729_v10, %v8725_v16  ;;  %v11129_v16 = vmov 0.0|0.0   ;;  %v7278_v10 = vld [vmem:[%s18095_s4 + $0xa8] sm:$0xff]  ;;  %v10489_v17 = vpack.c.bf16 %v7260_v13, %v7259_v7  ;;  %v7307_v57 = vld [vmem:[%s18095_s4 + $0x190] sm:$0xff]  ;;  %v7313_v7 = vld [vmem:[%s18095_s4 + $0x1c0] sm:$0xff] }
 0x742   :  { %10450 = vmatpush1.bf16.msra.mxu1 %v10449_v36  ;;  %10404 = vmatprep.subr.bf16.mxu0 %v10403_v34  ;;  %v10423_v36 = vpack.c.bf16 %v8736_v58, %v8732_v32  ;;  %v8731_v34 = vld [vmem:[%s18093_s3 + $0xba0] sm:$0xff]  ;;  %v7314_v13 = vld [vmem:[%s18095_s4 + $0x1c8] sm:$0xff] }
 0x743   :  { %10452 = vmatprep.subr.bf16.mxu1 %v10451_v47  ;;  %v8737_v47 = vld [vmem:[%s18093_s3 + $0xbd0] sm:$0xff]  ;;  %v10425_v29 = vpack.c.bf16 %v8735_v8, %v8731_v34  ;;  %v7293_v58 = vld [vmem:[%s18095_s4 + $0x120] sm:$0xff]  ;;  %v7280_v8 = vld [vmem:[%s18095_s4 + $0xb8] sm:$0xff] }
 0x744   :  { %v7279_v34 = vld [vmem:[%s18095_s4 + $0xb0] sm:$0xff] }
 0x745   :  { %10406 = vmatpush1.bf16.msra.mxu0 %v10405_v6  ;;  %v10473_v6 = vpack.c.bf16 %v8737_v47, %v8733_v28  ;;  %v10522_v28 = vpack.c.bf16 %v7294_v59, %v7293_v58  ;;  %v7296_v47 = vld [vmem:[%s18095_s4 + $0x138] sm:$0xff]  ;;  %v7269_v59 = vld [vmem:[%s18095_s4 + $0x60] sm:$0xff] }
 0x746   :  { %10454 = vmatpush1.bf16.msra.mxu1 %v10453_v45  ;;  %10408 = vmatprep.subr.bf16.mxu0 %v10407_v56  ;;  %v10427_v45 = vpack.c.bf16 %v8744_v2, %v8740_v14  ;;  %v8739_v56 = vld [vmem:[%s18093_s3 + $0xbe0] sm:$0xff]  ;;  %v10495_v2 = vpack.c.bf16 %v7280_v8, %v7279_v34  ;;  %v7288_v8 = vld [vmem:[%s18095_s4 + $0xf8] sm:$0xff] }
 0x747   :  { %10456 = vmatprep.subr.bf16.mxu1 %v10455_v33  ;;  %v8745_v33 = vld [vmem:[%s18093_s3 + $0xc10] sm:$0xff]  ;;  %v10429_v21 = vpack.c.bf16 %v8743_v53, %v8739_v56  ;;  %v7297_v56 = vld [vmem:[%s18095_s4 + $0x140] sm:$0xff]  ;;  %v7298_v53 = vld [vmem:[%s18095_s4 + $0x148] sm:$0xff] }
 0x748   :  { %v10528_v15 = vpack.c.bf16 %v7298_v53, %v7297_v56 }
 0x749   :  { %10410 = vmatpush1.bf16.msra.mxu0 %v10409_v22  ;;  %v10477_v22 = vpack.c.bf16 %v8745_v33, %v8741_v12  ;;  %v10497_v12 = vpack.c.bf16 %v7264_v1, %v7263_v23  ;;  %v7265_v33 = vld [vmem:[%s18095_s4 + $0x40] sm:$0xff]  ;;  %v7319_v23 = vld [vmem:[%s18095_s4 + $0x1f0] sm:$0xf] }
 0x74a   :  { %10458 = vmatpush1.bf16.msra.mxu1 %v10457_v62  ;;  %10412 = vmatprep.subr.bf16.mxu0 %v10411_v46  ;;  %v10431_v62 = vpack.c.bf16 %v8752_v31, %v8748_v43  ;;  %v8747_v46 = vld [vmem:[%s18093_s3 + $0xc20] sm:$0xff]  ;;  %v7266_v43 = vld [vmem:[%s18095_s4 + $0x48] sm:$0xff]  ;;  %v7283_v31 = vld [vmem:[%s18095_s4 + $0xd0] sm:$0xff] }
 0x74b   :  { %10460 = vmatprep.subr.bf16.mxu1 %v10459_v5  ;;  %v8753_v5 = vld [vmem:[%s18093_s3 + $0xc50] sm:$0xff]  ;;  %v10433_v27 = vpack.c.bf16 %v8751_v50, %v8747_v46  ;;  %v10503_v46 = vpack.c.bf16 %v7284_v51, %v7283_v31  ;;  %v7227_v1 = vld [vmem:[%s18096_s7] sm:$0xf] }
 0x74c   :  { %v10481_v4 = vpack.c.bf16 %v8753_v5, %v8749_v60  ;;  %v7267_v50 = vld [vmem:[%s18095_s4 + $0x50] sm:$0xff]  ;;  %v7285_v60 = vld [vmem:[%s18095_s4 + $0xe0] sm:$0xff]  ;;  %v7286_v5 = vld [vmem:[%s18095_s4 + $0xe8] sm:$0xff]  ;;  %v7232_v56 = vrot.slane %v7227_v1, %v18957_v35 }
 0x74d   :  { %10414 = vmatpush1.bf16.msra.mxu0 %v10413_v49  ;;  %v7290_v49 = vld [vmem:[%s18095_s4 + $0x108] sm:$0xff] }
 0x74e   :  { %10462 = vmatpush1.bf16.msra.mxu1 %v10461_v20  ;;  %10416 = vmatprep.subr.bf16.mxu0 %v10415_v52  ;;  %v7273_v20 = vld [vmem:[%s18095_s4 + $0x80] sm:$0xff]  ;;  %v7274_v52 = vld [vmem:[%s18095_s4 + $0x88] sm:$0xff]  ;;  %v10516_v11 = vpack.c.bf16 %v7290_v49, %v7289_v25  ;;  %v10507_v25 = vpack.c.bf16 %v7286_v5, %v7285_v60 }
 0x74f   :  { %10464 = vmatprep.subr.bf16.mxu1 %v10463_v0  ;;  %v8757_v0 = vld [vmem:[%s18093_s3 + $0xc70] sm:$0xff]  ;;  %v10483_v30 = vpack.c.bf16 %v7274_v52, %v7273_v20  ;;  %v7304_v52 = vld [vmem:[%s18095_s4 + $0x178] sm:$0xff]  ;;  %v8761_v5 = vld [vmem:[%s18097_s8] ss:$0 sm:$0xff] }
 0x750   :  { %v7303_v20 = vld [vmem:[%s18095_s4 + $0x170] sm:$0xff] }
 0x751   :  { %10418 = vmatpush1.bf16.msra.mxu0 %v10417_v54  ;;  %v7291_v54 = vld [vmem:[%s18095_s4 + $0x110] sm:$0xff] }
 0x752   :  { %10466 = vmatpush1.bf16.msra.mxu1 %v10465_v63  ;;  %10420 = vmatprep.subr.bf16.mxu0 %v10419_v44  ;;  %v7292_v63 = vld [vmem:[%s18095_s4 + $0x118] sm:$0xff]  ;;  %v10485_v44 = vpack.c.bf16 %v7258_v42, %v7257_v38  ;;  %v7305_v38 = vld [vmem:[%s18095_s4 + $0x180] sm:$0xff]  ;;  %v7306_v42 = vld [vmem:[%s18095_s4 + $0x188] sm:$0xff] }
 0x753   :  { %10468 = vmatprep.subr.bf16.mxu1 %v10467_v9  ;;  %v7277_v9 = vld [vmem:[%s18095_s4 + $0xa0] sm:$0xff]  ;;  %v10519_v32 = vpack.c.bf16 %v7292_v63, %v7291_v54  ;;  %v7311_v63 = vld [vmem:[%s18095_s4 + $0x1b0] sm:$0xff] }
 0x755   :  { %10422 = vmatpush1.bf16.msra.mxu0 %v10421_v37  ;;  %v10491_v37 = vpack.c.bf16 %v7278_v10, %v7277_v9  ;;  %v10552_v9 = vpack.c.bf16 %v7314_v13, %v7313_v7  ;;  %v7315_v10 = vld [vmem:[%s18095_s4 + $0x1d0] sm:$0xff] }
 0x756   :  { %10470 = vmatpush1.bf16.msra.mxu1 %v10469_v19  ;;  %10424 = vmatprep.subr.bf16.mxu0 %v10423_v36  ;;  %v7261_v19 = vld [vmem:[%s18095_s4 + $0x20] sm:$0xff]  ;;  %v7262_v36 = vld [vmem:[%s18095_s4 + $0x28] sm:$0xff] }
 0x757   :  { %10472 = vmatprep.subr.bf16.mxu1 %v10471_v61  ;;  %v7295_v61 = vld [vmem:[%s18095_s4 + $0x130] sm:$0xff]  ;;  %v10493_v14 = vpack.c.bf16 %v7262_v36, %v7261_v19  ;;  %v7317_v19 = vld [vmem:[%s18095_s4 + $0x1e0] sm:$0xff]  ;;  %v7318_v36 = vld [vmem:[%s18095_s4 + $0x1e8] sm:$0xff] }
 0x758   :  { %v10558_v34 = vpack.c.bf16 %v7318_v36, %v7317_v19 }
 0x759   :  { %10426 = vmatpush1.bf16.msra.mxu0 %v10425_v29  ;;  %v7281_v29 = vld [vmem:[%s18095_s4 + $0xc0] sm:$0xff] }
 0x75a   :  { %10474 = vmatpush1.bf16.msra.mxu1 %v10473_v6  ;;  %10428 = vmatprep.subr.bf16.mxu0 %v10427_v45  ;;  %v7282_v6 = vld [vmem:[%s18095_s4 + $0xc8] sm:$0xff]  ;;  %v10525_v45 = vpack.c.bf16 %v7296_v47, %v7295_v61  ;;  %v7271_v61 = vld [vmem:[%s18095_s4 + $0x70] sm:$0xff]  ;;  %v7272_v47 = vld [vmem:[%s18095_s4 + $0x78] sm:$0xff] }
 0x75b   :  { %10476 = vmatprep.subr.bf16.mxu1 %v10475_v48  ;;  %v10499_v48 = vpack.c.bf16 %v7282_v6, %v7281_v29  ;;  %v18959_v29 = vld [vmem:[#allocation80_spill] sm:$0xff] }
 0x75c   :  { %v7239_v6 = vsub.s32 2, %v18959_v29 }
 0x75d   :  { %10430 = vmatpush1.bf16.msra.mxu0 %v10429_v21  ;;  %v7299_v21 = vld [vmem:[%s18095_s4 + $0x150] sm:$0xff] }
 0x75e   :  { %10478 = vmatpush1.bf16.msra.mxu1 %v10477_v22  ;;  %10432 = vmatprep.subr.bf16.mxu0 %v10431_v62  ;;  %v7300_v22 = vld [vmem:[%s18095_s4 + $0x158] sm:$0xff]  ;;  %v10501_v62 = vpack.c.bf16 %v7266_v43, %v7265_v33  ;;  %v7240_v53 = vrot.slane %v7227_v1, %v7239_v6 }
 0x75f   :  { %10480 = vmatprep.subr.bf16.mxu1 %v10479_v39  ;;  %v7268_v39 = vld [vmem:[%s18095_s4 + $0x58] sm:$0xff] }
 0x761   :  { %10434 = vmatpush1.bf16.msra.mxu0 %v10433_v27  ;;  %v10531_v27 = vpack.c.bf16 %v7300_v22, %v7299_v21 }
 0x762   :  { %10482 = vmatpush1.bf16.msra.mxu1 %v10481_v4  ;;  %7129 = vmatprep.subr.mxu0 %v8756_v26  ;;  %v7301_v4 = vld [vmem:[%s18095_s4 + $0x160] sm:$0xff]  ;;  %v7302_v26 = vld [vmem:[%s18095_s4 + $0x168] sm:$0xff] }
 0x763   :  { %7200 = vmatprep.subr.mxu1 %v8758_v41  ;;  %v10505_v41 = vpack.c.bf16 %v7268_v39, %v7267_v50  ;;  %v10534_v49 = vpack.c.bf16 %v7302_v26, %v7301_v4 }
 0x765   :  { %7130 = vmatpush1.msra.mxu0 %v8755_v55  ;;  %v10537_v55 = vpack.c.bf16 %v7304_v52, %v7303_v20 }
 0x766   :  { %7201 = vmatpush1.msra.mxu1 %v8757_v0  ;;  %7146 = vmatmul.mubr.f32.vlgmr.msra.gmra.mrb[150].mxu0 %v6233_v18  ;;  %v10540_v0 = vpack.c.bf16 %v7306_v42, %v7305_v38 }
 0x767   :  { %7217 = vmatmul.mubr.f32.vlgmr.msra.gmra.mrb[144].mxu1 %v6233_v18  ;;  %10515 = vmatprep.subr.bf16.mxu1 %v11129_v16  ;;  %v10543_v18 = vpack.c.bf16 %v7308_v3, %v7307_v57 }
 0x768   :  { %10517 = vmatpush1.bf16.msra.mxu1 %v10516_v11  ;;  %10484 = vmatprep.subr.bf16.mxu0 %v10483_v30  ;;  %v7309_v11 = vld [vmem:[%s18095_s4 + $0x1a0] sm:$0xff]  ;;  %v7310_v30 = vld [vmem:[%s18095_s4 + $0x1a8] sm:$0xff] }
 0x769   :  { %10518 = vmatprep.subr.bf16.mxu1 %v11129_v16  ;;  %10486 = vmatpush3.bf16.msra.mxu0 %v10485_v44  ;;  %v10546_v54 = vpack.c.bf16 %v7310_v30, %v7309_v11  ;;  %v7312_v44 = vld [vmem:[%s18095_s4 + $0x1b8] sm:$0xff] }
 0x76a   :  { %10488 = vmatprep.subr.bf16.mxu0 %v10487_v24  ;;  %v10549_v24 = vpack.c.bf16 %v7312_v44, %v7311_v63 }
 0x76c   :  { %10520 = vmatpush1.bf16.msra.mxu1 %v10519_v32  ;;  %v7316_v32 = vld [vmem:[%s18095_s4 + $0x1d8] sm:$0xff] }
 0x76d   :  { %10521 = vmatprep.subr.bf16.mxu1 %v11129_v16  ;;  %10490 = vmatpush3.bf16.msra.mxu0 %v10489_v17  ;;  %v10555_v58 = vpack.c.bf16 %v7316_v32, %v7315_v10  ;;  %v7270_v17 = vld [vmem:[%s18095_s4 + $0x68] sm:$0xff] }
 0x76e   :  { %10492 = vmatprep.subr.bf16.mxu0 %v10491_v37  ;;  %v10509_v37 = vpack.c.bf16 %v7270_v17, %v7269_v59 }
 0x770   :  { %10523 = vmatpush1.bf16.msra.mxu1 %v10522_v28 }
 0x771   :  { %10524 = vmatprep.subr.bf16.mxu1 %v11129_v16  ;;  %10494 = vmatpush3.bf16.msra.mxu0 %v10493_v14  ;;  %v10513_v14 = vpack.c.bf16 %v7272_v47, %v7271_v61 }
 0x772   :  { %10496 = vmatprep.subr.bf16.mxu0 %v10495_v2  ;;  %v18958_v2 = vmov 0.0  }
 0x774   :  { %10526 = vmatpush1.bf16.msra.mxu1 %v10525_v45  ;;  %v7243_v45 = vsub.s32 3, %v18959_v29 }
 0x775   :  { %10527 = vmatprep.subr.bf16.mxu1 %v11129_v16  ;;  %10498 = vmatpush3.bf16.msra.mxu0 %v10497_v12  ;;  %v7236_v12 = vrot.slane %v7227_v1, %v18956_v40 }
 0x776   :  { %10500 = vmatprep.subr.bf16.mxu0 %v10499_v48  ;;  %v7244_v48 = vrot.slane %v7227_v1, %v7243_v45 }
 0x778   :  { %10529 = vmatpush1.bf16.msra.mxu1 %v10528_v15 }
 0x779   :  { %10530 = vmatprep.subr.bf16.mxu1 %v11129_v16  ;;  %10502 = vmatpush3.bf16.msra.mxu0 %v10501_v62 }
 0x77a   :  { %10504 = vmatprep.subr.bf16.mxu0 %v10503_v46 }
 0x77c   :  { %10532 = vmatpush1.bf16.msra.mxu1 %v10531_v27 }
 0x77d   :  { %10533 = vmatprep.subr.bf16.mxu1 %v11129_v16  ;;  %10506 = vmatpush3.bf16.msra.mxu0 %v10505_v41 }
 0x77e   :  { %10508 = vmatprep.subr.bf16.mxu0 %v10507_v25 }
 0x780   :  { %10535 = vmatpush1.bf16.msra.mxu1 %v10534_v49 }
 0x781   :  { %10536 = vmatprep.subr.bf16.mxu1 %v11129_v16  ;;  %10510 = vmatpush3.bf16.msra.mxu0 %v10509_v37 }
 0x784   :  { %10538 = vmatpush1.bf16.msra.mxu1 %v10537_v55 }
 0x785   :  { %10539 = vmatprep.subr.bf16.mxu1 %v11129_v16 }
 0x788   :  { %10541 = vmatpush1.bf16.msra.mxu1 %v10540_v0 }
 0x789   :  { %10542 = vmatprep.subr.bf16.mxu1 %v11129_v16 }
 0x78c   :  { %10544 = vmatpush1.bf16.msra.mxu1 %v10543_v18 }
 0x78d   :  { %10545 = vmatprep.subr.bf16.mxu1 %v11129_v16 }
 0x790   :  { %10547 = vmatpush1.bf16.msra.mxu1 %v10546_v54 }
 0x791   :  { %10548 = vmatprep.subr.bf16.mxu1 %v11129_v16 }
 0x794   :  { %10550 = vmatpush1.bf16.msra.mxu1 %v10549_v24 }
 0x795   :  { %10551 = vmatprep.subr.bf16.mxu1 %v11129_v16 }
 0x798   :  { %10553 = vmatpush1.bf16.msra.mxu1 %v10552_v9 }
 0x799   :  { %10554 = vmatprep.subr.bf16.mxu1 %v11129_v16 }
 0x79c   :  { %10556 = vmatpush1.bf16.msra.mxu1 %v10555_v58 }
 0x79d   :  { %10557 = vmatprep.subr.bf16.mxu1 %v11129_v16  ;;  %v7287_v16 = vld [vmem:[%s18095_s4 + $0xf0] sm:$0xff] }
 0x79e   :  { %v10511_v28 = vpack.c.bf16 %v7288_v8, %v7287_v16 }
 0x7a0   :  { %10559 = vmatpush1.bf16.msra.mxu1 %v10558_v34  ;;  %10512 = vmatprep.subr.bf16.mxu0 %v10511_v28 }
 0x7a1   :  { %7464 = vmatprep.subr.mxu1 %v18958_v2  ;;  %10514 = vmatpush3.bf16.msra.mxu0 %v10513_v14 }
 0x7a4   :  { %8762 = vmatpush1.msk.msra.mxu1 %vm161_vm0, %v7319_v23 }
 0x839   :  { %v7147_v33 = vpop.f32.mrb[150].mxu0 }
 0x83a   :  { %v7249_v43 = vadd.f32 %v7232_v56, %v7147_v33  ;;  %v7218_v31 = vpop.f32.mrb[144].mxu1  ;;  %v7149_v51 = vpop.f32.mrb[151].mxu0 }
 0x83b   :  { %v7251_v15 = vadd.f32 %v7240_v53, %v7218_v31  ;;  %v7250_v21 = vadd.f32 %v7236_v12, %v7149_v51  ;;  %v7220_v22 = vpop.f32.mrb[145].mxu1 }
 0x83c   :  { %v7252_v62 = vadd.f32 %v7244_v48, %v7220_v22  ;;  %v7253_v50 = vmax.f32 %v7249_v43, 0.0 }
 0x83d   :  { %v7254_v46 = vmax.f32 %v7250_v21, 0.0  ;;  %v7255_v60 = vmax.f32 %v7251_v15, 0.0 }
 0x83e   :  { %v7256_v39 = vmax.f32 %v7252_v62, 0.0 }
 0x83f   :  { %7398 = vmatprep.mubr.f32.mxu0 %v7254_v46 }
 0x840   :  { %8763 = vmatprep.mubr.msk.f32.mxu1 %vm7327_vm8, %v7256_v39  ;;  %7399 = vmatmul.mubr.f32.vlgmr.msra.gmra.mrb[152].mxu0 %v7253_v50 }
 0x841   :  { %7469 = vmatmul.mubr.f32.vlgmr.msra.gmra.mrb[146].mxu1 %v7255_v60 }
 0x913   :  { %v8796_v35 = vpop.f32.mrb[152].mxu0 }
 0x914   :  { %v7470_v40 = vpop.f32.mrb[146].mxu1  ;;  %v8797_v27 = vpop.f32.mrb[153].mxu0 }
 0x915   :  { %v8798_v4 = vadd.f32 %v8797_v27, %v8796_v35  ;;  %v7472_v26 = vpop.f32.mrb[147].mxu1 }
 0x917   :  { %v7401_v41 = vadd.f32 %v8798_v4, %v8761_v5 }
 0x919   :  { %v7471_v25 = vadd.f32 %v7470_v40, %v7401_v41 }
 0x91b   :  { %7474 = vmax.xlane.f32.xlu0 %v7471_v25 }
 0x9a8   :  { %v7475_v49 = vpop.xlane.xlu0 %7474 }
 0x9a9   :  { %v7476_v20 = vsub.f32 %v7471_v25, %v7475_v49 }
 0x9ab   :  { %v7477_v52 = vmul.f32 1.442695, %v7476_v20 }
 0x9ad   :  { %11093 = vpow2.f32 %v7477_v52 }
 0x9b7   :  { %v11094_v55 = vpop.eup %11093 }
 0x9b8   :  { %7479 = vadd.xlane.f32.xlu1 %v11094_v55 }
 0xa45   :  { %v7480_v38 = vpop.xlane.xlu1 %7479 }
 0xa46   :  { %11095 = vlog2.f32 %v7480_v38 }
 0xa50   :  { %v11096_v42 = vpop.eup %11095 }
 0xa51   :  { %v7482_v0 = vmul.f32 0.6931472, %v11096_v42 }
 0xa53   :  { %v7483_v57 = vsub.f32 %v7476_v20, %v7482_v0 }
 0xa55   :  { %7484 = vst [vmem:[%s18098_s9] sm:$0xff] %v7483_v57 }

</bundles_post_ra>
